<compile_context>
chip_gen: v5e
topology: v5e:2x2
jax: 0.10.0
libtpu: 0.0.40
codegen_flags: <defaults>
</compile_context>

<pallas_src>
import numpy as np
import jax
import jax.numpy as jnp
from jax.experimental import pallas as pl
from jax.experimental.pallas import tpu as pltpu

HIDDEN = 32                      # hidden_dim
HEADS = 8                        # MultiScaleAttention default num_heads
HEAD_DIM = HIDDEN // HEADS       # 4
H = W = 24                       # hw_shape hard-coded in MSA.forward
POOL_K, POOL_S, POOL_P = 3, 2, 1 # kernel_q=(3,3), stride_q=(2,2), padding=1
HQ = WQ = (H + 2 * POOL_P - POOL_K) // POOL_S + 1   # 12
N = H * W                        # 576 key/value tokens
NQ = HQ * WQ                     # 144 query tokens
LN_EPS = 1e-6                    # LayerNorm2d eps
SCALE = HEAD_DIM ** -0.5


def _make_pool_matrix():
    """(NQ, N) matrix PqT s.t. pooled[oq, c] = sum_j PqT[oq, j] * x_seq[j, c].

    Encodes AvgPool2d(kernel=3, stride=2, padding=1, count_include_pad=True):
    out-of-range taps are simply omitted while keeping the /9 divisor, so no
    padded tensor ever needs to be materialized."""
    p1 = np.zeros((H, HQ), np.float32)
    for o in range(HQ):
        for k in range(POOL_K):
            r = POOL_S * o + k - POOL_P
            if 0 <= r < H:
                p1[r, o] = 1.0
    m = np.einsum("ho,wp->ophw", p1, p1).reshape(NQ, N) / float(POOL_K * POOL_K)
    return m


def _make_head_select():
    """(HEADS, HIDDEN) 0/1 mask: row h selects head-h channels."""
    sel = np.zeros((HEADS, HIDDEN), np.float32)
    for h in range(HEADS):
        sel[h, h * HEAD_DIM:(h + 1) * HEAD_DIM] = 1.0
    return sel


_PQT = _make_pool_matrix()       # (144, 576) f32 constant
_HSEL = _make_head_select()      # (8, 32)    f32 constant


# ----------------------------- fused Pallas kernel -----------------------------

def _abstractor_kernel(x_seq_ref, xT_ref, pqT_ref, hsel_ref, wq_ref, wkT_ref,
                       wvA_ref, bvA_ref, wp_ref, bp_ref, g_ref, b_ref, o_ref):
    f32 = jnp.float32
    bf16 = jnp.bfloat16
    x_seq = x_seq_ref[...]                          # (N, C)  token-major
    xT = xT_ref[...]                                # (C, N)  channel-major
    nq = pqT_ref.shape[0]                           # query rows handled this step

    # --- AvgPool2d(3,2,pad=1) on the q path: one standard matmul ------------
    q_pool = jnp.dot(pqT_ref[...], x_seq, preferred_element_type=f32)    # (nq, C)
    q = jnp.dot(q_pool, wq_ref[...], preferred_element_type=f32)         # (nq, C)

    # --- k kept channel-major (standard dot for s); V augmented with a ones
    #     column (via zero-padded weight + [0..0,1] bias) so the softmax
    #     denominator falls out of the o-matmul for free. --------------------
    kT = jnp.dot(wkT_ref[...], xT, preferred_element_type=f32)           # (C, N)
    v_aug = (jnp.dot(x_seq, wvA_ref[...], preferred_element_type=f32)
             + bvA_ref[...])                                             # (N, C+1)

    # --- stack heads along rows: row block h carries q masked to head-h
    #     channels and pre-scaled by 1/sqrt(head_dim) (residual uses raw q). --
    hsel = hsel_ref[...]                                                 # (HEADS, C) 0/1
    qm = (q[None, :, :] * (hsel * SCALE)[:, None, :]).reshape(HEADS * nq, HIDDEN)

    # --- two large MXU calls for all heads (bf16 operands, f32 accumulation) -
    s = jnp.dot(qm.astype(bf16), kT.astype(bf16),
                preferred_element_type=f32)                              # (8*nq, N)
    m = jnp.max(s, axis=-1, keepdims=True)
    e = jnp.exp(s - m)                                                   # unnormalized probs
    o_aug = jnp.dot(e.astype(bf16), v_aug.astype(bf16),
                    preferred_element_type=f32)                          # (8*nq, C+1)

    # --- deferred normalization: last column == sum_j e_j of the SAME row /
    #     same head; reciprocal on the EUP; residual added AFTER rescaling. ---
    inv = pl.reciprocal(o_aug[:, HIDDEN:HIDDEN + 1], approx=True)        # (8*nq, 1)
    o_heads = (o_aug[:, :HIDDEN] * inv).reshape(HEADS, nq, HIDDEN)

    # --- per-head channel select, head combine, residual pooling -------------
    o = jnp.sum(o_heads * hsel[:, None, :], axis=0) + q                  # (nq, C)

    # --- output projection + LayerNorm2d over channels -----------------------
    y = jnp.dot(o, wp_ref[...], preferred_element_type=f32) + bp_ref[...]
    mu = jnp.mean(y, axis=-1, keepdims=True)
    yc = y - mu
    var = jnp.mean(yc * yc, axis=-1, keepdims=True)
    o_ref[...] = yc * jax.lax.rsqrt(var + LN_EPS) * g_ref[...] + b_ref[...]


def abstractor_forward(x, params, q_split=2):
    """x: (B, HIDDEN, 24, 24) NCHW -> (B, HIDDEN, 12, 12) NCHW."""
    B = x.shape[0]
    assert NQ % q_split == 0 and (NQ // q_split) % 8 == 0
    nqc = NQ // q_split

    xT = x.reshape(B, HIDDEN, N)                    # channel-major (metadata-only)
    x_seq = jnp.transpose(xT, (0, 2, 1))            # token-major copy (72 KiB/batch)

    wkT = jnp.transpose(params["wk"])               # (out, in): k^T = wk^T @ x^T
    wv_aug = jnp.concatenate(
        [params["wv"], jnp.zeros((HIDDEN, 1), jnp.float32)], axis=1)     # (C, C+1)
    bv_aug = jnp.concatenate(
        [jnp.zeros((1, HIDDEN), jnp.float32), jnp.ones((1, 1), jnp.float32)], axis=1)

    out = pl.pallas_call(
        _abstractor_kernel,
        out_shape=jax.ShapeDtypeStruct((B, NQ, HIDDEN), jnp.float32),
        grid=(B, q_split),
        in_specs=[
            pl.BlockSpec((None, N, HIDDEN), lambda b, r: (b, 0, 0)),     # x_seq (N,C)
            pl.BlockSpec((None, HIDDEN, N), lambda b, r: (b, 0, 0)),     # xT    (C,N)
            pl.BlockSpec((nqc, N), lambda b, r: (r, 0)),                 # pool-matrix rows
            pl.BlockSpec((HEADS, HIDDEN), lambda b, r: (0, 0)),          # head-select mask
            pl.BlockSpec((HIDDEN, HIDDEN), lambda b, r: (0, 0)),         # wq   (in,out)
            pl.BlockSpec((HIDDEN, HIDDEN), lambda b, r: (0, 0)),         # wk^T (out,in)
            pl.BlockSpec((HIDDEN, HIDDEN + 1), lambda b, r: (0, 0)),     # [wv | 0]
            pl.BlockSpec((1, HIDDEN + 1), lambda b, r: (0, 0)),          # [0 .. 0 | 1]
            pl.BlockSpec((HIDDEN, HIDDEN), lambda b, r: (0, 0)),         # wp   (in,out)
            pl.BlockSpec((1, HIDDEN), lambda b, r: (0, 0)),              # proj bias
            pl.BlockSpec((1, HIDDEN), lambda b, r: (0, 0)),              # LN gamma
            pl.BlockSpec((1, HIDDEN), lambda b, r: (0, 0)),              # LN beta
        ],
        out_specs=pl.BlockSpec((None, nqc, HIDDEN), lambda b, r: (b, r, 0)),
        compiler_params=pltpu.CompilerParams(
            dimension_semantics=("parallel", "parallel"),   # feeds both v7x TCs
            vmem_limit_bytes=32 * 1024 * 1024),
    )(x_seq, xT, jnp.asarray(_PQT), jnp.asarray(_HSEL), params["wq"], wkT,
      wv_aug, bv_aug, params["wp"], params["bp"], params["gamma"], params["beta"])

    # lane-dense (B, NQ, C) slab -> NCHW; the only XLA op after the kernel.
    return jnp.transpose(out.reshape(B, HQ, WQ, HIDDEN), (0, 3, 1, 2))


# ----------------------------- pure-JAX reference -----------------------------

def reference_forward(x, params):
    hp = jax.lax.Precision.HIGHEST
    B = x.shape[0]
    x_seq = jnp.transpose(x.reshape(B, HIDDEN, N), (0, 2, 1))
    xh = jnp.transpose(x_seq.reshape(B, N, HEADS, HEAD_DIM), (0, 2, 1, 3))
    t = jnp.transpose(xh.reshape(B * HEADS, H, W, HEAD_DIM), (0, 3, 1, 2))
    tp = jax.lax.reduce_window(t, 0.0, jax.lax.add, (1, 1, 3, 3), (1, 1, 2, 2),
                               ((0, 0), (0, 0), (1, 1), (1, 1))) / 9.0
    q_pool = jnp.transpose(tp.reshape(B, HEADS, HEAD_DIM, NQ), (0, 1, 3, 2))
    q_in = jnp.transpose(q_pool, (0, 2, 1, 3)).reshape(B, NQ, HIDDEN)
    q = jnp.einsum("bnc,cd->bnd", q_in, params["wq"], precision=hp)
    k = jnp.einsum("bnc,cd->bnd", x_seq, params["wk"], precision=hp)
    v = jnp.einsum("bnc,cd->bnd", x_seq, params["wv"], precision=hp)
    q = jnp.transpose(q.reshape(B, NQ, HEADS, HEAD_DIM), (0, 2, 1, 3))
    k = jnp.transpose(k.reshape(B, N, HEADS, HEAD_DIM), (0, 2, 1, 3))
    v = jnp.transpose(v.reshape(B, N, HEADS, HEAD_DIM), (0, 2, 1, 3))
    s = jnp.einsum("bhqd,bhkd->bhqk", q * SCALE, k, precision=hp)
    p = jax.nn.softmax(s, axis=-1)
    o = jnp.einsum("bhqk,bhkd->bhqd", p, v, precision=hp) + q
    o = jnp.transpose(o, (0, 2, 1, 3)).reshape(B, NQ, HIDDEN)
    o = jnp.einsum("bnc,cd->bnd", o, params["wp"], precision=hp) + params["bp"]
    mu = jnp.mean(o, axis=-1, keepdims=True)
    var = jnp.mean((o - mu) ** 2, axis=-1, keepdims=True)
    o = (o - mu) * jax.lax.rsqrt(var + LN_EPS) * params["gamma"] + params["beta"]
    return jnp.transpose(o.reshape(B, HQ, WQ, HIDDEN), (0, 3, 1, 2))


# ----------------------------- main -----------------------------

if __name__ == "__main__":
    key = jax.random.PRNGKey(0)
    k_x, k_q, k_k, k_v, k_p, k_b = jax.random.split(key, 6)

    B = 2
    x = jax.random.normal(k_x, (B, HIDDEN, H, W), jnp.float32)

    # Weights stored as (in, out) = transposed torch Linear weights; q/k/v have no bias.
    params = {
        "wq": jax.random.normal(k_q, (HIDDEN, HIDDEN), jnp.float32) * 0.05,
        "wk": jax.random.normal(k_k, (HIDDEN, HIDDEN), jnp.float32) * 0.05,
        "wv": jax.random.normal(k_v, (HIDDEN, HIDDEN), jnp.float32) * 0.05,
        "wp": jax.random.normal(k_p, (HIDDEN, HIDDEN), jnp.float32) * 0.05,
        "bp": jax.random.normal(k_b, (1, HIDDEN), jnp.float32) * 0.05,
        "gamma": jnp.ones((1, HIDDEN), jnp.float32),   # LayerNorm2d init
        "beta": jnp.zeros((1, HIDDEN), jnp.float32),
    }

    out = jax.jit(abstractor_forward)(x, params)
    out = jax.block_until_ready(out)
    assert out.shape == (B, HIDDEN, HQ, WQ), out.shape

    ref = jax.block_until_ready(reference_forward(x, params))
    np.testing.assert_allclose(np.asarray(out), np.asarray(ref),
                               rtol=2e-3, atol=2e-3)
    print("KERNEL_OK")
</pallas_src>

<mosaic_0001>
module attributes {stable_mosaic.version = 11 : i64} {
  func.func @_abstractor_kernel(%arg0: i32, %arg1: i32, %arg2: memref<1x576x32xf32, #tpu.memory_space<vmem>>, %arg3: memref<1x32x576xf32, #tpu.memory_space<vmem>>, %arg4: memref<72x576xf32, #tpu.memory_space<vmem>>, %arg5: memref<8x32xf32, #tpu.memory_space<vmem>>, %arg6: memref<32x32xf32, #tpu.memory_space<vmem>>, %arg7: memref<32x32xf32, #tpu.memory_space<vmem>>, %arg8: memref<32x33xf32, #tpu.memory_space<vmem>>, %arg9: memref<1x33xf32, #tpu.memory_space<vmem>>, %arg10: memref<32x32xf32, #tpu.memory_space<vmem>>, %arg11: memref<1x32xf32, #tpu.memory_space<vmem>>, %arg12: memref<1x32xf32, #tpu.memory_space<vmem>>, %arg13: memref<1x32xf32, #tpu.memory_space<vmem>>, %arg14: memref<1x72x32xf32, #tpu.memory_space<vmem>>) attributes {dimension_semantics = [#tpu.dimension_semantics<parallel>, #tpu.dimension_semantics<parallel>], iteration_bounds = array<i64: 2, 2>, scalar_prefetch = 0 : i64, scratch_operands = 0 : i64, tpu.core_type = #tpu.core_type<tc>, window_params = [{transform_indices = @transform_0, window_bounds = array<i64: 1, 576, 32>}, {transform_indices = @transform_1, window_bounds = array<i64: 1, 32, 576>}, {transform_indices = @transform_2, window_bounds = array<i64: 72, 576>}, {pipeline_mode = #tpu.pipeline_mode<synchronous>, transform_indices = @transform_3, window_bounds = array<i64: 8, 32>}, {pipeline_mode = #tpu.pipeline_mode<synchronous>, transform_indices = @transform_4, window_bounds = array<i64: 32, 32>}, {pipeline_mode = #tpu.pipeline_mode<synchronous>, transform_indices = @transform_5, window_bounds = array<i64: 32, 32>}, {pipeline_mode = #tpu.pipeline_mode<synchronous>, transform_indices = @transform_6, window_bounds = array<i64: 32, 33>}, {pipeline_mode = #tpu.pipeline_mode<synchronous>, transform_indices = @transform_7, window_bounds = array<i64: 1, 33>}, {pipeline_mode = #tpu.pipeline_mode<synchronous>, transform_indices = @transform_8, window_bounds = array<i64: 32, 32>}, {pipeline_mode = #tpu.pipeline_mode<synchronous>, transform_indices = @transform_9, window_bounds = array<i64: 1, 32>}, {pipeline_mode = #tpu.pipeline_mode<synchronous>, transform_indices = @transform_10, window_bounds = array<i64: 1, 32>}, {pipeline_mode = #tpu.pipeline_mode<synchronous>, transform_indices = @transform_11, window_bounds = array<i64: 1, 32>}, {transform_indices = @transform_12, window_bounds = array<i64: 1, 72, 32>}]} {
    %c0 = arith.constant 0 : index
    %c0_0 = arith.constant 0 : index
    %c0_1 = arith.constant 0 : index
    %0 = vector.load %arg2[%c0, %c0_0, %c0_1] : memref<1x576x32xf32, #tpu.memory_space<vmem>>, vector<1x576x32xf32>
    %1 = vector.shape_cast %0 : vector<1x576x32xf32> to vector<576x32xf32>
    %c0_2 = arith.constant 0 : index
    %c0_3 = arith.constant 0 : index
    %c0_4 = arith.constant 0 : index
    %2 = vector.load %arg3[%c0_2, %c0_3, %c0_4] : memref<1x32x576xf32, #tpu.memory_space<vmem>>, vector<1x32x576xf32>
    %3 = vector.shape_cast %2 : vector<1x32x576xf32> to vector<32x576xf32>
    %c0_5 = arith.constant 0 : index
    %c0_6 = arith.constant 0 : index
    %4 = vector.load %arg4[%c0_5, %c0_6] : memref<72x576xf32, #tpu.memory_space<vmem>>, vector<72x576xf32>
    %cst = arith.constant dense<0.000000e+00> : vector<72x32xf32>
    %5 = tpu.matmul %4, %1, %cst {dimension_numbers = #tpu.dot_dimension_numbers<[1], [0], [0], [1], [0, 0, 1, 1], [], []>} : vector<72x576xf32>, vector<576x32xf32>, vector<72x32xf32> -> vector<72x32xf32>
    %c0_7 = arith.constant 0 : index
    %c0_8 = arith.constant 0 : index
    %6 = vector.load %arg6[%c0_7, %c0_8] : memref<32x32xf32, #tpu.memory_space<vmem>>, vector<32x32xf32>
    %cst_9 = arith.constant dense<0.000000e+00> : vector<72x32xf32>
    %7 = tpu.matmul %5, %6, %cst_9 {dimension_numbers = #tpu.dot_dimension_numbers<[1], [0], [0], [1], [0, 0, 1, 1], [], []>} : vector<72x32xf32>, vector<32x32xf32>, vector<72x32xf32> -> vector<72x32xf32>
    %c0_10 = arith.constant 0 : index
    %c0_11 = arith.constant 0 : index
    %8 = vector.load %arg7[%c0_10, %c0_11] : memref<32x32xf32, #tpu.memory_space<vmem>>, vector<32x32xf32>
    %cst_12 = arith.constant dense<0.000000e+00> : vector<32x576xf32>
    %9 = tpu.matmul %8, %3, %cst_12 {dimension_numbers = #tpu.dot_dimension_numbers<[1], [0], [0], [1], [0, 0, 1, 1], [], []>} : vector<32x32xf32>, vector<32x576xf32>, vector<32x576xf32> -> vector<32x576xf32>
    %c0_13 = arith.constant 0 : index
    %c0_14 = arith.constant 0 : index
    %10 = vector.load %arg8[%c0_13, %c0_14] : memref<32x33xf32, #tpu.memory_space<vmem>>, vector<32x33xf32>
    %cst_15 = arith.constant dense<0.000000e+00> : vector<576x33xf32>
    %11 = tpu.matmul %1, %10, %cst_15 {dimension_numbers = #tpu.dot_dimension_numbers<[1], [0], [0], [1], [0, 0, 1, 1], [], []>} : vector<576x32xf32>, vector<32x33xf32>, vector<576x33xf32> -> vector<576x33xf32>
    %c0_16 = arith.constant 0 : index
    %c0_17 = arith.constant 0 : index
    %12 = vector.load %arg9[%c0_16, %c0_17] : memref<1x33xf32, #tpu.memory_space<vmem>>, vector<1x33xf32>
    %13 = vector.broadcast %12 : vector<1x33xf32> to vector<576x33xf32>
    %14 = arith.addf %11, %13 : vector<576x33xf32>
    %c0_18 = arith.constant 0 : index
    %c0_19 = arith.constant 0 : index
    %15 = vector.load %arg5[%c0_18, %c0_19] : memref<8x32xf32, #tpu.memory_space<vmem>>, vector<8x32xf32>
    %16 = vector.shape_cast %7 : vector<72x32xf32> to vector<1x72x32xf32>
    %cst_20 = arith.constant 5.000000e-01 : f32
    %17 = vector.broadcast %cst_20 : f32 to vector<8x32xf32>
    %18 = arith.mulf %15, %17 : vector<8x32xf32>
    %19 = vector.shape_cast %18 : vector<8x32xf32> to vector<8x1x32xf32>
    %20 = vector.broadcast %16 : vector<1x72x32xf32> to vector<8x72x32xf32>
    %21 = vector.broadcast %19 : vector<8x1x32xf32> to vector<8x72x32xf32>
    %22 = arith.mulf %20, %21 : vector<8x72x32xf32>
    %23 = vector.shape_cast %22 : vector<8x72x32xf32> to vector<576x32xf32>
    %24 = arith.truncf %23 : vector<576x32xf32> to vector<576x32xbf16>
    %25 = arith.truncf %9 : vector<32x576xf32> to vector<32x576xbf16>
    %cst_21 = arith.constant dense<0.000000e+00> : vector<576x576xf32>
    %26 = tpu.matmul %24, %25, %cst_21 {dimension_numbers = #tpu.dot_dimension_numbers<[1], [0], [0], [1], [0, 0, 1, 1], [], []>} : vector<576x32xbf16>, vector<32x576xbf16>, vector<576x576xf32> -> vector<576x576xf32>
    %cst_22 = arith.constant dense<0xFF800000> : vector<576xf32>
    %27 = vector.multi_reduction <maximumf>, %26, %cst_22 [1] : vector<576x576xf32> to vector<576xf32>
    %28 = vector.shape_cast %27 : vector<576xf32> to vector<576x1xf32>
    %29 = vector.broadcast %28 : vector<576x1xf32> to vector<576x576xf32>
    %30 = arith.subf %26, %29 : vector<576x576xf32>
    %31 = math.exp %30 : vector<576x576xf32>
    %32 = arith.truncf %31 : vector<576x576xf32> to vector<576x576xbf16>
    %33 = arith.truncf %14 : vector<576x33xf32> to vector<576x33xbf16>
    %cst_23 = arith.constant dense<0.000000e+00> : vector<576x33xf32>
    %34 = tpu.matmul %32, %33, %cst_23 {dimension_numbers = #tpu.dot_dimension_numbers<[1], [0], [0], [1], [0, 0, 1, 1], [], []>} : vector<576x576xbf16>, vector<576x33xbf16>, vector<576x33xf32> -> vector<576x33xf32>
    %35 = vector.extract_strided_slice %34 {offsets = [0, 32], sizes = [576, 1], strides = [1, 1]} : vector<576x33xf32> to vector<576x1xf32>
    %36 = tpu.reciprocal %35 {approx = true} : vector<576x1xf32> -> vector<576x1xf32>
    %37 = vector.extract_strided_slice %34 {offsets = [0, 0], sizes = [576, 32], strides = [1, 1]} : vector<576x33xf32> to vector<576x32xf32>
    %38 = vector.broadcast %36 : vector<576x1xf32> to vector<576x32xf32>
    %39 = arith.mulf %37, %38 : vector<576x32xf32>
    %40 = vector.shape_cast %39 : vector<576x32xf32> to vector<8x72x32xf32>
    %41 = vector.shape_cast %15 : vector<8x32xf32> to vector<8x1x32xf32>
    %42 = vector.broadcast %41 : vector<8x1x32xf32> to vector<8x72x32xf32>
    %43 = arith.mulf %40, %42 : vector<8x72x32xf32>
    %cst_24 = arith.constant dense<0.000000e+00> : vector<72x32xf32>
    %44 = vector.multi_reduction <add>, %43, %cst_24 [0] : vector<8x72x32xf32> to vector<72x32xf32>
    %45 = arith.addf %44, %7 : vector<72x32xf32>
    %c0_25 = arith.constant 0 : index
    %c0_26 = arith.constant 0 : index
    %46 = vector.load %arg10[%c0_25, %c0_26] : memref<32x32xf32, #tpu.memory_space<vmem>>, vector<32x32xf32>
    %cst_27 = arith.constant dense<0.000000e+00> : vector<72x32xf32>
    %47 = tpu.matmul %45, %46, %cst_27 {dimension_numbers = #tpu.dot_dimension_numbers<[1], [0], [0], [1], [0, 0, 1, 1], [], []>} : vector<72x32xf32>, vector<32x32xf32>, vector<72x32xf32> -> vector<72x32xf32>
    %c0_28 = arith.constant 0 : index
    %c0_29 = arith.constant 0 : index
    %48 = vector.load %arg11[%c0_28, %c0_29] : memref<1x32xf32, #tpu.memory_space<vmem>>, vector<1x32xf32>
    %49 = vector.broadcast %48 : vector<1x32xf32> to vector<72x32xf32>
    %50 = arith.addf %47, %49 : vector<72x32xf32>
    %cst_30 = arith.constant dense<0.000000e+00> : vector<72xf32>
    %51 = vector.multi_reduction <add>, %50, %cst_30 [1] : vector<72x32xf32> to vector<72xf32>
    %52 = vector.shape_cast %51 : vector<72xf32> to vector<72x1xf32>
    %cst_31 = arith.constant 3.200000e+01 : f32
    %53 = vector.broadcast %cst_31 : f32 to vector<72x1xf32>
    %54 = arith.divf %52, %53 : vector<72x1xf32>
    %55 = vector.broadcast %54 : vector<72x1xf32> to vector<72x32xf32>
    %56 = arith.subf %50, %55 : vector<72x32xf32>
    %57 = arith.mulf %56, %56 : vector<72x32xf32>
    %cst_32 = arith.constant dense<0.000000e+00> : vector<72xf32>
    %58 = vector.multi_reduction <add>, %57, %cst_32 [1] : vector<72x32xf32> to vector<72xf32>
    %59 = vector.shape_cast %58 : vector<72xf32> to vector<72x1xf32>
    %cst_33 = arith.constant 3.200000e+01 : f32
    %60 = vector.broadcast %cst_33 : f32 to vector<72x1xf32>
    %61 = arith.divf %59, %60 : vector<72x1xf32>
    %cst_34 = arith.constant 9.99999997E-7 : f32
    %62 = vector.broadcast %cst_34 : f32 to vector<72x1xf32>
    %63 = arith.addf %61, %62 : vector<72x1xf32>
    %64 = math.rsqrt %63 : vector<72x1xf32>
    %65 = vector.broadcast %64 : vector<72x1xf32> to vector<72x32xf32>
    %66 = arith.mulf %56, %65 : vector<72x32xf32>
    %c0_35 = arith.constant 0 : index
    %c0_36 = arith.constant 0 : index
    %67 = vector.load %arg12[%c0_35, %c0_36] : memref<1x32xf32, #tpu.memory_space<vmem>>, vector<1x32xf32>
    %68 = vector.broadcast %67 : vector<1x32xf32> to vector<72x32xf32>
    %69 = arith.mulf %66, %68 : vector<72x32xf32>
    %c0_37 = arith.constant 0 : index
    %c0_38 = arith.constant 0 : index
    %70 = vector.load %arg13[%c0_37, %c0_38] : memref<1x32xf32, #tpu.memory_space<vmem>>, vector<1x32xf32>
    %71 = vector.broadcast %70 : vector<1x32xf32> to vector<72x32xf32>
    %72 = arith.addf %69, %71 : vector<72x32xf32>
    %c0_39 = arith.constant 0 : index
    %c0_40 = arith.constant 0 : index
    %c0_41 = arith.constant 0 : index
    %73 = vector.load %arg14[%c0_39, %c0_40, %c0_41] : memref<1x72x32xf32, #tpu.memory_space<vmem>>, vector<1x72x32xf32>
    %74 = vector.shape_cast %73 : vector<1x72x32xf32> to vector<72x32xf32>
    %75 = vector.shape_cast %72 : vector<72x32xf32> to vector<1x72x32xf32>
    tpu.vector_store %arg14[%c0_39, %c0_40, %c0_41], %75 {strides = array<i32>} : memref<1x72x32xf32, #tpu.memory_space<vmem>>, vector<1x72x32xf32>,
    return
  }
  func.func @transform_0(%arg0: i32, %arg1: i32) -> (i32, i32, i32) {
    %c0_i32 = arith.constant 0 : i32
    %c0_i32_0 = arith.constant 0 : i32
    %c0_i32_1 = arith.constant 0 : i32
    return %arg0, %c0_i32, %c0_i32_0 : i32, i32, i32
  }
  func.func @transform_1(%arg0: i32, %arg1: i32) -> (i32, i32, i32) {
    %c0_i32 = arith.constant 0 : i32
    %c0_i32_0 = arith.constant 0 : i32
    %c0_i32_1 = arith.constant 0 : i32
    return %arg0, %c0_i32, %c0_i32_0 : i32, i32, i32
  }
  func.func @transform_2(%arg0: i32, %arg1: i32) -> (i32, i32) {
    %c0_i32 = arith.constant 0 : i32
    %c0_i32_0 = arith.constant 0 : i32
    return %arg1, %c0_i32 : i32, i32
  }
  func.func @transform_3(%arg0: i32, %arg1: i32) -> (i32, i32) {
    %c0_i32 = arith.constant 0 : i32
    %c0_i32_0 = arith.constant 0 : i32
    %c0_i32_1 = arith.constant 0 : i32
    return %c0_i32, %c0_i32_0 : i32, i32
  }
  func.func @transform_4(%arg0: i32, %arg1: i32) -> (i32, i32) {
    %c0_i32 = arith.constant 0 : i32
    %c0_i32_0 = arith.constant 0 : i32
    %c0_i32_1 = arith.constant 0 : i32
    return %c0_i32, %c0_i32_0 : i32, i32
  }
  func.func @transform_5(%arg0: i32, %arg1: i32) -> (i32, i32) {
    %c0_i32 = arith.constant 0 : i32
    %c0_i32_0 = arith.constant 0 : i32
    %c0_i32_1 = arith.constant 0 : i32
    return %c0_i32, %c0_i32_0 : i32, i32
  }
  func.func @transform_6(%arg0: i32, %arg1: i32) -> (i32, i32) {
    %c0_i32 = arith.constant 0 : i32
    %c0_i32_0 = arith.constant 0 : i32
    %c0_i32_1 = arith.constant 0 : i32
    return %c0_i32, %c0_i32_0 : i32, i32
  }
  func.func @transform_7(%arg0: i32, %arg1: i32) -> (i32, i32) {
    %c0_i32 = arith.constant 0 : i32
    %c0_i32_0 = arith.constant 0 : i32
    %c0_i32_1 = arith.constant 0 : i32
    return %c0_i32, %c0_i32_0 : i32, i32
  }
  func.func @transform_8(%arg0: i32, %arg1: i32) -> (i32, i32) {
    %c0_i32 = arith.constant 0 : i32
    %c0_i32_0 = arith.constant 0 : i32
    %c0_i32_1 = arith.constant 0 : i32
    return %c0_i32, %c0_i32_0 : i32, i32
  }
  func.func @transform_9(%arg0: i32, %arg1: i32) -> (i32, i32) {
    %c0_i32 = arith.constant 0 : i32
    %c0_i32_0 = arith.constant 0 : i32
    %c0_i32_1 = arith.constant 0 : i32
    return %c0_i32, %c0_i32_0 : i32, i32
  }
  func.func @transform_10(%arg0: i32, %arg1: i32) -> (i32, i32) {
    %c0_i32 = arith.constant 0 : i32
    %c0_i32_0 = arith.constant 0 : i32
    %c0_i32_1 = arith.constant 0 : i32
    return %c0_i32, %c0_i32_0 : i32, i32
  }
  func.func @transform_11(%arg0: i32, %arg1: i32) -> (i32, i32) {
    %c0_i32 = arith.constant 0 : i32
    %c0_i32_0 = arith.constant 0 : i32
    %c0_i32_1 = arith.constant 0 : i32
    return %c0_i32, %c0_i32_0 : i32, i32
  }
  func.func @transform_12(%arg0: i32, %arg1: i32) -> (i32, i32, i32) {
    %c0_i32 = arith.constant 0 : i32
    %c0_i32_0 = arith.constant 0 : i32
    return %arg0, %arg1, %c0_i32 : i32, i32, i32
  }
}

</mosaic_0001>

<bundles_post_ra>
// kernel: abstractor_forward.1
= control target key start
LH: loop header
LB: loop body
LE: loop exit
PB: predicated region body
PF: predicated region fallthrough
CT: control target
= control target key end

     0   :  { %s14217_s0 = inlined_call_operand.vmem [shape: f32[2,576,32], index: 0, kind: input, shape index: {}]   ;;  %s14218_s1 = inlined_call_operand.vmem [shape: f32[2,32,576], index: 1, kind: input, shape index: {}]   ;;  %s14219_s2 = inlined_call_operand.hbm [shape: f32[144,576], index: 2, kind: input, shape index: {}]   ;;  %s14220_s3 = inlined_call_operand.vmem [shape: f32[8,32], index: 3, kind: input, shape index: {}]   ;;  %s14221_s4 = inlined_call_operand.vmem [shape: f32[32,32], index: 4, kind: input, shape index: {}]   ;;  %s14222_s5 = inlined_call_operand.vmem [shape: f32[32,32], index: 5, kind: input, shape index: {}]   ;;  %s14223_s6 = inlined_call_operand.vmem [shape: f32[32,33], index: 6, kind: input, shape index: {}]   ;;  %s14224_s7 = inlined_call_operand.vmem [shape: f32[1,33], index: 7, kind: input, shape index: {}]   ;;  %s14225_s8 = inlined_call_operand.vmem [shape: f32[32,32], index: 8, kind: input, shape index: {}]   ;;  %s14226_s9 = inlined_call_operand.vmem [shape: f32[1,32], index: 9, kind: input, shape index: {}]   ;;  %s14227_s10 = inlined_call_operand.vmem [shape: f32[1,32], index: 10, kind: input, shape index: {}]   ;;  %s14228_s11 = inlined_call_operand.vmem [shape: f32[1,32], index: 11, kind: input, shape index: {}]   ;;  %s14229_s12 = inlined_call_operand.vmem [shape: f32[2,144,32], index: 12, kind: output, shape index: {}]  }
   0x1   :  { %14832 = sst [smem:[#allocation293_spill]] %s14229_s12 }
   0x2   :  { %17 = vsyncpa [#allocation3], 0 }
   0x3   :  { %19 = vsyncpa [#allocation3 + $0x1], 0  ;;  %s8355_s21 = smov 0   ;;  %s8357_s22 = smov 0  }
   0x4   :  { %s8359_s23 = smov 0   ;;  %s8361_s24 = smov 0  }
   0x5   :  { %s8363_s25 = smov 0   ;;  %s8365_s26 = smov 0  }
   0x6   :  { %s8367_s27 = smov 0   ;;  %s8369_s28 = smov 0  }
   0x7 LB: > { %14833 = sst [smem:[#allocation5_spill]] %s8264_s23  ;;  %s6813_s29 = sadd.s32 4294967295, %s8284_s28   ;;  %s8284_s28 = sphi %s8369_s28, %s25_s28   ;;  %s8280_s27 = sphi %s8367_s27, %s16576_s27   ;;  %s8276_s26 = sphi %s8365_s26, %s16575_s26   ;;  %s8272_s25 = sphi %s8363_s25, %s16574_s25   ;;  %s8268_s24 = sphi %s8361_s24, %s16573_s24   ;;  %s8264_s23 = sphi %s8359_s23, %s16572_s23   ;;  %s8260_s22 = sphi %s8357_s22, %s16578_s22   ;;  %s8256_s21 = sphi %s8355_s21, %s16577_s21  }
   0x8   : > { %14834 = sst [smem:[#allocation6_spill]] %s8276_s26  ;;  %s34_s30 = sadd.s32 1, %s8276_s26 }
   0x9   : > { %14835 = sst [smem:[#allocation7_spill]] %s8280_s27  ;;  %p35_p0 = scmp.ge.s32.totalorder %s34_s30, 2 }
   0xa   : > { %s37_s13 = sadd.s32 1, %s8280_s27  ;;  %s96_s14 = sadd.s32 1, %s8264_s23 }
   0xb   : > { %p103_p1 = scmp.ne.s32.totalorder %s8264_s23, %s8260_s22  ;;  %s16580_s30 = smov (%p35_p0, %s34_s30), 0 }
   0xc   : > { %14836 = sst [smem:[#allocation8_spill]] %s16580_s30  ;;  %s16582_s13 = smov (!%p35_p0, %s37_s13), %s8280_s27 }
   0xd   : > { %s93_s15 = ssub.s32 %s8276_s26, %s16580_s30  ;;  %p104_p2 = scmp.eq.s32.totalorder %s8284_s28, 0 }
   0xe   : > { %p39_p3 = scmp.ge.s32.totalorder %s16582_s13, 2  ;;  %p94_p4 = scmp.eq.s32.totalorder %s93_s15, 0 }
   0xf   : > { %p105_p5 = por %p104_p2, %p103_p1  ;;  %p109_p6 = scmp.ne.s32.totalorder %s8260_s22, %s8256_s21 }
  0x10   : > { %s16584_s13 = smov (%p39_p3, %s16582_s13), 0  ;;  %p110_p7 = scmp.eq.s32.totalorder %s6813_s29, 0 }
  0x11   : > { %14837 = sst [smem:[#allocation9_spill]] %s16584_s13  ;;  %p7191_p8 = scmp.lt.s32.totalorder %s8284_s28, 4 }
  0x12   : > { %s8409_s16 = scalar_select %p94_p4, %s8264_s23, %s96_s14  }
  0x13   : > { %s393_s17 = sand.u32 1, %s8264_s23   ;;  %p8413_p9 = por %p110_p7, %p109_p6 }
  0x14   : > { %14838 = sst [smem:[#allocation10_spill]] %s8409_s16  ;;  %s7179_s19 = smul.u32 360, %s393_s17 }
  0x15   : > { %p7188_p10 = pnand %p7191_p8, %p105_p5  ;;  %s7192_s20 = smul.u32 360, %s8276_s26 }
  0x16   : > { %s397_s30 = scalar_lea.vmem [#allocation2], %s7179_s19  ;;  %p6818_p11 = scmp.ge.s32.totalorder %s8284_s28, 1 }
  0x17   : > { %s406_s15 = sshll.u32 %s397_s30, 4  ;;  %s403_s12 = scalar_lea.hbm %s14219_s2, %s7192_s20  ;;  %s407_s15 = int_to_ptr.vmem [resolvable:$true] %s406_s15 }
  0x18   : > { %s404_s14 = sshll.u32 %s403_s12, 4  ;;  %s394_s29 = scalar_lea.sflag [#allocation3], %s393_s17  ;;  %s405_s14 = int_to_ptr.hbm [resolvable:$true] %s404_s14 }
  0x19   : > { %s8286_s13 = smov 640   ;;  %s8287_s16 = smov 40  }
  0x1a   : > { %7190 = dma.hbm_to_vmem [thread:$0]  (!%p7188_p10), %s405_s14, 5760, %s407_s15, %s394_s29, %s8286_s13, %s8286_s13, %s8287_s16  }
  0x1b   : > { %p414_p12 = scmp.lt.s32.totalorder %s8284_s28, 5 }
  0x1d   : > { %p415_p13 = pnand %p6818_p11, %p414_p12 }
  0x1f   : > { %418 = sbr.rel (%p415_p13) target bundleno = 3001 (0xbb9), region = 68 }
  0x24   : > { %s420_s26 = sand.u32 1, %s8260_s22  }
  0x25   : > { %s7181_s19 = smul.u32 360, %s420_s26  ;;  %s421_s30 = scalar_lea.sflag [#allocation3], %s420_s26 }
  0x27   : > { %s8424_s23 = scalar_lea.vmem [#allocation2], %s7181_s19 }
  0x28   : > { %8251 = dma.done.wait (%p8413_p9), %s421_s30, 5760  }
  0x29   : > { %8253 = vsyncadd (%p8413_p9), %s421_s30, 4294961536  ;;  %p480_p0 = scmp.lt.s32.totalorder %s8272_s25, 1  ;;  %v594_v62 = vld [vmem:[%s8424_s23] sm:$0xff]  ;;  %v596_v63 = vld [vmem:[%s8424_s23 + $0x10] sm:$0xff]  ;;  %vm639_vm0 = vcmask 523264   ;;  %vm891_vm1 = vcmask 261120  }
  0x2a   : > { %s491_s14 = smul.u32 9, %s8268_s24 }
  0x2b   : > { %s16586_s25 = smov (!%p480_p0, %s8272_s25), 1 }
  0x2c   : > { %s7182_s12 = smul.u32 576, %s16586_s25  ;;  %p494_p1 = scmp.lt.s32.totalorder %s491_s14, 17 }
  0x2d   : > { %s7183_s26 = smul.u32 160, %s16586_s25 }
  0x2e   : > { %s8438_s16 = scalar_lea.vmem %s14217_s0, %s7182_s12  ;;  %s7184_s29 = smul.u32 18, %s16586_s25 }
  0x2f   : > { %v8441_v0 = vld [vmem:[%s8438_s16 + $0x78] sm:$0xff]  ;;  %v8447_v3 = vld [vmem:[%s8438_s16 + $0x70] sm:$0xff]  ;;  %v515_v6 = vld [vmem:[%s8438_s16 + $0x68] sm:$0xff]  ;;  %s8648_s20 = scalar_lea.vmem %s14218_s1, %s7183_s26  ;;  %s16588_s14 = smov (!%p494_p1, %s491_s14), 17 }
  0x30   : > { %v549_v1 = vld [vmem:[%s8438_s16 + $0x178] sm:$0xff]  ;;  %667 = vmatpush.msra.mxu0 %v8441_v0  ;;  %v548_v4 = vld [vmem:[%s8438_s16 + $0x170] sm:$0xff]  ;;  %v547_v8 = vld [vmem:[%s8438_s16 + $0x168] sm:$0xff]  ;;  %s16570_s26 = sld [smem:[#allocation293_spill]] }
  0x31   : > { %v565_v2 = vld [vmem:[%s8438_s16 + $0x1f8] sm:$0xff]  ;;  %755 = vmatpush.msra.mxu2 %v549_v1  ;;  %v564_v5 = vld [vmem:[%s8438_s16 + $0x1f0] sm:$0xff]  ;;  %v563_v9 = vld [vmem:[%s8438_s16 + $0x1e8] sm:$0xff] }
  0x32   : > { %799 = vmatpush.msra.mxu3 %v565_v2  ;;  %v8453_v7 = vld [vmem:[%s8438_s16 + $0xf8] sm:$0xff]  ;;  %668 = vmatpush.msra.mxu0 %v8447_v3  ;;  %v8459_v10 = vld [vmem:[%s8438_s16 + $0xf0] sm:$0xff]  ;;  %v514_v11 = vld [vmem:[%s8438_s16 + $0x60] sm:$0xff] }
  0x33   : > { %756 = vmatpush.msra.mxu2 %v548_v4  ;;  %711 = vmatpush.msra.mxu1 %v8453_v7  ;;  %v546_v12 = vld [vmem:[%s8438_s16 + $0x160] sm:$0xff]  ;;  %v8466_v14 = vld [vmem:[%s8438_s16 + $0xe8] sm:$0xff]  ;;  %v513_v15 = vld [vmem:[%s8438_s16 + $0x58] sm:$0xff] }
  0x34   : > { %800 = vmatpush.msra.mxu3 %v564_v5  ;;  %669 = vmatpush.msra.mxu0 %v515_v6  ;;  %v562_v13 = vld [vmem:[%s8438_s16 + $0x1e0] sm:$0xff]  ;;  %v545_v16 = vld [vmem:[%s8438_s16 + $0x158] sm:$0xff]  ;;  %v512_v19 = vld [vmem:[%s8438_s16 + $0x50] sm:$0xff] }
  0x35   : > { %757 = vmatpush.msra.mxu2 %v547_v8  ;;  %712 = vmatpush.msra.mxu1 %v8459_v10  ;;  %v561_v17 = vld [vmem:[%s8438_s16 + $0x1d8] sm:$0xff]  ;;  %v8473_v18 = vld [vmem:[%s8438_s16 + $0xe0] sm:$0xff]  ;;  %v8478_v20 = vld [vmem:[%s8438_s16 + $0x150] sm:$0xff] }
  0x36   : > { %801 = vmatpush.msra.mxu3 %v563_v9  ;;  %670 = vmatpush.msra.mxu0 %v514_v11  ;;  %14840 = vst [vmem:[#allocation11_spill] sm:$0xff] %v8478_v20  ;;  %v560_v21 = vld [vmem:[%s8438_s16 + $0x1d0] sm:$0xff]  ;;  %v8482_v22 = vld [vmem:[%s8438_s16 + $0xd8] sm:$0xff]  ;;  %v511_v23 = vld [vmem:[%s8438_s16 + $0x48] sm:$0xff] }
  0x37   : > { %758 = vmatpush.msra.mxu2 %v546_v12  ;;  %713 = vmatpush.msra.mxu1 %v8466_v14  ;;  %v8487_v24 = vld [vmem:[%s8438_s16 + $0x148] sm:$0xff]  ;;  %v8492_v26 = vld [vmem:[%s8438_s16 + $0xd0] sm:$0xff]  ;;  %v510_v27 = vld [vmem:[%s8438_s16 + $0x40] sm:$0xff] }
  0x38   : > { %802 = vmatpush.msra.mxu3 %v562_v13  ;;  %671 = vmatpush.msra.mxu0 %v513_v15  ;;  %14841 = vst [vmem:[#allocation12_spill] sm:$0xff] %v8487_v24  ;;  %v559_v25 = vld [vmem:[%s8438_s16 + $0x1c8] sm:$0xff]  ;;  %v8497_v28 = vld [vmem:[%s8438_s16 + $0x140] sm:$0xff]  ;;  %v8506_v31 = vld [vmem:[%s8438_s16 + $0x38] sm:$0xff] }
  0x39   : > { %759 = vmatpush.msra.mxu2 %v545_v16  ;;  %714 = vmatpush.msra.mxu1 %v8473_v18  ;;  %14842 = vst [vmem:[#allocation13_spill] sm:$0xff] %v8497_v28  ;;  %v558_v29 = vld [vmem:[%s8438_s16 + $0x1c0] sm:$0xff]  ;;  %v8502_v30 = vld [vmem:[%s8438_s16 + $0xc8] sm:$0xff]  ;;  %v8509_v32 = vld [vmem:[%s8438_s16 + $0x138] sm:$0xff] }
  0x3a   : > { %803 = vmatpush.msra.mxu3 %v561_v17  ;;  %672 = vmatpush.msra.mxu0 %v512_v19  ;;  %14843 = vst [vmem:[#allocation14_spill] sm:$0xff] %v8506_v31  ;;  %v557_v33 = vld [vmem:[%s8438_s16 + $0x1b8] sm:$0xff]  ;;  %v8514_v34 = vld [vmem:[%s8438_s16 + $0xc0] sm:$0xff]  ;;  %v8518_v35 = vld [vmem:[%s8438_s16 + $0x30] sm:$0xff] }
  0x3b   : > { %760 = vmatpush.msra.mxu2 %v8478_v20  ;;  %715 = vmatpush.msra.mxu1 %v8482_v22  ;;  %14844 = vst [vmem:[#allocation15_spill] sm:$0xff] %v8509_v32  ;;  %v8521_v36 = vld [vmem:[%s8438_s16 + $0x130] sm:$0xff]  ;;  %v8527_v38 = vld [vmem:[%s8438_s16 + $0xb8] sm:$0xff]  ;;  %v8531_v39 = vld [vmem:[%s8438_s16 + $0x28] sm:$0xff] }
  0x3c   : > { %804 = vmatpush.msra.mxu3 %v560_v21  ;;  %673 = vmatpush.msra.mxu0 %v511_v23  ;;  %14845 = vst [vmem:[#allocation16_spill] sm:$0xff] %v8518_v35  ;;  %v556_v37 = vld [vmem:[%s8438_s16 + $0x1b0] sm:$0xff]  ;;  %v8534_v40 = vld [vmem:[%s8438_s16 + $0x128] sm:$0xff]  ;;  %v8544_v43 = vld [vmem:[%s8438_s16 + $0x20] sm:$0xff] }
  0x3d   : > { %761 = vmatpush.msra.mxu2 %v8487_v24  ;;  %716 = vmatpush.msra.mxu1 %v8492_v26  ;;  %14846 = vst [vmem:[#allocation17_spill] sm:$0xff] %v8521_v36  ;;  %v555_v41 = vld [vmem:[%s8438_s16 + $0x1a8] sm:$0xff]  ;;  %v8540_v42 = vld [vmem:[%s8438_s16 + $0xb0] sm:$0xff]  ;;  %v8547_v44 = vld [vmem:[%s8438_s16 + $0x120] sm:$0xff] }
  0x3e   : > { %805 = vmatpush.msra.mxu3 %v559_v25  ;;  %674 = vmatpush.msra.mxu0 %v510_v27  ;;  %14847 = vst [vmem:[#allocation18_spill] sm:$0xff] %v8531_v39  ;;  %v554_v45 = vld [vmem:[%s8438_s16 + $0x1a0] sm:$0xff]  ;;  %v8553_v46 = vld [vmem:[%s8438_s16 + $0xa8] sm:$0xff]  ;;  %v8557_v47 = vld [vmem:[%s8438_s16 + $0x18] sm:$0xff] }
  0x3f   : > { %762 = vmatpush.msra.mxu2 %v8497_v28  ;;  %717 = vmatpush.msra.mxu1 %v8502_v30  ;;  %14848 = vst [vmem:[#allocation19_spill] sm:$0xff] %v8534_v40  ;;  %v8560_v48 = vld [vmem:[%s8438_s16 + $0x118] sm:$0xff]  ;;  %v8566_v50 = vld [vmem:[%s8438_s16 + $0xa0] sm:$0xff]  ;;  %v8570_v51 = vld [vmem:[%s8438_s16 + $0x10] sm:$0xff] }
  0x40   : > { %806 = vmatpush.msra.mxu3 %v558_v29  ;;  %675 = vmatpush.msra.mxu0 %v8506_v31  ;;  %14849 = vst [vmem:[#allocation20_spill] sm:$0xff] %v8544_v43  ;;  %v553_v49 = vld [vmem:[%s8438_s16 + $0x198] sm:$0xff]  ;;  %v8573_v52 = vld [vmem:[%s8438_s16 + $0x110] sm:$0xff]  ;;  %v8579_v54 = vld [vmem:[%s8438_s16 + $0x8] sm:$0xff] }
  0x41   : > { %763 = vmatpush.msra.mxu2 %v8509_v32  ;;  %718 = vmatpush.msra.mxu1 %v8514_v34  ;;  %14850 = vst [vmem:[#allocation21_spill] sm:$0xff] %v8547_v44  ;;  %v552_v53 = vld [vmem:[%s8438_s16 + $0x190] sm:$0xff]  ;;  %v8582_v55 = vld [vmem:[%s8438_s16 + $0x98] sm:$0xff]  ;;  %v8585_v56 = vld [vmem:[%s8438_s16 + $0x108] sm:$0xff] }
  0x42   : > { %807 = vmatpush.msra.mxu3 %v557_v33  ;;  %676 = vmatpush.msra.mxu0 %v8518_v35  ;;  %14851 = vst [vmem:[#allocation22_spill] sm:$0xff] %v8557_v47  ;;  %v8589_v57 = vld [vmem:[%s8438_s16 + $0x188] sm:$0xff]  ;;  %v8592_v58 = vld [vmem:[%s8438_s16 + $0x90] sm:$0xff]  ;;  %v8598_v59 = vld [vmem:[%s8438_s16] sm:$0xff] }
  0x43   : > { %764 = vmatpush.msra.mxu2 %v8521_v36  ;;  %719 = vmatpush.msra.mxu1 %v8527_v38  ;;  %14852 = vst [vmem:[#allocation23_spill] sm:$0xff] %v8560_v48  ;;  %v8601_v60 = vld [vmem:[%s8438_s16 + $0x100] sm:$0xff]  ;;  %v8616_v2 = vld [vmem:[%s8438_s16 + $0x88] sm:$0xff]  ;;  %v600_v11 = vld [vmem:[%s8424_s23 + $0x30] sm:$0xff] }
  0x44   : > { %808 = vmatpush.msra.mxu3 %v556_v37  ;;  %677 = vmatpush.msra.mxu0 %v8531_v39  ;;  %14853 = vst [vmem:[#allocation24_spill] sm:$0xff] %v8570_v51  ;;  %v8606_v61 = vld [vmem:[%s8438_s16 + $0x180] sm:$0xff]  ;;  %v595_v5 = vld [vmem:[%s8424_s23 + $0x8] sm:$0xff]  ;;  %v604_v12 = vld [vmem:[%s8424_s23 + $0x50] sm:$0xff] }
  0x45   : > { %765 = vmatpush.msra.mxu2 %v8534_v40  ;;  %720 = vmatpush.msra.mxu1 %v8540_v42  ;;  %14854 = vst [vmem:[#allocation25_spill] sm:$0xff] %v8573_v52  ;;  %v597_v1 = vld [vmem:[%s8424_s23 + $0x18] sm:$0xff]  ;;  %v599_v6 = vld [vmem:[%s8424_s23 + $0x28] sm:$0xff]  ;;  %v602_v9 = vld [vmem:[%s8424_s23 + $0x40] sm:$0xff] }
  0x46   : > { %809 = vmatpush.msra.mxu3 %v555_v41  ;;  %678 = vmatpush.msra.mxu0 %v8544_v43  ;;  %14855 = vst [vmem:[#allocation26_spill] sm:$0xff] %v8579_v54  ;;  %v8620_v4 = vld [vmem:[%s8438_s16 + $0x80] sm:$0xff]  ;;  %v607_v15 = vld [vmem:[%s8424_s23 + $0x68] sm:$0xff]  ;;  %v612_v21 = vld [vmem:[%s8424_s23 + $0x90] sm:$0xff] }
  0x47   : > { %766 = vmatpush.msra.mxu2 %v8547_v44  ;;  %721 = vmatpush.msra.mxu1 %v8553_v46  ;;  %14856 = vst [vmem:[#allocation27_spill] sm:$0xff] %v8585_v56  ;;  %v601_v8 = vld [vmem:[%s8424_s23 + $0x38] sm:$0xff]  ;;  %v606_v13 = vld [vmem:[%s8424_s23 + $0x60] sm:$0xff]  ;;  %v611_v19 = vld [vmem:[%s8424_s23 + $0x88] sm:$0xff] }
  0x48   : > { %810 = vmatpush.msra.mxu3 %v554_v45  ;;  %679 = vmatpush.msra.mxu0 %v8557_v47  ;;  %14857 = vst [vmem:[#allocation28_spill] sm:$0xff] %v8589_v57  ;;  %v605_v16 = vld [vmem:[%s8424_s23 + $0x58] sm:$0xff]  ;;  %v572_v25 = vld [vmem:[%s8438_s16 + $0x230] sm:$0xff]  ;;  %v610_v27 = vld [vmem:[%s8424_s23 + $0x80] sm:$0xff] }
  0x49   : > { %767 = vmatpush.msra.mxu2 %v8560_v48  ;;  %722 = vmatpush.msra.mxu1 %v8566_v50  ;;  %14858 = vst [vmem:[#allocation29_spill] sm:$0xff] %v8598_v59  ;;  %v609_v17 = vld [vmem:[%s8424_s23 + $0x78] sm:$0xff]  ;;  %v614_v29 = vld [vmem:[%s8424_s23 + $0xa0] sm:$0xff]  ;;  %v616_v41 = vld [vmem:[%s8424_s23 + $0xb0] sm:$0xff] }
  0x4a   : > { %811 = vmatpush.msra.mxu3 %v553_v49  ;;  %680 = vmatpush.msra.mxu0 %v8570_v51  ;;  %14859 = vst [vmem:[#allocation30_spill] sm:$0xff] %v8606_v61  ;;  %v573_v23 = vld [vmem:[%s8438_s16 + $0x238] sm:$0xff]  ;;  %v571_v33 = vld [vmem:[%s8438_s16 + $0x228] sm:$0xff]  ;;  %v570_v37 = vld [vmem:[%s8438_s16 + $0x220] sm:$0xff] }
  0x4b   : > { %768 = vmatpush.msra.mxu2 %v8573_v52  ;;  %723 = vmatpush.msra.mxu1 %v8582_v55  ;;  %v617_v45 = vld [vmem:[%s8424_s23 + $0xb8] sm:$0xff]  ;;  %v888_v31 = vld [vmem:[%s14221_s4 + $0x8] sm:$0xff] }
  0x4c   : > { %812 = vmatpush.msra.mxu3 %v552_v53  ;;  %681 = vmatpush.msra.mxu0 %v8579_v54  ;;  %v569_v49 = vld [vmem:[%s8438_s16 + $0x218] sm:$0xff]  ;;  %v590_v53 = vld [vmem:[%s8648_s20 + $0x80] sm:$0xff]  ;;  %v579_v28 = vld [vmem:[%s8648_s20 + $0x28] sm:$0xff] }
  0x4d   : > { %769 = vmatpush.msra.mxu2 %v8585_v56  ;;  %724 = vmatpush.msra.mxu1 %v8592_v58  ;;  %v589_v39 = vld [vmem:[%s8648_s20 + $0x78] sm:$0xff]  ;;  %v574_v47 = vld [vmem:[%s8648_s20] sm:$0xff] }
  0x4e   : > { %813 = vmatpush.msra.mxu3 %v8589_v57  ;;  %682 = vmatpush.msra.mxu0 %v8598_v59 }
  0x4f   : > { %770 = vmatpush.msra.mxu2 %v8601_v60  ;;  %683 = vmatmul.f32.vlgmr.msra.gmra.mxu0 %v594_v62  ;;  %v568_v62 = vld [vmem:[%s8438_s16 + $0x210] sm:$0xff] }
  0x50   : > { %814 = vmatpush.msra.mxu3 %v8606_v61  ;;  %771 = vmatmul.f32.vlgmr.msra.gmra.mxu2 %v596_v63  ;;  %v615_v63 = vld [vmem:[%s8424_s23 + $0xa8] sm:$0xff] }
  0x51   : > { %815 = vmatmul.f32.vlgmr.msra.gmra.mxu3 %v597_v1  ;;  %725 = vmatpush.msra.mxu1 %v8616_v2  ;;  %v585_v1 = vld [vmem:[%s8648_s20 + $0x58] sm:$0xff] }
  0x52   : > { %851 = vmatpush.msrb.mxu0 %v573_v23  ;;  %7159 = vmatpush.msrb.mxu2 %v573_v23  ;;  %v629_v23 = vld [vmem:[%s8424_s23 + $0x118] sm:$0xff] }
  0x53   : > { %726 = vmatpush.msra.mxu1 %v8620_v4  ;;  %1020 = vmatpush.msrb.mxu3 %v590_v53  ;;  %v635_v53 = vld [vmem:[%s8424_s23 + $0x148] sm:$0xff] }
  0x54   : > { %727 = vmatmul.f32.vlgmr.msra.gmra.mxu1 %v595_v5  ;;  %852 = vmatpush.msrb.mxu0 %v572_v25  ;;  %v619_v5 = vld [vmem:[%s8424_s23 + $0xc8] sm:$0xff] }
  0x55   : > { %7160 = vmatpush.msrb.mxu2 %v572_v25  ;;  %1021 = vmatpush.msrb.mxu3 %v585_v1  ;;  %v631_v25 = vld [vmem:[%s8424_s23 + $0x128] sm:$0xff]  ;;  %v577_v1 = vld [vmem:[%s8648_s20 + $0x18] sm:$0xff] }
  0x56   : > { %853 = vmatpush.msrb.mxu0 %v571_v33 }
  0x57   : > { %686 = vmatmul.f32.gmra.mxu0 %v599_v6  ;;  %7161 = vmatpush.msrb.mxu2 %v571_v33  ;;  %v567_v6 = vld [vmem:[%s8438_s16 + $0x208] sm:$0xff] }
  0x58   : > { %774 = vmatmul.f32.gmra.mxu2 %v601_v8  ;;  %854 = vmatpush.msrb.mxu0 %v570_v37  ;;  %v580_v8 = vld [vmem:[%s8648_s20 + $0x30] sm:$0xff]  ;;  %v634_v33 = vld [vmem:[%s8424_s23 + $0x140] sm:$0xff] }
  0x59   : > { %818 = vmatmul.f32.gmra.mxu3 %v602_v9  ;;  %7162 = vmatpush.msrb.mxu2 %v570_v37  ;;  %v566_v9 = vld [vmem:[%s8438_s16 + $0x200] sm:$0xff]  ;;  %v636_v37 = vld [vmem:[%s8424_s23 + $0x150] sm:$0xff] }
  0x5a   : > { %855 = vmatpush.msrb.mxu0 %v569_v49  ;;  %1022 = vmatpush.msrb.mxu3 %v580_v8  ;;  %v603_v8 = vld [vmem:[%s8424_s23 + $0x48] sm:$0xff] }
  0x5b   : > { %7163 = vmatpush.msrb.mxu2 %v569_v49  ;;  %v587_v49 = vld [vmem:[%s8648_s20 + $0x68] sm:$0xff] }
  0x5c   : > { %730 = vmatmul.f32.gmra.mxu1 %v600_v11  ;;  %v621_v11 = vld [vmem:[%s8424_s23 + $0xd8] sm:$0xff]  ;;  %856 = vmatpush.msrb.mxu0 %v568_v62 }
  0x5d   : > { %7164 = vmatpush.msrb.mxu2 %v568_v62  ;;  %v582_v62 = vld [vmem:[%s8648_s20 + $0x40] sm:$0xff] }
  0x5e   : > { %857 = vmatpush.msrb.mxu0 %v567_v6 }
  0x5f   : > { %689 = vmatmul.f32.gmra.mxu0 %v604_v12  ;;  %v622_v12 = vld [vmem:[%s8424_s23 + $0xe0] sm:$0xff]  ;;  %7165 = vmatpush.msrb.mxu2 %v567_v6 }
  0x60   : > { %777 = vmatmul.f32.gmra.mxu2 %v606_v13  ;;  %v575_v13 = vld [vmem:[%s8648_s20 + $0x8] sm:$0xff]  ;;  %858 = vmatpush.msrb.mxu0 %v566_v9  ;;  %v8684_v6 = vld [vmem:[%s14222_s5] sm:$0xff] }
  0x61   : > { %821 = vmatmul.f32.gmra.mxu3 %v607_v15  ;;  %7166 = vmatpush.msrb.mxu2 %v566_v9  ;;  %v620_v15 = vld [vmem:[%s8424_s23 + $0xd0] sm:$0xff]  ;;  %v8694_v9 = vld [vmem:[%s14222_s5 + $0x8] sm:$0xff] }
  0x62   : > { %1023 = vmatpush.msrb.mxu3 %v575_v13  ;;  %v613_v13 = vld [vmem:[%s8424_s23 + $0x98] sm:$0xff] }
  0x64   : > { %733 = vmatmul.f32.gmra.mxu1 %v605_v16  ;;  %v624_v16 = vld [vmem:[%s8424_s23 + $0xf0] sm:$0xff] }
  0x67   : > { %692 = vmatmul.f32.gmra.mxu0 %v609_v17  ;;  %v626_v17 = vld [vmem:[%s8424_s23 + $0x100] sm:$0xff] }
  0x68   : > { %780 = vmatmul.f32.gmra.mxu2 %v611_v19  ;;  %v627_v19 = vld [vmem:[%s8424_s23 + $0x108] sm:$0xff] }
  0x69   : > { %824 = vmatmul.f32.gmra.mxu3 %v612_v21  ;;  %v625_v21 = vld [vmem:[%s8424_s23 + $0xf8] sm:$0xff] }
  0x6c   : > { %736 = vmatmul.f32.gmra.mxu1 %v610_v27  ;;  %v632_v27 = vld [vmem:[%s8424_s23 + $0x130] sm:$0xff] }
  0x6f   : > { %695 = vmatmul.f32.gmra.mxu0 %v614_v29  ;;  %v630_v29 = vld [vmem:[%s8424_s23 + $0x120] sm:$0xff] }
  0x70   : > { %783 = vmatmul.f32.gmra.mxu2 %v616_v41  ;;  %v637_v41 = vld [vmem:[%s8424_s23 + $0x158] sm:$0xff] }
  0x71   : > { %827 = vmatmul.f32.gmra.mxu3 %v617_v45  ;;  %v592_v45 = vld [vmem:[%s8648_s20 + $0x90] sm:$0xff] }
  0x72   : > { %1078 = vmatpush.msra.mxu3 %v592_v45 }
  0x74   : > { %739 = vmatmul.f32.gmra.mxu1 %v615_v63  ;;  %1079 = vmatpush.msra.mxu3 %v587_v49  ;;  %v598_v63 = vld [vmem:[%s8424_s23 + $0x20] sm:$0xff] }
  0x76   : > { %1080 = vmatpush.msra.mxu3 %v582_v62 }
  0x77   : > { %698 = vmatmul.f32.gmra.mxu0 %v619_v5  ;;  %v638_v5 = vld [vmem:[%s8424_s23 + $0x160] sm:$0xff] }
  0x78   : > { %786 = vmatmul.f32.gmra.mxu2 %v621_v11  ;;  %1081 = vmatpush.msra.mxu3 %v577_v1  ;;  %v608_v11 = vld [vmem:[%s8424_s23 + $0x70] sm:$0xff] }
  0x79   : > { %830 = vmatmul.f32.gmra.mxu3 %v622_v12  ;;  %v8703_v12 = vld [vmem:[%s14222_s5 + $0x10] sm:$0xff] }
  0x7c   : > { %742 = vmatmul.f32.gmra.mxu1 %v620_v15  ;;  %v8712_v15 = vld [vmem:[%s14222_s5 + $0x18] sm:$0xff] }
  0x7f   : > { %701 = vmatmul.f32.gmra.mxu0 %v624_v16  ;;  %v8720_v16 = vld [vmem:[%s14223_s6 + $0x18] sm:$0xff] }
  0x80   : > { %789 = vmatmul.f32.gmra.mxu2 %v626_v17  ;;  %v8726_v17 = vld [vmem:[%s14223_s6 + $0x10] sm:$0xff] }
  0x81   : > { %833 = vmatmul.f32.gmra.mxu3 %v627_v19  ;;  %v618_v19 = vld [vmem:[%s8424_s23 + $0xc0] sm:$0xff] }
  0x84   : > { %745 = vmatmul.f32.gmra.mxu1 %v625_v21  ;;  %v8733_v21 = vld [vmem:[%s14223_s6 + $0x8] sm:$0xff] }
  0x87   : > { %704 = vmatmul.f32.gmra.mxu0 %v629_v23  ;;  %v8739_v23 = vld [vmem:[%s14223_s6] sm:$0xff] }
  0x88   : > { %792 = vmatmul.f32.gmra.mxu2 %v631_v25  ;;  %v623_v25 = vld [vmem:[%s8424_s23 + $0xe8] sm:$0xff] }
  0x89   : > { %836 = vmatmul.f32.gmra.mxu3 %v632_v27  ;;  %v628_v27 = vld [vmem:[%s8424_s23 + $0x110] sm:$0xff] }
  0x8c   : > { %748 = vmatmul.f32.gmra.mxu1 %v630_v29 }
  0x8f   : > { %707 = vmatmul.f32.gmra.mxu0 %v634_v33  ;;  %v633_v33 = vld [vmem:[%s8424_s23 + $0x138] sm:$0xff]  ;;  %s497_s23 = sadd.s32 %s7184_s29, %s16588_s14 }
  0x90   : > { %795 = vmatmul.f32.gmra.mxu2 %v636_v37  ;;  %s6821_s25 = sshll.u32 %s497_s23, 3 }
  0x91   : > { %839 = vmatmul.f32.gmra.mxu3 %v637_v41  ;;  %s14142_s17 = scalar_lea.vmem %s16570_s26, %s6821_s25 }
  0x94   : > { %751 = vmatmul.f32.gmra.mxu1 %v635_v53 }
  0x97   : > { %6822 = vmatmul.msk.f32.vlgmr.msrb.gmra.mxu0 %vm639_vm0, %v598_v63 }
  0x98   : > { %6830 = vmatmul.msk.f32.vlgmr.msrb.gmra.mxu2 %vm639_vm0, %v638_v5 }
  0x99   : > { %6844 = vmatmul.msk.f32.vlgmr.msrb.gmra.mxu3 %vm891_vm1, %v8684_v6 }
  0x9a   : > { %7171 = vmatpush.msrb.mxu3 %v8720_v16 }
  0x9c   : > { %7172 = vmatpush.msrb.mxu3 %v8726_v17 }
  0x9e   : > { %7173 = vmatpush.msrb.mxu3 %v8733_v21 }
  0x9f   : > { %6823 = vmatmul.msk.f32.gmra.mxu0 %vm639_vm0, %v603_v8 }
  0xa0   : > { %7174 = vmatpush.msrb.mxu3 %v8739_v23 }
  0xa1   : > { %6845 = vmatmul.msk.f32.gmra.mxu3 %vm891_vm1, %v8694_v9 }
  0xa7   : > { %6824 = vmatmul.msk.f32.gmra.mxu0 %vm639_vm0, %v608_v11 }
  0xa9   : > { %6846 = vmatmul.msk.f32.gmra.mxu3 %vm891_vm1, %v8703_v12 }
  0xaf   : > { %6825 = vmatmul.msk.f32.gmra.mxu0 %vm639_vm0, %v613_v13 }
  0xb1   : > { %6847 = vmatmul.msk.f32.gmra.mxu3 %vm891_vm1, %v8712_v15 }
  0xb7   : > { %6826 = vmatmul.msk.f32.gmra.mxu0 %vm639_vm0, %v618_v19 }
  0xb9   : > { %6852 = vmatmul.msk.f32.vlgmr.msra.gmra.mxu3 %vm891_vm1, %v8684_v6 }
  0xbf   : > { %6827 = vmatmul.msk.f32.gmra.mxu0 %vm639_vm0, %v623_v25 }
  0xc1   : > { %6853 = vmatmul.msk.f32.gmra.mxu3 %vm891_vm1, %v8694_v9 }
  0xc7   : > { %6828 = vmatmul.msk.f32.gmra.mxu0 %vm639_vm0, %v628_v27 }
  0xc9   : > { %6854 = vmatmul.msk.f32.gmra.mxu3 %vm891_vm1, %v8703_v12 }
  0xcc   : > { %v684_v29 = vpop.f32.mrf.mxu0 }
  0xcf   : > { %6829 = vmatmul.msk.f32.gmra.mxu0 %vm639_vm0, %v633_v33 }
  0xd1   : > { %6855 = vmatmul.msk.f32.gmra.mxu3 %vm891_vm1, %v8712_v15  ;;  %v728_v37 = vpop.f32.mrf.mxu1 }
  0xd3   : > { %v772_v41 = vpop.f32.mrf.mxu2 }
  0xd4   : > { %v816_v45 = vpop.f32.mrf.mxu3  ;;  %v687_v49 = vpop.f32.mrf.mxu0 }
  0xd9   : > { %6874 = vmatmul.msk.f32.vlgmr.msrb.gmra.mxu3 %vm891_vm1, %v8447_v3  ;;  %v731_v53 = vpop.f32.mrf.mxu1 }
  0xda   : > { %v732_v59 = vadd.f32 %v731_v53, %v687_v49 }
  0xdb   : > { %v8759_v62 = vpop.f32.mrf.mxu2 }
  0xdc   : > { %v8761_v63 = vpop.f32.mrf.mxu3  ;;  %v8763_v1 = vpop.f32.mrf.mxu0 }
  0xe1   : > { %6875 = vmatmul.msk.f32.gmra.mxu3 %vm891_vm1, %v8441_v0  ;;  %v8767_v5 = vpop.f32.mrf.mxu1  ;;  %v890_v0 = vld [vmem:[%s14221_s4 + $0x18] sm:$0xff] }
  0xe2   : > { %931 = vmatpush.msrb.mxu1 %v890_v0  ;;  %7167 = vmatpush.msra.mxu2 %v890_v0  ;;  %v887_v0 = vld [vmem:[%s14221_s4] sm:$0xff] }
  0xe3   : > { %v8769_v8 = vpop.f32.mrf.mxu2 }
  0xe4   : > { %v8771_v11 = vpop.f32.mrf.mxu3  ;;  %v8773_v13 = vpop.f32.mrf.mxu0 }
  0xe9   : > { %6876 = vmatmul.msk.f32.gmra.mxu3 %vm891_vm1, %v8620_v4  ;;  %v8777_v3 = vpop.f32.mrf.mxu1  ;;  %v889_v4 = vld [vmem:[%s14221_s4 + $0x10] sm:$0xff] }
  0xea   : > { %932 = vmatpush.msrb.mxu1 %v889_v4  ;;  %7168 = vmatpush.msra.mxu2 %v889_v4  ;;  %v738_v53 = vadd.f32 %v8777_v3, %v8773_v13 }
  0xeb   : > { %v8779_v19 = vpop.f32.mrf.mxu2 }
  0xec   : > { %v8781_v25 = vpop.f32.mrf.mxu3  ;;  %v8783_v27 = vpop.f32.mrf.mxu0  ;;  %933 = vmatpush.msrb.mxu1 %v888_v31  ;;  %7169 = vmatpush.msra.mxu2 %v888_v31  ;;  %v584_v31 = vld [vmem:[%s8648_s20 + $0x50] sm:$0xff] }
  0xee   : > { %934 = vmatpush.msrb.mxu1 %v887_v0  ;;  %7170 = vmatpush.msra.mxu2 %v887_v0 }
  0xf0   : > { %991 = vmatpush.msrb.mxu2 %v589_v39 }
  0xf1   : > { %6877 = vmatmul.msk.f32.gmra.mxu3 %vm891_vm1, %v8616_v2  ;;  %v8790_v33 = vpop.f32.mrf.mxu1 }
  0xf2   : > { %992 = vmatpush.msrb.mxu2 %v584_v31 }
  0xf3   : > { %v8795_v57 = vpop.f32.mrf.mxu2 }
  0xf4   : > { %v8797_v61 = vpop.f32.mrf.mxu3  ;;  %v8799_v2 = vpop.f32.mrf.mxu0  ;;  %993 = vmatpush.msrb.mxu2 %v579_v28 }
  0xf6   : > { %994 = vmatpush.msrb.mxu2 %v574_v47 }
  0xf9   : > { %6878 = vmatmul.msk.f32.gmra.mxu3 %vm891_vm1, %v8592_v58  ;;  %v8809_v4 = vpop.f32.mrf.mxu1 }
  0xfb   : > { %v8811_v20 = vpop.f32.mrf.mxu2 }
  0xfc   : > { %v8813_v35 = vpop.f32.mrf.mxu3  ;;  %v8815_v24 = vpop.f32.mrf.mxu0 }
 0x101   : > { %6879 = vmatmul.msk.f32.gmra.mxu3 %vm891_vm1, %v8582_v55  ;;  %v8822_v0 = vpop.f32.mrf.mxu1  ;;  %v729_v55 = vadd.f32 %v728_v37, %v684_v29  ;;  %v776_v29 = vadd.f32 %v8759_v62, %v732_v59 }
 0x103   : > { %v8824_v58 = vpop.f32.mrf.mxu2  ;;  %v773_v40 = vadd.f32 %v772_v41, %v729_v55  ;;  %v820_v37 = vadd.f32 %v8761_v63, %v776_v29 }
 0x104   : > { %v8826_v43 = vpop.f32.mrf.mxu3  ;;  %v8828_v32 = vpop.f32.mrf.mxu0 }
 0x105   : > { %v817_v44 = vadd.f32 %v816_v45, %v773_v40  ;;  %v735_v40 = vadd.f32 %v8767_v5, %v8763_v1  ;;  %v576_v1 = vld [vmem:[%s8648_s20 + $0x10] sm:$0xff] }
 0x107   : > { %v779_v59 = vadd.f32 %v8769_v8, %v735_v40  ;;  %v782_v8 = vadd.f32 %v8779_v19, %v738_v53  ;;  %v744_v19 = vadd.f32 %v8809_v4, %v8799_v2  ;;  %v578_v40 = vld [vmem:[%s8648_s20 + $0x20] sm:$0xff] }
 0x108   : > { %v14864_v53 = vld [vmem:[#allocation21_spill] sm:$0xff] }
 0x109   : > { %6880 = vmatmul.msk.f32.gmra.mxu3 %vm891_vm1, %v8566_v50  ;;  %v8833_v39 = vpop.f32.mrf.mxu1 }
 0x10b   : > { %v8835_v36 = vpop.f32.mrf.mxu2 }
 0x10c   : > { %v8837_v51 = vpop.f32.mrf.mxu3  ;;  %v708_v31 = vpop.f32.mrf.mxu0 }
 0x111   : > { %6881 = vmatmul.msk.f32.gmra.mxu3 %vm891_vm1, %v8553_v46  ;;  %v752_v28 = vpop.f32.mrf.mxu1 }
 0x112   : > { %v753_v54 = vadd.f32 %v752_v28, %v708_v31 }
 0x113   : > { %v796_v47 = vpop.f32.mrf.mxu2 }
 0x114   : > { %v840_v48 = vpop.f32.mrf.mxu3  ;;  %v860_v50 = vpop.f32.mrf.mxu0  ;;  %v797_v56 = vadd.f32 %v796_v47, %v753_v54 }
 0x115   : > { %v861_v52 = vadd.f32 %v860_v50, %v817_v44 }
 0x116   : > { %v841_v46 = vadd.f32 %v840_v48, %v797_v56  ;;  %v581_v48 = vld [vmem:[%s8648_s20 + $0x38] sm:$0xff]  ;;  %v823_v56 = vadd.f32 %v8771_v11, %v779_v59  ;;  %v741_v11 = vadd.f32 %v8790_v33, %v8783_v27 }
 0x117   : > { %6831 = vmatmul.msk.f32.vlgmr.msrb.gmra.mxu1 %vm891_vm1, %v861_v52  ;;  %v591_v52 = vld [vmem:[%s8648_s20 + $0x88] sm:$0xff] }
 0x118   : > { %v785_v31 = vadd.f32 %v8795_v57, %v741_v11  ;;  %v1581_v11 = vld [vmem:[%s14220_s3] sm:$0xff] }
 0x119   : > { %6882 = vmatmul.msk.f32.gmra.mxu3 %vm891_vm1, %v8540_v42  ;;  %v586_v42 = vld [vmem:[%s8648_s20 + $0x60] sm:$0xff] }
 0x11b   : > { %v884_v41 = vpop.f32.mrf.mxu2 }
 0x11c   : > { %v1025_v45 = vpop.f32.mrf.mxu3  ;;  %v885_v49 = vadd.f32 %v884_v41, %v841_v46  ;;  %v863_v44 = vpop.f32.mrf.mxu0 }
 0x11d   : > { %v864_v54 = vadd.f32 %v863_v44, %v820_v37 }
 0x11e   : > { %6839 = vmatmul.msk.f32.vlgmr.msra.gmra.mxu2 %vm891_vm1, %v885_v49  ;;  %v14860_v49 = vld [vmem:[#allocation27_spill] sm:$0xff] }
 0x11f   : > { %6832 = vmatmul.msk.f32.gmra.mxu1 %vm891_vm1, %v864_v54  ;;  %1049 = vmatpush.msra.mxu2 %v591_v52  ;;  %v14862_v52 = vld [vmem:[#allocation23_spill] sm:$0xff] }
 0x121   : > { %6883 = vmatmul.msk.f32.gmra.mxu3 %vm891_vm1, %v8527_v38  ;;  %1050 = vmatpush.msra.mxu2 %v586_v42  ;;  %v826_v38 = vadd.f32 %v8781_v25, %v782_v8 }
 0x123   : > { %1051 = vmatpush.msra.mxu2 %v581_v48 }
 0x124   : > { %v1028_v62 = vpop.f32.mrf.mxu3  ;;  %v866_v63 = vpop.f32.mrf.mxu0 }
 0x125   : > { %v867_v5 = vadd.f32 %v866_v63, %v823_v56  ;;  %1052 = vmatpush.msra.mxu2 %v576_v1  ;;  %v8880_v47 = vpack.c.bf16 %v1028_v62, %v1025_v45  ;;  %v14863_v56 = vld [vmem:[#allocation29_spill] sm:$0xff]  ;;  %v14865_v62 = vld [vmem:[#allocation26_spill] sm:$0xff]  ;;  %v14866_v63 = vld [vmem:[#allocation19_spill] sm:$0xff] }
 0x126   : > { %6840 = vmatmul.msk.f32.vlgmr.msrb.gmra.mxu2 %vm891_vm1, %v8684_v6 }
 0x127   : > { %6833 = vmatmul.msk.f32.gmra.mxu1 %vm891_vm1, %v867_v5 }
 0x129   : > { %6884 = vmatmul.msk.f32.gmra.mxu3 %vm891_vm1, %v8514_v34  ;;  %v829_v34 = vadd.f32 %v8797_v61, %v785_v31  ;;  %v747_v61 = vadd.f32 %v8822_v0, %v8815_v24  ;;  %v750_v0 = vadd.f32 %v8833_v39, %v8828_v32  ;;  %v14869_v31 = vld [vmem:[#allocation17_spill] sm:$0xff] }
 0x12b   : > { %v791_v29 = vadd.f32 %v8824_v58, %v747_v61  ;;  %v794_v58 = vadd.f32 %v8835_v36, %v750_v0 }
 0x12c   : > { %v1031_v13 = vpop.f32.mrf.mxu3  ;;  %v869_v3 = vpop.f32.mrf.mxu0 }
 0x12d   : > { %v870_v55 = vadd.f32 %v869_v3, %v826_v38  ;;  %v835_v24 = vadd.f32 %v8826_v43, %v791_v29  ;;  %v14868_v3 = vld [vmem:[#allocation24_spill] sm:$0xff] }
 0x12e   : > { %6841 = vmatmul.msk.f32.gmra.mxu2 %vm891_vm1, %v8694_v9 }
 0x12f   : > { %6834 = vmatmul.msk.f32.gmra.mxu1 %vm891_vm1, %v870_v55  ;;  %v8992_v55 = vmul.f32 0.5, %v1581_v11 }
 0x131   : > { %6885 = vmatmul.msk.f32.gmra.mxu3 %vm891_vm1, %v8502_v30  ;;  %v788_v30 = vadd.f32 %v8811_v20, %v744_v19  ;;  %v593_v20 = vld [vmem:[%s8648_s20 + $0x98] sm:$0xff]  ;;  %v1587_v61 = vrot.slane %v8992_v55, 4 }
 0x132   : > { %1107 = vmatpush.msrb.mxu2 %v593_v20  ;;  %v14873_v20 = vld [vmem:[#allocation15_spill] sm:$0xff] }
 0x133   : > { %v832_v57 = vadd.f32 %v8813_v35, %v788_v30  ;;  %v583_v35 = vld [vmem:[%s8648_s20 + $0x48] sm:$0xff] }
 0x134   : > { %v1034_v25 = vpop.f32.mrf.mxu3  ;;  %v872_v33 = vpop.f32.mrf.mxu0 }
 0x135   : > { %v8878_v27 = vpack.c.bf16 %v1034_v25, %v1031_v13  ;;  %v873_v28 = vadd.f32 %v872_v33, %v829_v34  ;;  %v8997_v34 = vperm.slane %v8992_v55, 0  ;;  %v1585_v33 = vrot.slane %v8992_v55, 2 }
 0x136   : > { %6842 = vmatmul.msk.f32.gmra.mxu2 %vm891_vm1, %v8703_v12 }
 0x137   : > { %2028 = vmatpush.bf16.msra.mxu1 %v8878_v27 }
 0x138   : > { %6835 = vmatmul.msk.f32.gmra.mxu1 %vm891_vm1, %v873_v28  ;;  %v1586_v28 = vrot.slane %v8992_v55, 3 }
 0x139   : > { %6886 = vmatmul.msk.f32.gmra.mxu3 %vm891_vm1, %v8492_v26  ;;  %v588_v26 = vld [vmem:[%s8648_s20 + $0x70] sm:$0xff] }
 0x13a   : > { %1108 = vmatpush.msrb.mxu2 %v588_v26  ;;  %v9015_v29 = vperm.slane %v1586_v28, 0 }
 0x13b   : > { %2029 = vmatpush.bf16.msra.mxu1 %v8880_v47 }
 0x13c   : > { %v1083_v2 = vpop.f32.mrf.mxu3  ;;  %v875_v4 = vpop.f32.mrf.mxu0  ;;  %1109 = vmatpush.msrb.mxu2 %v583_v35  ;;  %v9021_v35 = vperm.slane %v1585_v33, 0  ;;  %v14890_v33 = vld [vmem:[#allocation14_spill] sm:$0xff] }
 0x13d   : > { %v876_v50 = vadd.f32 %v875_v4, %v832_v57  ;;  %v14871_v4 = vld [vmem:[#allocation22_spill] sm:$0xff] }
 0x13e   : > { %6843 = vmatmul.msk.f32.gmra.mxu2 %vm891_vm1, %v8712_v15 }
 0x13f   : > { %1110 = vmatpush.msrb.mxu2 %v578_v40 }
 0x140   : > { %6836 = vmatmul.msk.f32.gmra.mxu1 %vm891_vm1, %v876_v50 }
 0x141   : > { %6887 = vmatmul.msk.f32.gmra.mxu3 %vm891_vm1, %v8482_v22  ;;  %v838_v22 = vadd.f32 %v8837_v51, %v794_v58 }
 0x144   : > { %v1086_v46 = vpop.f32.mrf.mxu3  ;;  %v878_v37 = vpop.f32.mrf.mxu0 }
 0x145   : > { %v879_v41 = vadd.f32 %v878_v37, %v835_v24  ;;  %v9023_v24 = vperm.slane %v1587_v61, 0 }
 0x146   : > { %6848 = vmatmul.msk.f32.vlgmr.msra.gmra.mxu2 %vm891_vm1, %v8684_v6 }
 0x147   : > { %1360 = vmatpush.msra.mxu2 %v8720_v16  ;;  %v1718_v16 = vpack.c.bf16 %v1086_v46, %v1083_v2  ;;  %v1588_v2 = vrot.slane %v8992_v55, 5  ;;  %14875 = vst [vmem:[#allocation21_spill] sm:$0xff] %v9023_v24 }
 0x148   : > { %6837 = vmatmul.msk.f32.gmra.mxu1 %vm891_vm1, %v879_v41 }
 0x149   : > { %6888 = vmatmul.msk.f32.gmra.mxu3 %vm891_vm1, %v8473_v18  ;;  %1361 = vmatpush.msra.mxu2 %v8726_v17  ;;  %v8929_v17 = vld [vmem:[%s14224_s7] ss:$0 sm:$0xff]  ;;  %v9025_v0 = vperm.slane %v1588_v2, 0 }
 0x14b   : > { %1362 = vmatpush.msra.mxu2 %v8733_v21  ;;  %14876 = vst [vmem:[#allocation26_spill] sm:$0xff] %v9025_v0 }
 0x14c   : > { %v1089_v32 = vpop.f32.mrf.mxu3  ;;  %v881_v43 = vpop.f32.mrf.mxu0 }
 0x14d   : > { %v882_v39 = vadd.f32 %v881_v43, %v838_v22  ;;  %1363 = vmatpush.msra.mxu2 %v8739_v23 }
 0x14e   : > { %6849 = vmatmul.msk.f32.gmra.mxu2 %vm891_vm1, %v8694_v9 }
 0x150   : > { %6838 = vmatmul.msk.f32.gmra.mxu1 %vm891_vm1, %v882_v39 }
 0x151   : > { %6889 = vmatmul.msk.f32.gmra.mxu3 %vm891_vm1, %v8466_v14 }
 0x154   : > { %v1092_v18 = vpop.f32.mrf.mxu3 }
 0x155   : > { %v1723_v36 = vpack.c.bf16 %v1092_v18, %v1089_v32  ;;  %v14878_v18 = vld [vmem:[#allocation20_spill] sm:$0xff] }
 0x156   : > { %6850 = vmatmul.msk.f32.gmra.mxu2 %vm891_vm1, %v8703_v12 }
 0x157   : > { %2406 = vmatpush.bf16.msra.mxu3 %v1723_v36 }
 0x159   : > { %6890 = vmatmul.msk.f32.gmra.mxu3 %vm891_vm1, %v8459_v10 }
 0x15b   : > { %2407 = vmatpush.bf16.msra.mxu3 %v1718_v16 }
 0x15c   : > { %v1407_v51 = vpop.f32.mrf.mxu3 }
 0x15d   : > { %v1408_v14 = vadd.f32 %v8929_v17, %v1407_v51  ;;  %v14881_v51 = vld [vmem:[#allocation13_spill] sm:$0xff] }
 0x15e   : > { %6851 = vmatmul.msk.f32.gmra.mxu2 %vm891_vm1, %v8712_v15 }
 0x161   : > { %6891 = vmatmul.msk.f32.gmra.mxu3 %vm891_vm1, %v8453_v7 }
 0x164   : > { %v1410_v21 = vpop.f32.mrf.mxu3 }
 0x165   : > { %v1411_v23 = vadd.f32 %v8929_v17, %v1410_v21 }
 0x166   : > { %6856 = vmatmul.msk.f32.vlgmr.msrb.gmra.mxu2 %vm891_vm1, %v8684_v6  ;;  %v8163_v6 = vld [vmem:[%s8438_s16 + $0x190] sm:$0xff] }
 0x167   : > { %v4549_v45 = vpack.c.bf16 %v1411_v23, %v1408_v14 }
 0x169   : > { %6892 = vmatmul.msk.f32.gmra.mxu3 %vm891_vm1, %v8601_v60  ;;  %4686 = vmatpush.bf16.msrb.mxu1 %v4549_v45  ;;  %v14861_v60 = vld [vmem:[#allocation25_spill] sm:$0xff] }
 0x16c   : > { %v1413_v10 = vpop.f32.mrf.mxu3 }
 0x16d   : > { %v8946_v7 = vadd.f32 %v8929_v17, %v1413_v10 }
 0x16e   : > { %6857 = vmatmul.msk.f32.gmra.mxu2 %vm891_vm1, %v8694_v9 }
 0x171   : > { %6893 = vmatmul.msk.f32.gmra.mxu3 %vm891_vm1, %v14860_v49  ;;  %v14883_v49 = vld [vmem:[#allocation18_spill] sm:$0xff] }
 0x174   : > { %v1416_v44 = vpop.f32.mrf.mxu3 }
 0x175   : > { %v8949_v54 = vadd.f32 %v8929_v17, %v1416_v44 }
 0x176   : > { %6858 = vmatmul.msk.f32.gmra.mxu2 %vm891_vm1, %v8703_v12 }
 0x179   : > { %6894 = vmatmul.msk.f32.gmra.mxu3 %vm891_vm1, %v14861_v60  ;;  %v14885_v60 = vld [vmem:[#allocation12_spill] sm:$0xff] }
 0x17c   : > { %v1419_v9 = vpop.f32.mrf.mxu3 }
 0x17d   : > { %v8962_v59 = vadd.f32 %v8929_v17, %v1419_v9 }
 0x17e   : > { %6859 = vmatmul.msk.f32.gmra.mxu2 %vm891_vm1, %v8712_v15 }
 0x181   : > { %6895 = vmatmul.msk.f32.gmra.mxu3 %vm891_vm1, %v14862_v52 }
 0x184   : > { %v1422_v42 = vpop.f32.mrf.mxu3 }
 0x185   : > { %v8965_v48 = vadd.f32 %v8929_v17, %v1422_v42 }
 0x186   : > { %6860 = vmatmul.msk.f32.vlgmr.msra.gmra.mxu2 %vm891_vm1, %v14863_v56 }
 0x189   : > { %6896 = vmatmul.msk.f32.gmra.mxu3 %vm891_vm1, %v14864_v53 }
 0x18c   : > { %v1425_v15 = vpop.f32.mrf.mxu3 }
 0x18d   : > { %v8978_v1 = vadd.f32 %v8929_v17, %v1425_v15 }
 0x18e   : > { %6861 = vmatmul.msk.f32.gmra.mxu2 %vm891_vm1, %v14865_v62  ;;  %v14887_v62 = vld [vmem:[#allocation16_spill] sm:$0xff] }
 0x191   : > { %6897 = vmatmul.msk.f32.gmra.mxu3 %vm891_vm1, %v14866_v63  ;;  %v14888_v63 = vld [vmem:[#allocation11_spill] sm:$0xff] }
 0x194   : > { %v1428_v5 = vpop.f32.mrf.mxu3  ;;  %v8983_v38 = vpop.f32.mrf.mxu1 }
 0x195   : > { %v8981_v8 = vadd.f32 %v8929_v17, %v1428_v5  ;;  %14867 = vst [vmem:[#allocation27_spill] sm:$0xff] %v8983_v38  ;;  %v1607_v30 = vmul.f32 %v8997_v34, %v8983_v38  ;;  %v1634_v32 = vmul.f32 %v9015_v29, %v8983_v38  ;;  %v1652_v43 = vmul.f32 %v9025_v0, %v8983_v38 }
 0x196   : > { %6862 = vmatmul.msk.f32.gmra.mxu2 %vm891_vm1, %v14868_v3 }
 0x199   : > { %6898 = vmatmul.msk.f32.gmra.mxu3 %vm891_vm1, %v14869_v31 }
 0x19c   : > { %v1431_v19 = vpop.f32.mrf.mxu3  ;;  %v8999_v25 = vpop.f32.mrf.mxu1 }
 0x19d   : > { %14870 = vst [vmem:[#allocation25_spill] sm:$0xff] %v8999_v25  ;;  %v1608_v57 = vmul.f32 %v8997_v34, %v8999_v25  ;;  %v9028_v46 = vadd.f32 %v8929_v17, %v1431_v19 }
 0x19e   : > { %6863 = vmatmul.msk.f32.gmra.mxu2 %vm891_vm1, %v14871_v4 }
 0x19f   : > { %v9011_v50 = vpack.c.bf16 %v1608_v57, %v1607_v30  ;;  %v8152_v30 = vld [vmem:[%s8438_s16 + $0x158] sm:$0xff] }
 0x1a1   : > { %14872 = vst [vmem:[#allocation23_spill] sm:$0xff] %v9011_v50  ;;  %6899 = vmatmul.msk.f32.gmra.mxu3 %vm891_vm1, %v14873_v20  ;;  %v9017_v26 = vpop.f32.mrf.mxu2  ;;  %6968 = vmatmul.msk.bf16.vlgmr.msra.gmra.mxu1 %vm891_vm1, %v9011_v50 }
 0x1a2   : > { %14874 = vst [vmem:[#allocation29_spill] sm:$0xff] %v9017_v26  ;;  %v1633_v40 = vmul.f32 %v9021_v35, %v9017_v26  ;;  %v1651_v41 = vmul.f32 %v9023_v24, %v9017_v26 }
 0x1a4   : > { %v1434_v37 = vpop.f32.mrf.mxu3  ;;  %v9037_v22 = vpop.f32.mrf.mxu1  ;;  %v9047_v36 = vpack.c.bf16 %v1634_v32, %v1633_v40  ;;  %v9049_v16 = vpack.c.bf16 %v1652_v43, %v1651_v41  ;;  %v8153_v32 = vld [vmem:[%s8438_s16 + $0x40] sm:$0xff] }
 0x1a5   : > { %v9035_v58 = vadd.f32 %v8929_v17, %v1434_v37  ;;  %14877 = vst [vmem:[#allocation19_spill] sm:$0xff] %v9037_v22  ;;  %v1609_v45 = vmul.f32 %v8997_v34, %v9037_v22  ;;  %v8154_v43 = vld [vmem:[%s8438_s16 + $0x160] sm:$0xff] }
 0x1a6   : > { %6864 = vmatmul.msk.f32.gmra.mxu2 %vm891_vm1, %v14878_v18  ;;  %14879 = vst [vmem:[#allocation24_spill] sm:$0xff] %v9047_v36 }
 0x1a7   : > { %14880 = vst [vmem:[#allocation17_spill] sm:$0xff] %v9049_v16 }
 0x1a9   : > { %6900 = vmatmul.msk.f32.gmra.mxu3 %vm891_vm1, %v14881_v51  ;;  %v996_v14 = vpop.f32.mrf.mxu2 }
 0x1ac   : > { %v1437_v21 = vpop.f32.mrf.mxu3  ;;  %v9053_v23 = vpop.f32.mrf.mxu1 }
 0x1ad   : > { %14882 = vst [vmem:[#allocation22_spill] sm:$0xff] %v9053_v23  ;;  %v1610_v10 = vmul.f32 %v8997_v34, %v9053_v23  ;;  %v9068_v52 = vadd.f32 %v8929_v17, %v1437_v21 }
 0x1ae   : > { %6865 = vmatmul.msk.f32.gmra.mxu2 %vm891_vm1, %v14883_v49  ;;  %v8156_v49 = vld [vmem:[%s8438_s16 + $0x168] sm:$0xff] }
 0x1af   : > { %v9061_v44 = vpack.c.bf16 %v1610_v10, %v1609_v45  ;;  %v8155_v10 = vld [vmem:[%s8438_s16 + $0x48] sm:$0xff] }
 0x1b1   : > { %14884 = vst [vmem:[#allocation15_spill] sm:$0xff] %v9061_v44  ;;  %6901 = vmatmul.msk.f32.gmra.mxu3 %vm891_vm1, %v14885_v60  ;;  %v999_v9 = vpop.f32.mrf.mxu2  ;;  %6969 = vmatmul.msk.bf16.gmra.mxu1 %vm891_vm1, %v9061_v44 }
 0x1b2   : > { %v1715_v40 = vpack.c.bf16 %v999_v9, %v996_v14 }
 0x1b4   : > { %v1440_v42 = vpop.f32.mrf.mxu3 }
 0x1b5   : > { %v9071_v56 = vadd.f32 %v8929_v17, %v1440_v42  ;;  %v9073_v53 = vpop.f32.mrf.mxu1 }
 0x1b6   : > { %14886 = vst [vmem:[#allocation20_spill] sm:$0xff] %v9073_v53  ;;  %6866 = vmatmul.msk.f32.gmra.mxu2 %vm891_vm1, %v14887_v62  ;;  %v1611_v31 = vmul.f32 %v8997_v34, %v9073_v53 }
 0x1b9   : > { %6902 = vmatmul.msk.f32.gmra.mxu3 %vm891_vm1, %v14888_v63  ;;  %v1002_v5 = vpop.f32.mrf.mxu2 }
 0x1bc   : > { %v1443_v11 = vpop.f32.mrf.mxu3 }
 0x1bd   : > { %v9081_v3 = vpop.f32.mrf.mxu1  ;;  %v9096_v61 = vadd.f32 %v8929_v17, %v1443_v11  ;;  %v8158_v11 = vld [vmem:[%s8438_s16 + $0x170] sm:$0xff] }
 0x1be   : > { %14889 = vst [vmem:[#allocation13_spill] sm:$0xff] %v9081_v3  ;;  %v1612_v19 = vmul.f32 %v8997_v34, %v9081_v3  ;;  %6867 = vmatmul.msk.f32.gmra.mxu2 %vm891_vm1, %v14890_v33 }
 0x1c0   : > { %v9089_v28 = vpack.c.bf16 %v1612_v19, %v1611_v31 }
 0x1c1   : > { %6903 = vmatmul.msk.f32.gmra.mxu3 %vm891_vm1, %v8152_v30  ;;  %v1005_v57 = vpop.f32.mrf.mxu2  ;;  %v1615_v30 = vmul.f32 %v8997_v34, %v9017_v26 }
 0x1c2   : > { %14891 = vst [vmem:[#allocation18_spill] sm:$0xff] %v9089_v28  ;;  %6970 = vmatmul.msk.bf16.gmra.mxu1 %vm891_vm1, %v9089_v28  ;;  %v1720_v2 = vpack.c.bf16 %v1005_v57, %v1002_v5  ;;  %v8157_v5 = vld [vmem:[%s8438_s16 + $0x50] sm:$0xff] }
 0x1c4   : > { %v1446_v4 = vpop.f32.mrf.mxu3  ;;  %1839 = vmatpush.bf16.msra.mxu0 %v1720_v2  ;;  %7175 = vmatpush.bf16.msrb.mxu2 %v1720_v2  ;;  %v8159_v2 = vld [vmem:[%s8438_s16 + $0x58] sm:$0xff] }
 0x1c5   : > { %v9099_v20 = vadd.f32 %v8929_v17, %v1446_v4  ;;  %v9101_v37 = vpop.f32.mrf.mxu1 }
 0x1c6   : > { %14892 = vst [vmem:[#allocation12_spill] sm:$0xff] %v9101_v37  ;;  %6868 = vmatmul.msk.f32.gmra.mxu2 %vm891_vm1, %v8153_v32  ;;  %v1613_v21 = vmul.f32 %v8997_v34, %v9101_v37 }
 0x1c8   : > { %1840 = vmatpush.bf16.msra.mxu0 %v1715_v40  ;;  %7176 = vmatpush.bf16.msrb.mxu2 %v1715_v40  ;;  %v8160_v40 = vld [vmem:[%s8438_s16 + $0x178] sm:$0xff] }
 0x1c9   : > { %6904 = vmatmul.msk.f32.gmra.mxu3 %vm891_vm1, %v8154_v43  ;;  %v9109_v18 = vpop.f32.mrf.mxu2 }
 0x1cb   : > { %6932 = vmatmul.msk.bf16.vlgmr.msra.gmra.mxu0 %vm891_vm1, %v9011_v50 }
 0x1cc   : > { %7177 = vmatpush.bf16.msra.mxu2 %v8878_v27  ;;  %v1449_v51 = vpop.f32.mrf.mxu3 }
 0x1cd   : > { %v9114_v14 = vpop.f32.mrf.mxu1  ;;  %v9130_v9 = vadd.f32 %v8929_v17, %v1449_v51 }
 0x1ce   : > { %14893 = vst [vmem:[#allocation16_spill] sm:$0xff] %v9114_v14  ;;  %v1614_v45 = vmul.f32 %v8997_v34, %v9114_v14  ;;  %6869 = vmatmul.msk.f32.gmra.mxu2 %vm891_vm1, %v8155_v10  ;;  %v14896_v10 = vld [vmem:[#allocation30_spill] sm:$0xff] }
 0x1d0   : > { %7178 = vmatpush.bf16.msra.mxu2 %v8880_v47  ;;  %v9123_v27 = vpack.c.bf16 %v1614_v45, %v1613_v21  ;;  %v1584_v47 = vrot.slane %v8992_v55, 1  ;;  %v8161_v45 = vld [vmem:[%s8438_s16 + $0x60] sm:$0xff] }
 0x1d1   : > { %6905 = vmatmul.msk.f32.gmra.mxu3 %vm891_vm1, %v8156_v49  ;;  %v1057_v60 = vpop.f32.mrf.mxu2 }
 0x1d2   : > { %14894 = vst [vmem:[#allocation11_spill] sm:$0xff] %v9123_v27  ;;  %6971 = vmatmul.msk.bf16.gmra.mxu1 %vm891_vm1, %v9123_v27  ;;  %v9142_v19 = vperm.slane %v1584_v47, 0 }
 0x1d4   : > { %v1452_v42 = vpop.f32.mrf.mxu3  ;;  %v1616_v57 = vmul.f32 %v9142_v19, %v8983_v38  ;;  %v1618_v47 = vmul.f32 %v9142_v19, %v9037_v22 }
 0x1d5   : > { %v9133_v62 = vadd.f32 %v8929_v17, %v1452_v42 }
 0x1d6   : > { %6870 = vmatmul.msk.f32.gmra.mxu2 %vm891_vm1, %v8157_v5  ;;  %v9152_v4 = vpack.c.bf16 %v1616_v57, %v1615_v30  ;;  %v1589_v5 = vrot.slane %v8992_v55, 6 }
 0x1d8   : > { %14895 = vst [vmem:[#allocation14_spill] sm:$0xff] %v9152_v4  ;;  %v9181_v57 = vperm.slane %v1589_v5, 0 }
 0x1d9   : > { %6906 = vmatmul.msk.f32.gmra.mxu3 %vm891_vm1, %v8158_v11  ;;  %v1060_v31 = vpop.f32.mrf.mxu2  ;;  %v1617_v11 = vmul.f32 %v9142_v19, %v8999_v25 }
 0x1da   : > { %14898 = vst [vmem:[#allocation31_spill] sm:$0xff] %v9181_v57 }
 0x1db   : > { %6933 = vmatmul.msk.bf16.gmra.mxu0 %vm891_vm1, %v9061_v44  ;;  %v9179_v30 = vpack.c.bf16 %v1618_v47, %v1617_v11  ;;  %v1665_v47 = vmul.f32 %v9181_v57, %v9073_v53 }
 0x1dc   : > { %v1455_v33 = vpop.f32.mrf.mxu3 }
 0x1dd   : > { %v9159_v43 = vadd.f32 %v8929_v17, %v1455_v33  ;;  %v8162_v33 = vld [vmem:[%s8438_s16 + $0x68] sm:$0xff]  ;;  %14897 = vst [vmem:[#allocation30_spill] sm:$0xff] %v9179_v30 }
 0x1de   : > { %6871 = vmatmul.msk.f32.gmra.mxu2 %vm891_vm1, %v8159_v2  ;;  %v14899_v2 = vld [vmem:[#allocation28_spill] sm:$0xff] }
 0x1e1   : > { %6907 = vmatmul.msk.f32.gmra.mxu3 %vm891_vm1, %v8160_v40  ;;  %v1063_v32 = vpop.f32.mrf.mxu2 }
 0x1e2   : > { %6972 = vmatmul.msk.bf16.gmra.mxu1 %vm891_vm1, %v9152_v4  ;;  %v1722_v11 = vpack.c.bf16 %v1063_v32, %v1060_v31  ;;  %v1620_v32 = vmul.f32 %v9142_v19, %v9073_v53 }
 0x1e4   : > { %v1458_v34 = vpop.f32.mrf.mxu3 }
 0x1e5   : > { %v9162_v51 = vadd.f32 %v8929_v17, %v1458_v34  ;;  %v1666_v34 = vmul.f32 %v9181_v57, %v9081_v3 }
 0x1e6   : > { %6872 = vmatmul.msk.f32.gmra.mxu2 %vm891_vm1, %v8161_v45 }
 0x1e9   : > { %6908 = vmatmul.msk.f32.gmra.mxu3 %vm891_vm1, %v14896_v10  ;;  %v1112_v49 = vpop.f32.mrf.mxu2 }
 0x1eb   : > { %6934 = vmatmul.msk.bf16.gmra.mxu0 %vm891_vm1, %v9089_v28 }
 0x1ec   : > { %v1461_v42 = vpop.f32.mrf.mxu3 }
 0x1ed   : > { %v9190_v45 = vadd.f32 %v8929_v17, %v1461_v42  ;;  %v1717_v42 = vpack.c.bf16 %v1057_v60, %v9109_v18  ;;  %v8164_v18 = vld [vmem:[%s8438_s16 + $0x198] sm:$0xff] }
 0x1ee   : > { %6873 = vmatmul.msk.f32.gmra.mxu2 %vm891_vm1, %v8162_v33  ;;  %v9197_v33 = vpack.c.bf16 %v1666_v34, %v1665_v47  ;;  %v1619_v34 = vmul.f32 %v9142_v19, %v9053_v23 }
 0x1f0   : > { %14900 = vst [vmem:[#allocation28_spill] sm:$0xff] %v9197_v33 }
 0x1f1   : > { %6909 = vmatmul.msk.f32.gmra.mxu3 %vm891_vm1, %v14899_v2  ;;  %v1115_v40 = vpop.f32.mrf.mxu2 }
 0x1f2   : > { %6973 = vmatmul.msk.bf16.gmra.mxu1 %vm891_vm1, %v9179_v30 }
 0x1f4   : > { %v1464_v10 = vpop.f32.mrf.mxu3 }
 0x1f5   : > { %v9195_v5 = vadd.f32 %v8929_v17, %v1464_v10  ;;  %v9212_v10 = vpack.c.bf16 %v1620_v32, %v1619_v34  ;;  %v1667_v32 = vmul.f32 %v9181_v57, %v9101_v37  ;;  %v1719_v34 = vpack.c.bf16 %v1115_v40, %v1112_v49 }
 0x1f6   : > { %6961 = vmatmul.msk.bf16.vlgmr.msrb.gmra.mxu2 %vm891_vm1, %v9197_v33  ;;  %v1622_v49 = vmul.f32 %v9142_v19, %v9101_v37  ;;  %v1590_v40 = vrot.slane %v8992_v55, 7  ;;  %v1669_v55 = vmul.f32 %v9181_v57, %v9017_v26 }
 0x1f7   : > { %2217 = vmatpush.bf16.msrb.mxu2 %v1722_v11  ;;  %14901 = vst [vmem:[#allocation32_spill] sm:$0xff] %v9212_v10 }
 0x1f9   : > { %6910 = vmatmul.msk.f32.gmra.mxu3 %vm891_vm1, %v8163_v6  ;;  %v1118_v12 = vpop.f32.mrf.mxu2  ;;  %v1668_v6 = vmul.f32 %v9181_v57, %v9114_v14 }
 0x1fb   : > { %6935 = vmatmul.msk.bf16.gmra.mxu0 %vm891_vm1, %v9123_v27  ;;  %2218 = vmatpush.bf16.msrb.mxu2 %v1717_v42  ;;  %v8171_v27 = vld [vmem:[%s8438_s16 + $0x1d0] sm:$0xff] }
 0x1fc   : > { %v1467_v31 = vpop.f32.mrf.mxu3 }
 0x1fd   : > { %v9221_v47 = vadd.f32 %v8929_v17, %v1467_v31  ;;  %v8165_v31 = vld [vmem:[%s8438_s16 + $0x1a0] sm:$0xff] }
 0x201   : > { %6911 = vmatmul.msk.f32.gmra.mxu3 %vm891_vm1, %v8164_v18  ;;  %v1121_v60 = vpop.f32.mrf.mxu2  ;;  %v9228_v18 = vpack.c.bf16 %v1668_v6, %v1667_v32  ;;  %v1621_v6 = vmul.f32 %v9142_v19, %v9081_v3 }
 0x202   : > { %6974 = vmatmul.msk.bf16.gmra.mxu1 %vm891_vm1, %v9212_v10  ;;  %v1724_v11 = vpack.c.bf16 %v1121_v60, %v1118_v12 }
 0x203   : > { %14902 = vst [vmem:[#allocation33_spill] sm:$0xff] %v9228_v18 }
 0x204   : > { %v1470_v42 = vpop.f32.mrf.mxu3  ;;  %2595 = vmatpush.bf16.msrb.mxu0 %v1724_v11  ;;  %v9243_v11 = vpack.c.bf16 %v1622_v49, %v1621_v6 }
 0x205   : > { %v9226_v2 = vadd.f32 %v8929_v17, %v1470_v42  ;;  %v9245_v42 = vperm.slane %v1590_v40, 0 }
 0x206   : > { %6962 = vmatmul.msk.bf16.gmra.mxu2 %vm891_vm1, %v9228_v18  ;;  %14903 = vst [vmem:[#allocation34_spill] sm:$0xff] %v9243_v11 }
 0x207   : > { %v1672_v21 = vmul.f32 %v9245_v42, %v9037_v22  ;;  %v1675_v44 = vmul.f32 %v9245_v42, %v9081_v3 }
 0x208   : > { %2596 = vmatpush.bf16.msrb.mxu0 %v1719_v34  ;;  %v8166_v34 = vld [vmem:[%s8438_s16 + $0x1a8] sm:$0xff] }
 0x209   : > { %6912 = vmatmul.msk.f32.gmra.mxu3 %vm891_vm1, %v8165_v31  ;;  %v1365_v12 = vpop.f32.mrf.mxu2 }
 0x20a   : > { %v9248_v32 = vadd.f32 %v8929_v17, %v1365_v12  ;;  %v1670_v12 = vmul.f32 %v9245_v42, %v8983_v38 }
 0x20b   : > { %6936 = vmatmul.msk.bf16.gmra.mxu0 %vm891_vm1, %v9152_v4 }
 0x20c   : > { %v1473_v60 = vpop.f32.mrf.mxu3  ;;  %14904 = vst [vmem:[#allocation35_spill] sm:$0xff] %v9248_v32  ;;  %v9269_v39 = vpack.c.bf16 %v1670_v12, %v1669_v55  ;;  %v1624_v55 = vmul.f32 %v9142_v19, %v9017_v26 }
 0x20d   : > { %v9257_v13 = vadd.f32 %v8929_v17, %v1473_v60 }
 0x20e   : > { %14906 = vst [vmem:[#allocation37_spill] sm:$0xff] %v9269_v39 }
 0x211   : > { %6913 = vmatmul.msk.f32.gmra.mxu3 %vm891_vm1, %v8166_v34  ;;  %v1368_v31 = vpop.f32.mrf.mxu2 }
 0x212   : > { %6975 = vmatmul.msk.bf16.gmra.mxu1 %vm891_vm1, %v9243_v11  ;;  %v9260_v49 = vadd.f32 %v8929_v17, %v1368_v31  ;;  %v8167_v31 = vld [vmem:[%s8438_s16 + $0x1b0] sm:$0xff] }
 0x214   : > { %14905 = vst [vmem:[#allocation36_spill] sm:$0xff] %v9260_v49  ;;  %v1476_v40 = vpop.f32.mrf.mxu3 }
 0x215   : > { %v9267_v34 = vadd.f32 %v8929_v17, %v1476_v40  ;;  %v1623_v40 = vmul.f32 %v9142_v19, %v9114_v14 }
 0x216   : > { %6963 = vmatmul.msk.bf16.gmra.mxu2 %vm891_vm1, %v9269_v39 }
 0x217   : > { %v9285_v6 = vpack.c.bf16 %v1624_v55, %v1623_v40 }
 0x219   : > { %6914 = vmatmul.msk.f32.gmra.mxu3 %vm891_vm1, %v8167_v31  ;;  %v1371_v15 = vpop.f32.mrf.mxu2  ;;  %14908 = vst [vmem:[#allocation39_spill] sm:$0xff] %v9285_v6  ;;  %v8168_v31 = vld [vmem:[%s8438_s16 + $0x1b8] sm:$0xff] }
 0x21a   : > { %v9288_v60 = vadd.f32 %v8929_v17, %v1371_v15  ;;  %v1671_v15 = vmul.f32 %v9245_v42, %v8999_v25 }
 0x21b   : > { %6937 = vmatmul.msk.bf16.gmra.mxu0 %vm891_vm1, %v9179_v30 }
 0x21c   : > { %v1479_v41 = vpop.f32.mrf.mxu3  ;;  %v9309_v57 = vpack.c.bf16 %v1672_v21, %v1671_v15  ;;  %v1626_v21 = vmul.f32 %v9021_v35, %v8999_v25 }
 0x21d   : > { %v9297_v19 = vadd.f32 %v8929_v17, %v1479_v41 }
 0x21e   : > { %v9283_v12 = vpop.f32.mrf.mxu1  ;;  %14909 = vst [vmem:[#allocation40_spill] sm:$0xff] %v9309_v57 }
 0x21f   : > { %14907 = vst [vmem:[#allocation38_spill] sm:$0xff] %v9283_v12 }
 0x221   : > { %6915 = vmatmul.msk.f32.gmra.mxu3 %vm891_vm1, %v8168_v31  ;;  %v1374_v63 = vpop.f32.mrf.mxu2 }
 0x222   : > { %6976 = vmatmul.msk.bf16.gmra.mxu1 %vm891_vm1, %v9285_v6  ;;  %v9300_v40 = vadd.f32 %v8929_v17, %v1374_v63  ;;  %v8169_v63 = vld [vmem:[%s8438_s16 + $0x1c0] sm:$0xff] }
 0x224   : > { %v1482_v55 = vpop.f32.mrf.mxu3 }
 0x225   : > { %v9307_v12 = vadd.f32 %v8929_v17, %v1482_v55  ;;  %v1625_v55 = vmul.f32 %v9021_v35, %v8983_v38  ;;  %v8172_v38 = vld [vmem:[%s8438_s16 + $0x1d8] sm:$0xff] }
 0x226   : > { %v9313_v0 = vpop.f32.mrf.mxu1  ;;  %6964 = vmatmul.msk.bf16.gmra.mxu2 %vm891_vm1, %v9309_v57 }
 0x227   : > { %14910 = vst [vmem:[#allocation41_spill] sm:$0xff] %v9313_v0  ;;  %v9329_v31 = vpack.c.bf16 %v1626_v21, %v1625_v55 }
 0x229   : > { %6916 = vmatmul.msk.f32.gmra.mxu3 %vm891_vm1, %v8169_v63  ;;  %v1377_v16 = vpop.f32.mrf.mxu2  ;;  %14912 = vst [vmem:[#allocation43_spill] sm:$0xff] %v9329_v31  ;;  %v8170_v63 = vld [vmem:[%s8438_s16 + $0x1c8] sm:$0xff] }
 0x22a   : > { %v9332_v41 = vadd.f32 %v8929_v17, %v1377_v16  ;;  %v1673_v16 = vmul.f32 %v9245_v42, %v9053_v23 }
 0x22b   : > { %6938 = vmatmul.msk.bf16.gmra.mxu0 %vm891_vm1, %v9212_v10  ;;  %v1674_v10 = vmul.f32 %v9245_v42, %v9073_v53 }
 0x22c   : > { %v9319_v30 = vpop.f32.mrf.mxu3 }
 0x22d   : > { %v9349_v55 = vpack.c.bf16 %v1674_v10, %v1673_v16  ;;  %v1628_v10 = vmul.f32 %v9021_v35, %v9053_v23  ;;  %v1627_v16 = vmul.f32 %v9021_v35, %v9037_v22 }
 0x22e   : > { %v9327_v15 = vpop.f32.mrf.mxu1 }
 0x22f   : > { %14911 = vst [vmem:[#allocation42_spill] sm:$0xff] %v9327_v15 }
 0x230   : > { %14913 = vst [vmem:[#allocation44_spill] sm:$0xff] %v9349_v55 }
 0x231   : > { %6917 = vmatmul.msk.f32.gmra.mxu3 %vm891_vm1, %v8170_v63  ;;  %v1380_v0 = vpop.f32.mrf.mxu2 }
 0x232   : > { %6977 = vmatmul.msk.bf16.gmra.mxu1 %vm891_vm1, %v9329_v31  ;;  %v9341_v4 = vadd.f32 %v8929_v17, %v1380_v0 }
 0x234   : > { %v9343_v15 = vpop.f32.mrf.mxu3 }
 0x236   : > { %v9351_v63 = vpop.f32.mrf.mxu1  ;;  %6965 = vmatmul.msk.bf16.gmra.mxu2 %vm891_vm1, %v9349_v55 }
 0x237   : > { %14914 = vst [vmem:[#allocation45_spill] sm:$0xff] %v9351_v63  ;;  %v9369_v63 = vpack.c.bf16 %v1628_v10, %v1627_v16  ;;  %v8173_v10 = vld [vmem:[%s8438_s16 + $0x1e0] sm:$0xff] }
 0x239   : > { %6918 = vmatmul.msk.f32.gmra.mxu3 %vm891_vm1, %v8171_v27  ;;  %v9357_v0 = vpop.f32.mrf.mxu2 }
 0x23b   : > { %6939 = vmatmul.msk.bf16.gmra.mxu0 %vm891_vm1, %v9243_v11  ;;  %v1676_v11 = vmul.f32 %v9245_v42, %v9101_v37 }
 0x23c   : > { %v9359_v28 = vpop.f32.mrf.mxu3 }
 0x23d   : > { %v9381_v50 = vpack.c.bf16 %v1676_v11, %v1675_v44  ;;  %v1630_v44 = vmul.f32 %v9021_v35, %v9081_v3  ;;  %v1629_v11 = vmul.f32 %v9021_v35, %v9073_v53 }
 0x23f   : > { %v9367_v21 = vpop.f32.mrf.mxu1  ;;  %14916 = vst [vmem:[#allocation47_spill] sm:$0xff] %v9381_v50 }
 0x240   : > { %14915 = vst [vmem:[#allocation46_spill] sm:$0xff] %v9367_v21 }
 0x241   : > { %6919 = vmatmul.msk.f32.gmra.mxu3 %vm891_vm1, %v8172_v38  ;;  %v9373_v27 = vpop.f32.mrf.mxu2 }
 0x242   : > { %6978 = vmatmul.msk.bf16.gmra.mxu1 %vm891_vm1, %v9369_v63 }
 0x244   : > { %v1494_v24 = vpop.f32.mrf.mxu3 }
 0x246   : > { %6966 = vmatmul.msk.bf16.gmra.mxu2 %vm891_vm1, %v9381_v50  ;;  %v9399_v50 = vpack.c.bf16 %v1630_v44, %v1629_v11  ;;  %v1678_v44 = vmul.f32 %v9245_v42, %v9017_v26 }
 0x247   : > { %v9389_v16 = vpop.f32.mrf.mxu1 }
 0x248   : > { %v9387_v38 = vpop.f32.mrf.mxu0  ;;  %14918 = vst [vmem:[#allocation49_spill] sm:$0xff] %v9389_v16  ;;  %v1677_v16 = vmul.f32 %v9245_v42, %v9114_v14  ;;  %v1631_v42 = vmul.f32 %v9021_v35, %v9101_v37 }
 0x249   : > { %6920 = vmatmul.msk.f32.gmra.mxu3 %vm891_vm1, %v8173_v10  ;;  %14917 = vst [vmem:[#allocation48_spill] sm:$0xff] %v9387_v38  ;;  %v9391_v21 = vpop.f32.mrf.mxu2  ;;  %v8174_v10 = vld [vmem:[%s8438_s16 + $0x1e8] sm:$0xff] }
 0x24a   : > { %v9415_v11 = vpack.c.bf16 %v1678_v44, %v1677_v16  ;;  %v8176_v44 = vld [vmem:[%s8438_s16 + $0x1f8] sm:$0xff] }
 0x24b   : > { %6940 = vmatmul.msk.bf16.gmra.mxu0 %vm891_vm1, %v9285_v6 }
 0x24c   : > { %v1497_v55 = vpop.f32.mrf.mxu3  ;;  %14921 = vst [vmem:[#allocation52_spill] sm:$0xff] %v9415_v11 }
 0x24d   : > { %v1498_v26 = vadd.f32 %v8929_v17, %v1497_v55  ;;  %v1492_v55 = vadd.f32 %v8929_v17, %v9359_v28 }
 0x24f   : > { %v9411_v3 = vpop.f32.mrf.mxu1 }
 0x250   : > { %v9403_v38 = vpop.f32.mrf.mxu0  ;;  %14920 = vst [vmem:[#allocation51_spill] sm:$0xff] %v9411_v3  ;;  %v1632_v3 = vmul.f32 %v9021_v35, %v9114_v14 }
 0x251   : > { %6921 = vmatmul.msk.f32.gmra.mxu3 %vm891_vm1, %v8174_v10  ;;  %14919 = vst [vmem:[#allocation50_spill] sm:$0xff] %v9403_v38  ;;  %v9409_v6 = vpop.f32.mrf.mxu2  ;;  %v8175_v10 = vld [vmem:[%s8438_s16 + $0x1f0] sm:$0xff] }
 0x252   : > { %6979 = vmatmul.msk.bf16.gmra.mxu1 %vm891_vm1, %v9399_v50  ;;  %v9431_v16 = vpack.c.bf16 %v1632_v3, %v1631_v42 }
 0x254   : > { %v1500_v57 = vpop.f32.mrf.mxu3 }
 0x255   : > { %v1501_v35 = vadd.f32 %v8929_v17, %v1500_v57 }
 0x256   : > { %6967 = vmatmul.msk.bf16.gmra.mxu2 %vm891_vm1, %v9415_v11 }
 0x257   : > { %v9427_v23 = vpop.f32.mrf.mxu1  ;;  %v4564_v57 = vpack.c.bf16 %v1501_v35, %v1498_v26  ;;  %v14928_v35 = vpack.c.bf16 %v9099_v20, %v9096_v61 }
 0x258   : > { %v9421_v38 = vpop.f32.mrf.mxu0  ;;  %14923 = vst [vmem:[#allocation54_spill] sm:$0xff] %v9427_v23 }
 0x259   : > { %6922 = vmatmul.msk.f32.gmra.mxu3 %vm891_vm1, %v8175_v10  ;;  %14922 = vst [vmem:[#allocation53_spill] sm:$0xff] %v9421_v38  ;;  %v1395_v32 = vpop.f32.mrf.mxu2 }
 0x25b   : > { %6941 = vmatmul.msk.bf16.gmra.mxu0 %vm891_vm1, %v9329_v31 }
 0x25c   : > { %v1503_v49 = vpop.f32.mrf.mxu3 }
 0x25d   : > { %v1504_v38 = vadd.f32 %v8929_v17, %v1503_v49  ;;  %v14926_v49 = vpack.c.bf16 %v9162_v51, %v9159_v43  ;;  %v1486_v43 = vadd.f32 %v8929_v17, %v9319_v30  ;;  %v1489_v51 = vadd.f32 %v8929_v17, %v9343_v15 }
 0x25f   : > { %v9443_v42 = vpop.f32.mrf.mxu1 }
 0x260   : > { %v9435_v10 = vpop.f32.mrf.mxu0  ;;  %14925 = vst [vmem:[#allocation56_spill] sm:$0xff] %v9443_v42 }
 0x261   : > { %6923 = vmatmul.msk.f32.gmra.mxu3 %vm891_vm1, %v8176_v44  ;;  %14924 = vst [vmem:[#allocation55_spill] sm:$0xff] %v9435_v10  ;;  %v1398_v31 = vpop.f32.mrf.mxu2  ;;  %v8177_v44 = vld [vmem:[%s8438_s16 + $0x200] sm:$0xff] }
 0x262   : > { %6980 = vmatmul.msk.bf16.gmra.mxu1 %vm891_vm1, %v9431_v16 }
 0x264   : > { %v1506_v11 = vpop.f32.mrf.mxu3 }
 0x265   : > { %v1507_v23 = vadd.f32 %v8929_v17, %v1506_v11 }
 0x266   : > { %6997 = vmatmul.msk.bf16.vlgmr.msra.gmra.mxu2 %vm891_vm1, %v9197_v33 }
 0x267   : > { %v4565_v3 = vpack.c.bf16 %v1507_v23, %v1504_v38  ;;  %4875 = vmatpush.bf16.msra.mxu2 %v14926_v49  ;;  %v1495_v23 = vadd.f32 %v8929_v17, %v1494_v24  ;;  %v8178_v24 = vld [vmem:[%s8438_s16 + $0x208] sm:$0xff]  ;;  %v1396_v49 = vadd.f32 %v8929_v17, %v1395_v32  ;;  %v1390_v32 = vadd.f32 %v8929_v17, %v9391_v21 }
 0x268   : > { %v9449_v10 = vpop.f32.mrf.mxu0  ;;  %v14932_v21 = vpack.c.bf16 %v9307_v12, %v9297_v19  ;;  %v1635_v12 = vmul.f32 %v9015_v29, %v8999_v25  ;;  %v14936_v19 = vpack.c.bf16 %v9267_v34, %v9257_v13 }
 0x269   : > { %6924 = vmatmul.msk.f32.gmra.mxu3 %vm891_vm1, %v8177_v44  ;;  %v1401_v38 = vpop.f32.mrf.mxu2  ;;  %v14927_v44 = vpack.c.bf16 %v9133_v62, %v9130_v9  ;;  %v4563_v28 = vpack.c.bf16 %v1495_v23, %v1492_v55  ;;  %v9473_v9 = vpop.f32.mrf.mxu1  ;;  %v1399_v55 = vadd.f32 %v8929_v17, %v1398_v31  ;;  %v1393_v31 = vadd.f32 %v8929_v17, %v9409_v6 }
 0x26a   : > { %5064 = vmatpush.bf16.msrb.mxu3 %v4565_v3  ;;  %v4562_v3 = vpack.c.bf16 %v1489_v51, %v1486_v43  ;;  %14929 = vst [vmem:[#allocation57_spill] sm:$0xff] %v9473_v9  ;;  %v1402_v62 = vadd.f32 %v8929_v17, %v1401_v38  ;;  %v8179_v43 = vld [vmem:[%s8438_s16 + $0x210] sm:$0xff]  ;;  %v1636_v51 = vmul.f32 %v9015_v29, %v9037_v22 }
 0x26b   : > { %6942 = vmatmul.msk.bf16.gmra.mxu0 %vm891_vm1, %v9369_v63  ;;  %4876 = vmatpush.bf16.msra.mxu2 %v14927_v44  ;;  %v4547_v44 = vpack.c.bf16 %v1399_v55, %v1396_v49 }
 0x26c   : > { %v1509_v11 = vpop.f32.mrf.mxu3 }
 0x26d   : > { %v9479_v30 = vadd.f32 %v8929_v17, %v1509_v11 }
 0x26e   : > { %5065 = vmatpush.bf16.msrb.mxu3 %v4564_v57  ;;  %v14930_v57 = vpack.c.bf16 %v9071_v56, %v9068_v52  ;;  %v14931_v56 = vpack.c.bf16 %v9035_v58, %v9028_v46  ;;  %v14935_v58 = vpack.c.bf16 %v8981_v8, %v8978_v1  ;;  %v14938_v1 = vpack.c.bf16 %v8965_v48, %v8962_v59 }
 0x26f   : > { %4877 = vmatpush.bf16.msra.mxu2 %v14928_v35  ;;  %v4546_v35 = vpack.c.bf16 %v1393_v31, %v1390_v32  ;;  %v14939_v8 = vpack.c.bf16 %v9226_v2, %v9221_v47  ;;  %v14941_v59 = vpack.c.bf16 %v8949_v54, %v8946_v7  ;;  %v14943_v2 = vpack.c.bf16 %v9195_v5, %v9190_v45  ;;  %v14950_v31 = vld [vmem:[#allocation36_spill] sm:$0xff] }
 0x270   : > { %v9468_v26 = vpop.f32.mrf.mxu0  ;;  %v1638_v5 = vmul.f32 %v9015_v29, %v9073_v53 }
 0x271   : > { %6925 = vmatmul.msk.f32.gmra.mxu3 %vm891_vm1, %v8178_v24  ;;  %v1404_v15 = vpop.f32.mrf.mxu2  ;;  %v1387_v24 = vadd.f32 %v8929_v17, %v9373_v27  ;;  %v9528_v27 = vpack.c.bf16 %v1636_v51, %v1635_v12 }
 0x272   : > { %6981 = vmatmul.msk.bf16.gmra.mxu1 %vm891_vm1, %v9047_v36  ;;  %5066 = vmatpush.bf16.msrb.mxu3 %v4563_v28  ;;  %v1405_v61 = vadd.f32 %v8929_v17, %v1404_v15  ;;  %v1384_v28 = vadd.f32 %v8929_v17, %v9357_v0 }
 0x273   : > { %4878 = vmatpush.bf16.msra.mxu2 %v14930_v57  ;;  %14937 = vst [vmem:[#allocation60_spill] sm:$0xff] %v9528_v27  ;;  %v14946_v57 = vpack.c.bf16 %v9300_v40, %v9288_v60 }
 0x274   : > { %v1512_v20 = vpop.f32.mrf.mxu3  ;;  %v4548_v38 = vpack.c.bf16 %v1405_v61, %v1402_v62  ;;  %v4545_v0 = vpack.c.bf16 %v1387_v24, %v1384_v28  ;;  %v8180_v62 = vld [vmem:[%s8438_s16 + $0x218] sm:$0xff]  ;;  %v14944_v61 = vpack.c.bf16 %v9341_v4, %v9332_v41  ;;  %v14947_v4 = vld [vmem:[#allocation22_spill] sm:$0xff] }
 0x275   : > { %v9485_v23 = vadd.f32 %v8929_v17, %v1512_v20  ;;  %v8181_v20 = vld [vmem:[%s8438_s16 + $0x220] sm:$0xff]  ;;  %v1637_v41 = vmul.f32 %v9015_v29, %v14947_v4 }
 0x276   : > { %5067 = vmatpush.bf16.msrb.mxu3 %v4562_v3  ;;  %6998 = vmatmul.msk.bf16.gmra.mxu2 %vm891_vm1, %v9228_v18  ;;  %v9516_v3 = vpop.f32.mrf.mxu1  ;;  %v14992_v18 = vld [vmem:[#allocation11_spill] sm:$0xff] }
 0x277   : > { %4687 = vmatpush.bf16.msrb.mxu1 %v4548_v38  ;;  %4879 = vmatpush.bf16.msra.mxu2 %v14931_v56  ;;  %14934 = vst [vmem:[#allocation59_spill] sm:$0xff] %v9516_v3  ;;  %v9582_v32 = vpack.c.bf16 %v1638_v5, %v1637_v41  ;;  %v8182_v56 = vld [vmem:[%s8438_s16 + $0x228] sm:$0xff]  ;;  %v14972_v41 = vld [vmem:[#allocation47_spill] sm:$0xff] }
 0x278   : > { %v9500_v52 = vpop.f32.mrf.mxu0 }
 0x279   : > { %6926 = vmatmul.msk.f32.gmra.mxu3 %vm891_vm1, %v8179_v43  ;;  %v9508_v6 = vpop.f32.mrf.mxu2  ;;  %14949 = vst [vmem:[#allocation65_spill] sm:$0xff] %v9582_v32 }
 0x27a   : > { %5068 = vmatpush.bf16.msrb.mxu3 %v14932_v21  ;;  %14933 = vst [vmem:[#allocation58_spill] sm:$0xff] %v9508_v6 }
 0x27b   : > { %6943 = vmatmul.msk.bf16.gmra.mxu0 %vm891_vm1, %v9399_v50  ;;  %4688 = vmatpush.bf16.msrb.mxu1 %v4547_v44  ;;  %v14951_v44 = vld [vmem:[#allocation35_spill] sm:$0xff] }
 0x27c   : > { %v1515_v46 = vpop.f32.mrf.mxu3  ;;  %4880 = vmatpush.bf16.msra.mxu2 %v14935_v58  ;;  %v14952_v43 = vpack.c.bf16 %v14950_v31, %v14951_v44  ;;  %v14962_v31 = vld [vmem:[#allocation44_spill] sm:$0xff] }
 0x27d   : > { %v9543_v13 = vadd.f32 %v8929_v17, %v1515_v46  ;;  %v8183_v46 = vld [vmem:[%s8438_s16 + $0x230] sm:$0xff] }
 0x27e   : > { %5069 = vmatpush.bf16.msrb.mxu3 %v14936_v19  ;;  %v9553_v48 = vpop.f32.mrf.mxu1 }
 0x27f   : > { %4689 = vmatpush.bf16.msrb.mxu1 %v4546_v35  ;;  %14942 = vst [vmem:[#allocation62_spill] sm:$0xff] %v9553_v48  ;;  %v14954_v35 = vld [vmem:[#allocation40_spill] sm:$0xff] }
 0x280   : > { %v9532_v15 = vpop.f32.mrf.mxu0  ;;  %4881 = vmatpush.bf16.msra.mxu2 %v14938_v1  ;;  %v14957_v1 = vld [vmem:[#allocation13_spill] sm:$0xff] }
 0x281   : > { %6927 = vmatmul.msk.f32.gmra.mxu3 %vm891_vm1, %v8180_v62  ;;  %v9545_v34 = vpop.f32.mrf.mxu2  ;;  %v1640_v62 = vmul.f32 %v9015_v29, %v9101_v37 }
 0x282   : > { %6982 = vmatmul.msk.bf16.gmra.mxu1 %vm891_vm1, %v9528_v27  ;;  %5070 = vmatpush.bf16.msrb.mxu3 %v14939_v8  ;;  %14940 = vst [vmem:[#allocation61_spill] sm:$0xff] %v9545_v34  ;;  %v1639_v8 = vmul.f32 %v9015_v29, %v14957_v1 }
 0x283   : > { %4690 = vmatpush.bf16.msrb.mxu1 %v4545_v0 }
 0x284   : > { %v1518_v49 = vpop.f32.mrf.mxu3  ;;  %4882 = vmatpush.bf16.msra.mxu2 %v14941_v59  ;;  %v8184_v59 = vld [vmem:[%s8438_s16 + $0x238] sm:$0xff] }
 0x285   : > { %v9548_v55 = vadd.f32 %v8929_v17, %v1518_v49  ;;  %v9619_v49 = vpack.c.bf16 %v1640_v62, %v1639_v8  ;;  %v14967_v62 = vld [vmem:[#allocation29_spill] sm:$0xff] }
 0x286   : > { %5071 = vmatpush.bf16.msrb.mxu3 %v14943_v2  ;;  %6999 = vmatmul.msk.bf16.gmra.mxu2 %vm891_vm1, %v9269_v39  ;;  %v9580_v38 = vpop.f32.mrf.mxu1  ;;  %v1642_v8 = vmul.f32 %v9015_v29, %v14967_v62  ;;  %v14984_v39 = vld [vmem:[#allocation18_spill] sm:$0xff] }
 0x287   : > { %4691 = vmatpush.bf16.msrb.mxu1 %v14944_v61  ;;  %14948 = vst [vmem:[#allocation64_spill] sm:$0xff] %v9580_v38 }
 0x288   : > { %v9567_v7 = vpop.f32.mrf.mxu0  ;;  %14958 = vst [vmem:[#allocation67_spill] sm:$0xff] %v9619_v49 }
 0x289   : > { %6928 = vmatmul.msk.f32.gmra.mxu3 %vm891_vm1, %v8181_v20  ;;  %v9569_v54 = vpop.f32.mrf.mxu2 }
 0x28a   : > { %14945 = vst [vmem:[#allocation63_spill] sm:$0xff] %v9569_v54 }
 0x28b   : > { %6944 = vmatmul.msk.bf16.gmra.mxu0 %vm891_vm1, %v9431_v16  ;;  %4692 = vmatpush.bf16.msrb.mxu1 %v14946_v57 }
 0x28c   : > { %v1521_v45 = vpop.f32.mrf.mxu3 }
 0x28d   : > { %v9594_v60 = vadd.f32 %v8929_v17, %v1521_v45 }
 0x28e   : > { %v9609_v12 = vpop.f32.mrf.mxu1 }
 0x28f   : > { %4693 = vmatpush.bf16.msrb.mxu1 %v14952_v43  ;;  %14955 = vst [vmem:[#allocation35_spill] sm:$0xff] %v9609_v12  ;;  %v14964_v43 = vld [vmem:[#allocation23_spill] sm:$0xff] }
 0x290   : > { %v9589_v21 = vpop.f32.mrf.mxu0 }
 0x291   : > { %6929 = vmatmul.msk.f32.gmra.mxu3 %vm891_vm1, %v8182_v56  ;;  %v9596_v40 = vpop.f32.mrf.mxu2 }
 0x292   : > { %6983 = vmatmul.msk.bf16.gmra.mxu1 %vm891_vm1, %v9582_v32  ;;  %14953 = vst [vmem:[#allocation36_spill] sm:$0xff] %v9596_v40 }
 0x294   : > { %v1524_v51 = vpop.f32.mrf.mxu3 }
 0x295   : > { %v9599_v28 = vadd.f32 %v8929_v17, %v1524_v51 }
 0x296   : > { %7000 = vmatmul.msk.bf16.gmra.mxu2 %vm891_vm1, %v14954_v35  ;;  %v9632_v45 = vpop.f32.mrf.mxu1 }
 0x297   : > { %14961 = vst [vmem:[#allocation70_spill] sm:$0xff] %v9632_v45 }
 0x298   : > { %v9607_v58 = vpop.f32.mrf.mxu0 }
 0x299   : > { %6930 = vmatmul.msk.f32.gmra.mxu3 %vm891_vm1, %v8183_v46  ;;  %v9611_v19 = vpop.f32.mrf.mxu2  ;;  %v1641_v46 = vmul.f32 %v9015_v29, %v9114_v14 }
 0x29a   : > { %14956 = vst [vmem:[#allocation66_spill] sm:$0xff] %v9611_v19  ;;  %v14977_v19 = vld [vmem:[#allocation27_spill] sm:$0xff] }
 0x29b   : > { %6945 = vmatmul.msk.bf16.gmra.mxu0 %vm891_vm1, %v9047_v36 }
 0x29c   : > { %v1527_v0 = vpop.f32.mrf.mxu3 }
 0x29d   : > { %v9628_v61 = vadd.f32 %v8929_v17, %v1527_v0 }
 0x29e   : > { %v9653_v0 = vpop.f32.mrf.mxu1 }
 0x29f   : > { %14966 = vst [vmem:[#allocation72_spill] sm:$0xff] %v9653_v0 }
 0x2a0   : > { %v9623_v2 = vpop.f32.mrf.mxu0 }
 0x2a1   : > { %6931 = vmatmul.msk.f32.gmra.mxu3 %vm891_vm1, %v8184_v59  ;;  %14959 = vst [vmem:[#allocation68_spill] sm:$0xff] %v9623_v2  ;;  %v9630_v20 = vpop.f32.mrf.mxu2  ;;  %v9657_v59 = vpack.c.bf16 %v1642_v8, %v1641_v46  ;;  %v14976_v8 = vld [vmem:[#allocation21_spill] sm:$0xff]  ;;  %v15032_v2 = vld [vmem:[#allocation39_spill] sm:$0xff] }
 0x2a2   : > { %6984 = vmatmul.msk.bf16.gmra.mxu1 %vm891_vm1, %v9619_v49  ;;  %14960 = vst [vmem:[#allocation69_spill] sm:$0xff] %v9630_v20  ;;  %v14974_v20 = vld [vmem:[#allocation15_spill] sm:$0xff]  ;;  %v1643_v40 = vmul.f32 %v14976_v8, %v14977_v19 }
 0x2a3   : > { %14968 = vst [vmem:[#allocation73_spill] sm:$0xff] %v9657_v59 }
 0x2a4   : > { %v1530_v5 = vpop.f32.mrf.mxu3 }
 0x2a5   : > { %v9635_v57 = vadd.f32 %v8929_v17, %v1530_v5 }
 0x2a6   : > { %7001 = vmatmul.msk.bf16.gmra.mxu2 %vm891_vm1, %v14962_v31  ;;  %v9667_v24 = vpop.f32.mrf.mxu1  ;;  %v14982_v31 = vld [vmem:[#allocation52_spill] sm:$0xff] }
 0x2a7   : > { %14971 = vst [vmem:[#allocation76_spill] sm:$0xff] %v9667_v24 }
 0x2a8   : > { %v9641_v44 = vpop.f32.mrf.mxu0 }
 0x2a9   : > { %14963 = vst [vmem:[#allocation71_spill] sm:$0xff] %v9641_v44  ;;  %7040 = vmatmul.msk.bf16.vlgmr.msra.gmra.mxu3 %vm891_vm1, %v14964_v43  ;;  %v9645_v56 = vpop.f32.mrf.mxu2 }
 0x2aa   : > { %14965 = vst [vmem:[#allocation23_spill] sm:$0xff] %v9645_v56 }
 0x2ab   : > { %6946 = vmatmul.msk.bf16.gmra.mxu0 %vm891_vm1, %v9528_v27 }
 0x2ac   : > { %v9647_v51 = vpop.f32.mrf.mxu3 }
 0x2ae   : > { %v9687_v6 = vpop.f32.mrf.mxu1 }
 0x2af   : > { %14980 = vst [vmem:[#allocation79_spill] sm:$0xff] %v9687_v6  ;;  %v1645_v6 = vmul.f32 %v14976_v8, %v9037_v22 }
 0x2b0   : > { %v9659_v5 = vpop.f32.mrf.mxu0 }
 0x2b1   : > { %14969 = vst [vmem:[#allocation74_spill] sm:$0xff] %v9659_v5  ;;  %v9663_v11 = vpop.f32.mrf.mxu2 }
 0x2b2   : > { %6985 = vmatmul.msk.bf16.gmra.mxu1 %vm891_vm1, %v9657_v59  ;;  %14970 = vst [vmem:[#allocation75_spill] sm:$0xff] %v9663_v11  ;;  %v1644_v11 = vmul.f32 %v14976_v8, %v8999_v25 }
 0x2b4   : > { %v9665_v47 = vpop.f32.mrf.mxu3  ;;  %v9683_v54 = vpack.c.bf16 %v1644_v11, %v1643_v40 }
 0x2b6   : > { %7002 = vmatmul.msk.bf16.gmra.mxu2 %vm891_vm1, %v14972_v41  ;;  %14978 = vst [vmem:[#allocation21_spill] sm:$0xff] %v9683_v54  ;;  %v9701_v40 = vpop.f32.mrf.mxu1 }
 0x2b7   : > { %14986 = vst [vmem:[#allocation82_spill] sm:$0xff] %v9701_v40 }
 0x2b8   : > { %v9671_v56 = vpop.f32.mrf.mxu0 }
 0x2b9   : > { %14973 = vst [vmem:[#allocation77_spill] sm:$0xff] %v9671_v56  ;;  %7041 = vmatmul.msk.bf16.gmra.mxu3 %vm891_vm1, %v14974_v20  ;;  %v9675_v29 = vpop.f32.mrf.mxu2 }
 0x2ba   : > { %14975 = vst [vmem:[#allocation15_spill] sm:$0xff] %v9675_v29 }
 0x2bb   : > { %6947 = vmatmul.msk.bf16.gmra.mxu0 %vm891_vm1, %v9582_v32 }
 0x2bc   : > { %v1539_v46 = vpop.f32.mrf.mxu3 }
 0x2c0   : > { %v9685_v34 = vpop.f32.mrf.mxu0 }
 0x2c1   : > { %14979 = vst [vmem:[#allocation78_spill] sm:$0xff] %v9685_v34  ;;  %v9691_v29 = vpop.f32.mrf.mxu2  ;;  %v9717_v34 = vpop.f32.mrf.mxu1 }
 0x2c2   : > { %6986 = vmatmul.msk.bf16.gmra.mxu1 %vm891_vm1, %v9683_v54  ;;  %14981 = vst [vmem:[#allocation80_spill] sm:$0xff] %v9691_v29  ;;  %v1646_v29 = vmul.f32 %v14976_v8, %v14947_v4 }
 0x2c3   : > { %14990 = vst [vmem:[#allocation86_spill] sm:$0xff] %v9717_v34  ;;  %v1647_v34 = vmul.f32 %v14976_v8, %v9073_v53 }
 0x2c4   : > { %v1542_v41 = vpop.f32.mrf.mxu3 }
 0x2c6   : > { %7003 = vmatmul.msk.bf16.gmra.mxu2 %vm891_vm1, %v14982_v31  ;;  %v9709_v31 = vpack.c.bf16 %v1646_v29, %v1645_v6 }
 0x2c8   : > { %v9695_v35 = vpop.f32.mrf.mxu0  ;;  %14987 = vst [vmem:[#allocation83_spill] sm:$0xff] %v9709_v31 }
 0x2c9   : > { %14983 = vst [vmem:[#allocation81_spill] sm:$0xff] %v9695_v35  ;;  %7042 = vmatmul.msk.bf16.gmra.mxu3 %vm891_vm1, %v14984_v39  ;;  %v9699_v11 = vpop.f32.mrf.mxu2 }
 0x2ca   : > { %14985 = vst [vmem:[#allocation18_spill] sm:$0xff] %v9699_v11 }
 0x2cb   : > { %6948 = vmatmul.msk.bf16.gmra.mxu0 %vm891_vm1, %v9619_v49 }
 0x2cc   : > { %v1545_v24 = vpop.f32.mrf.mxu3 }
 0x2cd   : > { %v1546_v12 = vadd.f32 %v8929_v17, %v1545_v24 }
 0x2d0   : > { %v9711_v35 = vpop.f32.mrf.mxu0 }
 0x2d1   : > { %14988 = vst [vmem:[#allocation84_spill] sm:$0xff] %v9711_v35  ;;  %v9715_v11 = vpop.f32.mrf.mxu2  ;;  %v9733_v35 = vpop.f32.mrf.mxu1 }
 0x2d2   : > { %6987 = vmatmul.msk.bf16.gmra.mxu1 %vm891_vm1, %v9709_v31  ;;  %14989 = vst [vmem:[#allocation85_spill] sm:$0xff] %v9715_v11  ;;  %v1648_v11 = vmul.f32 %v14976_v8, %v14957_v1 }
 0x2d3   : > { %14994 = vst [vmem:[#allocation88_spill] sm:$0xff] %v9733_v35 }
 0x2d4   : > { %v1548_v40 = vpop.f32.mrf.mxu3  ;;  %v9735_v56 = vpack.c.bf16 %v1648_v11, %v1647_v34  ;;  %v1540_v34 = vadd.f32 %v8929_v17, %v1539_v46  ;;  %v1543_v11 = vadd.f32 %v8929_v17, %v1542_v41 }
 0x2d5   : > { %v1549_v33 = vadd.f32 %v8929_v17, %v1548_v40 }
 0x2d6   : > { %7004 = vmatmul.msk.bf16.vlgmr.msrb.gmra.mxu2 %vm891_vm1, %v14964_v43  ;;  %14995 = vst [vmem:[#allocation89_spill] sm:$0xff] %v9735_v56  ;;  %v4571_v41 = vpack.c.bf16 %v1543_v11, %v1540_v34  ;;  %v15009_v11 = vpack.c.bf16 %v9599_v28, %v9594_v60 }
 0x2d7   : > { %v4572_v35 = vpack.c.bf16 %v1549_v33, %v1546_v12  ;;  %v1534_v33 = vadd.f32 %v8929_v17, %v9647_v51  ;;  %v1537_v12 = vadd.f32 %v8929_v17, %v9665_v47  ;;  %v15006_v47 = vld [vmem:[#allocation30_spill] sm:$0xff] }
 0x2d8   : > { %v9721_v0 = vpop.f32.mrf.mxu0 }
 0x2d9   : > { %14991 = vst [vmem:[#allocation87_spill] sm:$0xff] %v9721_v0  ;;  %7043 = vmatmul.msk.bf16.gmra.mxu3 %vm891_vm1, %v14992_v18  ;;  %v9725_v6 = vpop.f32.mrf.mxu2  ;;  %v9755_v24 = vpop.f32.mrf.mxu1 }
 0x2da   : > { %14993 = vst [vmem:[#allocation11_spill] sm:$0xff] %v9725_v6 }
 0x2db   : > { %6949 = vmatmul.msk.bf16.gmra.mxu0 %vm891_vm1, %v9657_v59 }
 0x2dc   : > { %v1551_v29 = vpop.f32.mrf.mxu3 }
 0x2dd   : > { %v1552_v6 = vadd.f32 %v8929_v17, %v1551_v29  ;;  %v14999_v29 = vld [vmem:[#allocation14_spill] sm:$0xff] }
 0x2de   : > { %15000 = vst [vmem:[#allocation14_spill] sm:$0xff] %v9755_v24 }
 0x2e0   : > { %v9737_v0 = vpop.f32.mrf.mxu0 }
 0x2e1   : > { %14996 = vst [vmem:[#allocation90_spill] sm:$0xff] %v9737_v0  ;;  %v9742_v45 = vpop.f32.mrf.mxu2  ;;  %v9779_v51 = vpop.f32.mrf.mxu1 }
 0x2e2   : > { %6988 = vmatmul.msk.bf16.gmra.mxu1 %vm891_vm1, %v9735_v56  ;;  %14997 = vst [vmem:[#allocation91_spill] sm:$0xff] %v9742_v45 }
 0x2e3   : > { %15004 = vst [vmem:[#allocation96_spill] sm:$0xff] %v9779_v51 }
 0x2e4   : > { %v1554_v5 = vpop.f32.mrf.mxu3 }
 0x2e5   : > { %v1555_v44 = vadd.f32 %v8929_v17, %v1554_v5 }
 0x2e6   : > { %7005 = vmatmul.msk.bf16.gmra.mxu2 %vm891_vm1, %v14974_v20 }
 0x2e7   : > { %v4573_v38 = vpack.c.bf16 %v1555_v44, %v1552_v6  ;;  %v1650_v44 = vmul.f32 %v14976_v8, %v9114_v14  ;;  %v4570_v6 = vpack.c.bf16 %v1537_v12, %v1534_v33  ;;  %v15012_v12 = vpack.c.bf16 %v9548_v55, %v9543_v13 }
 0x2e8   : > { %v9751_v0 = vpop.f32.mrf.mxu0 }
 0x2e9   : > { %14998 = vst [vmem:[#allocation92_spill] sm:$0xff] %v9751_v0  ;;  %7044 = vmatmul.msk.bf16.gmra.mxu3 %vm891_vm1, %v14999_v29  ;;  %5253 = vmatpush.bf16.msra.mxu0 %v4573_v38  ;;  %v9757_v40 = vpop.f32.mrf.mxu2  ;;  %v1649_v38 = vmul.f32 %v14976_v8, %v9101_v37 }
 0x2ea   : > { %15001 = vst [vmem:[#allocation93_spill] sm:$0xff] %v9757_v40 }
 0x2eb   : > { %6950 = vmatmul.msk.bf16.gmra.mxu0 %vm891_vm1, %v9683_v54  ;;  %v9771_v46 = vpack.c.bf16 %v1650_v44, %v1649_v38  ;;  %v9799_v44 = vpop.f32.mrf.mxu1  ;;  %v15015_v38 = vpack.c.bf16 %v9485_v23, %v9479_v30 }
 0x2ec   : > { %v9759_v5 = vpop.f32.mrf.mxu3  ;;  %15010 = vst [vmem:[#allocation98_spill] sm:$0xff] %v9799_v44 }
 0x2ed   : > { %5254 = vmatpush.bf16.msra.mxu0 %v4572_v35  ;;  %v15007_v35 = vpack.c.bf16 %v9635_v57, %v9628_v61  ;;  %v15013_v61 = vld [vmem:[#allocation17_spill] sm:$0xff] }
 0x2f0   : > { %v9773_v45 = vpop.f32.mrf.mxu0 }
 0x2f1   : > { %15002 = vst [vmem:[#allocation94_spill] sm:$0xff] %v9773_v45  ;;  %5255 = vmatpush.bf16.msra.mxu0 %v4571_v41  ;;  %v9777_v40 = vpop.f32.mrf.mxu2 }
 0x2f2   : > { %6989 = vmatmul.msk.bf16.gmra.mxu1 %vm891_vm1, %v9771_v46  ;;  %15003 = vst [vmem:[#allocation95_spill] sm:$0xff] %v9777_v40  ;;  %v15025_v40 = vld [vmem:[#allocation34_spill] sm:$0xff] }
 0x2f3   : > { %v9813_v60 = vpop.f32.mrf.mxu1 }
 0x2f4   : > { %v9781_v24 = vpop.f32.mrf.mxu3  ;;  %15016 = vst [vmem:[#allocation100_spill] sm:$0xff] %v9813_v60 }
 0x2f5   : > { %5256 = vmatpush.bf16.msra.mxu0 %v4570_v6  ;;  %v15018_v6 = vld [vmem:[#allocation32_spill] sm:$0xff] }
 0x2f6   : > { %7006 = vmatmul.msk.bf16.gmra.mxu2 %vm891_vm1, %v14984_v39 }
 0x2f8   : > { %v9785_v17 = vpop.f32.mrf.mxu0 }
 0x2f9   : > { %15005 = vst [vmem:[#allocation97_spill] sm:$0xff] %v9785_v17  ;;  %7045 = vmatmul.msk.bf16.gmra.mxu3 %vm891_vm1, %v15006_v47  ;;  %5257 = vmatpush.bf16.msra.mxu0 %v15007_v35  ;;  %v9792_v8 = vpop.f32.mrf.mxu2  ;;  %v15020_v35 = vld [vmem:[#allocation26_spill] sm:$0xff] }
 0x2fa   : > { %15008 = vst [vmem:[#allocation30_spill] sm:$0xff] %v9792_v8  ;;  %v1654_v30 = vmul.f32 %v15020_v35, %v9037_v22  ;;  %v1653_v23 = vmul.f32 %v15020_v35, %v8999_v25 }
 0x2fb   : > { %6951 = vmatmul.msk.bf16.gmra.mxu0 %vm891_vm1, %v9709_v31 }
 0x2fc   : > { %v1563_v34 = vpop.f32.mrf.mxu3 }
 0x2fd   : > { %5258 = vmatpush.bf16.msra.mxu0 %v15009_v11  ;;  %v9829_v11 = vpack.c.bf16 %v1654_v30, %v1653_v23 }
 0x300   : > { %v9801_v33 = vpop.f32.mrf.mxu0 }
 0x301   : > { %15011 = vst [vmem:[#allocation99_spill] sm:$0xff] %v9801_v33  ;;  %5259 = vmatpush.bf16.msra.mxu0 %v15012_v12  ;;  %v9808_v57 = vpop.f32.mrf.mxu2 }
 0x302   : > { %6990 = vmatmul.msk.bf16.gmra.mxu1 %vm891_vm1, %v15013_v61  ;;  %15014 = vst [vmem:[#allocation17_spill] sm:$0xff] %v9808_v57 }
 0x304   : > { %v1566_v41 = vpop.f32.mrf.mxu3 }
 0x305   : > { %5260 = vmatpush.bf16.msra.mxu0 %v15015_v38  ;;  %v9833_v38 = vpop.f32.mrf.mxu1 }
 0x306   : > { %7007 = vmatmul.msk.bf16.gmra.mxu2 %vm891_vm1, %v14992_v18  ;;  %15022 = vst [vmem:[#allocation102_spill] sm:$0xff] %v9833_v38  ;;  %v1655_v38 = vmul.f32 %v15020_v35, %v14947_v4 }
 0x308   : > { %v9817_v28 = vpop.f32.mrf.mxu0 }
 0x309   : > { %15017 = vst [vmem:[#allocation101_spill] sm:$0xff] %v9817_v28  ;;  %7046 = vmatmul.msk.bf16.gmra.mxu3 %vm891_vm1, %v15018_v6  ;;  %v9821_v13 = vpop.f32.mrf.mxu2 }
 0x30a   : > { %15019 = vst [vmem:[#allocation32_spill] sm:$0xff] %v9821_v13 }
 0x30b   : > { %6952 = vmatmul.msk.bf16.gmra.mxu0 %vm891_vm1, %v9735_v56 }
 0x30c   : > { %v1569_v55 = vpop.f32.mrf.mxu3 }
 0x30d   : > { %v9847_v23 = vpop.f32.mrf.mxu1 }
 0x30e   : > { %15027 = vst [vmem:[#allocation105_spill] sm:$0xff] %v9847_v23 }
 0x310   : > { %v9831_v12 = vpop.f32.mrf.mxu0 }
 0x311   : > { %15021 = vst [vmem:[#allocation26_spill] sm:$0xff] %v9831_v12  ;;  %v9837_v13 = vpop.f32.mrf.mxu2 }
 0x312   : > { %6991 = vmatmul.msk.bf16.gmra.mxu1 %vm891_vm1, %v9829_v11  ;;  %15023 = vst [vmem:[#allocation103_spill] sm:$0xff] %v9837_v13  ;;  %v1656_v13 = vmul.f32 %v15020_v35, %v9073_v53 }
 0x314   : > { %v1572_v57 = vpop.f32.mrf.mxu3  ;;  %v9855_v28 = vpack.c.bf16 %v1656_v13, %v1655_v38 }
 0x315   : > { %v9866_v51 = vpop.f32.mrf.mxu1 }
 0x316   : > { %7008 = vmatmul.msk.bf16.gmra.mxu2 %vm891_vm1, %v14999_v29  ;;  %15030 = vst [vmem:[#allocation108_spill] sm:$0xff] %v9866_v51 }
 0x318   : > { %v9841_v8 = vpop.f32.mrf.mxu0 }
 0x319   : > { %15024 = vst [vmem:[#allocation104_spill] sm:$0xff] %v9841_v8  ;;  %7047 = vmatmul.msk.bf16.gmra.mxu3 %vm891_vm1, %v15025_v40  ;;  %v9845_v30 = vpop.f32.mrf.mxu2 }
 0x31a   : > { %15026 = vst [vmem:[#allocation34_spill] sm:$0xff] %v9845_v30  ;;  %v8185_v30 = vld [vmem:[%s14224_s7] ss:$0 sm:$0xff] }
 0x31b   : > { %6953 = vmatmul.msk.bf16.gmra.mxu0 %vm891_vm1, %v9771_v46  ;;  %v1570_v44 = vadd.f32 %v8185_v30, %v1569_v55  ;;  %v1573_v53 = vadd.f32 %v8185_v30, %v1572_v57  ;;  %v1564_v38 = vadd.f32 %v8185_v30, %v1563_v34  ;;  %v1558_v34 = vadd.f32 %v8185_v30, %v9759_v5 }
 0x31c   : > { %v1575_v12 = vpop.f32.mrf.mxu3  ;;  %v1657_v57 = vmul.f32 %v15020_v35, %v14957_v1 }
 0x31d   : > { %v1576_v23 = vadd.f32 %v8185_v30, %v1575_v12  ;;  %v4576_v45 = vpack.c.bf16 %v1573_v53, %v1570_v44  ;;  %v1561_v53 = vadd.f32 %v8185_v30, %v9781_v24  ;;  %v15041_v24 = vld [vmem:[#allocation43_spill] sm:$0xff] }
 0x320   : > { %v9857_v8 = vpop.f32.mrf.mxu0 }
 0x321   : > { %15028 = vst [vmem:[#allocation106_spill] sm:$0xff] %v9857_v8  ;;  %v9864_v60 = vpop.f32.mrf.mxu2  ;;  %v1567_v8 = vadd.f32 %v8185_v30, %v1566_v41  ;;  %v9886_v41 = vpop.f32.mrf.mxu1 }
 0x322   : > { %6992 = vmatmul.msk.bf16.gmra.mxu1 %vm891_vm1, %v9855_v28  ;;  %15029 = vst [vmem:[#allocation107_spill] sm:$0xff] %v9864_v60 }
 0x323   : > { %v4575_v44 = vpack.c.bf16 %v1567_v8, %v1564_v38  ;;  %15035 = vst [vmem:[#allocation111_spill] sm:$0xff] %v9886_v41 }
 0x324   : > { %v1578_v33 = vpop.f32.mrf.mxu3 }
 0x325   : > { %v1579_v17 = vadd.f32 %v8185_v30, %v1578_v33 }
 0x326   : > { %7009 = vmatmul.msk.bf16.gmra.mxu2 %vm891_vm1, %v15006_v47 }
 0x327   : > { %v4577_v13 = vpack.c.bf16 %v1579_v17, %v1576_v23  ;;  %v1658_v17 = vmul.f32 %v15020_v35, %v9101_v37  ;;  %v4574_v23 = vpack.c.bf16 %v1561_v53, %v1558_v34  ;;  %v1660_v34 = vmul.f32 %v15020_v35, %v14967_v62 }
 0x328   : > { %v9870_v0 = vpop.f32.mrf.mxu0 }
 0x329   : > { %15031 = vst [vmem:[#allocation109_spill] sm:$0xff] %v9870_v0  ;;  %7048 = vmatmul.msk.bf16.gmra.mxu3 %vm891_vm1, %v15032_v2  ;;  %5446 = vmatpush.bf16.msra.mxu1 %v4577_v13  ;;  %v9874_v12 = vpop.f32.mrf.mxu2  ;;  %v9888_v55 = vpack.c.bf16 %v1658_v17, %v1657_v57  ;;  %v9904_v8 = vpop.f32.mrf.mxu1  ;;  %v1659_v17 = vmul.f32 %v15020_v35, %v9114_v14 }
 0x32a   : > { %15033 = vst [vmem:[#allocation39_spill] sm:$0xff] %v9874_v12 }
 0x32b   : > { %6954 = vmatmul.msk.bf16.gmra.mxu0 %vm891_vm1, %v15013_v61  ;;  %15036 = vst [vmem:[#allocation112_spill] sm:$0xff] %v9888_v55  ;;  %v9916_v53 = vpack.c.bf16 %v1660_v34, %v1659_v17  ;;  %v15053_v34 = vld [vmem:[#allocation31_spill] sm:$0xff] }
 0x32c   : > { %v9878_v33 = vpop.f32.mrf.mxu3  ;;  %15042 = vst [vmem:[#allocation43_spill] sm:$0xff] %v9904_v8  ;;  %v1662_v62 = vmul.f32 %v15053_v34, %v8999_v25 }
 0x32d   : > { %15034 = vst [vmem:[#allocation110_spill] sm:$0xff] %v9878_v33  ;;  %5447 = vmatpush.bf16.msra.mxu1 %v4576_v45 }
 0x32e   : > { %15045 = vst [vmem:[#allocation119_spill] sm:$0xff] %v9916_v53 }
 0x330   : > { %v9890_v13 = vpop.f32.mrf.mxu0 }
 0x331   : > { %15037 = vst [vmem:[#allocation113_spill] sm:$0xff] %v9890_v13  ;;  %5448 = vmatpush.bf16.msra.mxu1 %v4575_v44  ;;  %v9894_v37 = vpop.f32.mrf.mxu2 }
 0x332   : > { %6993 = vmatmul.msk.bf16.gmra.mxu1 %vm891_vm1, %v9888_v55  ;;  %15038 = vst [vmem:[#allocation114_spill] sm:$0xff] %v9894_v37 }
 0x334   : > { %v9896_v5 = vpop.f32.mrf.mxu3 }
 0x335   : > { %15039 = vst [vmem:[#allocation115_spill] sm:$0xff] %v9896_v5  ;;  %5449 = vmatpush.bf16.msra.mxu1 %v4574_v23  ;;  %v9924_v23 = vpop.f32.mrf.mxu1 }
 0x336   : > { %7010 = vmatmul.msk.bf16.gmra.mxu2 %vm891_vm1, %v15018_v6  ;;  %15048 = vst [vmem:[#allocation122_spill] sm:$0xff] %v9924_v23 }
 0x338   : > { %v9900_v45 = vpop.f32.mrf.mxu0 }
 0x339   : > { %15040 = vst [vmem:[#allocation116_spill] sm:$0xff] %v9900_v45  ;;  %7049 = vmatmul.msk.bf16.gmra.mxu3 %vm891_vm1, %v15041_v24  ;;  %v9906_v30 = vpop.f32.mrf.mxu2 }
 0x33a   : > { %15043 = vst [vmem:[#allocation117_spill] sm:$0xff] %v9906_v30  ;;  %v1661_v30 = vmul.f32 %v15053_v34, %v14977_v19  ;;  %v1664_v19 = vmul.f32 %v15053_v34, %v14947_v4 }
 0x33b   : > { %6955 = vmatmul.msk.bf16.gmra.mxu0 %vm891_vm1, %v9829_v11 }
 0x33c   : > { %v9910_v38 = vpop.f32.mrf.mxu3  ;;  %v9946_v37 = vpack.c.bf16 %v1662_v62, %v1661_v30 }
 0x33d   : > { %15044 = vst [vmem:[#allocation118_spill] sm:$0xff] %v9910_v38 }
 0x33e   : > { %15055 = vst [vmem:[#allocation127_spill] sm:$0xff] %v9946_v37 }
 0x340   : > { %v9918_v44 = vpop.f32.mrf.mxu0 }
 0x341   : > { %15046 = vst [vmem:[#allocation120_spill] sm:$0xff] %v9918_v44  ;;  %v9922_v57 = vpop.f32.mrf.mxu2 }
 0x342   : > { %6994 = vmatmul.msk.bf16.gmra.mxu1 %vm891_vm1, %v9916_v53  ;;  %15047 = vst [vmem:[#allocation121_spill] sm:$0xff] %v9922_v57  ;;  %v9942_v57 = vpop.f32.mrf.mxu1 }
 0x343   : > { %15054 = vst [vmem:[#allocation31_spill] sm:$0xff] %v9942_v57 }
 0x344   : > { %v9926_v1 = vpop.f32.mrf.mxu3 }
 0x345   : > { %15049 = vst [vmem:[#allocation123_spill] sm:$0xff] %v9926_v1 }
 0x346   : > { %7011 = vmatmul.msk.bf16.gmra.mxu2 %vm891_vm1, %v15025_v40 }
 0x348   : > { %v9930_v14 = vpop.f32.mrf.mxu0 }
 0x349   : > { %15050 = vst [vmem:[#allocation124_spill] sm:$0xff] %v9930_v14  ;;  %7050 = vmatmul.msk.bf16.gmra.mxu3 %vm891_vm1, %v9369_v63  ;;  %v9934_v35 = vpop.f32.mrf.mxu2 }
 0x34a   : > { %15051 = vst [vmem:[#allocation125_spill] sm:$0xff] %v9934_v35  ;;  %v9956_v14 = vpop.f32.mrf.mxu1 }
 0x34b   : > { %6956 = vmatmul.msk.bf16.gmra.mxu0 %vm891_vm1, %v9855_v28  ;;  %15059 = vst [vmem:[#allocation131_spill] sm:$0xff] %v9956_v14 }
 0x34c   : > { %v9938_v17 = vpop.f32.mrf.mxu3 }
 0x34d   : > { %15052 = vst [vmem:[#allocation126_spill] sm:$0xff] %v9938_v17 }
 0x350   : > { %v9948_v12 = vpop.f32.mrf.mxu0 }
 0x351   : > { %15056 = vst [vmem:[#allocation128_spill] sm:$0xff] %v9948_v12  ;;  %v9952_v35 = vpop.f32.mrf.mxu2 }
 0x352   : > { %6995 = vmatmul.msk.bf16.gmra.mxu1 %vm891_vm1, %v9946_v37  ;;  %15057 = vst [vmem:[#allocation129_spill] sm:$0xff] %v9952_v35  ;;  %v1663_v35 = vmul.f32 %v15053_v34, %v9037_v22 }
 0x354   : > { %v9954_v60 = vpop.f32.mrf.mxu3  ;;  %v9974_v12 = vpack.c.bf16 %v1664_v19, %v1663_v35 }
 0x355   : > { %15058 = vst [vmem:[#allocation130_spill] sm:$0xff] %v9954_v60 }
 0x356   : > { %7012 = vmatmul.msk.bf16.gmra.mxu2 %vm891_vm1, %v15032_v2  ;;  %15063 = vst [vmem:[#allocation135_spill] sm:$0xff] %v9974_v12 }
 0x358   : > { %v9960_v25 = vpop.f32.mrf.mxu0 }
 0x359   : > { %15060 = vst [vmem:[#allocation132_spill] sm:$0xff] %v9960_v25  ;;  %7051 = vmatmul.msk.bf16.gmra.mxu3 %vm891_vm1, %v9399_v50  ;;  %v9964_v62 = vpop.f32.mrf.mxu2  ;;  %v9978_v25 = vpop.f32.mrf.mxu1 }
 0x35a   : > { %15061 = vst [vmem:[#allocation133_spill] sm:$0xff] %v9964_v62 }
 0x35b   : > { %6957 = vmatmul.msk.bf16.gmra.mxu0 %vm891_vm1, %v9888_v55  ;;  %15065 = vst [vmem:[#allocation137_spill] sm:$0xff] %v9978_v25 }
 0x35c   : > { %v9968_v30 = vpop.f32.mrf.mxu3 }
 0x35d   : > { %15062 = vst [vmem:[#allocation134_spill] sm:$0xff] %v9968_v30 }
 0x360   : > { %v9976_v14 = vpop.f32.mrf.mxu0 }
 0x361   : > { %15064 = vst [vmem:[#allocation136_spill] sm:$0xff] %v9976_v14  ;;  %v9982_v44 = vpop.f32.mrf.mxu2 }
 0x362   : > { %6996 = vmatmul.msk.bf16.gmra.mxu1 %vm891_vm1, %v9974_v12 }
 0x364   : > { %v9984_v57 = vpop.f32.mrf.mxu3 }
 0x365   : > { %15066 = vst [vmem:[#allocation138_spill] sm:$0xff] %v9984_v57 }
 0x366   : > { %7013 = vmatmul.msk.bf16.gmra.mxu2 %vm891_vm1, %v15041_v24 }
 0x368   : > { %v9988_v4 = vpop.f32.mrf.mxu0 }
 0x369   : > { %15067 = vst [vmem:[#allocation139_spill] sm:$0xff] %v9988_v4  ;;  %7052 = vmatmul.msk.bf16.gmra.mxu3 %vm891_vm1, %v9431_v16  ;;  %v9992_v19 = vpop.f32.mrf.mxu2 }
 0x36b   : > { %6958 = vmatmul.msk.bf16.gmra.mxu0 %vm891_vm1, %v9916_v53 }
 0x36c   : > { %v9996_v35 = vpop.f32.mrf.mxu3 }
 0x36d   : > { %15068 = vst [vmem:[#allocation140_spill] sm:$0xff] %v9996_v35 }
 0x370   : > { %v9998_v34 = vpop.f32.mrf.mxu0 }
 0x371   : > { %15069 = vst [vmem:[#allocation141_spill] sm:$0xff] %v9998_v34  ;;  %v10000_v22 = vpop.f32.mrf.mxu2 }
 0x374   : > { %v10002_v14 = vpop.f32.mrf.mxu3 }
 0x375   : > { %15070 = vst [vmem:[#allocation142_spill] sm:$0xff] %v10002_v14 }
 0x376   : > { %7014 = vmatmul.msk.bf16.gmra.mxu2 %vm891_vm1, %v9369_v63 }
 0x378   : > { %v10006_v4 = vpop.f32.mrf.mxu0 }
 0x379   : > { %15071 = vst [vmem:[#allocation143_spill] sm:$0xff] %v10006_v4  ;;  %7053 = vmatmul.msk.bf16.gmra.mxu3 %vm891_vm1, %v9047_v36  ;;  %v10010_v25 = vpop.f32.mrf.mxu2 }
 0x37b   : > { %6959 = vmatmul.msk.bf16.gmra.mxu0 %vm891_vm1, %v9946_v37 }
 0x37c   : > { %v10014_v45 = vpop.f32.mrf.mxu3 }
 0x37d   : > { %15072 = vst [vmem:[#allocation144_spill] sm:$0xff] %v10014_v45 }
 0x380   : > { %v10016_v34 = vpop.f32.mrf.mxu0 }
 0x381   : > { %15073 = vst [vmem:[#allocation145_spill] sm:$0xff] %v10016_v34  ;;  %v10018_v23 = vpop.f32.mrf.mxu2 }
 0x384   : > { %v10020_v13 = vpop.f32.mrf.mxu3 }
 0x385   : > { %15074 = vst [vmem:[#allocation146_spill] sm:$0xff] %v10020_v13 }
 0x386   : > { %7015 = vmatmul.msk.bf16.gmra.mxu2 %vm891_vm1, %v9399_v50 }
 0x388   : > { %v10024_v4 = vpop.f32.mrf.mxu0 }
 0x389   : > { %15075 = vst [vmem:[#allocation147_spill] sm:$0xff] %v10024_v4  ;;  %7054 = vmatmul.msk.bf16.gmra.mxu3 %vm891_vm1, %v9528_v27  ;;  %v10028_v8 = vpop.f32.mrf.mxu2 }
 0x38b   : > { %6960 = vmatmul.msk.bf16.gmra.mxu0 %vm891_vm1, %v9974_v12 }
 0x38c   : > { %v10032_v0 = vpop.f32.mrf.mxu3 }
 0x38d   : > { %15076 = vst [vmem:[#allocation148_spill] sm:$0xff] %v10032_v0 }
 0x390   : > { %v10034_v34 = vpop.f32.mrf.mxu0 }
 0x391   : > { %15077 = vst [vmem:[#allocation149_spill] sm:$0xff] %v10034_v34  ;;  %v10036_v41 = vpop.f32.mrf.mxu2 }
 0x394   : > { %v10038_v51 = vpop.f32.mrf.mxu3 }
 0x395   : > { %15078 = vst [vmem:[#allocation150_spill] sm:$0xff] %v10038_v51 }
 0x396   : > { %7016 = vmatmul.msk.bf16.gmra.mxu2 %vm891_vm1, %v9431_v16 }
 0x398   : > { %v10042_v4 = vpop.f32.mrf.mxu0 }
 0x399   : > { %15079 = vst [vmem:[#allocation151_spill] sm:$0xff] %v10042_v4  ;;  %7055 = vmatmul.msk.bf16.gmra.mxu3 %vm891_vm1, %v9582_v32  ;;  %v10046_v13 = vpop.f32.mrf.mxu2 }
 0x39b   : > { %7076 = vmatmul.msk.bf16.vlgmr.msrb.gmra.mxu0 %vm891_vm1, %v14964_v43 }
 0x39c   : > { %v10048_v48 = vpop.f32.mrf.mxu3 }
 0x39d   : > { %15080 = vst [vmem:[#allocation152_spill] sm:$0xff] %v10048_v48 }
 0x3a0   : > { %v10052_v34 = vpop.f32.mrf.mxu0 }
 0x3a1   : > { %15081 = vst [vmem:[#allocation153_spill] sm:$0xff] %v10052_v34  ;;  %v10054_v0 = vpop.f32.mrf.mxu2 }
 0x3a4   : > { %v10056_v51 = vpop.f32.mrf.mxu3 }
 0x3a5   : > { %15082 = vst [vmem:[#allocation154_spill] sm:$0xff] %v10056_v51 }
 0x3a6   : > { %7017 = vmatmul.msk.bf16.gmra.mxu2 %vm891_vm1, %v9047_v36 }
 0x3a8   : > { %v10060_v4 = vpop.f32.mrf.mxu0 }
 0x3a9   : > { %15083 = vst [vmem:[#allocation155_spill] sm:$0xff] %v10060_v4  ;;  %7056 = vmatmul.msk.bf16.gmra.mxu3 %vm891_vm1, %v9619_v49  ;;  %v10064_v45 = vpop.f32.mrf.mxu2 }
 0x3ab   : > { %7077 = vmatmul.msk.bf16.gmra.mxu0 %vm891_vm1, %v14974_v20 }
 0x3ac   : > { %v10066_v48 = vpop.f32.mrf.mxu3 }
 0x3ad   : > { %15084 = vst [vmem:[#allocation156_spill] sm:$0xff] %v10066_v48 }
 0x3b0   : > { %v10070_v43 = vpop.f32.mrf.mxu0 }
 0x3b1   : > { %15085 = vst [vmem:[#allocation157_spill] sm:$0xff] %v10070_v43  ;;  %v10072_v34 = vpop.f32.mrf.mxu2 }
 0x3b4   : > { %v10074_v51 = vpop.f32.mrf.mxu3 }
 0x3b5   : > { %15086 = vst [vmem:[#allocation158_spill] sm:$0xff] %v10074_v51 }
 0x3b6   : > { %7018 = vmatmul.msk.bf16.gmra.mxu2 %vm891_vm1, %v9528_v27 }
 0x3b8   : > { %v10078_v4 = vpop.f32.mrf.mxu0 }
 0x3b9   : > { %15087 = vst [vmem:[#allocation159_spill] sm:$0xff] %v10078_v4  ;;  %7057 = vmatmul.msk.bf16.gmra.mxu3 %vm891_vm1, %v9657_v59  ;;  %v10082_v36 = vpop.f32.mrf.mxu2 }
 0x3ba   : > { %15088 = vst [vmem:[#allocation160_spill] sm:$0xff] %v10082_v36 }
 0x3bb   : > { %7078 = vmatmul.msk.bf16.gmra.mxu0 %vm891_vm1, %v14984_v39 }
 0x3bc   : > { %v10084_v48 = vpop.f32.mrf.mxu3 }
 0x3bd   : > { %15089 = vst [vmem:[#allocation161_spill] sm:$0xff] %v10084_v48 }
 0x3c0   : > { %v10088_v20 = vpop.f32.mrf.mxu0 }
 0x3c1   : > { %15090 = vst [vmem:[#allocation162_spill] sm:$0xff] %v10088_v20  ;;  %v10090_v43 = vpop.f32.mrf.mxu2 }
 0x3c2   : > { %15091 = vst [vmem:[#allocation163_spill] sm:$0xff] %v10090_v43 }
 0x3c4   : > { %v10092_v51 = vpop.f32.mrf.mxu3 }
 0x3c5   : > { %15092 = vst [vmem:[#allocation164_spill] sm:$0xff] %v10092_v51 }
 0x3c6   : > { %7019 = vmatmul.msk.bf16.gmra.mxu2 %vm891_vm1, %v9582_v32 }
 0x3c8   : > { %v10096_v4 = vpop.f32.mrf.mxu0 }
 0x3c9   : > { %15093 = vst [vmem:[#allocation165_spill] sm:$0xff] %v10096_v4  ;;  %7058 = vmatmul.msk.bf16.gmra.mxu3 %vm891_vm1, %v9683_v54  ;;  %v10100_v27 = vpop.f32.mrf.mxu2 }
 0x3ca   : > { %15094 = vst [vmem:[#allocation166_spill] sm:$0xff] %v10100_v27 }
 0x3cb   : > { %7079 = vmatmul.msk.bf16.gmra.mxu0 %vm891_vm1, %v14992_v18 }
 0x3cc   : > { %v10102_v48 = vpop.f32.mrf.mxu3 }
 0x3cd   : > { %15095 = vst [vmem:[#allocation167_spill] sm:$0xff] %v10102_v48 }
 0x3d0   : > { %v10106_v39 = vpop.f32.mrf.mxu0 }
 0x3d1   : > { %15096 = vst [vmem:[#allocation168_spill] sm:$0xff] %v10106_v39  ;;  %v10108_v20 = vpop.f32.mrf.mxu2 }
 0x3d2   : > { %15097 = vst [vmem:[#allocation169_spill] sm:$0xff] %v10108_v20 }
 0x3d4   : > { %v10110_v51 = vpop.f32.mrf.mxu3 }
 0x3d5   : > { %15098 = vst [vmem:[#allocation170_spill] sm:$0xff] %v10110_v51 }
 0x3d6   : > { %7020 = vmatmul.msk.bf16.gmra.mxu2 %vm891_vm1, %v9619_v49 }
 0x3d8   : > { %v10114_v4 = vpop.f32.mrf.mxu0 }
 0x3d9   : > { %15099 = vst [vmem:[#allocation171_spill] sm:$0xff] %v10114_v4  ;;  %7059 = vmatmul.msk.bf16.gmra.mxu3 %vm891_vm1, %v9709_v31  ;;  %v10118_v32 = vpop.f32.mrf.mxu2 }
 0x3da   : > { %15100 = vst [vmem:[#allocation172_spill] sm:$0xff] %v10118_v32 }
 0x3db   : > { %7080 = vmatmul.msk.bf16.gmra.mxu0 %vm891_vm1, %v14999_v29 }
 0x3dc   : > { %v10120_v48 = vpop.f32.mrf.mxu3 }
 0x3dd   : > { %15101 = vst [vmem:[#allocation173_spill] sm:$0xff] %v10120_v48 }
 0x3e0   : > { %v10124_v18 = vpop.f32.mrf.mxu0 }
 0x3e1   : > { %15102 = vst [vmem:[#allocation174_spill] sm:$0xff] %v10124_v18  ;;  %v10126_v39 = vpop.f32.mrf.mxu2 }
 0x3e2   : > { %15103 = vst [vmem:[#allocation175_spill] sm:$0xff] %v10126_v39 }
 0x3e4   : > { %v10128_v51 = vpop.f32.mrf.mxu3 }
 0x3e5   : > { %15104 = vst [vmem:[#allocation176_spill] sm:$0xff] %v10128_v51 }
 0x3e6   : > { %7021 = vmatmul.msk.bf16.gmra.mxu2 %vm891_vm1, %v9657_v59 }
 0x3e8   : > { %v10132_v4 = vpop.f32.mrf.mxu0 }
 0x3e9   : > { %15105 = vst [vmem:[#allocation177_spill] sm:$0xff] %v10132_v4  ;;  %7060 = vmatmul.msk.bf16.gmra.mxu3 %vm891_vm1, %v9735_v56  ;;  %v10136_v49 = vpop.f32.mrf.mxu2 }
 0x3ea   : > { %15106 = vst [vmem:[#allocation178_spill] sm:$0xff] %v10136_v49 }
 0x3eb   : > { %7081 = vmatmul.msk.bf16.gmra.mxu0 %vm891_vm1, %v15006_v47 }
 0x3ec   : > { %v10138_v48 = vpop.f32.mrf.mxu3 }
 0x3ed   : > { %15107 = vst [vmem:[#allocation179_spill] sm:$0xff] %v10138_v48 }
 0x3f0   : > { %v10142_v29 = vpop.f32.mrf.mxu0 }
 0x3f1   : > { %15108 = vst [vmem:[#allocation180_spill] sm:$0xff] %v10142_v29  ;;  %v10144_v18 = vpop.f32.mrf.mxu2 }
 0x3f2   : > { %15109 = vst [vmem:[#allocation181_spill] sm:$0xff] %v10144_v18 }
 0x3f4   : > { %v10146_v51 = vpop.f32.mrf.mxu3 }
 0x3f5   : > { %15110 = vst [vmem:[#allocation182_spill] sm:$0xff] %v10146_v51 }
 0x3f6   : > { %7022 = vmatmul.msk.bf16.gmra.mxu2 %vm891_vm1, %v9683_v54 }
 0x3f8   : > { %v10150_v4 = vpop.f32.mrf.mxu0 }
 0x3f9   : > { %15111 = vst [vmem:[#allocation183_spill] sm:$0xff] %v10150_v4  ;;  %7061 = vmatmul.msk.bf16.gmra.mxu3 %vm891_vm1, %v9771_v46  ;;  %v10154_v59 = vpop.f32.mrf.mxu2 }
 0x3fa   : > { %15112 = vst [vmem:[#allocation184_spill] sm:$0xff] %v10154_v59 }
 0x3fb   : > { %7082 = vmatmul.msk.bf16.gmra.mxu0 %vm891_vm1, %v15018_v6 }
 0x3fc   : > { %v10156_v48 = vpop.f32.mrf.mxu3 }
 0x3fd   : > { %15113 = vst [vmem:[#allocation185_spill] sm:$0xff] %v10156_v48 }
 0x400   : > { %v10160_v47 = vpop.f32.mrf.mxu0 }
 0x401   : > { %15114 = vst [vmem:[#allocation186_spill] sm:$0xff] %v10160_v47  ;;  %v10162_v29 = vpop.f32.mrf.mxu2  ;;  %v15121_v47 = vld [vmem:[#allocation38_spill] sm:$0xff] }
 0x402   : > { %15115 = vst [vmem:[#allocation187_spill] sm:$0xff] %v10162_v29  ;;  %v15122_v29 = vld [vmem:[#allocation48_spill] sm:$0xff] }
 0x404   : > { %v10164_v51 = vpop.f32.mrf.mxu3 }
 0x405   : > { %15116 = vst [vmem:[#allocation188_spill] sm:$0xff] %v10164_v51  ;;  %v2778_v51 = vmax.f32 %v15122_v29, %v15121_v47  ;;  %v15126_v47 = vld [vmem:[#allocation41_spill] sm:$0xff] }
 0x406   : > { %7023 = vmatmul.msk.bf16.gmra.mxu2 %vm891_vm1, %v9709_v31 }
 0x408   : > { %v10168_v4 = vpop.f32.mrf.mxu0 }
 0x409   : > { %15117 = vst [vmem:[#allocation189_spill] sm:$0xff] %v10168_v4  ;;  %7062 = vmatmul.msk.bf16.gmra.mxu3 %vm891_vm1, %v15013_v61  ;;  %v10172_v54 = vpop.f32.mrf.mxu2  ;;  %v2779_v4 = vmax.f32 %v2778_v51, %v9964_v62 }
 0x40a   : > { %15118 = vst [vmem:[#allocation190_spill] sm:$0xff] %v10172_v54  ;;  %v15127_v54 = vld [vmem:[#allocation50_spill] sm:$0xff] }
 0x40b   : > { %7083 = vmatmul.msk.bf16.gmra.mxu0 %vm891_vm1, %v15025_v40  ;;  %v2780_v40 = vmax.f32 %v2779_v4, %v9878_v33  ;;  %v15131_v33 = vld [vmem:[#allocation42_spill] sm:$0xff] }
 0x40c   : > { %v10174_v48 = vpop.f32.mrf.mxu3 }
 0x40d   : > { %15119 = vst [vmem:[#allocation191_spill] sm:$0xff] %v10174_v48 }
 0x410   : > { %v10178_v6 = vpop.f32.mrf.mxu0 }
 0x411   : > { %15120 = vst [vmem:[#allocation192_spill] sm:$0xff] %v10178_v6  ;;  %v10182_v59 = vpop.f32.mrf.mxu2 }
 0x412   : > { %15123 = vst [vmem:[#allocation48_spill] sm:$0xff] %v10182_v59  ;;  %v2785_v59 = vmax.f32 %v15127_v54, %v15126_v47  ;;  %v15132_v47 = vld [vmem:[#allocation53_spill] sm:$0xff] }
 0x413   : > { %v2792_v49 = vmax.f32 %v15132_v47, %v15131_v33 }
 0x414   : > { %v10184_v31 = vpop.f32.mrf.mxu3 }
 0x415   : > { %15124 = vst [vmem:[#allocation193_spill] sm:$0xff] %v10184_v31 }
 0x416   : > { %7024 = vmatmul.msk.bf16.gmra.mxu2 %vm891_vm1, %v9735_v56  ;;  %v2786_v56 = vmax.f32 %v2785_v59, %v9982_v44 }
 0x418   : > { %v10191_v48 = vpop.f32.mrf.mxu0  ;;  %v2787_v4 = vmax.f32 %v2786_v56, %v9896_v5 }
 0x419   : > { %7063 = vmatmul.msk.bf16.gmra.mxu3 %vm891_vm1, %v9829_v11  ;;  %15125 = vst [vmem:[#allocation194_spill] sm:$0xff] %v10191_v48  ;;  %v2781_v6 = vsel %vm639_vm0, %v10191_v48, -inf  ;;  %v10198_v18 = vpop.f32.mrf.mxu2 }
 0x41a   : > { %15128 = vst [vmem:[#allocation50_spill] sm:$0xff] %v10198_v18  ;;  %v2782_v31 = vmax.f32 %v2780_v40, %v2781_v6 }
 0x41b   : > { %7084 = vmatmul.msk.bf16.gmra.mxu0 %vm891_vm1, %v15032_v2  ;;  %v2793_v2 = vmax.f32 %v2792_v49, %v9992_v19 }
 0x41c   : > { %v10200_v51 = vpop.f32.mrf.mxu3  ;;  %2783 = vmax.xlane.f32.xlu0 %v2782_v31 }
 0x41d   : > { %15129 = vst [vmem:[#allocation195_spill] sm:$0xff] %v10200_v51  ;;  %v2794_v56 = vmax.f32 %v2793_v2, %v9910_v38  ;;  %v15140_v38 = vld [vmem:[#allocation46_spill] sm:$0xff] }
 0x420   : > { %v10205_v62 = vpop.f32.mrf.mxu0 }
 0x421   : > { %15130 = vst [vmem:[#allocation196_spill] sm:$0xff] %v10205_v62  ;;  %v2788_v48 = vsel %vm639_vm0, %v10205_v62, -inf  ;;  %v10212_v18 = vpop.f32.mrf.mxu2  ;;  %v15136_v62 = vld [vmem:[#allocation45_spill] sm:$0xff] }
 0x422   : > { %15133 = vst [vmem:[#allocation53_spill] sm:$0xff] %v10212_v18  ;;  %v2789_v6 = vmax.f32 %v2787_v4, %v2788_v48  ;;  %v15137_v48 = vld [vmem:[#allocation55_spill] sm:$0xff] }
 0x423   : > { %v2799_v4 = vmax.f32 %v15137_v48, %v15136_v62  ;;  %v2806_v62 = vmax.f32 %v9449_v10, %v15140_v38 }
 0x424   : > { %v10214_v40 = vpop.f32.mrf.mxu3  ;;  %2790 = vmax.xlane.f32.xlu0 %v2789_v6 }
 0x425   : > { %15134 = vst [vmem:[#allocation197_spill] sm:$0xff] %v10214_v40  ;;  %v2800_v33 = vmax.f32 %v2799_v4, %v10000_v22 }
 0x426   : > { %7025 = vmatmul.msk.bf16.gmra.mxu2 %vm891_vm1, %v9771_v46 }
 0x427   : > { %v2801_v2 = vmax.f32 %v2800_v33, %v9926_v1 }
 0x428   : > { %v10221_v31 = vpop.f32.mrf.mxu0 }
 0x429   : > { %7064 = vmatmul.msk.bf16.gmra.mxu3 %vm891_vm1, %v9855_v28  ;;  %15135 = vst [vmem:[#allocation198_spill] sm:$0xff] %v10221_v31  ;;  %v2795_v59 = vsel %vm639_vm0, %v10221_v31, -inf  ;;  %v10228_v5 = vpop.f32.mrf.mxu2 }
 0x42a   : > { %v2796_v49 = vmax.f32 %v2794_v56, %v2795_v59  ;;  %v10244_v59 = vpop.f32.mrf.mxu1 }
 0x42b   : > { %7085 = vmatmul.msk.bf16.gmra.mxu0 %vm891_vm1, %v15041_v24  ;;  %15142 = vst [vmem:[#allocation200_spill] sm:$0xff] %v10244_v59  ;;  %v2807_v24 = vmax.f32 %v2806_v62, %v10010_v25  ;;  %v15149_v59 = vld [vmem:[#allocation51_spill] sm:$0xff] }
 0x42c   : > { %v10230_v6 = vpop.f32.mrf.mxu3  ;;  %2797 = vmax.xlane.f32.xlu1 %v2796_v49  ;;  %v15145_v49 = vld [vmem:[#allocation49_spill] sm:$0xff] }
 0x42d   : > { %15138 = vst [vmem:[#allocation55_spill] sm:$0xff] %v10230_v6  ;;  %v2808_v4 = vmax.f32 %v2807_v24, %v9938_v17 }
 0x430   : > { %v10235_v40 = vpop.f32.mrf.mxu0 }
 0x431   : > { %15139 = vst [vmem:[#allocation199_spill] sm:$0xff] %v10235_v40  ;;  %v2802_v31 = vsel %vm639_vm0, %v10235_v40, -inf  ;;  %v10242_v51 = vpop.f32.mrf.mxu2 }
 0x432   : > { %15141 = vst [vmem:[#allocation46_spill] sm:$0xff] %v10242_v51  ;;  %v2803_v56 = vmax.f32 %v2801_v2, %v2802_v31  ;;  %v2813_v2 = vmax.f32 %v9468_v26, %v15145_v49 }
 0x434   : > { %v10246_v6 = vpop.f32.mrf.mxu3  ;;  %2804 = vmax.xlane.f32.xlu1 %v2803_v56  ;;  %v2814_v1 = vmax.f32 %v2813_v2, %v10018_v23 }
 0x435   : > { %15143 = vst [vmem:[#allocation201_spill] sm:$0xff] %v10246_v6  ;;  %v10267_v6 = vpop.f32.mrf.mxu1 }
 0x436   : > { %7026 = vmatmul.msk.bf16.gmra.mxu2 %vm891_vm1, %v15013_v61  ;;  %15147 = vst [vmem:[#allocation204_spill] sm:$0xff] %v10267_v6 }
 0x438   : > { %v10253_v33 = vpop.f32.mrf.mxu0 }
 0x439   : > { %7065 = vmatmul.msk.bf16.gmra.mxu3 %vm891_vm1, %v9888_v55  ;;  %15144 = vst [vmem:[#allocation202_spill] sm:$0xff] %v10253_v33  ;;  %v2809_v31 = vsel %vm639_vm0, %v10253_v33, -inf  ;;  %v10260_v40 = vpop.f32.mrf.mxu2  ;;  %v2815_v33 = vmax.f32 %v2814_v1, %v9954_v60 }
 0x43a   : > { %v2810_v62 = vmax.f32 %v2808_v4, %v2809_v31  ;;  %v2820_v4 = vmax.f32 %v9500_v52, %v15149_v59  ;;  %v15193_v59 = vld [vmem:[#allocation70_spill] sm:$0xff] }
 0x43b   : > { %7086 = vmatmul.msk.bf16.gmra.mxu0 %vm891_vm1, %v9369_v63 }
 0x43c   : > { %v10262_v56 = vpop.f32.mrf.mxu3  ;;  %2811 = vmax.xlane.f32.xlu2 %v2810_v62  ;;  %v2821_v63 = vmax.f32 %v2820_v4, %v10028_v8 }
 0x43d   : > { %15146 = vst [vmem:[#allocation203_spill] sm:$0xff] %v10262_v56  ;;  %v10281_v2 = vpop.f32.mrf.mxu1 }
 0x43e   : > { %15152 = vst [vmem:[#allocation208_spill] sm:$0xff] %v10281_v2  ;;  %v2822_v62 = vmax.f32 %v2821_v63, %v9968_v30 }
 0x440   : > { %v10269_v24 = vpop.f32.mrf.mxu0 }
 0x441   : > { %15148 = vst [vmem:[#allocation205_spill] sm:$0xff] %v10269_v24  ;;  %v2816_v17 = vsel %vm639_vm0, %v10269_v24, -inf  ;;  %v10276_v31 = vpop.f32.mrf.mxu2 }
 0x442   : > { %15150 = vst [vmem:[#allocation206_spill] sm:$0xff] %v10276_v31  ;;  %v2817_v56 = vmax.f32 %v2815_v33, %v2816_v17  ;;  %v15154_v33 = vld [vmem:[#allocation54_spill] sm:$0xff] }
 0x443   : > { %v2827_v24 = vmax.f32 %v9532_v15, %v15154_v33 }
 0x444   : > { %v10278_v49 = vpop.f32.mrf.mxu3  ;;  %2818 = vmax.xlane.f32.xlu2 %v2817_v56 }
 0x445   : > { %15151 = vst [vmem:[#allocation207_spill] sm:$0xff] %v10278_v49  ;;  %v2828_v49 = vmax.f32 %v2827_v24, %v10036_v41  ;;  %v10304_v30 = vpop.f32.mrf.mxu1 }
 0x446   : > { %7027 = vmatmul.msk.bf16.gmra.mxu2 %vm891_vm1, %v9829_v11  ;;  %15157 = vst [vmem:[#allocation212_spill] sm:$0xff] %v10304_v30  ;;  %v15179_v30 = vld [vmem:[#allocation71_spill] sm:$0xff] }
 0x447   : > { %v2829_v63 = vmax.f32 %v2828_v49, %v9984_v57 }
 0x448   : > { %v10287_v1 = vpop.f32.mrf.mxu0 }
 0x449   : > { %7066 = vmatmul.msk.bf16.gmra.mxu3 %vm891_vm1, %v9916_v53  ;;  %15153 = vst [vmem:[#allocation209_spill] sm:$0xff] %v10287_v1  ;;  %v2823_v17 = vsel %vm639_vm0, %v10287_v1, -inf  ;;  %v10294_v4 = vpop.f32.mrf.mxu2 }
 0x44a   : > { %v2824_v56 = vmax.f32 %v2822_v62, %v2823_v17  ;;  %v2834_v62 = vmax.f32 %v9567_v7, %v9443_v42  ;;  %v15178_v42 = vld [vmem:[#allocation64_spill] sm:$0xff] }
 0x44b   : > { %7087 = vmatmul.msk.bf16.gmra.mxu0 %vm891_vm1, %v9399_v50 }
 0x44c   : > { %v10296_v60 = vpop.f32.mrf.mxu3  ;;  %2825 = vmax.xlane.f32.xlu0 %v2824_v56  ;;  %v2835_v50 = vmax.f32 %v2834_v62, %v10046_v13 }
 0x44d   : > { %15155 = vst [vmem:[#allocation210_spill] sm:$0xff] %v10296_v60 }
 0x44e   : > { %v2836_v24 = vmax.f32 %v2835_v50, %v9996_v35 }
 0x450   : > { %v10301_v2 = vpop.f32.mrf.mxu0 }
 0x451   : > { %15156 = vst [vmem:[#allocation211_spill] sm:$0xff] %v10301_v2  ;;  %v2830_v1 = vsel %vm639_vm0, %v10301_v2, -inf  ;;  %v10310_v17 = vpop.f32.mrf.mxu2 }
 0x452   : > { %15158 = vst [vmem:[#allocation213_spill] sm:$0xff] %v10310_v17  ;;  %v2831_v60 = vmax.f32 %v2829_v63, %v2830_v1  ;;  %v2841_v1 = vmax.f32 %v9589_v21, %v9473_v9 }
 0x454   : > { %v10312_v33 = vpop.f32.mrf.mxu3  ;;  %2832 = vmax.xlane.f32.xlu1 %v2831_v60  ;;  %v10328_v60 = vpop.f32.mrf.mxu1  ;;  %v2842_v57 = vmax.f32 %v2841_v1, %v10054_v0 }
 0x455   : > { %15159 = vst [vmem:[#allocation214_spill] sm:$0xff] %v10312_v33 }
 0x456   : > { %7028 = vmatmul.msk.bf16.gmra.mxu2 %vm891_vm1, %v9855_v28  ;;  %15162 = vst [vmem:[#allocation217_spill] sm:$0xff] %v10328_v60 }
 0x458   : > { %v10319_v49 = vpop.f32.mrf.mxu0 }
 0x459   : > { %7067 = vmatmul.msk.bf16.gmra.mxu3 %vm891_vm1, %v9946_v37  ;;  %15160 = vst [vmem:[#allocation215_spill] sm:$0xff] %v10319_v49  ;;  %v2837_v56 = vsel %vm639_vm0, %v10319_v49, -inf  ;;  %v10326_v63 = vpop.f32.mrf.mxu2  ;;  %v2843_v49 = vmax.f32 %v2842_v57, %v10002_v14  ;;  %v15171_v14 = vld [vmem:[#allocation68_spill] sm:$0xff] }
 0x45a   : > { %15161 = vst [vmem:[#allocation216_spill] sm:$0xff] %v10326_v63  ;;  %v2838_v62 = vmax.f32 %v2836_v24, %v2837_v56  ;;  %v2848_v24 = vmax.f32 %v9607_v58, %v9516_v3 }
 0x45b   : > { %7088 = vmatmul.msk.bf16.gmra.mxu0 %vm891_vm1, %v9431_v16 }
 0x45c   : > { %v10330_v2 = vpop.f32.mrf.mxu3  ;;  %2839 = vmax.xlane.f32.xlu2 %v2838_v62  ;;  %v2849_v16 = vmax.f32 %v2848_v24, %v10064_v45  ;;  %v10347_v1 = vpop.f32.mrf.mxu1  ;;  %v15169_v62 = vld [vmem:[#allocation144_spill] sm:$0xff] }
 0x45d   : > { %15163 = vst [vmem:[#allocation218_spill] sm:$0xff] %v10330_v2 }
 0x45e   : > { %15167 = vst [vmem:[#allocation222_spill] sm:$0xff] %v10347_v1  ;;  %v15174_v1 = vld [vmem:[#allocation24_spill] sm:$0xff] }
 0x460   : > { %v10335_v50 = vpop.f32.mrf.mxu0 }
 0x461   : > { %15164 = vst [vmem:[#allocation219_spill] sm:$0xff] %v10335_v50  ;;  %v2844_v35 = vsel %vm639_vm0, %v10335_v50, -inf  ;;  %v10342_v56 = vpop.f32.mrf.mxu2  ;;  %v2850_v50 = vmax.f32 %v2849_v16, %v15169_v62  ;;  %v15177_v62 = vld [vmem:[#allocation146_spill] sm:$0xff] }
 0x462   : > { %15165 = vst [vmem:[#allocation220_spill] sm:$0xff] %v10342_v56  ;;  %v2845_v33 = vmax.f32 %v2843_v49, %v2844_v35  ;;  %v15170_v49 = vld [vmem:[#allocation62_spill] sm:$0xff] }
 0x464   : > { %v10344_v2 = vpop.f32.mrf.mxu3  ;;  %2846 = vmax.xlane.f32.xlu0 %v2845_v33  ;;  %v10367_v9 = vpop.f32.mrf.mxu1 }
 0x465   : > { %15166 = vst [vmem:[#allocation221_spill] sm:$0xff] %v10344_v2  ;;  %v2855_v2 = vmax.f32 %v15171_v14, %v15170_v49 }
 0x466   : > { %7029 = vmatmul.msk.bf16.gmra.mxu2 %vm891_vm1, %v9888_v55  ;;  %15175 = vst [vmem:[#allocation24_spill] sm:$0xff] %v10367_v9 }
 0x467   : > { %v2856_v60 = vmax.f32 %v2855_v2, %v10072_v34 }
 0x468   : > { %v10353_v57 = vpop.f32.mrf.mxu0 }
 0x469   : > { %7068 = vmatmul.msk.bf16.gmra.mxu3 %vm891_vm1, %v9974_v12  ;;  %15168 = vst [vmem:[#allocation223_spill] sm:$0xff] %v10353_v57  ;;  %v2851_v35 = vsel %vm639_vm0, %v10353_v57, -inf  ;;  %v10360_v24 = vpop.f32.mrf.mxu2  ;;  %v2857_v57 = vmax.f32 %v2856_v60, %v15177_v62 }
 0x46a   : > { %15172 = vst [vmem:[#allocation68_spill] sm:$0xff] %v10360_v24  ;;  %v2852_v33 = vmax.f32 %v2850_v50, %v2851_v35  ;;  %v2862_v50 = vmax.f32 %v15179_v30, %v15178_v42 }
 0x46b   : > { %7089 = vmatmul.msk.bf16.gmra.mxu0 %vm891_vm1, %v15174_v1  ;;  %v15182_v1 = vld [vmem:[#allocation28_spill] sm:$0xff] }
 0x46c   : > { %v10362_v3 = vpop.f32.mrf.mxu3  ;;  %2853 = vmax.xlane.f32.xlu1 %v2852_v33  ;;  %v2863_v2 = vmax.f32 %v2862_v50, %v10082_v36  ;;  %v15184_v33 = vld [vmem:[#allocation148_spill] sm:$0xff]  ;;  %v10388_v62 = vpop.f32.mrf.mxu1 }
 0x46d   : > { %15173 = vst [vmem:[#allocation224_spill] sm:$0xff] %v10362_v3 }
 0x46e   : > { %15185 = vst [vmem:[#allocation228_spill] sm:$0xff] %v10388_v62 }
 0x470   : > { %v10369_v16 = vpop.f32.mrf.mxu0 }
 0x471   : > { %15176 = vst [vmem:[#allocation225_spill] sm:$0xff] %v10369_v16  ;;  %v2858_v49 = vsel %vm639_vm0, %v10369_v16, -inf  ;;  %v10376_v35 = vpop.f32.mrf.mxu2  ;;  %v2864_v16 = vmax.f32 %v2863_v2, %v15184_v33  ;;  %v15192_v33 = vld [vmem:[#allocation150_spill] sm:$0xff] }
 0x472   : > { %15180 = vst [vmem:[#allocation71_spill] sm:$0xff] %v10376_v35  ;;  %v2859_v3 = vmax.f32 %v2857_v57, %v2858_v49  ;;  %v15186_v49 = vld [vmem:[#allocation35_spill] sm:$0xff] }
 0x474   : > { %v10378_v55 = vpop.f32.mrf.mxu3  ;;  %2860 = vmax.xlane.f32.xlu2 %v2859_v3 }
 0x475   : > { %15181 = vst [vmem:[#allocation226_spill] sm:$0xff] %v10378_v55  ;;  %v15187_v55 = vld [vmem:[#allocation74_spill] sm:$0xff] }
 0x476   : > { %7030 = vmatmul.msk.bf16.gmra.mxu2 %vm891_vm1, %v9916_v53  ;;  %v2869_v42 = vmax.f32 %v15187_v55, %v15186_v49  ;;  %v15190_v53 = vld [vmem:[#allocation60_spill] sm:$0xff]  ;;  %v15194_v49 = vld [vmem:[#allocation77_spill] sm:$0xff] }
 0x477   : > { %v2876_v35 = vmax.f32 %v15194_v49, %v15193_v59 }
 0x478   : > { %v10385_v60 = vpop.f32.mrf.mxu0  ;;  %v2870_v36 = vmax.f32 %v2869_v42, %v10090_v43 }
 0x479   : > { %7069 = vmatmul.msk.bf16.gmra.mxu3 %vm891_vm1, %v15182_v1  ;;  %15183 = vst [vmem:[#allocation227_spill] sm:$0xff] %v10385_v60  ;;  %v2865_v57 = vsel %vm639_vm0, %v10385_v60, -inf  ;;  %v10394_v50 = vpop.f32.mrf.mxu2  ;;  %v2877_v42 = vmax.f32 %v2876_v35, %v10100_v27 }
 0x47a   : > { %15188 = vst [vmem:[#allocation74_spill] sm:$0xff] %v10394_v50  ;;  %v2866_v3 = vmax.f32 %v2864_v16, %v2865_v57  ;;  %v2871_v62 = vmax.f32 %v2870_v36, %v15192_v33  ;;  %v10410_v57 = vpop.f32.mrf.mxu1  ;;  %v15198_v36 = vld [vmem:[#allocation33_spill] sm:$0xff]  ;;  %v15202_v33 = vld [vmem:[#allocation78_spill] sm:$0xff] }
 0x47b   : > { %7090 = vmatmul.msk.bf16.gmra.mxu0 %vm891_vm1, %v15190_v53  ;;  %15196 = vst [vmem:[#allocation230_spill] sm:$0xff] %v10410_v57  ;;  %v15205_v57 = vld [vmem:[#allocation65_spill] sm:$0xff] }
 0x47c   : > { %v10396_v9 = vpop.f32.mrf.mxu3  ;;  %2867 = vmax.xlane.f32.xlu0 %v2866_v3  ;;  %v15200_v3 = vld [vmem:[#allocation152_spill] sm:$0xff] }
 0x47d   : > { %15189 = vst [vmem:[#allocation229_spill] sm:$0xff] %v10396_v9 }
 0x480   : > { %v10401_v2 = vpop.f32.mrf.mxu0 }
 0x481   : > { %15191 = vst [vmem:[#allocation60_spill] sm:$0xff] %v10401_v2  ;;  %v2872_v60 = vsel %vm639_vm0, %v10401_v2, -inf  ;;  %v10408_v50 = vpop.f32.mrf.mxu2  ;;  %v2878_v2 = vmax.f32 %v2877_v42, %v15200_v3 }
 0x482   : > { %15195 = vst [vmem:[#allocation77_spill] sm:$0xff] %v10408_v50  ;;  %v2873_v16 = vmax.f32 %v2871_v62, %v2872_v60  ;;  %v15201_v60 = vld [vmem:[#allocation72_spill] sm:$0xff]  ;;  %v10433_v27 = vpop.f32.mrf.mxu1 }
 0x483   : > { %v2883_v59 = vmax.f32 %v15202_v33, %v15201_v60  ;;  %15206 = vst [vmem:[#allocation65_spill] sm:$0xff] %v10433_v27 }
 0x484   : > { %v10412_v9 = vpop.f32.mrf.mxu3  ;;  %2874 = vmax.xlane.f32.xlu1 %v2873_v16 }
 0x485   : > { %15197 = vst [vmem:[#allocation231_spill] sm:$0xff] %v10412_v9 }
 0x486   : > { %7031 = vmatmul.msk.bf16.gmra.mxu2 %vm891_vm1, %v9946_v37  ;;  %v2884_v37 = vmax.f32 %v2883_v59, %v10108_v20 }
 0x488   : > { %v10419_v53 = vpop.f32.mrf.mxu0 }
 0x489   : > { %7070 = vmatmul.msk.bf16.gmra.mxu3 %vm891_vm1, %v15198_v36  ;;  %15199 = vst [vmem:[#allocation232_spill] sm:$0xff] %v10419_v53  ;;  %v2879_v62 = vsel %vm639_vm0, %v10419_v53, -inf  ;;  %v10426_v9 = vpop.f32.mrf.mxu2  ;;  %v15209_v53 = vld [vmem:[#allocation154_spill] sm:$0xff] }
 0x48a   : > { %15203 = vst [vmem:[#allocation78_spill] sm:$0xff] %v10426_v9  ;;  %v2880_v35 = vmax.f32 %v2878_v2, %v2879_v62  ;;  %v2885_v50 = vmax.f32 %v2884_v37, %v15209_v53  ;;  %v15210_v2 = vld [vmem:[#allocation76_spill] sm:$0xff]  ;;  %v15211_v62 = vld [vmem:[#allocation81_spill] sm:$0xff]  ;;  %v10451_v20 = vpop.f32.mrf.mxu1 }
 0x48b   : > { %7091 = vmatmul.msk.bf16.gmra.mxu0 %vm891_vm1, %v15205_v57  ;;  %15214 = vst [vmem:[#allocation237_spill] sm:$0xff] %v10451_v20 }
 0x48c   : > { %v10428_v16 = vpop.f32.mrf.mxu3  ;;  %2881 = vmax.xlane.f32.xlu2 %v2880_v35 }
 0x48d   : > { %15204 = vst [vmem:[#allocation233_spill] sm:$0xff] %v10428_v16  ;;  %v2890_v16 = vmax.f32 %v15211_v62, %v15210_v2 }
 0x48f   : > { %v10435_v42 = vpop.xlane.xlu0 %2783  ;;  %v2891_v27 = vmax.f32 %v2890_v16, %v10118_v32 }
 0x490   : > { %15207 = vst [vmem:[#allocation234_spill] sm:$0xff] %v10435_v42  ;;  %v10437_v3 = vpop.f32.mrf.mxu0  ;;  %v3282_v59 = vsub.f32 %v15122_v29, %v10435_v42 }
 0x491   : > { %15208 = vst [vmem:[#allocation235_spill] sm:$0xff] %v10437_v3  ;;  %v2886_v60 = vsel %vm639_vm0, %v10437_v3, -inf  ;;  %v10444_v9 = vpop.f32.mrf.mxu2 }
 0x492   : > { %15212 = vst [vmem:[#allocation81_spill] sm:$0xff] %v10444_v9  ;;  %v2887_v57 = vmax.f32 %v2885_v50, %v2886_v60  ;;  %v3642_v37 = vmul.f32 1.442695, %v3282_v59  ;;  %v15216_v50 = vld [vmem:[#allocation37_spill] sm:$0xff]  ;;  %v15218_v60 = vld [vmem:[#allocation156_spill] sm:$0xff]  ;;  %v10480_v6 = vpop.f32.mrf.mxu1 }
 0x493   : > { %v15220_v59 = vld [vmem:[#allocation84_spill] sm:$0xff]  ;;  %15227 = vst [vmem:[#allocation242_spill] sm:$0xff] %v10480_v6 }
 0x494   : > { %v10448_v35 = vpop.f32.mrf.mxu3  ;;  %2888 = vmax.xlane.f32.xlu0 %v2887_v57  ;;  %v15219_v57 = vld [vmem:[#allocation79_spill] sm:$0xff]  ;;  %7268 = vpow2.f32 %v3642_v37 }
 0x495   : > { %15213 = vst [vmem:[#allocation236_spill] sm:$0xff] %v10448_v35  ;;  %v2892_v35 = vmax.f32 %v2891_v27, %v15218_v60  ;;  %v2897_v2 = vmax.f32 %v15220_v59, %v15219_v57  ;;  %v15226_v60 = vld [vmem:[#allocation158_spill] sm:$0xff] }
 0x496   : > { %7032 = vmatmul.msk.bf16.gmra.mxu2 %vm891_vm1, %v9974_v12 }
 0x497   : > { %v10455_v3 = vpop.xlane.xlu0 %2790  ;;  %v2898_v43 = vmax.f32 %v2897_v2, %v10126_v39 }
 0x498   : > { %15215 = vst [vmem:[#allocation238_spill] sm:$0xff] %v10455_v3  ;;  %v3287_v53 = vsub.f32 %v15127_v54, %v10455_v3  ;;  %v10461_v29 = vpop.f32.mrf.mxu0  ;;  %v15223_v54 = vld [vmem:[#allocation67_spill] sm:$0xff] }
 0x499   : > { %7071 = vmatmul.msk.bf16.gmra.mxu3 %vm891_vm1, %v15216_v50  ;;  %15217 = vst [vmem:[#allocation239_spill] sm:$0xff] %v10461_v29  ;;  %v2893_v16 = vsel %vm639_vm0, %v10461_v29, -inf  ;;  %v10468_v12 = vpop.f32.mrf.mxu2  ;;  %v2899_v57 = vmax.f32 %v2898_v43, %v15226_v60  ;;  %v15232_v43 = vld [vmem:[#allocation178_spill] sm:$0xff] }
 0x49a   : > { %v3652_v20 = vmul.f32 1.442695, %v3287_v53  ;;  %15221 = vst [vmem:[#allocation84_spill] sm:$0xff] %v10468_v12  ;;  %v2894_v32 = vmax.f32 %v2892_v35, %v2893_v16  ;;  %v7269_v53 = vpop.eup %7268  ;;  %v15228_v16 = vld [vmem:[#allocation82_spill] sm:$0xff]  ;;  %v10510_v24 = vpop.f32.mrf.mxu1 }
 0x49b   : > { %7092 = vmatmul.msk.bf16.gmra.mxu0 %vm891_vm1, %v15223_v54  ;;  %15240 = vst [vmem:[#allocation248_spill] sm:$0xff] %v10510_v24  ;;  %v15248_v24 = vld [vmem:[#allocation92_spill] sm:$0xff] }
 0x49c   : > { %v10470_v9 = vpop.f32.mrf.mxu3  ;;  %7270 = vpow2.f32 %v3652_v20  ;;  %2895 = vmax.xlane.f32.xlu1 %v2894_v32 }
 0x49d   : > { %15222 = vst [vmem:[#allocation240_spill] sm:$0xff] %v10470_v9  ;;  %v15229_v9 = vld [vmem:[#allocation87_spill] sm:$0xff] }
 0x49e   : > { %v2904_v54 = vmax.f32 %v15229_v9, %v15228_v16  ;;  %v15243_v16 = vld [vmem:[#allocation181_spill] sm:$0xff] }
 0x49f   : > { %v10475_v27 = vpop.xlane.xlu1 %2797 }
 0x4a0   : > { %15224 = vst [vmem:[#allocation67_spill] sm:$0xff] %v10475_v27  ;;  %v10477_v29 = vpop.f32.mrf.mxu0  ;;  %v3292_v32 = vsub.f32 %v15132_v47, %v10475_v27  ;;  %v2905_v60 = vmax.f32 %v2904_v54, %v15232_v43  ;;  %v15238_v54 = vld [vmem:[#allocation90_spill] sm:$0xff]  ;;  %v15242_v43 = vld [vmem:[#allocation73_spill] sm:$0xff] }
 0x4a1   : > { %15225 = vst [vmem:[#allocation241_spill] sm:$0xff] %v10477_v29  ;;  %v2900_v35 = vsel %vm639_vm0, %v10477_v29, -inf  ;;  %v10486_v12 = vpop.f32.mrf.mxu2 }
 0x4a2   : > { %v7271_v37 = vpop.eup %7270  ;;  %15230 = vst [vmem:[#allocation243_spill] sm:$0xff] %v10486_v12  ;;  %v2901_v20 = vmax.f32 %v2899_v57, %v2900_v35  ;;  %v3662_v6 = vmul.f32 1.442695, %v3292_v32  ;;  %v15234_v57 = vld [vmem:[#allocation40_spill] sm:$0xff]  ;;  %v15236_v35 = vld [vmem:[#allocation161_spill] sm:$0xff] }
 0x4a3   : > { %v4362_v39 = vpack.c.bf16 %v7271_v37, %v7269_v53  ;;  %v2906_v53 = vmax.f32 %v2905_v60, %v15236_v35 }
 0x4a4   : > { %v10490_v2 = vpop.f32.mrf.mxu3  ;;  %2902 = vmax.xlane.f32.xlu2 %v2901_v20  ;;  %7272 = vpow2.f32 %v3662_v6 }
 0x4a5   : > { %15231 = vst [vmem:[#allocation244_spill] sm:$0xff] %v10490_v2  ;;  %4694 = vmatmul.bf16.vlgmr.msrb.gmra.mxu1 %v4362_v39  ;;  %v15237_v39 = vld [vmem:[#allocation86_spill] sm:$0xff] }
 0x4a6   : > { %7033 = vmatmul.msk.bf16.gmra.mxu2 %vm891_vm1, %v15182_v1  ;;  %v2911_v20 = vmax.f32 %v15238_v54, %v15237_v39  ;;  %v15246_v39 = vld [vmem:[#allocation164_spill] sm:$0xff] }
 0x4a7   : > { %v10495_v29 = vpop.xlane.xlu1 %2804 }
 0x4a8   : > { %15233 = vst [vmem:[#allocation245_spill] sm:$0xff] %v10495_v29  ;;  %v3297_v12 = vsub.f32 %v15137_v48, %v10495_v29  ;;  %v10501_v47 = vpop.f32.mrf.mxu0  ;;  %v2912_v60 = vmax.f32 %v2911_v20, %v15243_v16  ;;  %v15251_v16 = vld [vmem:[#allocation184_spill] sm:$0xff] }
 0x4a9   : > { %7072 = vmatmul.msk.bf16.gmra.mxu3 %vm891_vm1, %v15234_v57  ;;  %15235 = vst [vmem:[#allocation246_spill] sm:$0xff] %v10501_v47  ;;  %v2907_v37 = vsel %vm639_vm0, %v10501_v47, -inf  ;;  %v10508_v2 = vpop.f32.mrf.mxu2 }
 0x4aa   : > { %15239 = vst [vmem:[#allocation247_spill] sm:$0xff] %v10508_v2  ;;  %v2908_v1 = vmax.f32 %v2906_v53, %v2907_v37  ;;  %v3672_v32 = vmul.f32 1.442695, %v3297_v12  ;;  %v2913_v2 = vmax.f32 %v2912_v60, %v15246_v39  ;;  %v7273_v53 = vpop.eup %7272  ;;  %v10533_v60 = vpop.f32.mrf.mxu1 }
 0x4ab   : > { %7093 = vmatmul.msk.bf16.gmra.mxu0 %vm891_vm1, %v15242_v43  ;;  %15252 = vst [vmem:[#allocation253_spill] sm:$0xff] %v10533_v60 }
 0x4ac   : > { %v10512_v48 = vpop.f32.mrf.mxu3  ;;  %2909 = vmax.xlane.f32.xlu0 %v2908_v1  ;;  %7274 = vpow2.f32 %v3672_v32 }
 0x4ad   : > { %15241 = vst [vmem:[#allocation249_spill] sm:$0xff] %v10512_v48  ;;  %v15247_v48 = vld [vmem:[#allocation88_spill] sm:$0xff] }
 0x4ae   : > { %v2918_v54 = vmax.f32 %v15248_v24, %v15247_v48 }
 0x4af   : > { %v10517_v47 = vpop.xlane.xlu2 %2811 }
 0x4b0   : > { %15244 = vst [vmem:[#allocation73_spill] sm:$0xff] %v10517_v47  ;;  %v10519_v35 = vpop.f32.mrf.mxu0  ;;  %v3302_v1 = vsub.f32 %v9449_v10, %v10517_v47  ;;  %v2919_v9 = vmax.f32 %v2918_v54, %v15251_v16  ;;  %v15262_v16 = vld [vmem:[#allocation187_spill] sm:$0xff] }
 0x4b1   : > { %15245 = vst [vmem:[#allocation250_spill] sm:$0xff] %v10519_v35  ;;  %v2914_v12 = vsel %vm639_vm0, %v10519_v35, -inf  ;;  %v10526_v43 = vpop.f32.mrf.mxu2 }
 0x4b2   : > { %v7275_v37 = vpop.eup %7274  ;;  %15249 = vst [vmem:[#allocation251_spill] sm:$0xff] %v10526_v43  ;;  %v2915_v6 = vmax.f32 %v2913_v2, %v2914_v12  ;;  %v3682_v48 = vmul.f32 1.442695, %v3302_v1  ;;  %v15254_v12 = vld [vmem:[#allocation44_spill] sm:$0xff] }
 0x4b3   : > { %v4367_v32 = vpack.c.bf16 %v7275_v37, %v7273_v53  ;;  %v15256_v53 = vld [vmem:[#allocation167_spill] sm:$0xff] }
 0x4b4   : > { %v10530_v20 = vpop.f32.mrf.mxu3  ;;  %2916 = vmax.xlane.f32.xlu1 %v2915_v6  ;;  %v2920_v54 = vmax.f32 %v2919_v9, %v15256_v53  ;;  %v15257_v6 = vld [vmem:[#allocation14_spill] sm:$0xff]  ;;  %7276 = vpow2.f32 %v3682_v48  ;;  %v10557_v9 = vpop.f32.mrf.mxu1 }
 0x4b5   : > { %15250 = vst [vmem:[#allocation252_spill] sm:$0xff] %v10530_v20  ;;  %4699 = vmatmul.bf16.gmra.mxu1 %v4367_v32  ;;  %v15258_v32 = vld [vmem:[#allocation94_spill] sm:$0xff] }
 0x4b6   : > { %7034 = vmatmul.msk.bf16.gmra.mxu2 %vm891_vm1, %v15198_v36  ;;  %v2925_v20 = vmax.f32 %v15258_v32, %v15257_v6  ;;  %v15266_v6 = vld [vmem:[#allocation170_spill] sm:$0xff] }
 0x4b7   : > { %v10537_v35 = vpop.xlane.xlu2 %2818 }
 0x4b8   : > { %15253 = vst [vmem:[#allocation254_spill] sm:$0xff] %v10537_v35  ;;  %v3307_v2 = vsub.f32 %v9468_v26, %v10537_v35  ;;  %v10543_v10 = vpop.f32.mrf.mxu0  ;;  %v15261_v26 = vld [vmem:[#allocation21_spill] sm:$0xff]  ;;  %v2926_v24 = vmax.f32 %v2925_v20, %v15262_v16  ;;  %v15271_v16 = vld [vmem:[#allocation190_spill] sm:$0xff] }
 0x4b9   : > { %7073 = vmatmul.msk.bf16.gmra.mxu3 %vm891_vm1, %v15254_v12  ;;  %15255 = vst [vmem:[#allocation255_spill] sm:$0xff] %v10543_v10  ;;  %v2921_v37 = vsel %vm639_vm0, %v10543_v10, -inf  ;;  %v10550_v60 = vpop.f32.mrf.mxu2 }
 0x4ba   : > { %15259 = vst [vmem:[#allocation256_spill] sm:$0xff] %v10550_v60  ;;  %v2922_v36 = vmax.f32 %v2920_v54, %v2921_v37  ;;  %v3692_v1 = vmul.f32 1.442695, %v3307_v2  ;;  %v2927_v60 = vmax.f32 %v2926_v24, %v15266_v6  ;;  %v7277_v54 = vpop.eup %7276  ;;  %v15300_v6 = vld [vmem:[#allocation89_spill] sm:$0xff] }
 0x4bb   : > { %7094 = vmatmul.msk.bf16.gmra.mxu0 %vm891_vm1, %v15261_v26  ;;  %15263 = vst [vmem:[#allocation21_spill] sm:$0xff] %v10557_v9  ;;  %v15268_v26 = vld [vmem:[#allocation97_spill] sm:$0xff] }
 0x4bc   : > { %v10552_v43 = vpop.f32.mrf.mxu3  ;;  %2923 = vmax.xlane.f32.xlu2 %v2922_v36  ;;  %7278 = vpow2.f32 %v3692_v1 }
 0x4bd   : > { %15260 = vst [vmem:[#allocation257_spill] sm:$0xff] %v10552_v43  ;;  %v15267_v43 = vld [vmem:[#allocation96_spill] sm:$0xff] }
 0x4be   : > { %v2932_v48 = vmax.f32 %v15268_v26, %v15267_v43  ;;  %v15281_v43 = vld [vmem:[#allocation83_spill] sm:$0xff]  ;;  %v15282_v26 = vld [vmem:[#allocation48_spill] sm:$0xff] }
 0x4bf   : > { %v10559_v10 = vpop.xlane.xlu0 %2825 }
 0x4c0   : > { %15264 = vst [vmem:[#allocation258_spill] sm:$0xff] %v10559_v10  ;;  %v10561_v53 = vpop.f32.mrf.mxu0  ;;  %v3312_v20 = vsub.f32 %v9500_v52, %v10559_v10  ;;  %v2933_v39 = vmax.f32 %v2932_v48, %v15271_v16  ;;  %v15277_v48 = vld [vmem:[#allocation98_spill] sm:$0xff] }
 0x4c1   : > { %15265 = vst [vmem:[#allocation259_spill] sm:$0xff] %v10561_v53  ;;  %v2928_v2 = vsel %vm639_vm0, %v10561_v53, -inf  ;;  %v10568_v32 = vpop.f32.mrf.mxu2 }
 0x4c2   : > { %v7279_v37 = vpop.eup %7278  ;;  %15269 = vst [vmem:[#allocation260_spill] sm:$0xff] %v10568_v32  ;;  %v2929_v36 = vmax.f32 %v2927_v60, %v2928_v2  ;;  %v3702_v53 = vmul.f32 1.442695, %v3312_v20  ;;  %v15273_v60 = vld [vmem:[#allocation47_spill] sm:$0xff]  ;;  %v15275_v2 = vld [vmem:[#allocation173_spill] sm:$0xff] }
 0x4c3   : > { %v4372_v9 = vpack.c.bf16 %v7279_v37, %v7277_v54  ;;  %v2934_v54 = vmax.f32 %v2933_v39, %v15275_v2  ;;  %v10586_v37 = vpop.f32.mrf.mxu1  ;;  %v15285_v2 = vld [vmem:[#allocation176_spill] sm:$0xff] }
 0x4c4   : > { %v10572_v1 = vpop.f32.mrf.mxu3  ;;  %2930 = vmax.xlane.f32.xlu0 %v2929_v36  ;;  %15276 = vst [vmem:[#allocation264_spill] sm:$0xff] %v10586_v37  ;;  %v15278_v36 = vld [vmem:[#allocation99_spill] sm:$0xff]  ;;  %7280 = vpow2.f32 %v3702_v53 }
 0x4c5   : > { %15270 = vst [vmem:[#allocation261_spill] sm:$0xff] %v10572_v1  ;;  %4704 = vmatmul.bf16.gmra.mxu1 %v4372_v9  ;;  %v2939_v1 = vmax.f32 %v15278_v36, %v15277_v48 }
 0x4c6   : > { %7035 = vmatmul.msk.bf16.gmra.mxu2 %vm891_vm1, %v15216_v50 }
 0x4c7   : > { %v10577_v24 = vpop.xlane.xlu1 %2832  ;;  %v2940_v39 = vmax.f32 %v2939_v1, %v15282_v26 }
 0x4c8   : > { %15272 = vst [vmem:[#allocation262_spill] sm:$0xff] %v10577_v24  ;;  %v3317_v32 = vsub.f32 %v9532_v15, %v10577_v24  ;;  %v10583_v52 = vpop.f32.mrf.mxu0 }
 0x4c9   : > { %7074 = vmatmul.msk.bf16.gmra.mxu3 %vm891_vm1, %v15273_v60  ;;  %15274 = vst [vmem:[#allocation263_spill] sm:$0xff] %v10583_v52  ;;  %v2935_v9 = vsel %vm639_vm0, %v10583_v52, -inf  ;;  %v10592_v50 = vpop.f32.mrf.mxu2  ;;  %v2941_v48 = vmax.f32 %v2940_v39, %v15285_v2  ;;  %v15291_v39 = vld [vmem:[#allocation50_spill] sm:$0xff] }
 0x4ca   : > { %15279 = vst [vmem:[#allocation265_spill] sm:$0xff] %v10592_v50  ;;  %v2936_v20 = vmax.f32 %v2934_v54, %v2935_v9  ;;  %v3712_v16 = vmul.f32 1.442695, %v3317_v32  ;;  %v7281_v36 = vpop.eup %7280  ;;  %v15286_v9 = vld [vmem:[#allocation100_spill] sm:$0xff] }
 0x4cb   : > { %7095 = vmatmul.msk.bf16.gmra.mxu0 %vm891_vm1, %v15281_v43  ;;  %v10610_v1 = vpop.f32.mrf.mxu1 }
 0x4cc   : > { %v10594_v15 = vpop.f32.mrf.mxu3  ;;  %2937 = vmax.xlane.f32.xlu1 %v2936_v20  ;;  %7282 = vpow2.f32 %v3712_v16  ;;  %15289 = vst [vmem:[#allocation269_spill] sm:$0xff] %v10610_v1 }
 0x4cd   : > { %15280 = vst [vmem:[#allocation266_spill] sm:$0xff] %v10594_v15  ;;  %v15287_v15 = vld [vmem:[#allocation101_spill] sm:$0xff] }
 0x4ce   : > { %v2946_v50 = vmax.f32 %v15287_v15, %v15286_v9  ;;  %v15292_v9 = vld [vmem:[#allocation133_spill] sm:$0xff] }
 0x4cf   : > { %v10599_v37 = vpop.xlane.xlu2 %2839  ;;  %v3284_v15 = vsub.f32 %v15292_v9, %v10435_v42 }
 0x4d0   : > { %15283 = vst [vmem:[#allocation83_spill] sm:$0xff] %v10599_v37  ;;  %v10601_v52 = vpop.f32.mrf.mxu0  ;;  %v3322_v16 = vsub.f32 %v9567_v7, %v10599_v37  ;;  %v2947_v2 = vmax.f32 %v2946_v50, %v15291_v39 }
 0x4d1   : > { %15284 = vst [vmem:[#allocation267_spill] sm:$0xff] %v10601_v52  ;;  %v2942_v32 = vsel %vm639_vm0, %v10601_v52, -inf  ;;  %v10608_v43 = vpop.f32.mrf.mxu2  ;;  %v3289_v52 = vsub.f32 %v9982_v44, %v10455_v3  ;;  %v3646_v39 = vmul.f32 1.442695, %v3284_v15 }
 0x4d2   : > { %v7283_v54 = vpop.eup %7282  ;;  %15288 = vst [vmem:[#allocation268_spill] sm:$0xff] %v10608_v43  ;;  %v2943_v53 = vmax.f32 %v2941_v48, %v2942_v32  ;;  %v3722_v32 = vmul.f32 1.442695, %v3322_v16 }
 0x4d3   : > { %v4377_v26 = vpack.c.bf16 %v7283_v54, %v7281_v36  ;;  %v15294_v36 = vld [vmem:[#allocation52_spill] sm:$0xff]  ;;  %v15295_v54 = vld [vmem:[#allocation179_spill] sm:$0xff] }
 0x4d4   : > { %v10614_v20 = vpop.f32.mrf.mxu3  ;;  %2944 = vmax.xlane.f32.xlu2 %v2943_v53  ;;  %v2948_v44 = vmax.f32 %v2947_v2, %v15295_v54  ;;  %v15296_v53 = vld [vmem:[#allocation102_spill] sm:$0xff]  ;;  %7284 = vpow2.f32 %v3722_v32  ;;  %v15305_v32 = vld [vmem:[#allocation105_spill] sm:$0xff] }
 0x4d5   : > { %15290 = vst [vmem:[#allocation270_spill] sm:$0xff] %v10614_v20  ;;  %4709 = vmatmul.bf16.gmra.mxu1 %v4377_v26  ;;  %v3656_v26 = vmul.f32 1.442695, %v3289_v52  ;;  %v15297_v20 = vld [vmem:[#allocation26_spill] sm:$0xff]  ;;  %v10643_v52 = vpop.f32.mrf.mxu1 }
 0x4d6   : > { %7036 = vmatmul.msk.bf16.gmra.mxu2 %vm891_vm1, %v15234_v57  ;;  %v2953_v1 = vmax.f32 %v15297_v20, %v15296_v53  ;;  %15301 = vst [vmem:[#allocation89_spill] sm:$0xff] %v10643_v52 }
 0x4d7   : > { %v10623_v48 = vpop.xlane.xlu0 %2846 }
 0x4d8   : > { %15293 = vst [vmem:[#allocation133_spill] sm:$0xff] %v10623_v48  ;;  %v3327_v7 = vsub.f32 %v9589_v21, %v10623_v48  ;;  %v10629_v50 = vpop.f32.mrf.mxu0  ;;  %v2954_v2 = vmax.f32 %v2953_v1, %v10212_v18 }
 0x4d9   : > { %7075 = vmatmul.msk.bf16.gmra.mxu3 %vm891_vm1, %v15294_v36  ;;  %v2949_v9 = vsel %vm639_vm0, %v10629_v50, -inf  ;;  %v10636_v57 = vpop.f32.mrf.mxu2 }
 0x4da   : > { %15298 = vst [vmem:[#allocation179_spill] sm:$0xff] %v10636_v57  ;;  %v2950_v16 = vmax.f32 %v2948_v44, %v2949_v9  ;;  %v3732_v43 = vmul.f32 1.442695, %v3327_v7  ;;  %v15304_v7 = vld [vmem:[#allocation182_spill] sm:$0xff]  ;;  %v7285_v44 = vpop.eup %7284 }
 0x4db   : > { %7096 = vmatmul.msk.bf16.gmra.mxu0 %vm891_vm1, %v15300_v6  ;;  %v2955_v15 = vmax.f32 %v2954_v2, %v15304_v7 }
 0x4dc   : > { %v10638_v21 = vpop.f32.mrf.mxu3  ;;  %2951 = vmax.xlane.f32.xlu0 %v2950_v16  ;;  %7286 = vpow2.f32 %v3732_v43 }
 0x4dd   : > { %15299 = vst [vmem:[#allocation271_spill] sm:$0xff] %v10638_v21  ;;  %7288 = vpow2.f32 %v3656_v26  ;;  %v15306_v21 = vld [vmem:[#allocation104_spill] sm:$0xff] }
 0x4de   : > { %7290 = vpow2.f32 %v3646_v39  ;;  %v2960_v1 = vmax.f32 %v15306_v21, %v15305_v32  ;;  %v10663_v32 = vpop.f32.mrf.mxu1 }
 0x4df   : > { %v10645_v53 = vpop.xlane.xlu1 %2853  ;;  %15309 = vst [vmem:[#allocation275_spill] sm:$0xff] %v10663_v32 }
 0x4e0   : > { %15302 = vst [vmem:[#allocation272_spill] sm:$0xff] %v10645_v53  ;;  %v10647_v57 = vpop.f32.mrf.mxu0  ;;  %v3332_v39 = vsub.f32 %v9607_v58, %v10645_v53  ;;  %v2961_v2 = vmax.f32 %v2960_v1, %v10228_v5  ;;  %v15312_v1 = vld [vmem:[#allocation108_spill] sm:$0xff] }
 0x4e1   : > { %15303 = vst [vmem:[#allocation273_spill] sm:$0xff] %v10647_v57  ;;  %v2956_v9 = vsel %vm639_vm0, %v10647_v57, -inf  ;;  %v10654_v16 = vpop.f32.mrf.mxu2  ;;  %v3299_v57 = vsub.f32 %v10000_v22, %v10495_v29  ;;  %v15311_v22 = vld [vmem:[#allocation185_spill] sm:$0xff] }
 0x4e2   : > { %v7287_v6 = vpop.eup %7286  ;;  %15307 = vst [vmem:[#allocation104_spill] sm:$0xff] %v10654_v16  ;;  %v2957_v43 = vmax.f32 %v2955_v15, %v2956_v9  ;;  %v3294_v15 = vsub.f32 %v9992_v19, %v10475_v27  ;;  %v15313_v19 = vld [vmem:[#allocation106_spill] sm:$0xff] }
 0x4e3   : > { %v7289_v52 = vpop.eup %7288  ;;  %v4382_v18 = vpack.c.bf16 %v7287_v6, %v7285_v44  ;;  %v3742_v44 = vmul.f32 1.442695, %v3332_v39 }
 0x4e4   : > { %v10658_v26 = vpop.f32.mrf.mxu3  ;;  %2958 = vmax.xlane.f32.xlu1 %v2957_v43  ;;  %v7291_v7 = vpop.eup %7290  ;;  %v2967_v43 = vmax.f32 %v15313_v19, %v15312_v1 }
 0x4e5   : > { %15308 = vst [vmem:[#allocation274_spill] sm:$0xff] %v10658_v26  ;;  %4714 = vmatmul.bf16.gmra.mxu1 %v4382_v18  ;;  %v4364_v20 = vpack.c.bf16 %v7289_v52, %v7291_v7  ;;  %v2962_v18 = vmax.f32 %v2961_v2, %v15311_v22  ;;  %v3676_v7 = vmul.f32 1.442695, %v3299_v57  ;;  %7292 = vpow2.f32 %v3742_v44 }
 0x4e6   : > { %7037 = vmatmul.msk.bf16.gmra.mxu2 %vm891_vm1, %v15254_v12 }
 0x4e7   : > { %v10669_v58 = vpop.xlane.xlu2 %2860 }
 0x4e8   : > { %15310 = vst [vmem:[#allocation276_spill] sm:$0xff] %v10669_v58  ;;  %v3337_v9 = vsub.f32 %v15171_v14, %v10669_v58  ;;  %v10673_v6 = vpop.f32.mrf.mxu0  ;;  %v3666_v14 = vmul.f32 1.442695, %v3294_v15  ;;  %v15320_v15 = vld [vmem:[#allocation111_spill] sm:$0xff] }
 0x4e9   : > { %5072 = vmatmul.bf16.vlgmr.msrb.gmra.mxu3 %v4364_v20  ;;  %v2963_v52 = vsel %vm639_vm0, %v10673_v6, -inf  ;;  %v10680_v26 = vpop.f32.mrf.mxu2  ;;  %v2968_v20 = vmax.f32 %v2967_v43, %v10242_v51 }
 0x4ea   : > { %15314 = vst [vmem:[#allocation185_spill] sm:$0xff] %v10680_v26  ;;  %v2964_v32 = vmax.f32 %v2962_v18, %v2963_v52  ;;  %v3752_v12 = vmul.f32 1.442695, %v3337_v9  ;;  %v15318_v26 = vld [vmem:[#allocation188_spill] sm:$0xff]  ;;  %v10692_v52 = vpop.f32.mrf.mxu1 }
 0x4eb   : > { %7097 = vmatmul.msk.bf16.gmra.mxu0 %vm891_vm1, %v9771_v46  ;;  %v2969_v18 = vmax.f32 %v2968_v20, %v15318_v26  ;;  %v7293_v9 = vpop.eup %7292  ;;  %15319 = vst [vmem:[#allocation278_spill] sm:$0xff] %v10692_v52 }
 0x4ec   : > { %v10682_v39 = vpop.f32.mrf.mxu3  ;;  %2965 = vmax.xlane.f32.xlu2 %v2964_v32  ;;  %7294 = vpow2.f32 %v3752_v12 }
 0x4ed   : > { %15315 = vst [vmem:[#allocation108_spill] sm:$0xff] %v10682_v39  ;;  %7296 = vpow2.f32 %v3676_v7  ;;  %v15321_v39 = vld [vmem:[#allocation109_spill] sm:$0xff] }
 0x4ee   : > { %7298 = vpow2.f32 %v3666_v14  ;;  %v2974_v43 = vmax.f32 %v15321_v39, %v15320_v15 }
 0x4ef   : > { %v10687_v57 = vpop.xlane.xlu0 %2867 }
 0x4f0   : > { %15316 = vst [vmem:[#allocation106_spill] sm:$0xff] %v10687_v57  ;;  %v10689_v2 = vpop.f32.mrf.mxu0  ;;  %v3342_v14 = vsub.f32 %v15179_v30, %v10687_v57  ;;  %v2975_v26 = vmax.f32 %v2974_v43, %v10260_v40 }
 0x4f1   : > { %15317 = vst [vmem:[#allocation277_spill] sm:$0xff] %v10689_v2  ;;  %v2970_v46 = vsel %vm639_vm0, %v10689_v2, -inf  ;;  %v10698_v32 = vpop.f32.mrf.mxu2  ;;  %v3309_v2 = vsub.f32 %v10018_v23, %v10537_v35 }
 0x4f2   : > { %v7295_v44 = vpop.eup %7294  ;;  %15322 = vst [vmem:[#allocation111_spill] sm:$0xff] %v10698_v32  ;;  %v2971_v12 = vmax.f32 %v2969_v18, %v2970_v46  ;;  %v3304_v32 = vsub.f32 %v10010_v25, %v10517_v47  ;;  %v3762_v18 = vmul.f32 1.442695, %v3342_v14  ;;  %v15327_v25 = vld [vmem:[#allocation113_spill] sm:$0xff] }
 0x4f3   : > { %v7297_v7 = vpop.eup %7296  ;;  %v4387_v20 = vpack.c.bf16 %v7295_v44, %v7293_v9  ;;  %v15325_v44 = vld [vmem:[#allocation191_spill] sm:$0xff] }
 0x4f4   : > { %v10702_v16 = vpop.f32.mrf.mxu3  ;;  %2972 = vmax.xlane.f32.xlu0 %v2971_v12  ;;  %v7299_v52 = vpop.eup %7298  ;;  %v2976_v43 = vmax.f32 %v2975_v26, %v15325_v44  ;;  %v15326_v12 = vld [vmem:[#allocation43_spill] sm:$0xff]  ;;  %7300 = vpow2.f32 %v3762_v18 }
 0x4f5   : > { %15323 = vst [vmem:[#allocation109_spill] sm:$0xff] %v10702_v16  ;;  %4719 = vmatmul.bf16.gmra.mxu1 %v4387_v20  ;;  %v4369_v51 = vpack.c.bf16 %v7297_v7, %v7299_v52  ;;  %v3696_v52 = vmul.f32 1.442695, %v3309_v2  ;;  %v2981_v7 = vmax.f32 %v15327_v25, %v15326_v12 }
 0x4f6   : > { %7038 = vmatmul.msk.bf16.gmra.mxu2 %vm891_vm1, %v15273_v60  ;;  %v10724_v60 = vpop.f32.mrf.mxu1 }
 0x4f7   : > { %v10711_v30 = vpop.xlane.xlu1 %2874  ;;  %15329 = vst [vmem:[#allocation280_spill] sm:$0xff] %v10724_v60  ;;  %v2982_v26 = vmax.f32 %v2981_v7, %v10276_v31  ;;  %v15334_v60 = vld [vmem:[#allocation122_spill] sm:$0xff]  ;;  %v15336_v7 = vld [vmem:[#allocation41_spill] sm:$0xff] }
 0x4f8   : > { %15324 = vst [vmem:[#allocation279_spill] sm:$0xff] %v10711_v30  ;;  %v3347_v9 = vsub.f32 %v15187_v55, %v10711_v30  ;;  %v10715_v46 = vpop.f32.mrf.mxu0 }
 0x4f9   : > { %5077 = vmatmul.bf16.gmra.mxu3 %v4369_v51  ;;  %v2977_v23 = vsel %vm639_vm0, %v10715_v46, -inf  ;;  %v10722_v14 = vpop.f32.mrf.mxu2  ;;  %v3686_v51 = vmul.f32 1.442695, %v3304_v32 }
 0x4fa   : > { %15328 = vst [vmem:[#allocation191_spill] sm:$0xff] %v10722_v14  ;;  %v2978_v20 = vmax.f32 %v2976_v43, %v2977_v23  ;;  %v3772_v16 = vmul.f32 1.442695, %v3347_v9  ;;  %v15333_v9 = vld [vmem:[#allocation193_spill] sm:$0xff]  ;;  %v7301_v23 = vpop.eup %7300 }
 0x4fb   : > { %7098 = vmatmul.msk.bf16.gmra.mxu0 %vm891_vm1, %v15013_v61  ;;  %v2983_v43 = vmax.f32 %v2982_v26, %v15333_v9  ;;  %v15335_v61 = vld [vmem:[#allocation116_spill] sm:$0xff] }
 0x4fc   : > { %v10726_v55 = vpop.f32.mrf.mxu3  ;;  %2979 = vmax.xlane.f32.xlu1 %v2978_v20  ;;  %7302 = vpow2.f32 %v3772_v16  ;;  %v2988_v32 = vmax.f32 %v15335_v61, %v15334_v60  ;;  %v3288_v20 = vsub.f32 %v15336_v7, %v10455_v3  ;;  %v3319_v60 = vsub.f32 %v10036_v41, %v10577_v24  ;;  %v15340_v7 = vld [vmem:[#allocation38_spill] sm:$0xff]  ;;  %v15342_v41 = vld [vmem:[#allocation195_spill] sm:$0xff] }
 0x4fd   : > { %15330 = vst [vmem:[#allocation281_spill] sm:$0xff] %v10726_v55  ;;  %7304 = vpow2.f32 %v3696_v52 }
 0x4fe   : > { %7306 = vpow2.f32 %v3686_v51  ;;  %v2989_v9 = vmax.f32 %v2988_v32, %v10294_v4  ;;  %v10749_v25 = vpop.f32.mrf.mxu1 }
 0x4ff   : > { %v10731_v2 = vpop.xlane.xlu2 %2881  ;;  %15339 = vst [vmem:[#allocation284_spill] sm:$0xff] %v10749_v25 }
 0x500   : > { %15331 = vst [vmem:[#allocation282_spill] sm:$0xff] %v10731_v2  ;;  %v10733_v14 = vpop.f32.mrf.mxu0  ;;  %v3352_v31 = vsub.f32 %v15194_v49, %v10731_v2  ;;  %v3314_v49 = vsub.f32 %v10028_v8, %v10559_v10 }
 0x501   : > { %15332 = vst [vmem:[#allocation283_spill] sm:$0xff] %v10733_v14  ;;  %v2984_v18 = vsel %vm639_vm0, %v10733_v14, -inf  ;;  %v10742_v16 = vpop.f32.mrf.mxu2 }
 0x502   : > { %v7303_v55 = vpop.eup %7302  ;;  %15337 = vst [vmem:[#allocation116_spill] sm:$0xff] %v10742_v16  ;;  %v2985_v52 = vmax.f32 %v2983_v43, %v2984_v18  ;;  %v3283_v43 = vsub.f32 %v15340_v7, %v10435_v42  ;;  %v3654_v18 = vmul.f32 1.442695, %v3288_v20  ;;  %v15343_v7 = vld [vmem:[#allocation31_spill] sm:$0xff]  ;;  %v15344_v20 = vld [vmem:[#allocation120_spill] sm:$0xff] }
 0x503   : > { %v7305_v51 = vpop.eup %7304  ;;  %v4392_v26 = vpack.c.bf16 %v7303_v55, %v7301_v23  ;;  %v3782_v23 = vmul.f32 1.442695, %v3352_v31 }
 0x504   : > { %v10746_v12 = vpop.f32.mrf.mxu3  ;;  %2986 = vmax.xlane.f32.xlu2 %v2985_v52  ;;  %v7307_v14 = vpop.eup %7306  ;;  %7308 = vpow2.f32 %v3654_v18 }
 0x505   : > { %15338 = vst [vmem:[#allocation41_spill] sm:$0xff] %v10746_v12  ;;  %4724 = vmatmul.bf16.gmra.mxu1 %v4392_v26  ;;  %v4374_v3 = vpack.c.bf16 %v7305_v51, %v7307_v14  ;;  %v2990_v26 = vmax.f32 %v2989_v9, %v15342_v41  ;;  %v2995_v14 = vmax.f32 %v15344_v20, %v15343_v7  ;;  %v3716_v51 = vmul.f32 1.442695, %v3319_v60 }
 0x506   : > { %7039 = vmatmul.msk.bf16.gmra.mxu2 %vm891_vm1, %v15294_v36  ;;  %v3644_v12 = vmul.f32 1.442695, %v3283_v43  ;;  %7310 = vpow2.f32 %v3782_v23  ;;  %v10777_v60 = vpop.f32.mrf.mxu1  ;;  %v15351_v23 = vld [vmem:[#allocation131_spill] sm:$0xff] }
 0x507   : > { %v10759_v55 = vpop.xlane.xlu0 %2888  ;;  %15347 = vst [vmem:[#allocation286_spill] sm:$0xff] %v10777_v60 }
 0x508   : > { %15341 = vst [vmem:[#allocation38_spill] sm:$0xff] %v10759_v55  ;;  %v3357_v32 = vsub.f32 %v15202_v33, %v10759_v55  ;;  %v10763_v52 = vpop.f32.mrf.mxu0  ;;  %v3706_v33 = vmul.f32 1.442695, %v3314_v49 }
 0x509   : > { %5082 = vmatmul.bf16.gmra.mxu3 %v4374_v3  ;;  %v2991_v8 = vsel %vm639_vm0, %v10763_v52, -inf  ;;  %v10770_v25 = vpop.f32.mrf.mxu2  ;;  %v2996_v3 = vmax.f32 %v2995_v14, %v10310_v17 }
 0x50a   : > { %v3792_v36 = vmul.f32 1.442695, %v3357_v32  ;;  %15345 = vst [vmem:[#allocation195_spill] sm:$0xff] %v10770_v25  ;;  %v2992_v31 = vmax.f32 %v2990_v26, %v2991_v8  ;;  %v7309_v9 = vpop.eup %7308  ;;  %v15350_v32 = vld [vmem:[#allocation197_spill] sm:$0xff] }
 0x50b   : > { %7099 = vmatmul.msk.bf16.gmra.mxu0 %vm891_vm1, %v9829_v11  ;;  %v2997_v26 = vmax.f32 %v2996_v3, %v15350_v32 }
 0x50c   : > { %v10772_v16 = vpop.f32.mrf.mxu3  ;;  %7312 = vpow2.f32 %v3792_v36  ;;  %2993 = vmax.xlane.f32.xlu0 %v2992_v31  ;;  %v7311_v8 = vpop.eup %7310  ;;  %v15352_v36 = vld [vmem:[#allocation124_spill] sm:$0xff] }
 0x50d   : > { %15346 = vst [vmem:[#allocation285_spill] sm:$0xff] %v10772_v16  ;;  %7314 = vpow2.f32 %v3716_v51  ;;  %v3002_v14 = vmax.f32 %v15352_v36, %v15351_v23  ;;  %v15356_v23 = vld [vmem:[#allocation42_spill] sm:$0xff] }
 0x50e   : > { %7316 = vpow2.f32 %v3644_v12  ;;  %v15353_v12 = vld [vmem:[#allocation45_spill] sm:$0xff]  ;;  %v3293_v36 = vsub.f32 %v15356_v23, %v10475_v27  ;;  %v15359_v23 = vld [vmem:[#allocation55_spill] sm:$0xff] }
 0x50f   : > { %7318 = vpow2.f32 %v3706_v33  ;;  %v10779_v43 = vpop.xlane.xlu1 %2895  ;;  %v3298_v51 = vsub.f32 %v15353_v12, %v10495_v29  ;;  %v3329_v12 = vsub.f32 %v10054_v0, %v10623_v48  ;;  %v15360_v0 = vld [vmem:[#allocation137_spill] sm:$0xff] }
 0x510   : > { %15348 = vst [vmem:[#allocation287_spill] sm:$0xff] %v10779_v43  ;;  %v10781_v18 = vpop.f32.mrf.mxu0  ;;  %v3362_v60 = vsub.f32 %v15211_v62, %v10779_v43  ;;  %v3324_v62 = vsub.f32 %v10046_v13, %v10599_v37 }
 0x511   : > { %15349 = vst [vmem:[#allocation288_spill] sm:$0xff] %v10781_v18  ;;  %v2998_v11 = vsel %vm639_vm0, %v10781_v18, -inf  ;;  %v10790_v31 = vpop.f32.mrf.mxu2  ;;  %v3003_v18 = vmax.f32 %v3002_v14, %v10326_v63  ;;  %v3674_v29 = vmul.f32 1.442695, %v3298_v51  ;;  %v3736_v13 = vmul.f32 1.442695, %v3329_v12 }
 0x512   : > { %v7313_v49 = vpop.eup %7312  ;;  %15354 = vst [vmem:[#allocation45_spill] sm:$0xff] %v10790_v31  ;;  %v2999_v33 = vmax.f32 %v2997_v26, %v2998_v11  ;;  %v15414_v63 = vld [vmem:[#allocation255_spill] sm:$0xff] }
 0x513   : > { %v7315_v16 = vpop.eup %7314  ;;  %v4397_v3 = vpack.c.bf16 %v7313_v49, %v7311_v8  ;;  %7320 = vpow2.f32 %v3674_v29  ;;  %v3339_v29 = vsub.f32 %v10072_v34, %v10669_v58 }
 0x514   : > { %v10794_v25 = vpop.f32.mrf.mxu3  ;;  %v7317_v42 = vpop.eup %7316  ;;  %3000 = vmax.xlane.f32.xlu1 %v2999_v33  ;;  %v3004_v33 = vmax.f32 %v3003_v18, %v15359_v23 }
 0x515   : > { %15355 = vst [vmem:[#allocation289_spill] sm:$0xff] %v10794_v25  ;;  %v7319_v32 = vpop.eup %7318  ;;  %4729 = vmatmul.bf16.gmra.mxu1 %v4397_v3  ;;  %v4363_v26 = vpack.c.bf16 %v7309_v9, %v7317_v42  ;;  %v3802_v25 = vmul.f32 1.442695, %v3362_v60  ;;  %v15361_v3 = vld [vmem:[#allocation128_spill] sm:$0xff]  ;;  %v3664_v9 = vmul.f32 1.442695, %v3293_v36  ;;  %v10814_v60 = vpop.f32.mrf.mxu1 }
 0x516   : > { %v4379_v11 = vpack.c.bf16 %v7315_v16, %v7319_v32  ;;  %v3009_v42 = vmax.f32 %v15361_v3, %v15360_v0  ;;  %15362 = vst [vmem:[#allocation291_spill] sm:$0xff] %v10814_v60  ;;  %v3303_v32 = vsub.f32 %v15140_v38, %v10517_v47  ;;  %v3726_v36 = vmul.f32 1.442695, %v3324_v62 }
 0x517   : > { %4883 = vmatmul.bf16.vlgmr.msra.gmra.mxu2 %v4363_v26  ;;  %v10803_v8 = vpop.xlane.xlu2 %2902  ;;  %7322 = vpow2.f32 %v3802_v25  ;;  %v3334_v38 = vsub.f32 %v10064_v45, %v10645_v53  ;;  %v15370_v45 = vld [vmem:[#allocation82_spill] sm:$0xff] }
 0x518   : > { %15357 = vst [vmem:[#allocation42_spill] sm:$0xff] %v10803_v8  ;;  %v3367_v49 = vsub.f32 %v15220_v59, %v10803_v8  ;;  %v10807_v14 = vpop.f32.mrf.mxu0  ;;  %v3010_v18 = vmax.f32 %v3009_v42, %v10342_v56  ;;  %v3684_v12 = vmul.f32 1.442695, %v3303_v32  ;;  %v15377_v56 = vld [vmem:[#allocation246_spill] sm:$0xff] }
 0x519   : > { %15358 = vst [vmem:[#allocation290_spill] sm:$0xff] %v10807_v14  ;;  %5087 = vmatmul.bf16.gmra.mxu3 %v4379_v11  ;;  %v3005_v16 = vsel %vm639_vm0, %v10807_v14, -inf  ;;  %v10818_v51 = vpop.f32.mrf.mxu2  ;;  %v15364_v11 = vld [vmem:[#allocation49_spill] sm:$0xff]  ;;  %v7321_v62 = vpop.eup %7320  ;;  %v3746_v34 = vmul.f32 1.442695, %v3334_v38 }
 0x51a   : > { %15363 = vst [vmem:[#allocation292_spill] sm:$0xff] %v10818_v51  ;;  %v3006_v59 = vmax.f32 %v3004_v33, %v3005_v16  ;;  %v3812_v26 = vmul.f32 1.442695, %v3367_v49  ;;  %v3308_v31 = vsub.f32 %v15364_v11, %v10537_v35  ;;  %v15366_v49 = vld [vmem:[#allocation200_spill] sm:$0xff]  ;;  %v15368_v16 = vld [vmem:[#allocation201_spill] sm:$0xff] }
 0x51b   : > { %7100 = vmatmul.msk.bf16.gmra.mxu0 %vm891_vm1, %v9855_v28  ;;  %v15367_v33 = vld [vmem:[#allocation132_spill] sm:$0xff]  ;;  %v3011_v11 = vmax.f32 %v3010_v18, %v15368_v16 }
 0x51c   : > { %v10823_v27 = vpop.f32.mrf.mxu3  ;;  %3007 = vmax.xlane.f32.xlu2 %v3006_v59  ;;  %7324 = vpow2.f32 %v3812_v26  ;;  %v3016_v25 = vmax.f32 %v15367_v33, %v15366_v49  ;;  %v3694_v28 = vmul.f32 1.442695, %v3308_v31  ;;  %v15371_v26 = vld [vmem:[#allocation178_spill] sm:$0xff]  ;;  %v3756_v49 = vmul.f32 1.442695, %v3339_v29 }
 0x51d   : > { %15365 = vst [vmem:[#allocation49_spill] sm:$0xff] %v10823_v27  ;;  %7326 = vpow2.f32 %v3736_v13  ;;  %v15369_v27 = vld [vmem:[#allocation87_spill] sm:$0xff]  ;;  %v15373_v13 = vld [vmem:[#allocation161_spill] sm:$0xff] }
 0x51e   : > { %7328 = vpow2.f32 %v3664_v9  ;;  %v7323_v9 = vpop.eup %7322 }
 0x51f   : > { %v2910_v42 = vpop.xlane.xlu0 %2909  ;;  %7330 = vpow2.f32 %v3726_v36  ;;  %v15374_v36 = vld [vmem:[#allocation68_spill] sm:$0xff] }
 0x520   : > { %v3372_v35 = vsub.f32 %v15369_v27, %v2910_v42  ;;  %v3373_v59 = vsub.f32 %v15370_v45, %v2910_v42  ;;  %v3374_v47 = vsub.f32 %v15371_v26, %v2910_v42  ;;  %v10837_v60 = vpop.f32.mrf.mxu0  ;;  %v3375_v32 = vsub.f32 %v15373_v13, %v2910_v42 }
 0x521   : > { %15372 = vst [vmem:[#allocation87_spill] sm:$0xff] %v10837_v60  ;;  %v3012_v51 = vsel %vm639_vm0, %v10837_v60, -inf  ;;  %v3017_v31 = vmax.f32 %v3016_v25, %v15374_v36  ;;  %v10843_v16 = vpop.f32.mrf.mxu2  ;;  %7332 = vpow2.f32 %v3684_v12  ;;  %v3376_v38 = vsub.f32 %v15377_v56, %v2910_v42  ;;  %v15380_v36 = vld [vmem:[#allocation136_spill] sm:$0xff]  ;;  %v15381_v56 = vld [vmem:[#allocation203_spill] sm:$0xff] }
 0x522   : > { %v7325_v18 = vpop.eup %7324  ;;  %v3822_v33 = vmul.f32 1.442695, %v3372_v35  ;;  %15375 = vst [vmem:[#allocation82_spill] sm:$0xff] %v10843_v16  ;;  %v10845_v27 = vpop.f32.mrf.mxu1  ;;  %v3013_v45 = vmax.f32 %v3011_v11, %v3012_v51  ;;  %v3824_v0 = vmul.f32 1.442695, %v3373_v59  ;;  %7334 = vpow2.f32 %v3694_v28  ;;  %v15379_v35 = vld [vmem:[#allocation204_spill] sm:$0xff] }
 0x523   : > { %15376 = vst [vmem:[#allocation178_spill] sm:$0xff] %v10845_v27  ;;  %v7327_v26 = vpop.eup %7326  ;;  %v4402_v13 = vpack.c.bf16 %v7325_v18, %v7323_v9  ;;  %v3826_v29 = vmul.f32 1.442695, %v3374_v47  ;;  %7336 = vpow2.f32 %v3746_v34  ;;  %v3023_v16 = vmax.f32 %v15380_v36, %v15379_v35  ;;  %v15382_v11 = vld [vmem:[#allocation71_spill] sm:$0xff] }
 0x524   : > { %v10848_v3 = vpop.f32.mrf.mxu3  ;;  %v7329_v60 = vpop.eup %7328  ;;  %3014 = vmax.xlane.f32.xlu0 %v3013_v45  ;;  %v3828_v14 = vmul.f32 1.442695, %v3375_v32  ;;  %7338 = vpow2.f32 %v3756_v49  ;;  %v3018_v42 = vmax.f32 %v3017_v31, %v15381_v56  ;;  %v15383_v28 = vld [vmem:[#allocation51_spill] sm:$0xff]  ;;  %v3830_v34 = vmul.f32 1.442695, %v3376_v38  ;;  %v15384_v32 = vld [vmem:[#allocation90_spill] sm:$0xff] }
 0x525   : > { %15378 = vst [vmem:[#allocation161_spill] sm:$0xff] %v10848_v3  ;;  %v7331_v25 = vpop.eup %7330  ;;  %4734 = vmatmul.bf16.gmra.mxu1 %v4402_v13  ;;  %v4368_v51 = vpack.c.bf16 %v7321_v62, %v7329_v60  ;;  %7340 = vpow2.f32 %v3822_v33  ;;  %v10854_v59 = vmax.f32 %v3023_v16, %v15382_v11  ;;  %v3313_v47 = vsub.f32 %v15383_v28, %v10559_v10  ;;  %v15385_v49 = vld [vmem:[#allocation86_spill] sm:$0xff]  ;;  %v15386_v62 = vld [vmem:[#allocation181_spill] sm:$0xff] }
 0x526   : > { %v4384_v12 = vpack.c.bf16 %v7327_v26, %v7331_v25  ;;  %7342 = vpow2.f32 %v3824_v0  ;;  %v15388_v26 = vld [vmem:[#allocation164_spill] sm:$0xff]  ;;  %v15389_v38 = vld [vmem:[#allocation250_spill] sm:$0xff] }
 0x527   : > { %4888 = vmatmul.bf16.gmra.mxu2 %v4368_v51  ;;  %v2917_v9 = vpop.xlane.xlu1 %2916  ;;  %v10858_v18 = vpop.eup %7332  ;;  %7344 = vpow2.f32 %v3826_v29 }
 0x528   : > { %v3377_v60 = vsub.f32 %v15384_v32, %v2917_v9  ;;  %v3378_v33 = vsub.f32 %v15385_v49, %v2917_v9  ;;  %v3379_v45 = vsub.f32 %v15386_v62, %v2917_v9  ;;  %v10863_v31 = vpop.f32.mrf.mxu0  ;;  %v10865_v16 = vpop.eup %7334  ;;  %7346 = vpow2.f32 %v3828_v14  ;;  %v15392_v14 = vld [vmem:[#allocation54_spill] sm:$0xff] }
 0x529   : > { %15387 = vst [vmem:[#allocation246_spill] sm:$0xff] %v10863_v31  ;;  %5092 = vmatmul.bf16.gmra.mxu3 %v4384_v12  ;;  %v3380_v0 = vsub.f32 %v15388_v26, %v2917_v9  ;;  %v3381_v13 = vsub.f32 %v15389_v38, %v2917_v9  ;;  %v3019_v25 = vsel %vm639_vm0, %v10863_v31, -inf  ;;  %v10871_v29 = vpop.eup %7336  ;;  %v10873_v49 = vpop.f32.mrf.mxu2  ;;  %v3318_v26 = vsub.f32 %v15392_v14, %v10577_v24  ;;  %v15393_v9 = vld [vmem:[#allocation160_spill] sm:$0xff]  ;;  %v15399_v14 = vld [vmem:[#allocation163_spill] sm:$0xff] }
 0x52a   : > { %v3832_v51 = vmul.f32 1.442695, %v3377_v60  ;;  %v3834_v28 = vmul.f32 1.442695, %v3378_v33  ;;  %v3836_v32 = vmul.f32 1.442695, %v3379_v45  ;;  %v10875_v62 = vpop.f32.mrf.mxu1  ;;  %v3020_v12 = vmax.f32 %v3018_v42, %v3019_v25  ;;  %v10877_v3 = vpop.eup %7338 }
 0x52b   : > { %15390 = vst [vmem:[#allocation51_spill] sm:$0xff] %v10873_v49  ;;  %v3344_v38 = vsub.f32 %v15393_v9, %v10687_v57  ;;  %7348 = vpow2.f32 %v3830_v34  ;;  %v3838_v10 = vmul.f32 1.442695, %v3380_v0  ;;  %v15395_v60 = vld [vmem:[#allocation112_spill] sm:$0xff]  ;;  %v7341_v33 = vpop.eup %7340  ;;  %v3840_v45 = vmul.f32 1.442695, %v3381_v13 }
 0x52c   : > { %15391 = vst [vmem:[#allocation90_spill] sm:$0xff] %v10875_v62  ;;  %v10883_v11 = vpop.f32.mrf.mxu3  ;;  %7101 = vmatmul.msk.bf16.gmra.mxu0 %vm891_vm1, %v15395_v60  ;;  %7350 = vpow2.f32 %v3832_v51  ;;  %3021 = vmax.xlane.f32.xlu1 %v3020_v12  ;;  %v10887_v42 = vpop.eup %7342  ;;  %v15397_v25 = vld [vmem:[#allocation208_spill] sm:$0xff]  ;;  %v15398_v49 = vld [vmem:[#allocation139_spill] sm:$0xff]  ;;  %v3349_v24 = vsub.f32 %v15399_v14, %v10711_v30  ;;  %v3704_v60 = vmul.f32 1.442695, %v3313_v47  ;;  %v15402_v13 = vld [vmem:[#allocation74_spill] sm:$0xff] }
 0x52d   : > { %15394 = vst [vmem:[#allocation86_spill] sm:$0xff] %v10883_v11  ;;  %v3030_v35 = vmax.f32 %v15398_v49, %v15397_v25  ;;  %7352 = vpow2.f32 %v3834_v28  ;;  %v10893_v34 = vpop.eup %7344  ;;  %v15400_v0 = vld [vmem:[#allocation207_spill] sm:$0xff]  ;;  %v3766_v12 = vmul.f32 1.442695, %v3344_v38  ;;  %v3714_v25 = vmul.f32 1.442695, %v3318_v26 }
 0x52e   : > { %15396 = vst [vmem:[#allocation181_spill] sm:$0xff] %v10887_v42  ;;  %7354 = vpow2.f32 %v3836_v32  ;;  %v3025_v9 = vmax.f32 %v10854_v59, %v15400_v0  ;;  %v10897_v11 = vpop.eup %7346  ;;  %v15403_v49 = vld [vmem:[#allocation92_spill] sm:$0xff]  ;;  %v15408_v47 = vld [vmem:[#allocation167_spill] sm:$0xff]  ;;  %v3776_v38 = vmul.f32 1.442695, %v3349_v24  ;;  %v15410_v26 = vld [vmem:[#allocation141_spill] sm:$0xff] }
 0x52f   : > { %15401 = vst [vmem:[#allocation164_spill] sm:$0xff] %v10897_v11  ;;  %v10900_v51 = vmax.f32 %v3030_v35, %v15402_v13  ;;  %7356 = vpow2.f32 %v3838_v10  ;;  %v2924_v36 = vpop.xlane.xlu2 %2923  ;;  %v15404_v28 = vld [vmem:[#allocation88_spill] sm:$0xff] }
 0x530   : > { %7358 = vpow2.f32 %v3840_v45  ;;  %v3382_v14 = vsub.f32 %v15403_v49, %v2924_v36  ;;  %v3383_v62 = vsub.f32 %v15404_v28, %v2924_v36  ;;  %v15405_v31 = vld [vmem:[#allocation184_spill] sm:$0xff]  ;;  %v10905_v56 = vpop.f32.mrf.mxu0  ;;  %v3385_v0 = vsub.f32 %v15408_v47, %v2924_v36 }
 0x531   : > { %v3384_v32 = vsub.f32 %v15405_v31, %v2924_v36  ;;  %15406 = vst [vmem:[#allocation250_spill] sm:$0xff] %v10905_v56  ;;  %v10907_v59 = vpop.eup %7348  ;;  %v3026_v35 = vsel %vm639_vm0, %v10905_v56, -inf  ;;  %v15409_v13 = vld [vmem:[#allocation212_spill] sm:$0xff]  ;;  %v10914_v49 = vpop.f32.mrf.mxu2  ;;  %7360 = vpow2.f32 %v3704_v60  ;;  %v3386_v17 = vsub.f32 %v15414_v63, %v2924_v36 }
 0x532   : > { %15407 = vst [vmem:[#allocation54_spill] sm:$0xff] %v10907_v59  ;;  %v7351_v10 = vpop.eup %7350  ;;  %v3037_v45 = vmax.f32 %v15410_v26, %v15409_v13  ;;  %v3842_v27 = vmul.f32 1.442695, %v3382_v14  ;;  %v10916_v28 = vpop.f32.mrf.mxu1  ;;  %v3027_v31 = vmax.f32 %v3025_v9, %v3026_v35  ;;  %v3844_v47 = vmul.f32 1.442695, %v3383_v62  ;;  %v15416_v14 = vld [vmem:[#allocation210_spill] sm:$0xff] }
 0x533   : > { %15411 = vst [vmem:[#allocation160_spill] sm:$0xff] %v10914_v49  ;;  %v10918_v23 = vpop.eup %7352  ;;  %v4407_v56 = vpack.c.bf16 %v7351_v10, %v7341_v33  ;;  %7362 = vpow2.f32 %v3714_v25  ;;  %v3846_v13 = vmul.f32 1.442695, %v3384_v32  ;;  %v3032_v49 = vmax.f32 %v10900_v51, %v15416_v14  ;;  %v15419_v33 = vld [vmem:[#allocation77_spill] sm:$0xff]  ;;  %v15441_v26 = vld [vmem:[#allocation190_spill] sm:$0xff] }
 0x534   : > { %15412 = vst [vmem:[#allocation112_spill] sm:$0xff] %v10916_v28  ;;  %v10921_v7 = vpop.f32.mrf.mxu3  ;;  %v10923_v24 = vpop.eup %7354  ;;  %7364 = vpow2.f32 %v3766_v12  ;;  %3028 = vmax.xlane.f32.xlu2 %v3027_v31  ;;  %v3848_v35 = vmul.f32 1.442695, %v3385_v0  ;;  %v4373_v63 = vpack.c.bf16 %v10865_v16, %v10858_v18  ;;  %v10938_v25 = vmax.f32 %v3037_v45, %v15419_v33  ;;  %v15422_v45 = vld [vmem:[#allocation14_spill] sm:$0xff]  ;;  %v15448_v28 = vld [vmem:[#allocation263_spill] sm:$0xff] }
 0x535   : > { %15413 = vst [vmem:[#allocation163_spill] sm:$0xff] %v10918_v23  ;;  %v10929_v60 = vpop.eup %7356  ;;  %4739 = vmatmul.bf16.gmra.mxu1 %v4407_v56  ;;  %7366 = vpow2.f32 %v3776_v38  ;;  %v4389_v51 = vpack.c.bf16 %v10877_v3, %v10871_v29  ;;  %v15420_v56 = vld [vmem:[#allocation56_spill] sm:$0xff]  ;;  %v3850_v18 = vmul.f32 1.442695, %v3386_v17  ;;  %v15423_v29 = vld [vmem:[#allocation187_spill] sm:$0xff]  ;;  %v15425_v17 = vld [vmem:[#allocation170_spill] sm:$0xff] }
 0x536   : > { %15415 = vst [vmem:[#allocation92_spill] sm:$0xff] %v10921_v7  ;;  %v10935_v62 = vpop.eup %7358  ;;  %7368 = vpow2.f32 %v3842_v27  ;;  %v3323_v12 = vsub.f32 %v15420_v56, %v10599_v37  ;;  %v15421_v27 = vld [vmem:[#allocation94_spill] sm:$0xff]  ;;  %v15434_v7 = vld [vmem:[#allocation143_spill] sm:$0xff] }
 0x537   : > { %15417 = vst [vmem:[#allocation88_spill] sm:$0xff] %v10929_v60  ;;  %7370 = vpow2.f32 %v3844_v47  ;;  %4893 = vmatmul.bf16.gmra.mxu2 %v4373_v63  ;;  %v2931_v16 = vpop.xlane.xlu0 %2930  ;;  %v10948_v38 = vpop.eup %7360  ;;  %v15426_v63 = vld [vmem:[#allocation259_spill] sm:$0xff] }
 0x538   : > { %15418 = vst [vmem:[#allocation184_spill] sm:$0xff] %v10935_v62  ;;  %7372 = vpow2.f32 %v3846_v13  ;;  %v3387_v10 = vsub.f32 %v15421_v27, %v2931_v16  ;;  %v3388_v3 = vsub.f32 %v15422_v45, %v2931_v16  ;;  %v3389_v31 = vsub.f32 %v15423_v29, %v2931_v16  ;;  %v10953_v0 = vpop.f32.mrf.mxu0 }
 0x539   : > { %15424 = vst [vmem:[#allocation167_spill] sm:$0xff] %v10953_v0  ;;  %5097 = vmatmul.bf16.gmra.mxu3 %v4389_v51  ;;  %v10955_v56 = vpop.eup %7362  ;;  %7374 = vpow2.f32 %v3848_v35  ;;  %v3390_v47 = vsub.f32 %v15425_v17, %v2931_v16  ;;  %v3391_v9 = vsub.f32 %v15426_v63, %v2931_v16  ;;  %v3033_v32 = vsel %vm639_vm0, %v10953_v0, -inf  ;;  %v10963_v59 = vpop.f32.mrf.mxu2  ;;  %v15429_v35 = vld [vmem:[#allocation57_spill] sm:$0xff]  ;;  %v15430_v16 = vld [vmem:[#allocation166_spill] sm:$0xff] }
 0x53a   : > { %v10961_v13 = vpop.eup %7364  ;;  %v3852_v27 = vmul.f32 1.442695, %v3387_v10  ;;  %v3854_v36 = vmul.f32 1.442695, %v3388_v3  ;;  %v3856_v45 = vmul.f32 1.442695, %v3389_v31  ;;  %v10965_v29 = vpop.f32.mrf.mxu1  ;;  %v3034_v51 = vmax.f32 %v3032_v49, %v3033_v32 }
 0x53b   : > { %15427 = vst [vmem:[#allocation255_spill] sm:$0xff] %v10963_v59  ;;  %v10967_v62 = vpop.eup %7366  ;;  %v3328_v17 = vsub.f32 %v15429_v35, %v10623_v48  ;;  %v3354_v63 = vsub.f32 %v15430_v16, %v10731_v2  ;;  %7376 = vpow2.f32 %v3850_v18  ;;  %v3858_v11 = vmul.f32 1.442695, %v3390_v47  ;;  %v15432_v10 = vld [vmem:[#allocation119_spill] sm:$0xff]  ;;  %v15433_v32 = vld [vmem:[#allocation217_spill] sm:$0xff]  ;;  %v15436_v47 = vld [vmem:[#allocation214_spill] sm:$0xff] }
 0x53c   : > { %15428 = vst [vmem:[#allocation56_spill] sm:$0xff] %v10965_v29  ;;  %v10973_v60 = vpop.f32.mrf.mxu3  ;;  %7102 = vmatmul.msk.bf16.gmra.mxu0 %vm891_vm1, %v15432_v10  ;;  %v7369_v3 = vpop.eup %7368  ;;  %7378 = vpow2.f32 %v3852_v27  ;;  %v3860_v31 = vmul.f32 1.442695, %v3391_v9  ;;  %3035 = vmax.xlane.f32.xlu0 %v3034_v51  ;;  %v3044_v37 = vmax.f32 %v15434_v7, %v15433_v32  ;;  %v15435_v35 = vld [vmem:[#allocation169_spill] sm:$0xff]  ;;  %v3039_v16 = vmax.f32 %v10938_v25, %v15436_v47  ;;  %v15438_v9 = vld [vmem:[#allocation78_spill] sm:$0xff] }
 0x53d   : > { %15431 = vst [vmem:[#allocation94_spill] sm:$0xff] %v10973_v60  ;;  %v10977_v49 = vpop.eup %7370  ;;  %v3359_v48 = vsub.f32 %v15435_v35, %v10759_v55  ;;  %7380 = vpow2.f32 %v3854_v36  ;;  %v3724_v10 = vmul.f32 1.442695, %v3323_v12  ;;  %v3734_v59 = vmul.f32 1.442695, %v3328_v17  ;;  %v15439_v7 = vld [vmem:[#allocation97_spill] sm:$0xff] }
 0x53e   : > { %v10983_v18 = vpop.eup %7372  ;;  %7382 = vpow2.f32 %v3856_v45  ;;  %v10990_v27 = vmax.f32 %v3044_v37, %v15438_v9  ;;  %v3786_v32 = vmul.f32 1.442695, %v3354_v63  ;;  %v15440_v36 = vld [vmem:[#allocation96_spill] sm:$0xff]  ;;  %v15444_v47 = vld [vmem:[#allocation173_spill] sm:$0xff]  ;;  %v15445_v17 = vld [vmem:[#allocation222_spill] sm:$0xff] }
 0x53f   : > { %v10987_v60 = vpop.eup %7374  ;;  %7384 = vpow2.f32 %v3858_v11  ;;  %v2938_v51 = vpop.xlane.xlu1 %2937  ;;  %v3796_v12 = vmul.f32 1.442695, %v3359_v48  ;;  %v15446_v63 = vld [vmem:[#allocation145_spill] sm:$0xff] }
 0x540   : > { %15437 = vst [vmem:[#allocation14_spill] sm:$0xff] %v10987_v60  ;;  %7386 = vpow2.f32 %v3860_v31  ;;  %v3392_v35 = vsub.f32 %v15439_v7, %v2938_v51  ;;  %v3393_v33 = vsub.f32 %v15440_v36, %v2938_v51  ;;  %v3394_v45 = vsub.f32 %v15441_v26, %v2938_v51  ;;  %v10995_v29 = vpop.f32.mrf.mxu0 }
 0x541   : > { %15442 = vst [vmem:[#allocation187_spill] sm:$0xff] %v10995_v29  ;;  %v10997_v25 = vpop.eup %7376  ;;  %v3395_v0 = vsub.f32 %v15444_v47, %v2938_v51  ;;  %v3040_v37 = vsel %vm639_vm0, %v10995_v29, -inf  ;;  %v3051_v31 = vmax.f32 %v15446_v63, %v15445_v17  ;;  %v11004_v7 = vpop.f32.mrf.mxu2  ;;  %7388 = vpow2.f32 %v3724_v10  ;;  %v15474_v17 = vld [vmem:[#allocation50_spill] sm:$0xff] }
 0x542   : > { %15443 = vst [vmem:[#allocation170_spill] sm:$0xff] %v10997_v25  ;;  %v7379_v11 = vpop.eup %7378  ;;  %v3862_v9 = vmul.f32 1.442695, %v3392_v35  ;;  %v11006_v36 = vpop.f32.mrf.mxu1  ;;  %v3041_v26 = vmax.f32 %v3039_v16, %v3040_v37  ;;  %v3396_v48 = vsub.f32 %v15448_v28, %v2938_v51  ;;  %v3864_v42 = vmul.f32 1.442695, %v3393_v33  ;;  %v15450_v35 = vld [vmem:[#allocation218_spill] sm:$0xff] }
 0x543   : > { %15447 = vst [vmem:[#allocation259_spill] sm:$0xff] %v11004_v7  ;;  %v11008_v14 = vpop.eup %7380  ;;  %v4412_v23 = vpack.c.bf16 %v7379_v11, %v7369_v3  ;;  %7390 = vpow2.f32 %v3734_v59  ;;  %v3866_v20 = vmul.f32 1.442695, %v3394_v45  ;;  %v3046_v7 = vmax.f32 %v10990_v27, %v15450_v35  ;;  %v15453_v51 = vld [vmem:[#allocation81_spill] sm:$0xff] }
 0x544   : > { %v11011_v47 = vpop.f32.mrf.mxu3  ;;  %v11013_v29 = vpop.eup %7382  ;;  %3042 = vmax.xlane.f32.xlu1 %v3041_v26  ;;  %7392 = vpow2.f32 %v3786_v32  ;;  %v3868_v28 = vmul.f32 1.442695, %v3395_v0  ;;  %v4378_v33 = vpack.c.bf16 %v10955_v56, %v10948_v38  ;;  %v11028_v45 = vmax.f32 %v3051_v31, %v15453_v51  ;;  %v15456_v31 = vld [vmem:[#allocation98_spill] sm:$0xff] }
 0x545   : > { %15449 = vst [vmem:[#allocation57_spill] sm:$0xff] %v11011_v47  ;;  %v11019_v10 = vpop.eup %7384  ;;  %7394 = vpow2.f32 %v3796_v12  ;;  %4744 = vmatmul.bf16.gmra.mxu1 %v4412_v23  ;;  %v4394_v32 = vpack.c.bf16 %v10967_v62, %v10961_v13  ;;  %v15454_v23 = vld [vmem:[#allocation59_spill] sm:$0xff]  ;;  %v3870_v38 = vmul.f32 1.442695, %v3396_v48  ;;  %v15457_v13 = vld [vmem:[#allocation48_spill] sm:$0xff] }
 0x546   : > { %15451 = vst [vmem:[#allocation166_spill] sm:$0xff] %v11019_v10  ;;  %v11025_v3 = vpop.eup %7386  ;;  %7396 = vpow2.f32 %v3862_v9  ;;  %v3333_v0 = vsub.f32 %v15454_v23, %v10645_v53  ;;  %v15455_v9 = vld [vmem:[#allocation99_spill] sm:$0xff] }
 0x547   : > { %15452 = vst [vmem:[#allocation119_spill] sm:$0xff] %v11025_v3  ;;  %7398 = vpow2.f32 %v3864_v42  ;;  %4898 = vmatmul.bf16.gmra.mxu2 %v4378_v33  ;;  %v2945_v56 = vpop.xlane.xlu2 %2944  ;;  %v11038_v37 = vpop.eup %7388  ;;  %v15459_v42 = vld [vmem:[#allocation176_spill] sm:$0xff]  ;;  %v15460_v33 = vld [vmem:[#allocation267_spill] sm:$0xff] }
 0x548   : > { %7400 = vpow2.f32 %v3866_v20  ;;  %v3397_v11 = vsub.f32 %v15455_v9, %v2945_v56  ;;  %v3398_v62 = vsub.f32 %v15456_v31, %v2945_v56  ;;  %v3399_v26 = vsub.f32 %v15457_v13, %v2945_v56  ;;  %v11043_v27 = vpop.f32.mrf.mxu0 }
 0x549   : > { %15458 = vst [vmem:[#allocation169_spill] sm:$0xff] %v11043_v27  ;;  %5102 = vmatmul.bf16.gmra.mxu3 %v4394_v32  ;;  %v11045_v23 = vpop.eup %7390  ;;  %7402 = vpow2.f32 %v3868_v28  ;;  %v3400_v48 = vsub.f32 %v15459_v42, %v2945_v56  ;;  %v3401_v16 = vsub.f32 %v15460_v33, %v2945_v56  ;;  %v3047_v12 = vsel %vm639_vm0, %v11043_v27, -inf  ;;  %v11053_v25 = vpop.f32.mrf.mxu2  ;;  %v15463_v28 = vld [vmem:[#allocation62_spill] sm:$0xff]  ;;  %v15464_v56 = vld [vmem:[#allocation172_spill] sm:$0xff] }
 0x54a   : > { %v11051_v20 = vpop.eup %7392  ;;  %v3872_v9 = vmul.f32 1.442695, %v3397_v11  ;;  %v3874_v59 = vmul.f32 1.442695, %v3398_v62  ;;  %v3876_v31 = vmul.f32 1.442695, %v3399_v26  ;;  %v11055_v13 = vpop.f32.mrf.mxu1  ;;  %v3048_v32 = vmax.f32 %v3046_v7, %v3047_v12 }
 0x54b   : > { %15461 = vst [vmem:[#allocation97_spill] sm:$0xff] %v11053_v25  ;;  %v11057_v3 = vpop.eup %7394  ;;  %v3338_v42 = vsub.f32 %v15463_v28, %v10669_v58  ;;  %v3364_v33 = vsub.f32 %v15464_v56, %v10779_v43  ;;  %7404 = vpow2.f32 %v3870_v38  ;;  %v3878_v60 = vmul.f32 1.442695, %v3400_v48  ;;  %v15466_v11 = vld [vmem:[#allocation127_spill] sm:$0xff]  ;;  %v15468_v56 = vld [vmem:[#allocation24_spill] sm:$0xff]  ;;  %v15472_v25 = vld [vmem:[#allocation101_spill] sm:$0xff] }
 0x54c   : > { %15462 = vst [vmem:[#allocation96_spill] sm:$0xff] %v11055_v13  ;;  %v11063_v10 = vpop.f32.mrf.mxu3  ;;  %7103 = vmatmul.msk.bf16.gmra.mxu0 %vm891_vm1, %v15466_v11  ;;  %v7397_v62 = vpop.eup %7396  ;;  %7406 = vpow2.f32 %v3872_v9  ;;  %v3880_v26 = vmul.f32 1.442695, %v3401_v16  ;;  %3049 = vmax.xlane.f32.xlu2 %v3048_v32  ;;  %v15467_v12 = vld [vmem:[#allocation175_spill] sm:$0xff]  ;;  %v15471_v16 = vld [vmem:[#allocation221_spill] sm:$0xff] }
 0x54d   : > { %15465 = vst [vmem:[#allocation190_spill] sm:$0xff] %v11063_v10  ;;  %v11067_v7 = vpop.eup %7398  ;;  %v3369_v47 = vsub.f32 %v15467_v12, %v10803_v8  ;;  %7408 = vpow2.f32 %v3874_v59  ;;  %v15469_v38 = vld [vmem:[#allocation147_spill] sm:$0xff]  ;;  %v3744_v10 = vmul.f32 1.442695, %v3333_v0  ;;  %v3806_v11 = vmul.f32 1.442695, %v3364_v33 }
 0x54e   : > { %v11071_v28 = vpop.eup %7400  ;;  %v3058_v48 = vmax.f32 %v15469_v38, %v15468_v56  ;;  %7410 = vpow2.f32 %v3876_v31  ;;  %v3053_v32 = vmax.f32 %v11028_v45, %v15471_v16  ;;  %v3754_v53 = vmul.f32 1.442695, %v3338_v42  ;;  %v15473_v59 = vld [vmem:[#allocation100_spill] sm:$0xff] }
 0x54f   : > { %v11075_v58 = vpop.eup %7402  ;;  %7412 = vpow2.f32 %v3878_v60  ;;  %v2952_v9 = vpop.xlane.xlu0 %2951  ;;  %v3816_v33 = vmul.f32 1.442695, %v3369_v47  ;;  %v15476_v45 = vld [vmem:[#allocation84_spill] sm:$0xff] }
 0x550   : > { %15470 = vst [vmem:[#allocation173_spill] sm:$0xff] %v11075_v58  ;;  %7414 = vpow2.f32 %v3880_v26  ;;  %v3402_v12 = vsub.f32 %v15472_v25, %v2952_v9  ;;  %v3403_v51 = vsub.f32 %v15473_v59, %v2952_v9  ;;  %v3404_v63 = vsub.f32 %v15474_v17, %v2952_v9  ;;  %v11082_v13 = vpop.f32.mrf.mxu0 }
 0x551   : > { %v11084_v31 = vpop.eup %7404  ;;  %v3405_v0 = vsub.f32 %v15295_v54, %v2952_v9  ;;  %v3054_v60 = vsel %vm639_vm0, %v11082_v13, -inf  ;;  %v3059_v42 = vmax.f32 %v3058_v48, %v15476_v45  ;;  %v11090_v38 = vpop.f32.mrf.mxu2  ;;  %7416 = vpow2.f32 %v3744_v10 }
 0x552   : > { %15475 = vst [vmem:[#allocation263_spill] sm:$0xff] %v11084_v31  ;;  %v7407_v56 = vpop.eup %7406  ;;  %v3882_v26 = vmul.f32 1.442695, %v3402_v12  ;;  %v11092_v25 = vpop.f32.mrf.mxu1  ;;  %v3055_v59 = vmax.f32 %v3053_v32, %v3054_v60  ;;  %v3406_v16 = vsub.f32 %v10629_v50, %v2952_v9  ;;  %v3884_v27 = vmul.f32 1.442695, %v3403_v51 }
 0x553   : > { %15477 = vst [vmem:[#allocation59_spill] sm:$0xff] %v11090_v38  ;;  %v11094_v17 = vpop.eup %7408  ;;  %v4417_v35 = vpack.c.bf16 %v7407_v56, %v7397_v62  ;;  %7418 = vpow2.f32 %v3754_v53  ;;  %v3886_v48 = vmul.f32 1.442695, %v3404_v63  ;;  %v3888_v10 = vmul.f32 1.442695, %v3405_v0  ;;  %v15481_v62 = vld [vmem:[#allocation228_spill] sm:$0xff] }
 0x554   : > { %v11097_v54 = vpop.f32.mrf.mxu3  ;;  %v11099_v47 = vpop.eup %7410  ;;  %7420 = vpow2.f32 %v3806_v11  ;;  %3056 = vmax.xlane.f32.xlu0 %v3055_v59  ;;  %v4383_v50 = vpack.c.bf16 %v11045_v23, %v11038_v37  ;;  %v15482_v56 = vld [vmem:[#allocation149_spill] sm:$0xff]  ;;  %v4399_v11 = vpack.c.bf16 %v11057_v3, %v11051_v20  ;;  %v15483_v23 = vld [vmem:[#allocation224_spill] sm:$0xff]  ;;  %v15485_v59 = vld [vmem:[#allocation102_spill] sm:$0xff] }
 0x555   : > { %15478 = vst [vmem:[#allocation99_spill] sm:$0xff] %v11097_v54  ;;  %v11103_v38 = vpop.eup %7412  ;;  %4749 = vmatmul.bf16.gmra.mxu1 %v4417_v35  ;;  %7422 = vpow2.f32 %v3816_v33  ;;  %v3065_v63 = vmax.f32 %v15482_v56, %v15481_v62  ;;  %v3890_v35 = vmul.f32 1.442695, %v3406_v16  ;;  %v3060_v32 = vmax.f32 %v3059_v42, %v15483_v23  ;;  %v15484_v33 = vld [vmem:[#allocation26_spill] sm:$0xff]  ;;  %v15486_v3 = vld [vmem:[#allocation53_spill] sm:$0xff]  ;;  %v15495_v62 = vld [vmem:[#allocation135_spill] sm:$0xff] }
 0x556   : > { %15479 = vst [vmem:[#allocation98_spill] sm:$0xff] %v11103_v38  ;;  %v11109_v53 = vpop.eup %7414  ;;  %7424 = vpow2.f32 %v3882_v26  ;;  %v15488_v16 = vld [vmem:[#allocation182_spill] sm:$0xff]  ;;  %v15504_v56 = vld [vmem:[#allocation247_spill] sm:$0xff] }
 0x557   : > { %15480 = vst [vmem:[#allocation48_spill] sm:$0xff] %v11109_v53  ;;  %7426 = vpow2.f32 %v3884_v27  ;;  %4903 = vmatmul.bf16.gmra.mxu2 %v4383_v50  ;;  %v2959_v37 = vpop.xlane.xlu1 %2958  ;;  %v11120_v60 = vpop.eup %7416  ;;  %v15489_v50 = vld [vmem:[#allocation273_spill] sm:$0xff] }
 0x558   : > { %7428 = vpow2.f32 %v3886_v48  ;;  %v3407_v26 = vsub.f32 %v15484_v33, %v2959_v37  ;;  %v3408_v12 = vsub.f32 %v15485_v59, %v2959_v37  ;;  %v3409_v20 = vsub.f32 %v15486_v3, %v2959_v37  ;;  %v11125_v51 = vpop.f32.mrf.mxu0 }
 0x559   : > { %15487 = vst [vmem:[#allocation176_spill] sm:$0xff] %v11125_v51  ;;  %5107 = vmatmul.bf16.gmra.mxu3 %v4399_v11  ;;  %v11127_v27 = vpop.eup %7418  ;;  %7430 = vpow2.f32 %v3888_v10  ;;  %v3410_v42 = vsub.f32 %v15488_v16, %v2959_v37  ;;  %v3411_v9 = vsub.f32 %v15489_v50, %v2959_v37  ;;  %v3061_v0 = vsel %vm639_vm0, %v11125_v51, -inf  ;;  %v11135_v53 = vpop.f32.mrf.mxu2  ;;  %v15492_v10 = vld [vmem:[#allocation243_spill] sm:$0xff]  ;;  %v15493_v16 = vld [vmem:[#allocation64_spill] sm:$0xff] }
 0x55a   : > { %v11133_v48 = vpop.eup %7420  ;;  %v3892_v33 = vmul.f32 1.442695, %v3407_v26  ;;  %v3894_v31 = vmul.f32 1.442695, %v3408_v12  ;;  %v3896_v59 = vmul.f32 1.442695, %v3409_v20  ;;  %v11137_v3 = vpop.f32.mrf.mxu1  ;;  %v3062_v11 = vmax.f32 %v3060_v32, %v3061_v0 }
 0x55b   : > { %15490 = vst [vmem:[#allocation267_spill] sm:$0xff] %v11135_v53  ;;  %v11139_v58 = vpop.eup %7422  ;;  %v3066_v38 = vmax.f32 %v3065_v63, %v15492_v10  ;;  %v3343_v37 = vsub.f32 %v15493_v16, %v10687_v57  ;;  %7432 = vpow2.f32 %v3890_v35  ;;  %v3898_v50 = vmul.f32 1.442695, %v3410_v42  ;;  %v15496_v32 = vld [vmem:[#allocation35_spill] sm:$0xff] }
 0x55c   : > { %15491 = vst [vmem:[#allocation62_spill] sm:$0xff] %v11137_v3  ;;  %v11144_v54 = vpop.f32.mrf.mxu3  ;;  %7104 = vmatmul.msk.bf16.gmra.mxu0 %vm891_vm1, %v15495_v62  ;;  %v7425_v12 = vpop.eup %7424  ;;  %7434 = vpow2.f32 %v3892_v33  ;;  %v3900_v26 = vmul.f32 1.442695, %v3411_v9  ;;  %3063 = vmax.xlane.f32.xlu1 %v3062_v11  ;;  %v3348_v0 = vsub.f32 %v15496_v32, %v10711_v30  ;;  %v15499_v33 = vld [vmem:[#allocation105_spill] sm:$0xff]  ;;  %v15501_v32 = vld [vmem:[#allocation230_spill] sm:$0xff] }
 0x55d   : > { %15494 = vst [vmem:[#allocation172_spill] sm:$0xff] %v11144_v54  ;;  %v11148_v20 = vpop.eup %7426  ;;  %7436 = vpow2.f32 %v3894_v31  ;;  %v3764_v42 = vmul.f32 1.442695, %v3343_v37  ;;  %v15498_v54 = vld [vmem:[#allocation226_spill] sm:$0xff] }
 0x55e   : > { %v11152_v63 = vpop.eup %7428  ;;  %7438 = vpow2.f32 %v3896_v59  ;;  %v3067_v62 = vmax.f32 %v3066_v38, %v15498_v54  ;;  %v15502_v59 = vld [vmem:[#allocation151_spill] sm:$0xff]  ;;  %v3774_v38 = vmul.f32 1.442695, %v3348_v0 }
 0x55f   : > { %v11154_v35 = vpop.eup %7430  ;;  %7440 = vpow2.f32 %v3898_v50  ;;  %v2966_v16 = vpop.xlane.xlu2 %2965  ;;  %v3072_v30 = vmax.f32 %v15502_v59, %v15501_v32 }
 0x560   : > { %15497 = vst [vmem:[#allocation127_spill] sm:$0xff] %v11154_v35  ;;  %7442 = vpow2.f32 %v3900_v26  ;;  %v3412_v9 = vsub.f32 %v15306_v21, %v2966_v16  ;;  %v3413_v11 = vsub.f32 %v15499_v33, %v2966_v16  ;;  %v3414_v57 = vsub.f32 %v10228_v5, %v2966_v16  ;;  %v11160_v53 = vpop.f32.mrf.mxu0 }
 0x561   : > { %v11162_v31 = vpop.eup %7432  ;;  %v3415_v37 = vsub.f32 %v15311_v22, %v2966_v16  ;;  %v3068_v50 = vsel %vm639_vm0, %v11160_v53, -inf  ;;  %v11169_v21 = vpop.f32.mrf.mxu2  ;;  %v3073_v3 = vmax.f32 %v3072_v30, %v15504_v56  ;;  %v3416_v51 = vsub.f32 %v10673_v6, %v2966_v16  ;;  %v15508_v16 = vld [vmem:[#allocation65_spill] sm:$0xff] }
 0x562   : > { %15500 = vst [vmem:[#allocation175_spill] sm:$0xff] %v11162_v31  ;;  %v7435_v26 = vpop.eup %7434  ;;  %v3902_v54 = vmul.f32 1.442695, %v3412_v9  ;;  %v11171_v33 = vpop.f32.mrf.mxu1  ;;  %v3069_v5 = vmax.f32 %v3067_v62, %v3068_v50  ;;  %v3904_v32 = vmul.f32 1.442695, %v3413_v11  ;;  %7444 = vpow2.f32 %v3764_v42  ;;  %v15509_v42 = vld [vmem:[#allocation153_spill] sm:$0xff] }
 0x563   : > { %15503 = vst [vmem:[#allocation101_spill] sm:$0xff] %v11169_v21  ;;  %v11173_v10 = vpop.eup %7436  ;;  %v4422_v22 = vpack.c.bf16 %v7435_v26, %v7425_v12  ;;  %v3906_v0 = vmul.f32 1.442695, %v3414_v57  ;;  %v3908_v62 = vmul.f32 1.442695, %v3415_v37  ;;  %v4388_v30 = vpack.c.bf16 %v11127_v27, %v11120_v60  ;;  %v15510_v27 = vld [vmem:[#allocation229_spill] sm:$0xff] }
 0x564   : > { %v11177_v59 = vpop.f32.mrf.mxu3  ;;  %v11179_v23 = vpop.eup %7438  ;;  %3070 = vmax.xlane.f32.xlu2 %v3069_v5  ;;  %7446 = vpow2.f32 %v3774_v38  ;;  %v3079_v57 = vmax.f32 %v15509_v42, %v15508_v16  ;;  %v4404_v11 = vpack.c.bf16 %v11139_v58, %v11133_v48  ;;  %v3910_v50 = vmul.f32 1.442695, %v3416_v51  ;;  %v15512_v48 = vld [vmem:[#allocation188_spill] sm:$0xff] }
 0x565   : > { %15505 = vst [vmem:[#allocation100_spill] sm:$0xff] %v11177_v59  ;;  %v11183_v21 = vpop.eup %7440  ;;  %4754 = vmatmul.bf16.gmra.mxu1 %v4422_v22  ;;  %7448 = vpow2.f32 %v3902_v54  ;;  %v3074_v38 = vmax.f32 %v3073_v3, %v15510_v27  ;;  %v15511_v22 = vld [vmem:[#allocation46_spill] sm:$0xff] }
 0x566   : > { %15506 = vst [vmem:[#allocation50_spill] sm:$0xff] %v11183_v21  ;;  %v11189_v12 = vpop.eup %7442  ;;  %7450 = vpow2.f32 %v3904_v32  ;;  %v15513_v32 = vld [vmem:[#allocation277_spill] sm:$0xff] }
 0x567   : > { %15507 = vst [vmem:[#allocation84_spill] sm:$0xff] %v11189_v12  ;;  %4908 = vmatmul.bf16.gmra.mxu2 %v4388_v30  ;;  %v2973_v60 = vpop.xlane.xlu0 %2972  ;;  %7452 = vpow2.f32 %v3906_v0 }
 0x568   : > { %v3417_v5 = vsub.f32 %v15313_v19, %v2973_v60  ;;  %v3418_v54 = vsub.f32 %v15312_v1, %v2973_v60  ;;  %v3419_v9 = vsub.f32 %v15511_v22, %v2973_v60  ;;  %v11203_v58 = vpop.f32.mrf.mxu0  ;;  %7454 = vpow2.f32 %v3908_v62  ;;  %v11209_v37 = vpop.eup %7444 }
 0x569   : > { %5112 = vmatmul.bf16.gmra.mxu3 %v4404_v11  ;;  %v3420_v51 = vsub.f32 %v15512_v48, %v2973_v60  ;;  %v3421_v30 = vsub.f32 %v15513_v32, %v2973_v60  ;;  %v3075_v3 = vsel %vm639_vm0, %v11203_v58, -inf  ;;  %v11211_v6 = vpop.f32.mrf.mxu2  ;;  %v15515_v11 = vld [vmem:[#allocation251_spill] sm:$0xff]  ;;  %v15516_v48 = vld [vmem:[#allocation70_spill] sm:$0xff]  ;;  %7456 = vpow2.f32 %v3910_v50  ;;  %v15517_v32 = vld [vmem:[#allocation28_spill] sm:$0xff] }
 0x56a   : > { %v3912_v0 = vmul.f32 1.442695, %v3417_v5  ;;  %v3914_v26 = vmul.f32 1.442695, %v3418_v54  ;;  %v3916_v19 = vmul.f32 1.442695, %v3419_v9  ;;  %v11213_v1 = vpop.f32.mrf.mxu1  ;;  %v3076_v22 = vmax.f32 %v3074_v38, %v3075_v3  ;;  %v7447_v31 = vpop.eup %7446 }
 0x56b   : > { %15514 = vst [vmem:[#allocation26_spill] sm:$0xff] %v11211_v6  ;;  %v3080_v62 = vmax.f32 %v3079_v57, %v15515_v11  ;;  %v3353_v12 = vsub.f32 %v15516_v48, %v10731_v2  ;;  %v3918_v60 = vmul.f32 1.442695, %v3420_v51  ;;  %v7449_v5 = vpop.eup %7448  ;;  %v3920_v9 = vmul.f32 1.442695, %v3421_v30  ;;  %v15518_v38 = vld [vmem:[#allocation72_spill] sm:$0xff] }
 0x56c   : > { %7105 = vmatmul.msk.bf16.gmra.mxu0 %vm891_vm1, %v15517_v32  ;;  %v11220_v35 = vpop.f32.mrf.mxu3  ;;  %7458 = vpow2.f32 %v3912_v0  ;;  %3077 = vmax.xlane.f32.xlu0 %v3076_v22  ;;  %v11222_v54 = vpop.eup %7450  ;;  %v3358_v3 = vsub.f32 %v15518_v38, %v10759_v55  ;;  %v15520_v48 = vld [vmem:[#allocation231_spill] sm:$0xff]  ;;  %v15523_v38 = vld [vmem:[#allocation237_spill] sm:$0xff] }
 0x56d   : > { %7460 = vpow2.f32 %v3914_v26  ;;  %v11226_v57 = vpop.eup %7452  ;;  %v3081_v32 = vmax.f32 %v3080_v62, %v15520_v48  ;;  %v3784_v21 = vmul.f32 1.442695, %v3353_v12  ;;  %v15526_v48 = vld [vmem:[#allocation256_spill] sm:$0xff] }
 0x56e   : > { %7462 = vpow2.f32 %v3916_v19  ;;  %v11228_v50 = vpop.eup %7454  ;;  %v15524_v19 = vld [vmem:[#allocation155_spill] sm:$0xff]  ;;  %v3794_v2 = vmul.f32 1.442695, %v3358_v3 }
 0x56f   : > { %15519 = vst [vmem:[#allocation102_spill] sm:$0xff] %v11228_v50  ;;  %7464 = vpow2.f32 %v3918_v60  ;;  %v2980_v51 = vpop.xlane.xlu1 %2979  ;;  %v11236_v26 = vpop.eup %7456  ;;  %v3086_v55 = vmax.f32 %v15524_v19, %v15523_v38 }
 0x570   : > { %7466 = vpow2.f32 %v3920_v9  ;;  %v3422_v30 = vsub.f32 %v15321_v39, %v2980_v51  ;;  %v3423_v0 = vsub.f32 %v15320_v15, %v2980_v51  ;;  %v3424_v22 = vsub.f32 %v10260_v40, %v2980_v51  ;;  %v11234_v59 = vpop.f32.mrf.mxu0  ;;  %15522 = vst [vmem:[#allocation182_spill] sm:$0xff] %v11236_v26 }
 0x571   : > { %15521 = vst [vmem:[#allocation53_spill] sm:$0xff] %v11234_v59  ;;  %v3425_v60 = vsub.f32 %v15325_v44, %v2980_v51  ;;  %v3082_v12 = vsel %vm639_vm0, %v11234_v59, -inf  ;;  %v11243_v39 = vpop.f32.mrf.mxu2  ;;  %v3087_v11 = vmax.f32 %v3086_v55, %v15526_v48  ;;  %v3426_v16 = vsub.f32 %v10715_v46, %v2980_v51  ;;  %v15534_v46 = vld [vmem:[#allocation206_spill] sm:$0xff] }
 0x572   : > { %v7459_v62 = vpop.eup %7458  ;;  %v3922_v9 = vmul.f32 1.442695, %v3422_v30  ;;  %15525 = vst [vmem:[#allocation273_spill] sm:$0xff] %v11243_v39  ;;  %v11245_v15 = vpop.f32.mrf.mxu1  ;;  %v3083_v40 = vmax.f32 %v3081_v32, %v3082_v12  ;;  %v3924_v38 = vmul.f32 1.442695, %v3423_v0  ;;  %7468 = vpow2.f32 %v3784_v21  ;;  %v15530_v0 = vld [vmem:[#allocation157_spill] sm:$0xff] }
 0x573   : > { %v11247_v6 = vpop.eup %7460  ;;  %v4427_v44 = vpack.c.bf16 %v7459_v62, %v7449_v5  ;;  %v3926_v59 = vmul.f32 1.442695, %v3424_v22  ;;  %7470 = vpow2.f32 %v3794_v2  ;;  %v3928_v32 = vmul.f32 1.442695, %v3425_v60  ;;  %v15529_v5 = vld [vmem:[#allocation242_spill] sm:$0xff]  ;;  %v15531_v60 = vld [vmem:[#allocation233_spill] sm:$0xff] }
 0x574   : > { %v11251_v3 = vpop.f32.mrf.mxu3  ;;  %v11253_v19 = vpop.eup %7462  ;;  %3084 = vmax.xlane.f32.xlu1 %v3083_v40  ;;  %v4393_v55 = vpack.c.bf16 %v7447_v31, %v11209_v37  ;;  %v3093_v22 = vmax.f32 %v15530_v0, %v15529_v5  ;;  %7472 = vpow2.f32 %v3922_v9  ;;  %v3930_v12 = vmul.f32 1.442695, %v3426_v16  ;;  %v15532_v37 = vld [vmem:[#allocation113_spill] sm:$0xff] }
 0x575   : > { %v11257_v39 = vpop.eup %7464  ;;  %4759 = vmatmul.bf16.gmra.mxu1 %v4427_v44  ;;  %7474 = vpow2.f32 %v3924_v38  ;;  %v3088_v62 = vmax.f32 %v3087_v11, %v15531_v60  ;;  %v15533_v44 = vld [vmem:[#allocation43_spill] sm:$0xff]  ;;  %v15536_v38 = vpack.c.bf16 %v10923_v24, %v10893_v34  ;;  %v15537_v16 = vld [vmem:[#allocation193_spill] sm:$0xff]  ;;  %v15541_v24 = vld [vmem:[#allocation260_spill] sm:$0xff] }
 0x576   : > { %15527 = vst [vmem:[#allocation64_spill] sm:$0xff] %v11257_v39  ;;  %v11262_v51 = vpop.eup %7466  ;;  %7476 = vpow2.f32 %v3926_v59  ;;  %v15538_v11 = vld [vmem:[#allocation283_spill] sm:$0xff] }
 0x577   : > { %15528 = vst [vmem:[#allocation135_spill] sm:$0xff] %v11262_v51  ;;  %4913 = vmatmul.bf16.gmra.mxu2 %v4393_v55  ;;  %v2987_v2 = vpop.xlane.xlu2 %2986  ;;  %7478 = vpow2.f32 %v3928_v32  ;;  %v3094_v32 = vmax.f32 %v3093_v22, %v15541_v24 }
 0x578   : > { %v3427_v40 = vsub.f32 %v15532_v37, %v2987_v2  ;;  %v3428_v30 = vsub.f32 %v15533_v44, %v2987_v2  ;;  %v3429_v5 = vsub.f32 %v15534_v46, %v2987_v2  ;;  %v11274_v9 = vpop.f32.mrf.mxu0  ;;  %v3430_v55 = vsub.f32 %v15537_v16, %v2987_v2  ;;  %v11283_v31 = vpop.eup %7468 }
 0x579   : > { %15535 = vst [vmem:[#allocation35_spill] sm:$0xff] %v11274_v9  ;;  %5117 = vmatmul.bf16.gmra.mxu3 %v15536_v38  ;;  %v3431_v21 = vsub.f32 %v15538_v11, %v2987_v2  ;;  %v3089_v59 = vsel %vm639_vm0, %v11274_v9, -inf  ;;  %v11285_v46 = vpop.f32.mrf.mxu2  ;;  %v7471_v34 = vpop.eup %7470  ;;  %v15542_v38 = vld [vmem:[#allocation76_spill] sm:$0xff]  ;;  %7480 = vpow2.f32 %v3930_v12  ;;  %v15543_v11 = vld [vmem:[#allocation33_spill] sm:$0xff] }
 0x57a   : > { %v3932_v37 = vmul.f32 1.442695, %v3427_v40  ;;  %v3934_v44 = vmul.f32 1.442695, %v3428_v30  ;;  %v3936_v26 = vmul.f32 1.442695, %v3429_v5  ;;  %v11287_v51 = vpop.f32.mrf.mxu1  ;;  %v3090_v50 = vmax.f32 %v3088_v62, %v3089_v59  ;;  %v7473_v30 = vpop.eup %7472 }
 0x57b   : > { %15539 = vst [vmem:[#allocation105_spill] sm:$0xff] %v11285_v46  ;;  %v3363_v16 = vsub.f32 %v15542_v38, %v10779_v43  ;;  %v3938_v2 = vmul.f32 1.442695, %v3430_v55  ;;  %v3940_v5 = vmul.f32 1.442695, %v3431_v21  ;;  %v11296_v40 = vpop.eup %7474  ;;  %v15545_v62 = vld [vmem:[#allocation79_spill] sm:$0xff] }
 0x57c   : > { %15540 = vst [vmem:[#allocation247_spill] sm:$0xff] %v11287_v51  ;;  %7106 = vmatmul.msk.bf16.gmra.mxu0 %vm891_vm1, %v15543_v11  ;;  %v11294_v39 = vpop.f32.mrf.mxu3  ;;  %7482 = vpow2.f32 %v3932_v37  ;;  %3091 = vmax.xlane.f32.xlu2 %v3090_v50  ;;  %v3368_v59 = vsub.f32 %v15545_v62, %v10803_v8  ;;  %v11300_v22 = vpop.eup %7476  ;;  %v15547_v11 = vld [vmem:[#allocation236_spill] sm:$0xff]  ;;  %v15548_v50 = vld [vmem:[#allocation122_spill] sm:$0xff]  ;;  %v15556_v51 = vld [vmem:[#allocation265_spill] sm:$0xff] }
 0x57d   : > { %15544 = vst [vmem:[#allocation153_spill] sm:$0xff] %v11296_v40  ;;  %7484 = vpow2.f32 %v3934_v44  ;;  %v11302_v12 = vpop.eup %7478  ;;  %v3804_v55 = vmul.f32 1.442695, %v3363_v16  ;;  %v3095_v43 = vmax.f32 %v3094_v32, %v15547_v11  ;;  %v15551_v62 = vld [vmem:[#allocation248_spill] sm:$0xff] }
 0x57e   : > { %7486 = vpow2.f32 %v3936_v26  ;;  %15546 = vst [vmem:[#allocation229_spill] sm:$0xff] %v11302_v12  ;;  %v15552_v26 = vld [vmem:[#allocation159_spill] sm:$0xff]  ;;  %v3814_v32 = vmul.f32 1.442695, %v3368_v59 }
 0x57f   : > { %7488 = vpow2.f32 %v3938_v2  ;;  %v2994_v38 = vpop.xlane.xlu0 %2993  ;;  %v11310_v44 = vpop.eup %7480  ;;  %v3100_v8 = vmax.f32 %v15552_v26, %v15551_v62 }
 0x580   : > { %7490 = vpow2.f32 %v3940_v5  ;;  %v3432_v21 = vsub.f32 %v15335_v61, %v2994_v38  ;;  %v3433_v37 = vsub.f32 %v15548_v50, %v2994_v38  ;;  %v3434_v46 = vsub.f32 %v10294_v4, %v2994_v38  ;;  %v11308_v24 = vpop.f32.mrf.mxu0  ;;  %15550 = vst [vmem:[#allocation188_spill] sm:$0xff] %v11310_v44 }
 0x581   : > { %15549 = vst [vmem:[#allocation46_spill] sm:$0xff] %v11308_v24  ;;  %v3435_v16 = vsub.f32 %v15342_v41, %v2994_v38  ;;  %v3096_v2 = vsel %vm639_vm0, %v11308_v24, -inf  ;;  %v11317_v61 = vpop.f32.mrf.mxu2  ;;  %v3101_v9 = vmax.f32 %v3100_v8, %v15556_v51  ;;  %v3436_v60 = vsub.f32 %v10763_v52, %v2994_v38  ;;  %v15564_v52 = vld [vmem:[#allocation213_spill] sm:$0xff] }
 0x582   : > { %v7483_v5 = vpop.eup %7482  ;;  %v3942_v11 = vmul.f32 1.442695, %v3432_v21  ;;  %15553 = vst [vmem:[#allocation277_spill] sm:$0xff] %v11317_v61  ;;  %v11319_v50 = vpop.f32.mrf.mxu1  ;;  %v3097_v4 = vmax.f32 %v3095_v43, %v3096_v2  ;;  %v3944_v62 = vmul.f32 1.442695, %v3433_v37  ;;  %7492 = vpow2.f32 %v3804_v55  ;;  %v15560_v37 = vld [vmem:[#allocation162_spill] sm:$0xff] }
 0x583   : > { %15554 = vst [vmem:[#allocation70_spill] sm:$0xff] %v11319_v50  ;;  %v11321_v0 = vpop.eup %7484  ;;  %v4432_v41 = vpack.c.bf16 %v7483_v5, %v7473_v30  ;;  %v3946_v59 = vmul.f32 1.442695, %v3434_v46  ;;  %v3948_v43 = vmul.f32 1.442695, %v3435_v16  ;;  %v4398_v8 = vpack.c.bf16 %v7471_v34, %v11283_v31  ;;  %v15559_v30 = vld [vmem:[#allocation253_spill] sm:$0xff] }
 0x584   : > { %15555 = vst [vmem:[#allocation28_spill] sm:$0xff] %v11321_v0  ;;  %v11325_v26 = vpop.f32.mrf.mxu3  ;;  %v11327_v48 = vpop.eup %7486  ;;  %3098 = vmax.xlane.f32.xlu0 %v3097_v4  ;;  %7494 = vpow2.f32 %v3814_v32  ;;  %v3107_v55 = vmax.f32 %v15560_v37, %v15559_v30  ;;  %v3950_v2 = vmul.f32 1.442695, %v3436_v60  ;;  %v15561_v5 = vld [vmem:[#allocation240_spill] sm:$0xff]  ;;  %v15567_v60 = vld [vmem:[#allocation197_spill] sm:$0xff]  ;;  %v15588_v50 = vld [vmem:[#allocation290_spill] sm:$0xff] }
 0x585   : > { %v11331_v61 = vpop.eup %7488  ;;  %4764 = vmatmul.bf16.gmra.mxu1 %v4432_v41  ;;  %7496 = vpow2.f32 %v3942_v11  ;;  %v3102_v4 = vmax.f32 %v3101_v9, %v15561_v5  ;;  %v15562_v34 = vld [vmem:[#allocation120_spill] sm:$0xff]  ;;  %v15563_v41 = vld [vmem:[#allocation31_spill] sm:$0xff]  ;;  %v15582_v37 = vld [vmem:[#allocation165_spill] sm:$0xff] }
 0x586   : > { %15557 = vst [vmem:[#allocation72_spill] sm:$0xff] %v11331_v61  ;;  %v11336_v38 = vpop.eup %7490  ;;  %7498 = vpow2.f32 %v3944_v62  ;;  %v15566_v62 = vpack.c.bf16 %v11013_v29, %v10983_v18  ;;  %v15568_v9 = vld [vmem:[#allocation288_spill] sm:$0xff]  ;;  %v15587_v5 = vld [vmem:[#allocation179_spill] sm:$0xff] }
 0x587   : > { %15558 = vst [vmem:[#allocation113_spill] sm:$0xff] %v11336_v38  ;;  %4918 = vmatmul.bf16.gmra.mxu2 %v4398_v8  ;;  %v3001_v16 = vpop.xlane.xlu1 %3000  ;;  %7500 = vpow2.f32 %v3946_v59  ;;  %v15571_v29 = vld [vmem:[#allocation268_spill] sm:$0xff] }
 0x588   : > { %v3437_v32 = vsub.f32 %v15562_v34, %v3001_v16  ;;  %v3438_v21 = vsub.f32 %v15563_v41, %v3001_v16  ;;  %v3439_v30 = vsub.f32 %v15564_v52, %v3001_v16  ;;  %v11348_v11 = vpop.f32.mrf.mxu0  ;;  %7502 = vpow2.f32 %v3948_v43  ;;  %v7493_v31 = vpop.eup %7492 }
 0x589   : > { %15565 = vst [vmem:[#allocation43_spill] sm:$0xff] %v11348_v11  ;;  %5122 = vmatmul.bf16.gmra.mxu3 %v15566_v62  ;;  %v3440_v8 = vsub.f32 %v15567_v60, %v3001_v16  ;;  %v3441_v46 = vsub.f32 %v15568_v9, %v3001_v16  ;;  %v3103_v59 = vsel %vm639_vm0, %v11348_v11, -inf  ;;  %v11357_v38 = vpop.f32.mrf.mxu2  ;;  %v3108_v18 = vmax.f32 %v3107_v55, %v15571_v29  ;;  %v15572_v62 = vld [vmem:[#allocation37_spill] sm:$0xff]  ;;  %v15576_v9 = vld [vmem:[#allocation124_spill] sm:$0xff] }
 0x58a   : > { %v3952_v34 = vmul.f32 1.442695, %v3437_v32  ;;  %v3954_v44 = vmul.f32 1.442695, %v3438_v21  ;;  %v3956_v41 = vmul.f32 1.442695, %v3439_v30  ;;  %v11359_v52 = vpop.f32.mrf.mxu1  ;;  %v3104_v12 = vmax.f32 %v3102_v4, %v3103_v59  ;;  %v7495_v61 = vpop.eup %7494 }
 0x58b   : > { %15569 = vst [vmem:[#allocation206_spill] sm:$0xff] %v11357_v38  ;;  %7504 = vpow2.f32 %v3950_v2  ;;  %v3958_v43 = vmul.f32 1.442695, %v3440_v8  ;;  %v7497_v60 = vpop.eup %7496  ;;  %v3960_v32 = vmul.f32 1.442695, %v3441_v46  ;;  %v15575_v2 = vld [vmem:[#allocation244_spill] sm:$0xff] }
 0x58c   : > { %15570 = vst [vmem:[#allocation193_spill] sm:$0xff] %v11359_v52  ;;  %7107 = vmatmul.msk.bf16.gmra.mxu0 %vm891_vm1, %v15572_v62  ;;  %v11364_v16 = vpop.f32.mrf.mxu3  ;;  %7506 = vpow2.f32 %v3952_v34  ;;  %3105 = vmax.xlane.f32.xlu1 %v3104_v12  ;;  %v11366_v21 = vpop.eup %7498  ;;  %v3109_v8 = vmax.f32 %v3108_v18, %v15575_v2  ;;  %v15577_v62 = vld [vmem:[#allocation131_spill] sm:$0xff]  ;;  %v15578_v34 = vld [vmem:[#allocation216_spill] sm:$0xff] }
 0x58d   : > { %15573 = vst [vmem:[#allocation283_spill] sm:$0xff] %v11366_v21  ;;  %7508 = vpow2.f32 %v3954_v44  ;;  %v11368_v30 = vpop.eup %7500  ;;  %v15581_v44 = vld [vmem:[#allocation21_spill] sm:$0xff]  ;;  %v15583_v52 = vld [vmem:[#allocation55_spill] sm:$0xff] }
 0x58e   : > { %7510 = vpow2.f32 %v3956_v41  ;;  %v11370_v4 = vpop.eup %7502  ;;  %v3114_v41 = vmax.f32 %v15582_v37, %v15581_v44 }
 0x58f   : > { %15574 = vst [vmem:[#allocation76_spill] sm:$0xff] %v11370_v4  ;;  %7512 = vpow2.f32 %v3958_v43  ;;  %v3008_v55 = vpop.xlane.xlu2 %3007  ;;  %v15602_v4 = vld [vmem:[#allocation104_spill] sm:$0xff] }
 0x590   : > { %7514 = vpow2.f32 %v3960_v32  ;;  %v3442_v59 = vsub.f32 %v15576_v9, %v3008_v55  ;;  %v3443_v38 = vsub.f32 %v15577_v62, %v3008_v55  ;;  %v3444_v46 = vsub.f32 %v15578_v34, %v3008_v55  ;;  %v11376_v12 = vpop.f32.mrf.mxu0 }
 0x591   : > { %15579 = vst [vmem:[#allocation33_spill] sm:$0xff] %v11376_v12  ;;  %v11378_v29 = vpop.eup %7504  ;;  %v3445_v11 = vsub.f32 %v15583_v52, %v3008_v55  ;;  %v3110_v43 = vsel %vm639_vm0, %v11376_v12, -inf  ;;  %v11385_v2 = vpop.f32.mrf.mxu2  ;;  %v3115_v51 = vmax.f32 %v3114_v41, %v15587_v5  ;;  %v3446_v24 = vsub.f32 %v15588_v50, %v3008_v55  ;;  %v15592_v55 = vld [vmem:[#allocation168_spill] sm:$0xff]  ;;  %v15595_v41 = vld [vmem:[#allocation137_spill] sm:$0xff] }
 0x592   : > { %15580 = vst [vmem:[#allocation79_spill] sm:$0xff] %v11378_v29  ;;  %v7507_v18 = vpop.eup %7506  ;;  %v3962_v32 = vmul.f32 1.442695, %v3442_v59  ;;  %v11387_v9 = vpop.f32.mrf.mxu1  ;;  %v3111_v62 = vmax.f32 %v3109_v8, %v3110_v43  ;;  %v3964_v40 = vmul.f32 1.442695, %v3443_v38  ;;  %v4403_v43 = vpack.c.bf16 %v7495_v61, %v7493_v31  ;;  %v15591_v38 = vld [vmem:[#allocation264_spill] sm:$0xff] }
 0x593   : > { %15584 = vst [vmem:[#allocation122_spill] sm:$0xff] %v11385_v2  ;;  %v11389_v34 = vpop.eup %7508  ;;  %v4437_v52 = vpack.c.bf16 %v7507_v18, %v7497_v60  ;;  %v3966_v12 = vmul.f32 1.442695, %v3444_v46  ;;  %v3968_v8 = vmul.f32 1.442695, %v3445_v11  ;;  %v3121_v60 = vmax.f32 %v15592_v55, %v15591_v38  ;;  %v15593_v59 = vld [vmem:[#allocation249_spill] sm:$0xff] }
 0x594   : > { %15585 = vst [vmem:[#allocation120_spill] sm:$0xff] %v11387_v9  ;;  %v11393_v44 = vpop.f32.mrf.mxu3  ;;  %v11395_v37 = vpop.eup %7510  ;;  %3112 = vmax.xlane.f32.xlu2 %v3111_v62  ;;  %7516 = vpow2.f32 %v3962_v32  ;;  %v3970_v18 = vmul.f32 1.442695, %v3446_v24  ;;  %v3116_v11 = vmax.f32 %v3115_v51, %v15593_v59  ;;  %v15594_v31 = vld [vmem:[#allocation128_spill] sm:$0xff]  ;;  %v15599_v24 = vld [vmem:[#allocation201_spill] sm:$0xff]  ;;  %v15600_v51 = vld [vmem:[#allocation87_spill] sm:$0xff] }
 0x595   : > { %15586 = vst [vmem:[#allocation31_spill] sm:$0xff] %v11389_v34  ;;  %v11399_v2 = vpop.eup %7512  ;;  %4769 = vmatmul.bf16.gmra.mxu1 %v4437_v52  ;;  %7518 = vpow2.f32 %v3964_v40  ;;  %v15596_v9 = vld [vmem:[#allocation220_spill] sm:$0xff]  ;;  %v15598_v40 = vpack.c.bf16 %v11099_v47, %v11071_v28  ;;  %v15603_v47 = vld [vmem:[#allocation178_spill] sm:$0xff] }
 0x596   : > { %15589 = vst [vmem:[#allocation213_spill] sm:$0xff] %v11399_v2  ;;  %v11403_v50 = vpop.eup %7514  ;;  %7520 = vpow2.f32 %v3966_v12  ;;  %v3122_v2 = vmax.f32 %v3121_v60, %v15602_v4  ;;  %v15621_v59 = vld [vmem:[#allocation90_spill] sm:$0xff] }
 0x597   : > { %15590 = vst [vmem:[#allocation197_spill] sm:$0xff] %v11403_v50  ;;  %4923 = vmatmul.bf16.gmra.mxu2 %v4403_v43  ;;  %v3015_v62 = vpop.xlane.xlu0 %3014  ;;  %7522 = vpow2.f32 %v3968_v8 }
 0x598   : > { %v3447_v52 = vsub.f32 %v15594_v31, %v3015_v62  ;;  %v3448_v5 = vsub.f32 %v15595_v41, %v3015_v62  ;;  %v3449_v38 = vsub.f32 %v15596_v9, %v3015_v62  ;;  %v11415_v32 = vpop.f32.mrf.mxu0  ;;  %v3450_v43 = vsub.f32 %v15599_v24, %v3015_v62 }
 0x599   : > { %15597 = vst [vmem:[#allocation288_spill] sm:$0xff] %v11415_v32  ;;  %5127 = vmatmul.bf16.gmra.mxu3 %v15598_v40  ;;  %v3451_v46 = vsub.f32 %v15600_v51, %v3015_v62  ;;  %v3117_v12 = vsel %vm639_vm0, %v11415_v32, -inf  ;;  %7524 = vpow2.f32 %v3970_v18  ;;  %v15604_v40 = vld [vmem:[#allocation40_spill] sm:$0xff] }
 0x59a   : > { %v3972_v61 = vmul.f32 1.442695, %v3447_v52  ;;  %v3974_v31 = vmul.f32 1.442695, %v3448_v5  ;;  %v3976_v29 = vmul.f32 1.442695, %v3449_v38  ;;  %v4884_v41 = vpop.f32.mrf.mxu2  ;;  %v11424_v50 = vpop.f32.mrf.mxu1  ;;  %v3118_v9 = vmax.f32 %v3116_v11, %v3117_v12 }
 0x59b   : > { %15601 = vst [vmem:[#allocation37_spill] sm:$0xff] %v11424_v50  ;;  %v3978_v28 = vmul.f32 1.442695, %v3450_v43  ;;  %v4885_v8 = vadd.f32 %v4884_v41, %v15603_v47  ;;  %v7517_v24 = vpop.eup %7516  ;;  %v3980_v52 = vmul.f32 1.442695, %v3451_v46  ;;  %v15608_v11 = vld [vmem:[#allocation269_spill] sm:$0xff] }
 0x59c   : > { %7108 = vmatmul.msk.bf16.gmra.mxu0 %vm891_vm1, %v15604_v40  ;;  %v11430_v62 = vpop.f32.mrf.mxu3  ;;  %7526 = vpow2.f32 %v3972_v61  ;;  %3119 = vmax.xlane.f32.xlu0 %v3118_v9  ;;  %v11432_v5 = vpop.eup %7518  ;;  %v15609_v43 = vld [vmem:[#allocation171_spill] sm:$0xff]  ;;  %v15610_v41 = vld [vmem:[#allocation252_spill] sm:$0xff] }
 0x59d   : > { %15605 = vst [vmem:[#allocation124_spill] sm:$0xff] %v11432_v5  ;;  %7528 = vpow2.f32 %v3974_v31  ;;  %v11435_v38 = vadd.f32 %v11220_v35, %v4885_v8  ;;  %v11437_v60 = vpop.eup %7520  ;;  %v3128_v51 = vmax.f32 %v15609_v43, %v15608_v11  ;;  %v3123_v61 = vmax.f32 %v3122_v2, %v15610_v41  ;;  %v15611_v46 = vld [vmem:[#allocation132_spill] sm:$0xff]  ;;  %v15617_v43 = vld [vmem:[#allocation185_spill] sm:$0xff] }
 0x59e   : > { %7530 = vpow2.f32 %v3976_v29  ;;  %v11439_v18 = vpop.eup %7522  ;;  %v15612_v47 = vld [vmem:[#allocation200_spill] sm:$0xff]  ;;  %v15616_v29 = vld [vmem:[#allocation203_spill] sm:$0xff] }
 0x59f   : > { %15606 = vst [vmem:[#allocation131_spill] sm:$0xff] %v11435_v38  ;;  %7532 = vpow2.f32 %v3978_v28  ;;  %v3022_v12 = vpop.xlane.xlu1 %3021  ;;  %v15613_v40 = vld [vmem:[#allocation68_spill] sm:$0xff]  ;;  %v11449_v38 = vpop.eup %7524  ;;  %v3129_v55 = vmax.f32 %v3128_v51, %v15617_v43  ;;  %v15630_v51 = vld [vmem:[#allocation257_spill] sm:$0xff] }
 0x5a0   : > { %15607 = vst [vmem:[#allocation216_spill] sm:$0xff] %v11439_v18  ;;  %7534 = vpow2.f32 %v3980_v52  ;;  %v3452_v9 = vsub.f32 %v15611_v46, %v3022_v12  ;;  %v3453_v31 = vsub.f32 %v15612_v47, %v3022_v12  ;;  %v3454_v35 = vsub.f32 %v15613_v40, %v3022_v12  ;;  %v11447_v8 = vpop.f32.mrf.mxu0  ;;  %v15620_v40 = vld [vmem:[#allocation246_spill] sm:$0xff] }
 0x5a1   : > { %15614 = vst [vmem:[#allocation55_spill] sm:$0xff] %v11447_v8  ;;  %v3455_v4 = vsub.f32 %v15616_v29, %v3022_v12  ;;  %v3124_v11 = vsel %vm639_vm0, %v11447_v8, -inf  ;;  %v3456_v50 = vsub.f32 %v15620_v40, %v3022_v12  ;;  %v3130_v12 = vmax.f32 %v3129_v55, %v15630_v51  ;;  %v15637_v55 = vld [vmem:[#allocation250_spill] sm:$0xff]  ;;  %v15657_v51 = vld [vmem:[#allocation56_spill] sm:$0xff] }
 0x5a2   : > { %15615 = vst [vmem:[#allocation290_spill] sm:$0xff] %v11449_v38  ;;  %v7527_v28 = vpop.eup %7526  ;;  %v3982_v2 = vmul.f32 1.442695, %v3452_v9  ;;  %v4886_v52 = vpop.f32.mrf.mxu2  ;;  %v3125_v46 = vmax.f32 %v3123_v61, %v3124_v11  ;;  %v3984_v32 = vmul.f32 1.442695, %v3453_v31  ;;  %v15626_v31 = vld [vmem:[#allocation174_spill] sm:$0xff] }
 0x5a3   : > { %v11455_v41 = vpop.f32.mrf.mxu1  ;;  %v11457_v47 = vpop.eup %7528  ;;  %v4887_v21 = vadd.f32 %v4886_v52, %v15621_v59  ;;  %v4442_v29 = vpack.c.bf16 %v7527_v28, %v7517_v24  ;;  %v3986_v8 = vmul.f32 1.442695, %v3454_v35  ;;  %v3988_v11 = vmul.f32 1.442695, %v3455_v4  ;;  %v15625_v24 = vld [vmem:[#allocation89_spill] sm:$0xff] }
 0x5a4   : > { %15618 = vst [vmem:[#allocation128_spill] sm:$0xff] %v11455_v41  ;;  %v11461_v34 = vpop.f32.mrf.mxu3  ;;  %v11463_v0 = vpop.eup %7530  ;;  %3126 = vmax.xlane.f32.xlu1 %v3125_v46  ;;  %v3135_v28 = vmax.f32 %v15626_v31, %v15625_v24  ;;  %7536 = vpow2.f32 %v3982_v2  ;;  %v3990_v52 = vmul.f32 1.442695, %v3456_v50  ;;  %v15627_v46 = vld [vmem:[#allocation163_spill] sm:$0xff]  ;;  %v15628_v4 = vld [vmem:[#allocation181_spill] sm:$0xff]  ;;  %v15632_v24 = vld [vmem:[#allocation204_spill] sm:$0xff]  ;;  %v15635_v50 = vpack.c.bf16 %v11179_v23, %v11152_v63 }
 0x5a5   : > { %15619 = vst [vmem:[#allocation137_spill] sm:$0xff] %v11457_v47  ;;  %v11467_v9 = vpop.eup %7532  ;;  %4774 = vmatmul.bf16.gmra.mxu1 %v4442_v29  ;;  %v11472_v61 = vadd.f32 %v11251_v3, %v4887_v21  ;;  %7538 = vpow2.f32 %v3984_v32  ;;  %v15629_v40 = vpack.c.bf16 %v15627_v46, %v15628_v4  ;;  %v15631_v21 = vld [vmem:[#allocation136_spill] sm:$0xff]  ;;  %v15633_v31 = vld [vmem:[#allocation71_spill] sm:$0xff] }
 0x5a6   : > { %15622 = vst [vmem:[#allocation220_spill] sm:$0xff] %v11467_v9  ;;  %v11474_v59 = vpop.eup %7534  ;;  %7540 = vpow2.f32 %v3986_v8  ;;  %v15636_v32 = vld [vmem:[#allocation207_spill] sm:$0xff]  ;;  %v15640_v63 = vld [vmem:[#allocation112_spill] sm:$0xff] }
 0x5a7   : > { %15623 = vst [vmem:[#allocation201_spill] sm:$0xff] %v11472_v61  ;;  %4928 = vmatmul.bf16.gmra.mxu2 %v15629_v40  ;;  %v3029_v29 = vpop.xlane.xlu2 %3028  ;;  %7542 = vpow2.f32 %v3988_v11 }
 0x5a8   : > { %15624 = vst [vmem:[#allocation87_spill] sm:$0xff] %v11474_v59  ;;  %v3457_v61 = vsub.f32 %v15631_v21, %v3029_v29  ;;  %v3458_v2 = vsub.f32 %v15632_v24, %v3029_v29  ;;  %v3459_v43 = vsub.f32 %v15633_v31, %v3029_v29  ;;  %v3460_v46 = vsub.f32 %v15636_v32, %v3029_v29  ;;  %v15639_v59 = vld [vmem:[#allocation111_spill] sm:$0xff] }
 0x5a9   : > { %v11489_v35 = vpop.f32.mrf.mxu0  ;;  %5132 = vmatmul.bf16.gmra.mxu3 %v15635_v50  ;;  %v3461_v4 = vsub.f32 %v15637_v55, %v3029_v29  ;;  %v3136_v18 = vmax.f32 %v3135_v28, %v15639_v59  ;;  %7544 = vpow2.f32 %v3990_v52  ;;  %v15641_v50 = vld [vmem:[#allocation44_spill] sm:$0xff] }
 0x5aa   : > { %15634 = vst [vmem:[#allocation178_spill] sm:$0xff] %v11489_v35  ;;  %v3131_v8 = vsel %vm639_vm0, %v11489_v35, -inf  ;;  %v3992_v40 = vmul.f32 1.442695, %v3457_v61  ;;  %v3994_v21 = vmul.f32 1.442695, %v3458_v2  ;;  %v4889_v24 = vpop.f32.mrf.mxu2  ;;  %v7537_v32 = vpop.eup %7536 }
 0x5ab   : > { %v3996_v3 = vmul.f32 1.442695, %v3459_v43  ;;  %v11498_v38 = vpop.f32.mrf.mxu1  ;;  %v3132_v31 = vmax.f32 %v3130_v12, %v3131_v8  ;;  %v3998_v23 = vmul.f32 1.442695, %v3460_v46  ;;  %v4890_v11 = vadd.f32 %v4889_v24, %v15640_v63  ;;  %v11506_v43 = vpop.eup %7538  ;;  %v15645_v2 = vld [vmem:[#allocation275_spill] sm:$0xff]  ;;  %v15646_v46 = vld [vmem:[#allocation177_spill] sm:$0xff] }
 0x5ac   : > { %15638 = vst [vmem:[#allocation40_spill] sm:$0xff] %v11498_v38  ;;  %7109 = vmatmul.msk.bf16.gmra.mxu0 %vm891_vm1, %v15641_v50  ;;  %v11504_v29 = vpop.f32.mrf.mxu3  ;;  %7546 = vpow2.f32 %v3992_v40  ;;  %v4000_v61 = vmul.f32 1.442695, %v3461_v4  ;;  %v11511_v28 = vpop.eup %7540  ;;  %v3142_v55 = vmax.f32 %v15646_v46, %v15645_v2  ;;  %v15647_v24 = vld [vmem:[#allocation261_spill] sm:$0xff]  ;;  %v15648_v4 = vld [vmem:[#allocation139_spill] sm:$0xff]  ;;  %v15649_v63 = vld [vmem:[#allocation208_spill] sm:$0xff] }
 0x5ad   : > { %3133 = vmax.xlane.f32.xlu2 %v3132_v31  ;;  %15642 = vst [vmem:[#allocation132_spill] sm:$0xff] %v11506_v43  ;;  %7548 = vpow2.f32 %v3994_v21  ;;  %v11509_v12 = vadd.f32 %v11294_v39, %v4890_v11  ;;  %v11513_v52 = vpop.eup %7542  ;;  %v3137_v40 = vmax.f32 %v3136_v18, %v15647_v24  ;;  %v15650_v50 = vld [vmem:[#allocation74_spill] sm:$0xff]  ;;  %v15654_v46 = vld [vmem:[#allocation191_spill] sm:$0xff] }
 0x5ae   : > { %7550 = vpow2.f32 %v3996_v3  ;;  %15644 = vst [vmem:[#allocation68_spill] sm:$0xff] %v11513_v52  ;;  %v15653_v3 = vld [vmem:[#allocation210_spill] sm:$0xff]  ;;  %v3143_v59 = vmax.f32 %v3142_v55, %v15654_v46  ;;  %v15693_v46 = vld [vmem:[#allocation96_spill] sm:$0xff] }
 0x5af   : > { %15643 = vst [vmem:[#allocation200_spill] sm:$0xff] %v11509_v12  ;;  %7552 = vpow2.f32 %v3998_v23  ;;  %v3036_v8 = vpop.xlane.xlu0 %3035  ;;  %v11523_v9 = vpop.eup %7544 }
 0x5b0   : > { %7554 = vpow2.f32 %v4000_v61  ;;  %v3462_v31 = vsub.f32 %v15648_v4, %v3036_v8  ;;  %v3463_v21 = vsub.f32 %v15649_v63, %v3036_v8  ;;  %v3464_v39 = vsub.f32 %v15650_v50, %v3036_v8  ;;  %15652 = vst [vmem:[#allocation246_spill] sm:$0xff] %v11523_v9  ;;  %v15656_v50 = vld [vmem:[#allocation167_spill] sm:$0xff] }
 0x5b1   : > { %v11521_v11 = vpop.f32.mrf.mxu0  ;;  %v3465_v12 = vsub.f32 %v15653_v3, %v3036_v8  ;;  %v3466_v38 = vsub.f32 %v15656_v50, %v3036_v8 }
 0x5b2   : > { %15651 = vst [vmem:[#allocation203_spill] sm:$0xff] %v11521_v11  ;;  %v3138_v2 = vsel %vm639_vm0, %v11521_v11, -inf  ;;  %v7547_v23 = vpop.eup %7546  ;;  %v4002_v18 = vmul.f32 1.442695, %v3462_v31  ;;  %v4891_v61 = vpop.f32.mrf.mxu2  ;;  %v4004_v35 = vmul.f32 1.442695, %v3463_v21 }
 0x5b3   : > { %v11529_v24 = vpop.f32.mrf.mxu1  ;;  %v3139_v4 = vmax.f32 %v3137_v40, %v3138_v2  ;;  %v11531_v63 = vpop.eup %7548  ;;  %v4892_v41 = vadd.f32 %v4891_v61, %v15657_v51  ;;  %v4447_v3 = vpack.c.bf16 %v7547_v23, %v7537_v32  ;;  %v4006_v11 = vmul.f32 1.442695, %v3464_v39  ;;  %v15661_v32 = vld [vmem:[#allocation278_spill] sm:$0xff]  ;;  %v15662_v21 = vld [vmem:[#allocation180_spill] sm:$0xff] }
 0x5b4   : > { %15655 = vst [vmem:[#allocation90_spill] sm:$0xff] %v11529_v24  ;;  %v11535_v5 = vpop.f32.mrf.mxu3  ;;  %v11537_v47 = vpop.eup %7550  ;;  %v4008_v2 = vmul.f32 1.442695, %v3465_v12  ;;  %v3149_v23 = vmax.f32 %v15662_v21, %v15661_v32  ;;  %v15663_v39 = vld [vmem:[#allocation234_spill] sm:$0xff]  ;;  %7556 = vpow2.f32 %v4002_v18  ;;  %v4010_v12 = vmul.f32 1.442695, %v3466_v38 }
 0x5b5   : > { %3140 = vmax.xlane.f32.xlu0 %v3139_v4  ;;  %v11541_v31 = vpop.eup %7552  ;;  %4779 = vmatmul.bf16.gmra.mxu1 %v4447_v3  ;;  %v11546_v40 = vadd.f32 %v11325_v26, %v4892_v41  ;;  %v15664_v61 = vld [vmem:[#allocation110_spill] sm:$0xff]  ;;  %7558 = vpow2.f32 %v4004_v35  ;;  %v15665_v3 = vpack.c.bf16 %v11008_v14, %v10977_v49  ;;  %v15671_v38 = vpack.c.bf16 %v11253_v19, %v11226_v57 }
 0x5b6   : > { %15658 = vst [vmem:[#allocation163_spill] sm:$0xff] %v11541_v31  ;;  %v11548_v51 = vpop.eup %7554  ;;  %v3285_v4 = vsub.f32 %v15664_v61, %v15663_v39  ;;  %v15666_v41 = vld [vmem:[#allocation266_spill] sm:$0xff]  ;;  %7560 = vpow2.f32 %v4006_v11  ;;  %v15668_v61 = vld [vmem:[#allocation212_spill] sm:$0xff]  ;;  %v15669_v39 = vld [vmem:[#allocation77_spill] sm:$0xff] }
 0x5b7   : > { %15659 = vst [vmem:[#allocation181_spill] sm:$0xff] %v11546_v40  ;;  %4933 = vmatmul.bf16.gmra.mxu2 %v15665_v3  ;;  %v3043_v26 = vpop.xlane.xlu1 %3042  ;;  %v3144_v55 = vmax.f32 %v3143_v59, %v15666_v41  ;;  %v15667_v40 = vld [vmem:[#allocation141_spill] sm:$0xff]  ;;  %7562 = vpow2.f32 %v4008_v2  ;;  %v15672_v14 = vld [vmem:[#allocation214_spill] sm:$0xff]  ;;  %v15673_v59 = vld [vmem:[#allocation187_spill] sm:$0xff] }
 0x5b8   : > { %15660 = vst [vmem:[#allocation136_spill] sm:$0xff] %v11548_v51  ;;  %v3467_v32 = vsub.f32 %v15667_v40, %v3043_v26  ;;  %v3468_v18 = vsub.f32 %v15668_v61, %v3043_v26  ;;  %v3469_v21 = vsub.f32 %v15669_v39, %v3043_v26  ;;  %v3470_v49 = vsub.f32 %v15672_v14, %v3043_v26  ;;  %v15675_v51 = vld [vmem:[#allocation116_spill] sm:$0xff]  ;;  %v15676_v2 = vld [vmem:[#allocation47_spill] sm:$0xff] }
 0x5b9   : > { %v11565_v50 = vpop.f32.mrf.mxu0  ;;  %5137 = vmatmul.bf16.gmra.mxu3 %v15671_v38  ;;  %v3471_v35 = vsub.f32 %v15673_v59, %v3043_v26  ;;  %v3150_v52 = vmax.f32 %v3149_v23, %v15675_v51  ;;  %7564 = vpow2.f32 %v4010_v12  ;;  %v15678_v14 = vld [vmem:[#allocation115_spill] sm:$0xff]  ;;  %v15689_v51 = vld [vmem:[#allocation218_spill] sm:$0xff] }
 0x5ba   : > { %15670 = vst [vmem:[#allocation204_spill] sm:$0xff] %v11565_v50  ;;  %v3145_v11 = vsel %vm639_vm0, %v11565_v50, -inf  ;;  %v4012_v3 = vmul.f32 1.442695, %v3467_v32  ;;  %v4014_v40 = vmul.f32 1.442695, %v3468_v18  ;;  %v4894_v61 = vpop.f32.mrf.mxu2  ;;  %v7557_v38 = vpop.eup %7556 }
 0x5bb   : > { %v4016_v8 = vmul.f32 1.442695, %v3469_v21  ;;  %v11574_v9 = vpop.f32.mrf.mxu1  ;;  %v3146_v39 = vmax.f32 %v3144_v55, %v3145_v11  ;;  %v4018_v57 = vmul.f32 1.442695, %v3470_v49  ;;  %v4895_v19 = vadd.f32 %v4894_v61, %v11006_v36  ;;  %v11582_v21 = vpop.eup %7558  ;;  %v15677_v18 = vld [vmem:[#allocation238_spill] sm:$0xff]  ;;  %v15681_v49 = vld [vmem:[#allocation280_spill] sm:$0xff] }
 0x5bc   : > { %15674 = vst [vmem:[#allocation71_spill] sm:$0xff] %v11574_v9  ;;  %7110 = vmatmul.msk.bf16.gmra.mxu0 %vm891_vm1, %v15676_v2  ;;  %v11580_v26 = vpop.f32.mrf.mxu3  ;;  %7566 = vpow2.f32 %v4012_v3  ;;  %v4020_v32 = vmul.f32 1.442695, %v3471_v35  ;;  %v3290_v55 = vsub.f32 %v15678_v14, %v15677_v18  ;;  %v11589_v12 = vpop.eup %7560  ;;  %v15682_v59 = vld [vmem:[#allocation183_spill] sm:$0xff]  ;;  %v3648_v3 = vmul.f32 1.442695, %v3285_v4 }
 0x5bd   : > { %3147 = vmax.xlane.f32.xlu1 %v3146_v39  ;;  %7568 = vpow2.f32 %v4014_v40  ;;  %v11587_v23 = vadd.f32 %v11364_v16, %v4895_v19  ;;  %v11591_v36 = vpop.eup %7562  ;;  %v3156_v11 = vmax.f32 %v15682_v59, %v15681_v49  ;;  %v15683_v61 = vld [vmem:[#allocation270_spill] sm:$0xff]  ;;  %v15684_v2 = vld [vmem:[#allocation143_spill] sm:$0xff]  ;;  %v15685_v40 = vld [vmem:[#allocation217_spill] sm:$0xff] }
 0x5be   : > { %7570 = vpow2.f32 %v4016_v8  ;;  %15680 = vst [vmem:[#allocation250_spill] sm:$0xff] %v11591_v36  ;;  %v3151_v39 = vmax.f32 %v3150_v52, %v15683_v61  ;;  %v15686_v16 = vld [vmem:[#allocation78_spill] sm:$0xff]  ;;  %v15690_v49 = vld [vmem:[#allocation195_spill] sm:$0xff] }
 0x5bf   : > { %15679 = vst [vmem:[#allocation207_spill] sm:$0xff] %v11587_v23  ;;  %7572 = vpow2.f32 %v4018_v57  ;;  %v3050_v35 = vpop.xlane.xlu2 %3049  ;;  %v11601_v8 = vpop.eup %7564  ;;  %v3658_v23 = vmul.f32 1.442695, %v3290_v55  ;;  %v3157_v52 = vmax.f32 %v3156_v11, %v15690_v49  ;;  %v15703_v11 = vld [vmem:[#allocation145_spill] sm:$0xff] }
 0x5c0   : > { %7574 = vpow2.f32 %v4020_v32  ;;  %v3472_v14 = vsub.f32 %v15684_v2, %v3050_v35  ;;  %v3473_v31 = vsub.f32 %v15685_v40, %v3050_v35  ;;  %v3474_v19 = vsub.f32 %v15686_v16, %v3050_v35  ;;  %15688 = vst [vmem:[#allocation44_spill] sm:$0xff] %v11601_v8  ;;  %v15692_v16 = vld [vmem:[#allocation169_spill] sm:$0xff] }
 0x5c1   : > { %v11599_v18 = vpop.f32.mrf.mxu0  ;;  %v3475_v9 = vsub.f32 %v15689_v51, %v3050_v35  ;;  %v3476_v50 = vsub.f32 %v15692_v16, %v3050_v35  ;;  %7576 = vpow2.f32 %v3648_v3  ;;  %v15698_v3 = vld [vmem:[#allocation186_spill] sm:$0xff]  ;;  %v15702_v16 = vld [vmem:[#allocation271_spill] sm:$0xff] }
 0x5c2   : > { %15687 = vst [vmem:[#allocation112_spill] sm:$0xff] %v11599_v18  ;;  %v3152_v4 = vsel %vm639_vm0, %v11599_v18, -inf  ;;  %v7567_v57 = vpop.eup %7566  ;;  %v4022_v32 = vmul.f32 1.442695, %v3472_v14  ;;  %v4896_v59 = vpop.f32.mrf.mxu2  ;;  %v4024_v41 = vmul.f32 1.442695, %v3473_v31  ;;  %7578 = vpow2.f32 %v3658_v23 }
 0x5c3   : > { %v11607_v2 = vpop.f32.mrf.mxu1  ;;  %v3153_v40 = vmax.f32 %v3151_v39, %v3152_v4  ;;  %v11609_v61 = vpop.eup %7568  ;;  %v4897_v55 = vadd.f32 %v4896_v59, %v15693_v46  ;;  %v4452_v51 = vpack.c.bf16 %v7567_v57, %v7557_v38  ;;  %v4026_v18 = vmul.f32 1.442695, %v3474_v19  ;;  %v15697_v59 = vld [vmem:[#allocation284_spill] sm:$0xff]  ;;  %v15699_v19 = vld [vmem:[#allocation67_spill] sm:$0xff]  ;;  %v15700_v4 = vld [vmem:[#allocation118_spill] sm:$0xff] }
 0x5c4   : > { %15691 = vst [vmem:[#allocation139_spill] sm:$0xff] %v11607_v2  ;;  %v11613_v24 = vpop.f32.mrf.mxu3  ;;  %v11615_v43 = vpop.eup %7570  ;;  %v4028_v39 = vmul.f32 1.442695, %v3475_v9  ;;  %v3163_v35 = vmax.f32 %v15698_v3, %v15697_v59  ;;  %v3295_v57 = vsub.f32 %v15700_v4, %v15699_v19  ;;  %7580 = vpow2.f32 %v4022_v32  ;;  %v15704_v4 = vld [vmem:[#allocation222_spill] sm:$0xff]  ;;  %v15705_v19 = vld [vmem:[#allocation81_spill] sm:$0xff]  ;;  %v15728_v2 = vld [vmem:[#allocation192_spill] sm:$0xff] }
 0x5c5   : > { %3154 = vmax.xlane.f32.xlu2 %v3153_v40  ;;  %v11619_v14 = vpop.eup %7572  ;;  %4784 = vmatmul.bf16.gmra.mxu1 %v4452_v51  ;;  %v11624_v46 = vadd.f32 %v11393_v44, %v4897_v55  ;;  %7582 = vpow2.f32 %v4024_v41  ;;  %v4030_v9 = vmul.f32 1.442695, %v3476_v50  ;;  %v15701_v40 = vpack.c.bf16 %v11094_v17, %v11067_v7  ;;  %v15708_v7 = vld [vmem:[#allocation221_spill] sm:$0xff] }
 0x5c6   : > { %15694 = vst [vmem:[#allocation208_spill] sm:$0xff] %v11619_v14  ;;  %v11626_v38 = vpop.eup %7574  ;;  %v3158_v55 = vmax.f32 %v3157_v52, %v15702_v16  ;;  %7584 = vpow2.f32 %v4026_v18  ;;  %v15707_v50 = vpack.c.bf16 %v11327_v48, %v11300_v22  ;;  %v15710_v48 = vld [vmem:[#allocation45_spill] sm:$0xff]  ;;  %v3668_v36 = vmul.f32 1.442695, %v3295_v57  ;;  %v15719_v14 = vld [vmem:[#allocation147_spill] sm:$0xff] }
 0x5c7   : > { %15695 = vst [vmem:[#allocation74_spill] sm:$0xff] %v11624_v46  ;;  %4938 = vmatmul.bf16.gmra.mxu2 %v15701_v40  ;;  %v3057_v44 = vpop.xlane.xlu0 %3056  ;;  %7586 = vpow2.f32 %v4028_v39  ;;  %v11652_v52 = vpop.eup %7576  ;;  %v3164_v22 = vmax.f32 %v3163_v35, %v15710_v48 }
 0x5c8   : > { %15696 = vst [vmem:[#allocation210_spill] sm:$0xff] %v11626_v38  ;;  %v3477_v31 = vsub.f32 %v15703_v11, %v3057_v44  ;;  %v3478_v32 = vsub.f32 %v15704_v4, %v3057_v44  ;;  %v3479_v46 = vsub.f32 %v15705_v19, %v3057_v44  ;;  %v3480_v17 = vsub.f32 %v15708_v7, %v3057_v44  ;;  %v11656_v38 = vpop.eup %7578  ;;  %v15713_v7 = vld [vmem:[#allocation123_spill] sm:$0xff] }
 0x5c9   : > { %v11643_v23 = vpop.f32.mrf.mxu0  ;;  %5142 = vmatmul.bf16.gmra.mxu3 %v15707_v50  ;;  %v3481_v41 = vsub.f32 %v11082_v13, %v3057_v44  ;;  %7588 = vpow2.f32 %v4030_v9  ;;  %v15711_v44 = vld [vmem:[#allocation52_spill] sm:$0xff] }
 0x5ca   : > { %15706 = vst [vmem:[#allocation167_spill] sm:$0xff] %v11643_v23  ;;  %v3159_v18 = vsel %vm639_vm0, %v11643_v23, -inf  ;;  %v4032_v11 = vmul.f32 1.442695, %v3477_v31  ;;  %v4034_v40 = vmul.f32 1.442695, %v3478_v32  ;;  %v4899_v19 = vpop.f32.mrf.mxu2  ;;  %v7581_v31 = vpop.eup %7580 }
 0x5cb   : > { %v4036_v4 = vmul.f32 1.442695, %v3479_v46  ;;  %v11654_v51 = vpop.f32.mrf.mxu1  ;;  %v3160_v8 = vmax.f32 %v3158_v55, %v3159_v18  ;;  %v4038_v39 = vmul.f32 1.442695, %v3480_v17  ;;  %v4900_v13 = vadd.f32 %v4899_v19, %v11092_v25  ;;  %v11664_v32 = vpop.eup %7582  ;;  %v15712_v55 = vld [vmem:[#allocation245_spill] sm:$0xff]  ;;  %v15716_v17 = vld [vmem:[#allocation286_spill] sm:$0xff] }
 0x5cc   : > { %15709 = vst [vmem:[#allocation56_spill] sm:$0xff] %v11654_v51  ;;  %7111 = vmatmul.msk.bf16.gmra.mxu0 %vm891_vm1, %v15711_v44  ;;  %v11662_v50 = vpop.f32.mrf.mxu3  ;;  %7590 = vpow2.f32 %v4032_v11  ;;  %v4040_v46 = vmul.f32 1.442695, %v3481_v41  ;;  %v3300_v18 = vsub.f32 %v15713_v7, %v15712_v55  ;;  %v11671_v9 = vpop.eup %7584  ;;  %v15717_v19 = vld [vmem:[#allocation189_spill] sm:$0xff]  ;;  %v15726_v23 = vld [vmem:[#allocation62_spill] sm:$0xff] }
 0x5cd   : > { %3161 = vmax.xlane.f32.xlu0 %v3160_v8  ;;  %7592 = vpow2.f32 %v4034_v40  ;;  %v11669_v35 = vadd.f32 %v11430_v62, %v4900_v13  ;;  %v11673_v25 = vpop.eup %7586  ;;  %v3170_v44 = vmax.f32 %v15717_v19, %v15716_v17  ;;  %v15718_v8 = vld [vmem:[#allocation274_spill] sm:$0xff]  ;;  %v15720_v40 = vld [vmem:[#allocation24_spill] sm:$0xff] }
 0x5ce   : > { %7594 = vpow2.f32 %v4036_v4  ;;  %15715 = vst [vmem:[#allocation141_spill] sm:$0xff] %v11673_v25  ;;  %v3165_v11 = vmax.f32 %v3164_v22, %v15718_v8  ;;  %v3678_v17 = vmul.f32 1.442695, %v3300_v18  ;;  %v15724_v22 = vld [vmem:[#allocation292_spill] sm:$0xff]  ;;  %v15727_v18 = vld [vmem:[#allocation291_spill] sm:$0xff] }
 0x5cf   : > { %15714 = vst [vmem:[#allocation110_spill] sm:$0xff] %v11669_v35  ;;  %7596 = vpow2.f32 %v4038_v39  ;;  %v3064_v41 = vpop.xlane.xlu1 %3063  ;;  %v11683_v4 = vpop.eup %7588  ;;  %v15723_v35 = vld [vmem:[#allocation224_spill] sm:$0xff]  ;;  %v3171_v57 = vmax.f32 %v3170_v44, %v15724_v22  ;;  %v3177_v44 = vmax.f32 %v15728_v2, %v15727_v18  ;;  %v15749_v25 = vld [vmem:[#allocation151_spill] sm:$0xff]  ;;  %v15755_v18 = vld [vmem:[#allocation61_spill] sm:$0xff] }
 0x5d0   : > { %7598 = vpow2.f32 %v4040_v46  ;;  %v3482_v7 = vsub.f32 %v15719_v14, %v3064_v41  ;;  %v3483_v55 = vsub.f32 %v15720_v40, %v3064_v41  ;;  %v3484_v62 = vsub.f32 %v15476_v45, %v3064_v41  ;;  %15722 = vst [vmem:[#allocation77_spill] sm:$0xff] %v11683_v4  ;;  %v15725_v45 = vld [vmem:[#allocation176_spill] sm:$0xff] }
 0x5d1   : > { %v11681_v13 = vpop.f32.mrf.mxu0  ;;  %v3485_v48 = vsub.f32 %v15723_v35, %v3064_v41  ;;  %v3486_v3 = vsub.f32 %v15725_v45, %v3064_v41  ;;  %7600 = vpow2.f32 %v3668_v36  ;;  %v4365_v36 = vpack.c.bf16 %v11656_v38, %v11652_v52  ;;  %v15738_v52 = vld [vmem:[#allocation243_spill] sm:$0xff] }
 0x5d2   : > { %15721 = vst [vmem:[#allocation212_spill] sm:$0xff] %v11681_v13  ;;  %v3166_v39 = vsel %vm639_vm0, %v11681_v13, -inf  ;;  %v7591_v19 = vpop.eup %7590  ;;  %v4042_v46 = vmul.f32 1.442695, %v3482_v7  ;;  %v4901_v8 = vpop.f32.mrf.mxu2  ;;  %v4044_v51 = vmul.f32 1.442695, %v3483_v55  ;;  %7602 = vpow2.f32 %v3678_v17 }
 0x5d3   : > { %v11689_v14 = vpop.f32.mrf.mxu1  ;;  %v3167_v40 = vmax.f32 %v3165_v11, %v3166_v39  ;;  %v11691_v59 = vpop.eup %7592  ;;  %v4902_v16 = vadd.f32 %v4901_v8, %v15726_v23  ;;  %v4457_v49 = vpack.c.bf16 %v7591_v19, %v7581_v31  ;;  %v4046_v7 = vmul.f32 1.442695, %v3484_v62  ;;  %v15732_v19 = vld [vmem:[#allocation73_spill] sm:$0xff]  ;;  %v15733_v8 = vld [vmem:[#allocation126_spill] sm:$0xff]  ;;  %v15737_v11 = vld [vmem:[#allocation228_spill] sm:$0xff] }
 0x5d4   : > { %v11695_v35 = vpop.f32.mrf.mxu3  ;;  %v11697_v13 = vpop.eup %7594  ;;  %v4048_v41 = vmul.f32 1.442695, %v3485_v48  ;;  %v3305_v62 = vsub.f32 %v15733_v8, %v15732_v19  ;;  %7604 = vpow2.f32 %v4042_v46  ;;  %v15734_v17 = vpack.c.bf16 %v11173_v10, %v11148_v20  ;;  %v15736_v46 = vld [vmem:[#allocation149_spill] sm:$0xff]  ;;  %v15740_v10 = vld [vmem:[#allocation226_spill] sm:$0xff] }
 0x5d5   : > { %3168 = vmax.xlane.f32.xlu1 %v3167_v40  ;;  %v11703_v39 = vpop.eup %7596  ;;  %4789 = vmatmul.bf16.gmra.mxu1 %v4457_v49  ;;  %v11708_v31 = vadd.f32 %v11461_v34, %v4902_v16  ;;  %7606 = vpow2.f32 %v4044_v51  ;;  %v4050_v49 = vmul.f32 1.442695, %v3486_v3  ;;  %v15735_v16 = vld [vmem:[#allocation108_spill] sm:$0xff]  ;;  %v15739_v3 = vpack.c.bf16 %v11395_v37, %v11368_v30  ;;  %v15741_v37 = vld [vmem:[#allocation82_spill] sm:$0xff] }
 0x5d6   : > { %15729 = vst [vmem:[#allocation214_spill] sm:$0xff] %v11703_v39  ;;  %v11710_v55 = vpop.eup %7598  ;;  %v3172_v40 = vmax.f32 %v3171_v57, %v15735_v16  ;;  %7608 = vpow2.f32 %v4046_v7  ;;  %v3178_v30 = vmax.f32 %v3177_v44, %v15741_v37 }
 0x5d7   : > { %15730 = vst [vmem:[#allocation187_spill] sm:$0xff] %v11708_v31  ;;  %4943 = vmatmul.bf16.gmra.mxu2 %v15734_v17  ;;  %v3071_v34 = vpop.xlane.xlu2 %3070  ;;  %7610 = vpow2.f32 %v4048_v41  ;;  %v11736_v7 = vpop.eup %7600 }
 0x5d8   : > { %15731 = vst [vmem:[#allocation47_spill] sm:$0xff] %v11710_v55  ;;  %v3487_v8 = vsub.f32 %v15736_v46, %v3071_v34  ;;  %v3488_v38 = vsub.f32 %v15737_v11, %v3071_v34  ;;  %v3489_v23 = vsub.f32 %v15738_v52, %v3071_v34  ;;  %v3490_v20 = vsub.f32 %v15740_v10, %v3071_v34  ;;  %v11740_v55 = vpop.eup %7602  ;;  %v15743_v10 = vld [vmem:[#allocation130_spill] sm:$0xff] }
 0x5d9   : > { %v11727_v48 = vpop.f32.mrf.mxu0  ;;  %5147 = vmatmul.bf16.gmra.mxu3 %v15739_v3  ;;  %v3491_v51 = vsub.f32 %v11160_v53, %v3071_v34  ;;  %7612 = vpow2.f32 %v4050_v49  ;;  %v15746_v49 = vld [vmem:[#allocation93_spill] sm:$0xff] }
 0x5da   : > { %v3173_v57 = vsel %vm639_vm0, %v11727_v48, -inf  ;;  %v4052_v17 = vmul.f32 1.442695, %v3487_v8  ;;  %v4054_v11 = vmul.f32 1.442695, %v3488_v38  ;;  %v4904_v52 = vpop.f32.mrf.mxu2  ;;  %v7605_v3 = vpop.eup %7604  ;;  %v15742_v38 = vld [vmem:[#allocation254_spill] sm:$0xff] }
 0x5db   : > { %v4056_v46 = vmul.f32 1.442695, %v3489_v23  ;;  %v11738_v45 = vpop.f32.mrf.mxu1  ;;  %v3174_v4 = vmax.f32 %v3172_v40, %v3173_v57  ;;  %v4058_v41 = vmul.f32 1.442695, %v3490_v20  ;;  %v4905_v53 = vadd.f32 %v4904_v52, %v11171_v33  ;;  %v11746_v23 = vpop.eup %7606 }
 0x5dc   : > { %v11744_v34 = vpop.f32.mrf.mxu3  ;;  %5261 = vmatmul.bf16.vlgmr.msra.gmra.mxu0 %v4365_v36  ;;  %7614 = vpow2.f32 %v4052_v17  ;;  %v4060_v8 = vmul.f32 1.442695, %v3491_v51  ;;  %v3310_v40 = vsub.f32 %v15743_v10, %v15742_v38  ;;  %v11753_v44 = vpop.eup %7608  ;;  %v15747_v36 = vld [vmem:[#allocation58_spill] sm:$0xff]  ;;  %v3688_v52 = vmul.f32 1.442695, %v3305_v62 }
 0x5dd   : > { %3175 = vmax.xlane.f32.xlu2 %v3174_v4  ;;  %7616 = vpow2.f32 %v4054_v11  ;;  %v11751_v57 = vadd.f32 %v11504_v29, %v4905_v53  ;;  %v11755_v33 = vpop.eup %7610  ;;  %v3184_v20 = vmax.f32 %v15747_v36, %v15746_v49  ;;  %v15748_v4 = vld [vmem:[#allocation109_spill] sm:$0xff]  ;;  %v15750_v11 = vld [vmem:[#allocation230_spill] sm:$0xff] }
 0x5de   : > { %7618 = vpow2.f32 %v4056_v46  ;;  %15745 = vst [vmem:[#allocation143_spill] sm:$0xff] %v11755_v33  ;;  %v3179_v17 = vmax.f32 %v3178_v30, %v15748_v4  ;;  %v3698_v38 = vmul.f32 1.442695, %v3310_v40  ;;  %v15753_v30 = vld [vmem:[#allocation51_spill] sm:$0xff] }
 0x5df   : > { %15744 = vst [vmem:[#allocation115_spill] sm:$0xff] %v11751_v57  ;;  %7620 = vpow2.f32 %v4058_v41  ;;  %v3078_v51 = vpop.xlane.xlu0 %3077  ;;  %v11765_v46 = vpop.eup %7612  ;;  %v3185_v62 = vmax.f32 %v3184_v20, %v15753_v30  ;;  %v15754_v40 = vld [vmem:[#allocation95_spill] sm:$0xff] }
 0x5e0   : > { %7622 = vpow2.f32 %v4060_v8  ;;  %v3492_v10 = vsub.f32 %v15749_v25, %v3078_v51  ;;  %v3493_v39 = vsub.f32 %v15750_v11, %v3078_v51  ;;  %v3494_v29 = vsub.f32 %v15504_v56, %v3078_v51  ;;  %15752 = vst [vmem:[#allocation78_spill] sm:$0xff] %v11765_v46  ;;  %v15779_v33 = vld [vmem:[#allocation155_spill] sm:$0xff] }
 0x5e1   : > { %v11763_v53 = vpop.f32.mrf.mxu0  ;;  %v3495_v19 = vsub.f32 %v15510_v27, %v3078_v51  ;;  %v3496_v56 = vsub.f32 %v11203_v58, %v3078_v51  ;;  %v3191_v20 = vmax.f32 %v15755_v18, %v15754_v40  ;;  %7624 = vpow2.f32 %v3688_v52  ;;  %v15789_v18 = vld [vmem:[#allocation247_spill] sm:$0xff] }
 0x5e2   : > { %15751 = vst [vmem:[#allocation217_spill] sm:$0xff] %v11763_v53  ;;  %v3180_v41 = vsel %vm639_vm0, %v11763_v53, -inf  ;;  %v7615_v57 = vpop.eup %7614  ;;  %v4062_v8 = vmul.f32 1.442695, %v3492_v10  ;;  %v4906_v31 = vpop.f32.mrf.mxu2  ;;  %v4064_v36 = vmul.f32 1.442695, %v3493_v39  ;;  %7626 = vpow2.f32 %v3698_v38 }
 0x5e3   : > { %v11771_v25 = vpop.f32.mrf.mxu1  ;;  %v3181_v11 = vmax.f32 %v3179_v17, %v3180_v41  ;;  %v11773_v49 = vpop.eup %7616  ;;  %v4907_v4 = vadd.f32 %v4906_v31, %v11213_v1  ;;  %v4462_v37 = vpack.c.bf16 %v7615_v57, %v7605_v3  ;;  %v4066_v10 = vmul.f32 1.442695, %v3494_v29  ;;  %v15759_v3 = vld [vmem:[#allocation258_spill] sm:$0xff] }
 0x5e4   : > { %v11777_v27 = vpop.f32.mrf.mxu3  ;;  %v11779_v53 = vpop.eup %7618  ;;  %v4068_v58 = vmul.f32 1.442695, %v3495_v19  ;;  %v15760_v57 = vld [vmem:[#allocation134_spill] sm:$0xff]  ;;  %7628 = vpow2.f32 %v4062_v8  ;;  %v4370_v52 = vpack.c.bf16 %v11740_v55, %v11736_v7  ;;  %v15761_v38 = vpack.c.bf16 %v11247_v6, %v11222_v54  ;;  %v15764_v7 = vld [vmem:[#allocation251_spill] sm:$0xff] }
 0x5e5   : > { %3182 = vmax.xlane.f32.xlu0 %v3181_v11  ;;  %v11785_v41 = vpop.eup %7620  ;;  %4794 = vmatmul.bf16.gmra.mxu1 %v4462_v37  ;;  %v11790_v39 = vadd.f32 %v11535_v5, %v4907_v4  ;;  %v3315_v51 = vsub.f32 %v15760_v57, %v15759_v3  ;;  %7630 = vpow2.f32 %v4064_v36  ;;  %v4070_v37 = vmul.f32 1.442695, %v3496_v56  ;;  %v15762_v4 = vld [vmem:[#allocation281_spill] sm:$0xff]  ;;  %v15767_v6 = vld [vmem:[#allocation231_spill] sm:$0xff] }
 0x5e6   : > { %15756 = vst [vmem:[#allocation218_spill] sm:$0xff] %v11785_v41  ;;  %v11792_v31 = vpop.eup %7622  ;;  %v3186_v29 = vmax.f32 %v3185_v62, %v15762_v4  ;;  %7632 = vpow2.f32 %v4066_v10  ;;  %v15763_v57 = vld [vmem:[#allocation65_spill] sm:$0xff]  ;;  %v15766_v36 = vpack.c.bf16 %v11463_v0, %v11437_v60  ;;  %v15770_v0 = vld [vmem:[#allocation160_spill] sm:$0xff] }
 0x5e7   : > { %15757 = vst [vmem:[#allocation169_spill] sm:$0xff] %v11790_v39  ;;  %4948 = vmatmul.bf16.gmra.mxu2 %v15761_v38  ;;  %v3085_v5 = vpop.xlane.xlu1 %3084  ;;  %7634 = vpow2.f32 %v4068_v58  ;;  %v15768_v62 = vld [vmem:[#allocation53_spill] sm:$0xff]  ;;  %v11818_v38 = vpop.eup %7624  ;;  %v3192_v60 = vmax.f32 %v3191_v20, %v15770_v0  ;;  %v15791_v4 = vld [vmem:[#allocation36_spill] sm:$0xff] }
 0x5e8   : > { %15758 = vst [vmem:[#allocation96_spill] sm:$0xff] %v11792_v31  ;;  %v3497_v8 = vsub.f32 %v15509_v42, %v3085_v5  ;;  %v3498_v55 = vsub.f32 %v15763_v57, %v3085_v5  ;;  %v3499_v17 = vsub.f32 %v15764_v7, %v3085_v5  ;;  %v3500_v54 = vsub.f32 %v15767_v6, %v3085_v5  ;;  %v11822_v31 = vpop.eup %7626 }
 0x5e9   : > { %v11809_v19 = vpop.f32.mrf.mxu0  ;;  %5152 = vmatmul.bf16.gmra.mxu3 %v15766_v36  ;;  %v3501_v56 = vsub.f32 %v15768_v62, %v3085_v5  ;;  %7636 = vpow2.f32 %v4070_v37  ;;  %v15773_v62 = vld [vmem:[#allocation138_spill] sm:$0xff] }
 0x5ea   : > { %15765 = vst [vmem:[#allocation118_spill] sm:$0xff] %v11809_v19  ;;  %v3187_v10 = vsel %vm639_vm0, %v11809_v19, -inf  ;;  %v4072_v42 = vmul.f32 1.442695, %v3497_v8  ;;  %v4074_v57 = vmul.f32 1.442695, %v3498_v55  ;;  %v4909_v7 = vpop.f32.mrf.mxu2  ;;  %v7629_v6 = vpop.eup %7628 }
 0x5eb   : > { %v4076_v11 = vmul.f32 1.442695, %v3499_v17  ;;  %v11820_v1 = vpop.f32.mrf.mxu1  ;;  %v3188_v46 = vmax.f32 %v3186_v29, %v3187_v10  ;;  %v4078_v58 = vmul.f32 1.442695, %v3500_v54  ;;  %v4910_v5 = vadd.f32 %v4909_v7, %v11245_v15  ;;  %v11828_v17 = vpop.eup %7630  ;;  %v15772_v55 = vld [vmem:[#allocation262_spill] sm:$0xff] }
 0x5ec   : > { %15769 = vst [vmem:[#allocation145_spill] sm:$0xff] %v11820_v1  ;;  %v11826_v36 = vpop.f32.mrf.mxu3  ;;  %5266 = vmatmul.bf16.gmra.mxu0 %v4370_v52  ;;  %7638 = vpow2.f32 %v4072_v42  ;;  %v4080_v8 = vmul.f32 1.442695, %v3501_v56  ;;  %v3320_v29 = vsub.f32 %v15773_v62, %v15772_v55  ;;  %v11835_v20 = vpop.eup %7632  ;;  %v15776_v37 = vld [vmem:[#allocation30_spill] sm:$0xff]  ;;  %v15777_v52 = vld [vmem:[#allocation63_spill] sm:$0xff]  ;;  %v15784_v55 = vld [vmem:[#allocation233_spill] sm:$0xff] }
 0x5ed   : > { %3189 = vmax.xlane.f32.xlu1 %v3188_v46  ;;  %15771 = vst [vmem:[#allocation222_spill] sm:$0xff] %v11828_v17  ;;  %7640 = vpow2.f32 %v4074_v57  ;;  %v11833_v10 = vadd.f32 %v11580_v26, %v4910_v5  ;;  %v11837_v15 = vpop.eup %7634  ;;  %v3198_v54 = vmax.f32 %v15777_v52, %v15776_v37  ;;  %v15778_v46 = vld [vmem:[#allocation41_spill] sm:$0xff]  ;;  %v3708_v7 = vmul.f32 1.442695, %v3315_v51  ;;  %v15781_v26 = vld [vmem:[#allocation256_spill] sm:$0xff] }
 0x5ee   : > { %7642 = vpow2.f32 %v4076_v11  ;;  %15775 = vst [vmem:[#allocation221_spill] sm:$0xff] %v11837_v15  ;;  %v3193_v42 = vmax.f32 %v3192_v60, %v15778_v46  ;;  %v15780_v57 = vld [vmem:[#allocation237_spill] sm:$0xff]  ;;  %v3718_v39 = vmul.f32 1.442695, %v3320_v29  ;;  %v15785_v60 = vld [vmem:[#allocation255_spill] sm:$0xff] }
 0x5ef   : > { %15774 = vst [vmem:[#allocation81_spill] sm:$0xff] %v11833_v10  ;;  %7644 = vpow2.f32 %v4078_v58  ;;  %v3092_v56 = vpop.xlane.xlu2 %3091  ;;  %v11847_v11 = vpop.eup %7636  ;;  %v3199_v51 = vmax.f32 %v3198_v54, %v15785_v60  ;;  %v15790_v29 = vld [vmem:[#allocation17_spill] sm:$0xff] }
 0x5f0   : > { %7646 = vpow2.f32 %v4080_v8  ;;  %v3502_v62 = vsub.f32 %v15779_v33, %v3092_v56  ;;  %v3503_v41 = vsub.f32 %v15780_v57, %v3092_v56  ;;  %v3504_v5 = vsub.f32 %v15781_v26, %v3092_v56  ;;  %15783 = vst [vmem:[#allocation123_spill] sm:$0xff] %v11847_v11  ;;  %v15788_v26 = vld [vmem:[#allocation35_spill] sm:$0xff]  ;;  %v15829_v60 = vld [vmem:[#allocation193_spill] sm:$0xff] }
 0x5f1   : > { %v11845_v3 = vpop.f32.mrf.mxu0  ;;  %v3505_v10 = vsub.f32 %v15784_v55, %v3092_v56  ;;  %v3506_v0 = vsub.f32 %v15788_v26, %v3092_v56  ;;  %v3205_v54 = vmax.f32 %v15791_v4, %v15790_v29  ;;  %7648 = vpow2.f32 %v3708_v7  ;;  %v15824_v29 = vld [vmem:[#allocation240_spill] sm:$0xff] }
 0x5f2   : > { %15782 = vst [vmem:[#allocation52_spill] sm:$0xff] %v11845_v3  ;;  %v3194_v58 = vsel %vm639_vm0, %v11845_v3, -inf  ;;  %v7639_v37 = vpop.eup %7638  ;;  %v4082_v8 = vmul.f32 1.442695, %v3502_v62  ;;  %v4911_v52 = vpop.f32.mrf.mxu2  ;;  %v4084_v40 = vmul.f32 1.442695, %v3503_v41  ;;  %7650 = vpow2.f32 %v3718_v39 }
 0x5f3   : > { %v11853_v33 = vpop.f32.mrf.mxu1  ;;  %v3195_v57 = vmax.f32 %v3193_v42, %v3194_v58  ;;  %v11855_v46 = vpop.eup %7640  ;;  %v4912_v1 = vadd.f32 %v4911_v52, %v15789_v18  ;;  %v4467_v19 = vpack.c.bf16 %v7639_v37, %v7629_v6  ;;  %v4086_v62 = vmul.f32 1.442695, %v3504_v5  ;;  %v15795_v37 = vld [vmem:[#allocation83_spill] sm:$0xff]  ;;  %v15796_v52 = vld [vmem:[#allocation140_spill] sm:$0xff] }
 0x5f4   : > { %15786 = vst [vmem:[#allocation147_spill] sm:$0xff] %v11853_v33  ;;  %v11859_v55 = vpop.f32.mrf.mxu3  ;;  %v11861_v3 = vpop.eup %7642  ;;  %v4088_v56 = vmul.f32 1.442695, %v3505_v10  ;;  %v3325_v5 = vsub.f32 %v15796_v52, %v15795_v37  ;;  %7652 = vpow2.f32 %v4082_v8  ;;  %v4375_v7 = vpack.c.bf16 %v11822_v31, %v11818_v38  ;;  %v15801_v8 = vld [vmem:[#allocation157_spill] sm:$0xff]  ;;  %v15802_v37 = vld [vmem:[#allocation242_spill] sm:$0xff]  ;;  %v15803_v38 = vld [vmem:[#allocation260_spill] sm:$0xff] }
 0x5f5   : > { %15787 = vst [vmem:[#allocation24_spill] sm:$0xff] %v11855_v46  ;;  %3196 = vmax.xlane.f32.xlu2 %v3195_v57  ;;  %v11867_v58 = vpop.eup %7644  ;;  %4799 = vmatmul.bf16.gmra.mxu1 %v4467_v19  ;;  %v11872_v41 = vadd.f32 %v11613_v24, %v4912_v1  ;;  %7654 = vpow2.f32 %v4084_v40  ;;  %v4090_v39 = vmul.f32 1.442695, %v3506_v0  ;;  %v15797_v19 = vld [vmem:[#allocation28_spill] sm:$0xff]  ;;  %v15798_v57 = vld [vmem:[#allocation153_spill] sm:$0xff]  ;;  %v15805_v40 = vpack.c.bf16 %v11537_v47, %v11511_v28  ;;  %v15809_v47 = vld [vmem:[#allocation259_spill] sm:$0xff] }
 0x5f6   : > { %15792 = vst [vmem:[#allocation224_spill] sm:$0xff] %v11867_v58  ;;  %v11874_v6 = vpop.eup %7646  ;;  %v15799_v26 = vpack.c.bf16 %v15797_v19, %v15798_v57  ;;  %v15800_v1 = vld [vmem:[#allocation285_spill] sm:$0xff]  ;;  %7656 = vpow2.f32 %v4086_v62  ;;  %v15806_v0 = vld [vmem:[#allocation236_spill] sm:$0xff]  ;;  %v3206_v28 = vmax.f32 %v3205_v54, %v15809_v47  ;;  %v15813_v58 = vld [vmem:[#allocation142_spill] sm:$0xff] }
 0x5f7   : > { %15793 = vst [vmem:[#allocation292_spill] sm:$0xff] %v11872_v41  ;;  %v3099_v24 = vpop.xlane.xlu0 %3098  ;;  %v3200_v42 = vmax.f32 %v3199_v51, %v15800_v1  ;;  %7658 = vpow2.f32 %v4088_v56  ;;  %v15807_v51 = vld [vmem:[#allocation46_spill] sm:$0xff]  ;;  %v15819_v47 = vld [vmem:[#allocation159_spill] sm:$0xff]  ;;  %v15831_v46 = vld [vmem:[#allocation69_spill] sm:$0xff] }
 0x5f8   : > { %15794 = vst [vmem:[#allocation176_spill] sm:$0xff] %v11874_v6  ;;  %4953 = vmatmul.bf16.gmra.mxu2 %v15799_v26  ;;  %v3507_v52 = vsub.f32 %v15801_v8, %v3099_v24  ;;  %v3508_v31 = vsub.f32 %v15802_v37, %v3099_v24  ;;  %v3509_v41 = vsub.f32 %v15803_v38, %v3099_v24  ;;  %v11900_v26 = vpop.eup %7648  ;;  %7660 = vpow2.f32 %v4090_v39 }
 0x5f9   : > { %v11891_v10 = vpop.f32.mrf.mxu0  ;;  %5157 = vmatmul.bf16.gmra.mxu3 %v15805_v40  ;;  %v3510_v19 = vsub.f32 %v15806_v0, %v3099_v24  ;;  %v3511_v57 = vsub.f32 %v15807_v51, %v3099_v24  ;;  %v11904_v15 = vpop.eup %7650  ;;  %v15810_v40 = vld [vmem:[#allocation70_spill] sm:$0xff] }
 0x5fa   : > { %15804 = vst [vmem:[#allocation62_spill] sm:$0xff] %v11891_v10  ;;  %v3201_v62 = vsel %vm639_vm0, %v11891_v10, -inf  ;;  %v4092_v8 = vmul.f32 1.442695, %v3507_v52  ;;  %v4094_v37 = vmul.f32 1.442695, %v3508_v31  ;;  %v4914_v38 = vpop.f32.mrf.mxu2  ;;  %v7653_v51 = vpop.eup %7652 }
 0x5fb   : > { %v4096_v18 = vmul.f32 1.442695, %v3509_v41  ;;  %v11902_v11 = vpop.f32.mrf.mxu1  ;;  %v3202_v6 = vmax.f32 %v3200_v42, %v3201_v62  ;;  %v4098_v56 = vmul.f32 1.442695, %v3510_v19  ;;  %v4915_v24 = vadd.f32 %v4914_v38, %v15810_v40  ;;  %v11910_v41 = vpop.eup %7654  ;;  %v15812_v31 = vld [vmem:[#allocation133_spill] sm:$0xff]  ;;  %v15816_v19 = vld [vmem:[#allocation32_spill] sm:$0xff] }
 0x5fc   : > { %15808 = vst [vmem:[#allocation192_spill] sm:$0xff] %v11902_v11  ;;  %v11908_v0 = vpop.f32.mrf.mxu3  ;;  %5271 = vmatmul.bf16.gmra.mxu0 %v4375_v7  ;;  %7662 = vpow2.f32 %v4092_v8  ;;  %v4100_v52 = vmul.f32 1.442695, %v3511_v57  ;;  %v3330_v42 = vsub.f32 %v15813_v58, %v15812_v31  ;;  %v11917_v54 = vpop.eup %7656  ;;  %v15817_v7 = vld [vmem:[#allocation66_spill] sm:$0xff]  ;;  %v3728_v40 = vmul.f32 1.442695, %v3325_v5 }
 0x5fd   : > { %3203 = vmax.xlane.f32.xlu0 %v3202_v6  ;;  %15811 = vst [vmem:[#allocation126_spill] sm:$0xff] %v11910_v41  ;;  %7664 = vpow2.f32 %v4094_v37  ;;  %v11915_v62 = vadd.f32 %v11662_v50, %v4915_v24  ;;  %v11919_v39 = vpop.eup %7658  ;;  %v3212_v38 = vmax.f32 %v15817_v7, %v15816_v19  ;;  %v15818_v6 = vld [vmem:[#allocation289_spill] sm:$0xff]  ;;  %v15820_v37 = vld [vmem:[#allocation248_spill] sm:$0xff] }
 0x5fe   : > { %7666 = vpow2.f32 %v4096_v18  ;;  %15815 = vst [vmem:[#allocation149_spill] sm:$0xff] %v11919_v39  ;;  %v3207_v8 = vmax.f32 %v3206_v28, %v15818_v6  ;;  %v15821_v50 = vld [vmem:[#allocation265_spill] sm:$0xff]  ;;  %v11929_v18 = vpop.eup %7660  ;;  %v3738_v19 = vmul.f32 1.442695, %v3330_v42  ;;  %v15830_v42 = vld [vmem:[#allocation103_spill] sm:$0xff] }
 0x5ff   : > { %15814 = vst [vmem:[#allocation108_spill] sm:$0xff] %v11915_v62  ;;  %7668 = vpow2.f32 %v4098_v56  ;;  %v3106_v57 = vpop.xlane.xlu1 %3105  ;;  %v15825_v28 = vld [vmem:[#allocation97_spill] sm:$0xff] }
 0x600   : > { %7670 = vpow2.f32 %v4100_v52  ;;  %v3512_v58 = vsub.f32 %v15819_v47, %v3106_v57  ;;  %v3513_v31 = vsub.f32 %v15820_v37, %v3106_v57  ;;  %v3514_v24 = vsub.f32 %v15821_v50, %v3106_v57  ;;  %15823 = vst [vmem:[#allocation243_spill] sm:$0xff] %v11929_v18  ;;  %v15828_v50 = vld [vmem:[#allocation43_spill] sm:$0xff] }
 0x601   : > { %v11927_v62 = vpop.f32.mrf.mxu0  ;;  %v3515_v4 = vsub.f32 %v15824_v29, %v3106_v57  ;;  %v3213_v5 = vmax.f32 %v3212_v38, %v15825_v28  ;;  %v3516_v10 = vsub.f32 %v15828_v50, %v3106_v57  ;;  %v3219_v38 = vmax.f32 %v15831_v46, %v15830_v42  ;;  %v15864_v42 = vld [vmem:[#allocation249_spill] sm:$0xff] }
 0x602   : > { %15822 = vst [vmem:[#allocation228_spill] sm:$0xff] %v11927_v62  ;;  %v3208_v56 = vsel %vm639_vm0, %v11927_v62, -inf  ;;  %v7663_v7 = vpop.eup %7662  ;;  %v4102_v52 = vmul.f32 1.442695, %v3512_v58  ;;  %v4916_v6 = vpop.f32.mrf.mxu2  ;;  %v4104_v1 = vmul.f32 1.442695, %v3513_v31  ;;  %7672 = vpow2.f32 %v3728_v40 }
 0x603   : > { %v11935_v47 = vpop.f32.mrf.mxu1  ;;  %v3209_v37 = vmax.f32 %v3207_v8, %v3208_v56  ;;  %v11937_v11 = vpop.eup %7664  ;;  %v4917_v33 = vadd.f32 %v4916_v6, %v15829_v60  ;;  %v4472_v17 = vpack.c.bf16 %v7663_v7, %v7653_v51  ;;  %v4106_v58 = vmul.f32 1.442695, %v3514_v24  ;;  %v15835_v7 = vld [vmem:[#allocation272_spill] sm:$0xff]  ;;  %v15869_v28 = vld [vmem:[#allocation37_spill] sm:$0xff] }
 0x604   : > { %15826 = vst [vmem:[#allocation226_spill] sm:$0xff] %v11935_v47  ;;  %v11941_v29 = vpop.f32.mrf.mxu3  ;;  %v11943_v62 = vpop.eup %7666  ;;  %v4108_v57 = vmul.f32 1.442695, %v3515_v4  ;;  %7674 = vpow2.f32 %v3738_v19  ;;  %v15836_v6 = vld [vmem:[#allocation144_spill] sm:$0xff]  ;;  %v4380_v40 = vpack.c.bf16 %v11904_v15, %v11900_v26  ;;  %v15837_v19 = vld [vmem:[#allocation31_spill] sm:$0xff] }
 0x605   : > { %15827 = vst [vmem:[#allocation130_spill] sm:$0xff] %v11937_v11  ;;  %3210 = vmax.xlane.f32.xlu1 %v3209_v37  ;;  %v11949_v56 = vpop.eup %7668  ;;  %4804 = vmatmul.bf16.gmra.mxu1 %v4472_v17  ;;  %v11954_v51 = vadd.f32 %v11695_v35, %v4917_v33  ;;  %v3335_v24 = vsub.f32 %v15836_v6, %v15835_v7  ;;  %7676 = vpow2.f32 %v4102_v52  ;;  %v4110_v17 = vmul.f32 1.442695, %v3516_v10  ;;  %v15838_v37 = vld [vmem:[#allocation283_spill] sm:$0xff]  ;;  %v15840_v33 = vld [vmem:[#allocation49_spill] sm:$0xff]  ;;  %v15841_v52 = vld [vmem:[#allocation162_spill] sm:$0xff] }
 0x606   : > { %15832 = vst [vmem:[#allocation151_spill] sm:$0xff] %v11949_v56  ;;  %v11956_v31 = vpop.eup %7670  ;;  %7678 = vpow2.f32 %v4104_v1  ;;  %v15839_v50 = vpack.c.bf16 %v15837_v19, %v15838_v37  ;;  %v3214_v8 = vmax.f32 %v3213_v5, %v15840_v33  ;;  %v15842_v7 = vld [vmem:[#allocation253_spill] sm:$0xff]  ;;  %v15843_v26 = vld [vmem:[#allocation268_spill] sm:$0xff]  ;;  %v15845_v10 = vpack.c.bf16 %v11615_v43, %v11589_v12  ;;  %v15849_v43 = vld [vmem:[#allocation59_spill] sm:$0xff] }
 0x607   : > { %15833 = vst [vmem:[#allocation230_spill] sm:$0xff] %v11954_v51  ;;  %v3113_v35 = vpop.xlane.xlu2 %3112  ;;  %7680 = vpow2.f32 %v4106_v58  ;;  %v15846_v1 = vld [vmem:[#allocation244_spill] sm:$0xff]  ;;  %v15847_v5 = vld [vmem:[#allocation33_spill] sm:$0xff]  ;;  %v3220_v12 = vmax.f32 %v3219_v38, %v15849_v43  ;;  %v15853_v56 = vld [vmem:[#allocation146_spill] sm:$0xff] }
 0x608   : > { %15834 = vst [vmem:[#allocation51_spill] sm:$0xff] %v11956_v31  ;;  %4958 = vmatmul.bf16.gmra.mxu2 %v15839_v50  ;;  %v3517_v6 = vsub.f32 %v15841_v52, %v3113_v35  ;;  %v3518_v15 = vsub.f32 %v15842_v7, %v3113_v35  ;;  %v3519_v51 = vsub.f32 %v15843_v26, %v3113_v35  ;;  %7682 = vpow2.f32 %v4108_v57  ;;  %v11982_v50 = vpop.eup %7672  ;;  %v15859_v43 = vld [vmem:[#allocation165_spill] sm:$0xff]  ;;  %v15871_v11 = vld [vmem:[#allocation75_spill] sm:$0xff] }
 0x609   : > { %v11973_v4 = vpop.f32.mrf.mxu0  ;;  %5162 = vmatmul.bf16.gmra.mxu3 %v15845_v10  ;;  %v3520_v19 = vsub.f32 %v15846_v1, %v3113_v35  ;;  %v3521_v37 = vsub.f32 %v15847_v5, %v3113_v35  ;;  %7684 = vpow2.f32 %v4110_v17  ;;  %v15850_v10 = vld [vmem:[#allocation120_spill] sm:$0xff] }
 0x60a   : > { %15844 = vst [vmem:[#allocation134_spill] sm:$0xff] %v11973_v4  ;;  %v3215_v58 = vsel %vm639_vm0, %v11973_v4, -inf  ;;  %v4112_v52 = vmul.f32 1.442695, %v3517_v6  ;;  %v4114_v7 = vmul.f32 1.442695, %v3518_v15  ;;  %v4919_v26 = vpop.f32.mrf.mxu2  ;;  %v11986_v39 = vpop.eup %7674 }
 0x60b   : > { %v4116_v60 = vmul.f32 1.442695, %v3519_v51  ;;  %v11984_v18 = vpop.f32.mrf.mxu1  ;;  %v3216_v31 = vmax.f32 %v3214_v8, %v3215_v58  ;;  %v4118_v57 = vmul.f32 1.442695, %v3520_v19  ;;  %v4920_v35 = vadd.f32 %v4919_v26, %v15850_v10  ;;  %v7677_v5 = vpop.eup %7676  ;;  %v15852_v15 = vld [vmem:[#allocation276_spill] sm:$0xff]  ;;  %v15856_v19 = vld [vmem:[#allocation34_spill] sm:$0xff] }
 0x60c   : > { %15848 = vst [vmem:[#allocation65_spill] sm:$0xff] %v11984_v18  ;;  %v11990_v1 = vpop.f32.mrf.mxu3  ;;  %5276 = vmatmul.bf16.gmra.mxu0 %v4380_v40  ;;  %7686 = vpow2.f32 %v4112_v52  ;;  %v4120_v6 = vmul.f32 1.442695, %v3521_v37  ;;  %v11992_v51 = vpop.eup %7678  ;;  %v3340_v8 = vsub.f32 %v15853_v56, %v15852_v15  ;;  %v15857_v40 = vld [vmem:[#allocation23_spill] sm:$0xff]  ;;  %v3748_v10 = vmul.f32 1.442695, %v3335_v24 }
 0x60d   : > { %3217 = vmax.xlane.f32.xlu2 %v3216_v31  ;;  %15851 = vst [vmem:[#allocation251_spill] sm:$0xff] %v11992_v51  ;;  %7688 = vpow2.f32 %v4114_v7  ;;  %v11997_v58 = vadd.f32 %v11744_v34, %v4920_v35  ;;  %v11999_v38 = vpop.eup %7680  ;;  %v3226_v26 = vmax.f32 %v15857_v40, %v15856_v19  ;;  %v15858_v31 = vld [vmem:[#allocation161_spill] sm:$0xff]  ;;  %v15861_v34 = vld [vmem:[#allocation179_spill] sm:$0xff] }
 0x60e   : > { %7690 = vpow2.f32 %v4116_v60  ;;  %v12001_v17 = vpop.eup %7682  ;;  %v3221_v52 = vmax.f32 %v3220_v12, %v15858_v31  ;;  %v15860_v7 = vld [vmem:[#allocation21_spill] sm:$0xff]  ;;  %v3758_v19 = vmul.f32 1.442695, %v3340_v8  ;;  %v15865_v12 = vld [vmem:[#allocation267_spill] sm:$0xff] }
 0x60f   : > { %15854 = vst [vmem:[#allocation231_spill] sm:$0xff] %v11997_v58  ;;  %7692 = vpow2.f32 %v4118_v57  ;;  %v3120_v37 = vpop.xlane.xlu0 %3119  ;;  %v12011_v60 = vpop.eup %7684  ;;  %v3227_v24 = vmax.f32 %v3226_v26, %v15865_v12  ;;  %v15870_v8 = vld [vmem:[#allocation107_spill] sm:$0xff]  ;;  %v15908_v12 = vld [vmem:[#allocation40_spill] sm:$0xff] }
 0x610   : > { %15855 = vst [vmem:[#allocation53_spill] sm:$0xff] %v12001_v17  ;;  %7694 = vpow2.f32 %v4120_v6  ;;  %v3522_v56 = vsub.f32 %v15859_v43, %v3120_v37  ;;  %v3523_v15 = vsub.f32 %v15860_v7, %v3120_v37  ;;  %v3524_v35 = vsub.f32 %v15861_v34, %v3120_v37  ;;  %v15868_v34 = vld [vmem:[#allocation288_spill] sm:$0xff] }
 0x611   : > { %v12009_v58 = vpop.f32.mrf.mxu0  ;;  %15863 = vst [vmem:[#allocation155_spill] sm:$0xff] %v12011_v60  ;;  %v3525_v46 = vsub.f32 %v15864_v42, %v3120_v37  ;;  %v3526_v4 = vsub.f32 %v15868_v34, %v3120_v37  ;;  %v3233_v26 = vmax.f32 %v15871_v11, %v15870_v8  ;;  %7696 = vpow2.f32 %v3748_v10  ;;  %v15904_v8 = vld [vmem:[#allocation257_spill] sm:$0xff] }
 0x612   : > { %15862 = vst [vmem:[#allocation138_spill] sm:$0xff] %v12009_v58  ;;  %v3222_v57 = vsel %vm639_vm0, %v12009_v58, -inf  ;;  %v7687_v40 = vpop.eup %7686  ;;  %v4122_v6 = vmul.f32 1.442695, %v3522_v56  ;;  %v4921_v31 = vpop.f32.mrf.mxu2  ;;  %v4124_v33 = vmul.f32 1.442695, %v3523_v15  ;;  %7698 = vpow2.f32 %v3758_v19 }
 0x613   : > { %v12017_v43 = vpop.f32.mrf.mxu1  ;;  %v3223_v7 = vmax.f32 %v3221_v52, %v3222_v57  ;;  %v12019_v18 = vpop.eup %7688  ;;  %v4922_v47 = vadd.f32 %v4921_v31, %v15869_v28  ;;  %v4477_v41 = vpack.c.bf16 %v7687_v40, %v7677_v5  ;;  %v4126_v56 = vmul.f32 1.442695, %v3524_v35  ;;  %v15875_v40 = vld [vmem:[#allocation106_spill] sm:$0xff]  ;;  %v15876_v31 = vld [vmem:[#allocation148_spill] sm:$0xff]  ;;  %v15877_v19 = vld [vmem:[#allocation137_spill] sm:$0xff] }
 0x614   : > { %15866 = vst [vmem:[#allocation237_spill] sm:$0xff] %v12017_v43  ;;  %v12023_v42 = vpop.f32.mrf.mxu3  ;;  %v12025_v58 = vpop.eup %7690  ;;  %v4128_v37 = vmul.f32 1.442695, %v3525_v46  ;;  %v3345_v35 = vsub.f32 %v15876_v31, %v15875_v40  ;;  %7700 = vpow2.f32 %v4122_v6  ;;  %v4385_v10 = vpack.c.bf16 %v11986_v39, %v11982_v50  ;;  %v15881_v6 = vld [vmem:[#allocation168_spill] sm:$0xff] }
 0x615   : > { %15867 = vst [vmem:[#allocation256_spill] sm:$0xff] %v12019_v18  ;;  %3224 = vmax.xlane.f32.xlu0 %v3223_v7  ;;  %v12031_v57 = vpop.eup %7692  ;;  %4809 = vmatmul.bf16.gmra.mxu1 %v4477_v41  ;;  %v12036_v5 = vadd.f32 %v11777_v27, %v4922_v47  ;;  %7702 = vpow2.f32 %v4124_v33  ;;  %v4130_v41 = vmul.f32 1.442695, %v3526_v4  ;;  %v15878_v7 = vld [vmem:[#allocation124_spill] sm:$0xff]  ;;  %v15880_v47 = vld [vmem:[#allocation86_spill] sm:$0xff]  ;;  %v15885_v4 = vpack.c.bf16 %v11697_v13, %v11671_v9  ;;  %v15889_v9 = vld [vmem:[#allocation101_spill] sm:$0xff] }
 0x616   : > { %15872 = vst [vmem:[#allocation233_spill] sm:$0xff] %v12031_v57  ;;  %v12038_v15 = vpop.eup %7694  ;;  %v15879_v34 = vpack.c.bf16 %v15877_v19, %v15878_v7  ;;  %v3228_v52 = vmax.f32 %v3227_v24, %v15880_v47  ;;  %7704 = vpow2.f32 %v4126_v56  ;;  %v15882_v40 = vld [vmem:[#allocation264_spill] sm:$0xff]  ;;  %v15887_v24 = vld [vmem:[#allocation55_spill] sm:$0xff]  ;;  %v3234_v13 = vmax.f32 %v3233_v26, %v15889_v9  ;;  %v15893_v57 = vld [vmem:[#allocation150_spill] sm:$0xff] }
 0x617   : > { %15873 = vst [vmem:[#allocation35_spill] sm:$0xff] %v12036_v5  ;;  %v3127_v27 = vpop.xlane.xlu1 %3126  ;;  %v15883_v50 = vld [vmem:[#allocation104_spill] sm:$0xff]  ;;  %7706 = vpow2.f32 %v4128_v37  ;;  %v15899_v9 = vld [vmem:[#allocation171_spill] sm:$0xff] }
 0x618   : > { %15874 = vst [vmem:[#allocation247_spill] sm:$0xff] %v12038_v15  ;;  %4963 = vmatmul.bf16.gmra.mxu2 %v15879_v34  ;;  %v3527_v31 = vsub.f32 %v15881_v6, %v3127_v27  ;;  %v3528_v39 = vsub.f32 %v15882_v40, %v3127_v27  ;;  %v3529_v5 = vsub.f32 %v15883_v50, %v3127_v27  ;;  %v15886_v33 = vld [vmem:[#allocation252_spill] sm:$0xff]  ;;  %v12064_v34 = vpop.eup %7696  ;;  %7708 = vpow2.f32 %v4130_v41 }
 0x619   : > { %v12055_v46 = vpop.f32.mrf.mxu0  ;;  %5167 = vmatmul.bf16.gmra.mxu3 %v15885_v4  ;;  %v3530_v19 = vsub.f32 %v15886_v33, %v3127_v27  ;;  %v3531_v7 = vsub.f32 %v15887_v24, %v3127_v27  ;;  %v12068_v17 = vpop.eup %7698  ;;  %v15890_v4 = vld [vmem:[#allocation128_spill] sm:$0xff] }
 0x61a   : > { %15884 = vst [vmem:[#allocation140_spill] sm:$0xff] %v12055_v46  ;;  %v3229_v56 = vsel %vm639_vm0, %v12055_v46, -inf  ;;  %v4132_v6 = vmul.f32 1.442695, %v3527_v31  ;;  %v4134_v40 = vmul.f32 1.442695, %v3528_v39  ;;  %v4924_v50 = vpop.f32.mrf.mxu2  ;;  %v7701_v24 = vpop.eup %7700 }
 0x61b   : > { %v4136_v28 = vmul.f32 1.442695, %v3529_v5  ;;  %v12066_v60 = vpop.f32.mrf.mxu1  ;;  %v3230_v15 = vmax.f32 %v3228_v52, %v3229_v56  ;;  %v4138_v37 = vmul.f32 1.442695, %v3530_v19  ;;  %v4925_v27 = vadd.f32 %v4924_v50, %v15890_v4  ;;  %v12074_v5 = vpop.eup %7702  ;;  %v15892_v39 = vld [vmem:[#allocation279_spill] sm:$0xff]  ;;  %v15910_v18 = vld [vmem:[#allocation80_spill] sm:$0xff] }
 0x61c   : > { %15888 = vst [vmem:[#allocation28_spill] sm:$0xff] %v12066_v60  ;;  %v12072_v33 = vpop.f32.mrf.mxu3  ;;  %5281 = vmatmul.bf16.gmra.mxu0 %v4385_v10  ;;  %7710 = vpow2.f32 %v4132_v6  ;;  %v4140_v31 = vmul.f32 1.442695, %v3531_v7  ;;  %v3350_v52 = vsub.f32 %v15893_v57, %v15892_v39  ;;  %v12081_v26 = vpop.eup %7704  ;;  %v15896_v19 = vld [vmem:[#allocation39_spill] sm:$0xff]  ;;  %v3768_v6 = vmul.f32 1.442695, %v3345_v35 }
 0x61d   : > { %3231 = vmax.xlane.f32.xlu1 %v3230_v15  ;;  %15891 = vst [vmem:[#allocation153_spill] sm:$0xff] %v12074_v5  ;;  %7712 = vpow2.f32 %v4134_v40  ;;  %v12079_v56 = vadd.f32 %v11826_v36, %v4925_v27  ;;  %v12083_v41 = vpop.eup %7706  ;;  %v15897_v10 = vld [vmem:[#allocation15_spill] sm:$0xff]  ;;  %v15898_v7 = vld [vmem:[#allocation92_spill] sm:$0xff]  ;;  %v15900_v40 = vld [vmem:[#allocation269_spill] sm:$0xff] }
 0x61e   : > { %7714 = vpow2.f32 %v4136_v28  ;;  %15895 = vst [vmem:[#allocation242_spill] sm:$0xff] %v12083_v41  ;;  %v3240_v50 = vmax.f32 %v15897_v10, %v15896_v19  ;;  %v3235_v4 = vmax.f32 %v3234_v13, %v15898_v7  ;;  %v15901_v36 = vld [vmem:[#allocation185_spill] sm:$0xff]  ;;  %v12093_v28 = vpop.eup %7708  ;;  %v15905_v10 = vld [vmem:[#allocation26_spill] sm:$0xff] }
 0x61f   : > { %15894 = vst [vmem:[#allocation157_spill] sm:$0xff] %v12079_v56  ;;  %7716 = vpow2.f32 %v4138_v37  ;;  %v3778_v37 = vmul.f32 1.442695, %v3350_v52  ;;  %v15909_v52 = vld [vmem:[#allocation114_spill] sm:$0xff]  ;;  %v15946_v5 = vld [vmem:[#allocation85_spill] sm:$0xff] }
 0x620   : > { %v3134_v15 = vpop.xlane.xlu2 %3133  ;;  %7718 = vpow2.f32 %v4140_v31  ;;  %15903 = vst [vmem:[#allocation236_spill] sm:$0xff] %v12093_v28  ;;  %v3241_v13 = vmax.f32 %v3240_v50, %v15905_v10  ;;  %v3247_v50 = vmax.f32 %v15910_v18, %v15909_v52  ;;  %v15941_v52 = vld [vmem:[#allocation266_spill] sm:$0xff] }
 0x621   : > { %v3532_v57 = vsub.f32 %v15899_v9, %v3134_v15  ;;  %v3533_v39 = vsub.f32 %v15900_v40, %v3134_v15  ;;  %v3534_v27 = vsub.f32 %v15901_v36, %v3134_v15  ;;  %v12091_v56 = vpop.f32.mrf.mxu0  ;;  %v3535_v11 = vsub.f32 %v15904_v8, %v3134_v15  ;;  %v15907_v36 = vld [vmem:[#allocation178_spill] sm:$0xff] }
 0x622   : > { %15902 = vst [vmem:[#allocation260_spill] sm:$0xff] %v12091_v56  ;;  %v3236_v35 = vsel %vm639_vm0, %v12091_v56, -inf  ;;  %v7711_v19 = vpop.eup %7710  ;;  %v4926_v7 = vpop.f32.mrf.mxu2  ;;  %v3536_v46 = vsub.f32 %v15907_v36, %v3134_v15  ;;  %7720 = vpow2.f32 %v3768_v6  ;;  %v15915_v6 = vld [vmem:[#allocation152_spill] sm:$0xff] }
 0x623   : > { %v4142_v31 = vmul.f32 1.442695, %v3532_v57  ;;  %v12099_v9 = vpop.f32.mrf.mxu1  ;;  %v3237_v40 = vmax.f32 %v3235_v4, %v3236_v35  ;;  %v12101_v60 = vpop.eup %7712  ;;  %v4144_v47 = vmul.f32 1.442695, %v3533_v39  ;;  %v4927_v43 = vadd.f32 %v4926_v7, %v15908_v12  ;;  %v15920_v12 = vld [vmem:[#allocation89_spill] sm:$0xff] }
 0x624   : > { %15906 = vst [vmem:[#allocation46_spill] sm:$0xff] %v12099_v9  ;;  %v12105_v8 = vpop.f32.mrf.mxu3  ;;  %v4482_v51 = vpack.c.bf16 %v7711_v19, %v7701_v24  ;;  %v12107_v56 = vpop.eup %7714  ;;  %v4146_v57 = vmul.f32 1.442695, %v3534_v27  ;;  %v4148_v15 = vmul.f32 1.442695, %v3535_v11  ;;  %7722 = vpow2.f32 %v3778_v37  ;;  %v15914_v19 = vld [vmem:[#allocation282_spill] sm:$0xff] }
 0x625   : > { %3238 = vmax.xlane.f32.xlu2 %v3237_v40  ;;  %v12113_v35 = vpop.eup %7716  ;;  %v12118_v24 = vadd.f32 %v11859_v55, %v4927_v43  ;;  %v3355_v7 = vsub.f32 %v15915_v6, %v15914_v19  ;;  %7724 = vpow2.f32 %v4142_v31  ;;  %v4390_v27 = vpack.c.bf16 %v12068_v17, %v12064_v34  ;;  %v15916_v37 = vld [vmem:[#allocation132_spill] sm:$0xff]  ;;  %v15918_v43 = vld [vmem:[#allocation94_spill] sm:$0xff]  ;;  %v15921_v34 = vld [vmem:[#allocation111_spill] sm:$0xff] }
 0x626   : > { %15911 = vst [vmem:[#allocation70_spill] sm:$0xff] %v12113_v35  ;;  %4814 = vmatmul.bf16.gmra.mxu1 %v4482_v51  ;;  %v12120_v39 = vpop.eup %7718  ;;  %7726 = vpow2.f32 %v4144_v47  ;;  %v4150_v51 = vmul.f32 1.442695, %v3536_v46  ;;  %v15917_v40 = vpack.c.bf16 %v11531_v63, %v15916_v37  ;;  %v3242_v36 = vmax.f32 %v3241_v13, %v15918_v43  ;;  %v15919_v31 = vld [vmem:[#allocation174_spill] sm:$0xff]  ;;  %v15924_v63 = vld [vmem:[#allocation261_spill] sm:$0xff]  ;;  %v15925_v13 = vld [vmem:[#allocation203_spill] sm:$0xff] }
 0x627   : > { %15912 = vst [vmem:[#allocation142_spill] sm:$0xff] %v12118_v24  ;;  %7728 = vpow2.f32 %v4146_v57  ;;  %v15923_v46 = vpack.c.bf16 %v11779_v53, %v11753_v44  ;;  %v15927_v44 = vld [vmem:[#allocation273_spill] sm:$0xff]  ;;  %v15930_v35 = vld [vmem:[#allocation154_spill] sm:$0xff]  ;;  %v15944_v43 = vld [vmem:[#allocation71_spill] sm:$0xff] }
 0x628   : > { %15913 = vst [vmem:[#allocation159_spill] sm:$0xff] %v12120_v39  ;;  %4968 = vmatmul.bf16.gmra.mxu2 %v15917_v40  ;;  %v3141_v55 = vpop.xlane.xlu0 %3140  ;;  %7730 = vpow2.f32 %v4148_v15  ;;  %v12146_v40 = vpop.eup %7720  ;;  %v3248_v53 = vmax.f32 %v3247_v50, %v15927_v44  ;;  %v15936_v24 = vld [vmem:[#allocation177_spill] sm:$0xff] }
 0x629   : > { %v3537_v6 = vsub.f32 %v15919_v31, %v3141_v55  ;;  %v3538_v17 = vsub.f32 %v15920_v12, %v3141_v55  ;;  %v3539_v19 = vsub.f32 %v15921_v34, %v3141_v55  ;;  %v12137_v11 = vpop.f32.mrf.mxu0  ;;  %5172 = vmatmul.bf16.gmra.mxu3 %v15923_v46  ;;  %v3540_v47 = vsub.f32 %v15924_v63, %v3141_v55  ;;  %v15928_v46 = vld [vmem:[#allocation90_spill] sm:$0xff] }
 0x62a   : > { %15922 = vst [vmem:[#allocation248_spill] sm:$0xff] %v12137_v11  ;;  %v3541_v37 = vsub.f32 %v15925_v13, %v3141_v55  ;;  %v3243_v57 = vsel %vm639_vm0, %v12137_v11, -inf  ;;  %v4929_v34 = vpop.f32.mrf.mxu2  ;;  %v12150_v41 = vpop.eup %7722  ;;  %7732 = vpow2.f32 %v4150_v51 }
 0x62b   : > { %v4152_v31 = vmul.f32 1.442695, %v3537_v6  ;;  %v4154_v12 = vmul.f32 1.442695, %v3538_v17  ;;  %v4156_v4 = vmul.f32 1.442695, %v3539_v19  ;;  %v12148_v28 = vpop.f32.mrf.mxu1  ;;  %v3244_v39 = vmax.f32 %v3242_v36, %v3243_v57  ;;  %v7725_v13 = vpop.eup %7724 }
 0x62c   : > { %15926 = vst [vmem:[#allocation265_spill] sm:$0xff] %v12148_v28  ;;  %v4158_v15 = vmul.f32 1.442695, %v3540_v47  ;;  %v4930_v55 = vadd.f32 %v4929_v34, %v15928_v46  ;;  %v12154_v63 = vpop.f32.mrf.mxu3  ;;  %5286 = vmatmul.bf16.gmra.mxu0 %v4390_v27  ;;  %v4160_v6 = vmul.f32 1.442695, %v3541_v37  ;;  %v12156_v19 = vpop.eup %7726  ;;  %v15929_v17 = vld [vmem:[#allocation38_spill] sm:$0xff] }
 0x62d   : > { %7734 = vpow2.f32 %v4152_v31  ;;  %3245 = vmax.xlane.f32.xlu0 %v3244_v39  ;;  %v3360_v36 = vsub.f32 %v15930_v35, %v15929_v17  ;;  %v12163_v50 = vpop.eup %7728  ;;  %v15933_v47 = vld [vmem:[#allocation117_spill] sm:$0xff]  ;;  %v15934_v27 = vld [vmem:[#allocation18_spill] sm:$0xff]  ;;  %v3788_v46 = vmul.f32 1.442695, %v3355_v7 }
 0x62e   : > { %7736 = vpow2.f32 %v4154_v12  ;;  %v12161_v57 = vadd.f32 %v11908_v0, %v4930_v55  ;;  %v12165_v51 = vpop.eup %7730  ;;  %v3254_v34 = vmax.f32 %v15934_v27, %v15933_v47  ;;  %v15935_v39 = vld [vmem:[#allocation57_spill] sm:$0xff]  ;;  %v15937_v12 = vld [vmem:[#allocation275_spill] sm:$0xff] }
 0x62f   : > { %7738 = vpow2.f32 %v4156_v4  ;;  %15932 = vst [vmem:[#allocation43_spill] sm:$0xff] %v12165_v51  ;;  %v3249_v31 = vmax.f32 %v3248_v53, %v15935_v39  ;;  %v15938_v0 = vld [vmem:[#allocation191_spill] sm:$0xff]  ;;  %v3798_v44 = vmul.f32 1.442695, %v3360_v36  ;;  %v15942_v53 = vld [vmem:[#allocation105_spill] sm:$0xff] }
 0x630   : > { %15931 = vst [vmem:[#allocation240_spill] sm:$0xff] %v12161_v57  ;;  %7740 = vpow2.f32 %v4158_v15  ;;  %v3148_v37 = vpop.xlane.xlu1 %3147  ;;  %v12175_v4 = vpop.eup %7732  ;;  %v3255_v7 = vmax.f32 %v3254_v34, %v15942_v53  ;;  %v15971_v51 = vld [vmem:[#allocation183_spill] sm:$0xff] }
 0x631   : > { %7742 = vpow2.f32 %v4160_v6  ;;  %v3542_v35 = vsub.f32 %v15936_v24, %v3148_v37  ;;  %v3543_v17 = vsub.f32 %v15937_v12, %v3148_v37  ;;  %v3544_v55 = vsub.f32 %v15938_v0, %v3148_v37  ;;  %v12173_v57 = vpop.f32.mrf.mxu0  ;;  %15940 = vst [vmem:[#allocation144_spill] sm:$0xff] %v12175_v4  ;;  %v15943_v0 = vld [vmem:[#allocation204_spill] sm:$0xff] }
 0x632   : > { %15939 = vst [vmem:[#allocation193_spill] sm:$0xff] %v12173_v57  ;;  %v3545_v18 = vsub.f32 %v15941_v52, %v3148_v37  ;;  %v3250_v15 = vsel %vm639_vm0, %v12173_v57, -inf  ;;  %v4931_v27 = vpop.f32.mrf.mxu2  ;;  %v3546_v28 = vsub.f32 %v15943_v0, %v3148_v37  ;;  %v15945_v57 = vld [vmem:[#allocation121_spill] sm:$0xff]  ;;  %7744 = vpow2.f32 %v3788_v46  ;;  %v15951_v37 = vld [vmem:[#allocation156_spill] sm:$0xff]  ;;  %v15953_v0 = vld [vmem:[#allocation190_spill] sm:$0xff] }
 0x633   : > { %v7735_v47 = vpop.eup %7734  ;;  %v4162_v6 = vmul.f32 1.442695, %v3542_v35  ;;  %v12181_v24 = vpop.f32.mrf.mxu1  ;;  %v3251_v12 = vmax.f32 %v3249_v31, %v3250_v15  ;;  %v4164_v11 = vmul.f32 1.442695, %v3543_v17  ;;  %v4932_v36 = vadd.f32 %v4931_v27, %v15944_v43  ;;  %v15950_v27 = vld [vmem:[#allocation287_spill] sm:$0xff]  ;;  %v15955_v31 = vld [vmem:[#allocation278_spill] sm:$0xff] }
 0x634   : > { %v12183_v39 = vpop.eup %7736  ;;  %v12187_v10 = vpop.f32.mrf.mxu3  ;;  %v4487_v52 = vpack.c.bf16 %v7735_v47, %v7725_v13  ;;  %v3261_v34 = vmax.f32 %v15946_v5, %v15945_v57  ;;  %v4166_v35 = vmul.f32 1.442695, %v3544_v55  ;;  %7746 = vpow2.f32 %v3798_v44 }
 0x635   : > { %v12189_v9 = vpop.eup %7738  ;;  %3252 = vmax.xlane.f32.xlu1 %v3251_v12  ;;  %v4168_v17 = vmul.f32 1.442695, %v3545_v18  ;;  %v12200_v13 = vadd.f32 %v11941_v29, %v4932_v36  ;;  %v3365_v55 = vsub.f32 %v15951_v37, %v15950_v27  ;;  %7748 = vpow2.f32 %v4162_v6  ;;  %v15954_v6 = vld [vmem:[#allocation180_spill] sm:$0xff] }
 0x636   : > { %v12195_v15 = vpop.eup %7740  ;;  %4819 = vmatmul.bf16.gmra.mxu1 %v4487_v52  ;;  %v4395_v46 = vpack.c.bf16 %v12150_v41, %v12146_v40  ;;  %7750 = vpow2.f32 %v4164_v11  ;;  %v4170_v18 = vmul.f32 1.442695, %v3546_v28  ;;  %v15952_v12 = vpack.c.bf16 %v11609_v61, %v11582_v21  ;;  %v15956_v40 = vld [vmem:[#allocation116_spill] sm:$0xff]  ;;  %v15959_v21 = vld [vmem:[#allocation270_spill] sm:$0xff] }
 0x637   : > { %15947 = vst [vmem:[#allocation31_spill] sm:$0xff] %v12195_v15  ;;  %v12202_v47 = vpop.eup %7742  ;;  %v3256_v36 = vmax.f32 %v3255_v7, %v15953_v0  ;;  %7752 = vpow2.f32 %v4166_v35  ;;  %v15958_v28 = vpack.c.bf16 %v11861_v3, %v11835_v20  ;;  %v15960_v11 = vld [vmem:[#allocation112_spill] sm:$0xff]  ;;  %v15962_v3 = vld [vmem:[#allocation277_spill] sm:$0xff] }
 0x638   : > { %15948 = vst [vmem:[#allocation283_spill] sm:$0xff] %v12200_v13  ;;  %4973 = vmatmul.bf16.gmra.mxu2 %v15952_v12  ;;  %v3155_v29 = vpop.xlane.xlu2 %3154  ;;  %7754 = vpow2.f32 %v4168_v17  ;;  %v12228_v12 = vpop.eup %7744  ;;  %v3262_v20 = vmax.f32 %v3261_v34, %v15962_v3 }
 0x639   : > { %15949 = vst [vmem:[#allocation162_spill] sm:$0xff] %v12202_v47  ;;  %v3547_v37 = vsub.f32 %v15954_v6, %v3155_v29  ;;  %v3548_v41 = vsub.f32 %v15955_v31, %v3155_v29  ;;  %v3549_v43 = vsub.f32 %v15956_v40, %v3155_v29  ;;  %v12219_v44 = vpop.f32.mrf.mxu0  ;;  %5177 = vmatmul.bf16.gmra.mxu3 %v15958_v28  ;;  %7756 = vpow2.f32 %v4170_v18  ;;  %v15963_v28 = vld [vmem:[#allocation139_spill] sm:$0xff] }
 0x63a   : > { %15957 = vst [vmem:[#allocation253_spill] sm:$0xff] %v12219_v44  ;;  %v3550_v61 = vsub.f32 %v15959_v21, %v3155_v29  ;;  %v3551_v7 = vsub.f32 %v15960_v11, %v3155_v29  ;;  %v3257_v35 = vsel %vm639_vm0, %v12219_v44, -inf  ;;  %v4934_v40 = vpop.f32.mrf.mxu2  ;;  %v12232_v0 = vpop.eup %7746  ;;  %v15965_v44 = vld [vmem:[#allocation158_spill] sm:$0xff] }
 0x63b   : > { %v4172_v6 = vmul.f32 1.442695, %v3547_v37  ;;  %v4174_v31 = vmul.f32 1.442695, %v3548_v41  ;;  %v4176_v52 = vmul.f32 1.442695, %v3549_v43  ;;  %v12230_v4 = vpop.f32.mrf.mxu1  ;;  %v3258_v47 = vmax.f32 %v3256_v36, %v3257_v35  ;;  %v7749_v11 = vpop.eup %7748 }
 0x63c   : > { %15961 = vst [vmem:[#allocation268_spill] sm:$0xff] %v12230_v4  ;;  %v4178_v17 = vmul.f32 1.442695, %v3550_v61  ;;  %v4935_v29 = vadd.f32 %v4934_v40, %v15963_v28  ;;  %v12236_v21 = vpop.f32.mrf.mxu3  ;;  %5291 = vmatmul.bf16.gmra.mxu0 %v4395_v46  ;;  %v4180_v37 = vmul.f32 1.442695, %v3551_v7  ;;  %v12238_v43 = vpop.eup %7750  ;;  %v15964_v41 = vld [vmem:[#allocation42_spill] sm:$0xff] }
 0x63d   : > { %7758 = vpow2.f32 %v4172_v6  ;;  %3259 = vmax.xlane.f32.xlu2 %v3258_v47  ;;  %v3370_v36 = vsub.f32 %v15965_v44, %v15964_v41  ;;  %v12245_v34 = vpop.eup %7752  ;;  %v15968_v61 = vld [vmem:[#allocation125_spill] sm:$0xff]  ;;  %v15969_v46 = vld [vmem:[#allocation11_spill] sm:$0xff]  ;;  %v3808_v6 = vmul.f32 1.442695, %v3365_v55 }
 0x63e   : > { %7760 = vpow2.f32 %v4174_v31  ;;  %v12243_v35 = vadd.f32 %v11990_v1, %v4935_v29  ;;  %v12247_v18 = vpop.eup %7754  ;;  %v3268_v40 = vmax.f32 %v15969_v46, %v15968_v61  ;;  %v15970_v7 = vld [vmem:[#allocation99_spill] sm:$0xff]  ;;  %v15972_v31 = vld [vmem:[#allocation280_spill] sm:$0xff] }
 0x63f   : > { %7762 = vpow2.f32 %v4176_v52  ;;  %15967 = vst [vmem:[#allocation33_spill] sm:$0xff] %v12247_v18  ;;  %v3263_v28 = vmax.f32 %v3262_v20, %v15970_v7  ;;  %v15973_v1 = vld [vmem:[#allocation195_spill] sm:$0xff]  ;;  %v12257_v52 = vpop.eup %7756  ;;  %v15979_v46 = vld [vmem:[#allocation56_spill] sm:$0xff] }
 0x640   : > { %15966 = vst [vmem:[#allocation244_spill] sm:$0xff] %v12243_v35  ;;  %7764 = vpow2.f32 %v4178_v17  ;;  %v3162_v47 = vpop.xlane.xlu0 %3161  ;;  %v15976_v41 = vld [vmem:[#allocation271_spill] sm:$0xff]  ;;  %v3818_v17 = vmul.f32 1.442695, %v3370_v36  ;;  %v15977_v35 = vld [vmem:[#allocation206_spill] sm:$0xff] }
 0x641   : > { %7766 = vpow2.f32 %v4180_v37  ;;  %v3552_v44 = vsub.f32 %v15971_v51, %v3162_v47  ;;  %v3553_v15 = vsub.f32 %v15972_v31, %v3162_v47  ;;  %v3554_v29 = vsub.f32 %v15973_v1, %v3162_v47  ;;  %v12255_v27 = vpop.f32.mrf.mxu0  ;;  %15975 = vst [vmem:[#allocation146_spill] sm:$0xff] %v12257_v52  ;;  %v15978_v1 = vld [vmem:[#allocation167_spill] sm:$0xff] }
 0x642   : > { %15974 = vst [vmem:[#allocation120_spill] sm:$0xff] %v12255_v27  ;;  %v3555_v57 = vsub.f32 %v15976_v41, %v3162_v47  ;;  %v3264_v55 = vsel %vm639_vm0, %v12255_v27, -inf  ;;  %v3269_v20 = vmax.f32 %v3268_v40, %v15977_v35  ;;  %v4936_v7 = vpop.f32.mrf.mxu2  ;;  %v3556_v3 = vsub.f32 %v15978_v1, %v3162_v47  ;;  %v15988_v1 = vld [vmem:[#allocation284_spill] sm:$0xff] }
 0x643   : > { %v7759_v61 = vpop.eup %7758  ;;  %v4182_v37 = vmul.f32 1.442695, %v3552_v44  ;;  %v12263_v51 = vpop.f32.mrf.mxu1  ;;  %v3265_v31 = vmax.f32 %v3263_v28, %v3264_v55  ;;  %v4184_v13 = vmul.f32 1.442695, %v3553_v15  ;;  %v4937_v5 = vadd.f32 %v4936_v7, %v15979_v46 }
 0x644   : > { %v12265_v53 = vpop.eup %7760  ;;  %v12269_v41 = vpop.f32.mrf.mxu3  ;;  %v4492_v4 = vpack.c.bf16 %v7759_v61, %v7749_v11  ;;  %7768 = vpow2.f32 %v3808_v6  ;;  %v4186_v36 = vmul.f32 1.442695, %v3554_v29  ;;  %v4188_v28 = vmul.f32 1.442695, %v3555_v57  ;;  %v15983_v61 = vld [vmem:[#allocation129_spill] sm:$0xff]  ;;  %v15984_v6 = vld [vmem:[#allocation91_spill] sm:$0xff] }
 0x645   : > { %v12271_v27 = vpop.eup %7762  ;;  %3266 = vmax.xlane.f32.xlu0 %v3265_v31  ;;  %7770 = vpow2.f32 %v3818_v17  ;;  %v12280_v46 = vadd.f32 %v12023_v42, %v4937_v5  ;;  %v3275_v47 = vmax.f32 %v15984_v6, %v15983_v61  ;;  %v4400_v7 = vpack.c.bf16 %v12232_v0, %v12228_v12  ;;  %v15986_v5 = vld [vmem:[#allocation172_spill] sm:$0xff]  ;;  %v15989_v12 = vld [vmem:[#allocation45_spill] sm:$0xff] }
 0x646   : > { %v12275_v44 = vpop.eup %7764  ;;  %4824 = vmatmul.bf16.gmra.mxu1 %v4492_v4  ;;  %7772 = vpow2.f32 %v4182_v37  ;;  %v4190_v4 = vmul.f32 1.442695, %v3556_v3  ;;  %v15985_v29 = vpack.c.bf16 %v11691_v59, %v11664_v32  ;;  %v3270_v55 = vmax.f32 %v3269_v20, %v15986_v5  ;;  %v15987_v37 = vld [vmem:[#allocation186_spill] sm:$0xff]  ;;  %v15993_v3 = vld [vmem:[#allocation212_spill] sm:$0xff] }
 0x647   : > { %15980 = vst [vmem:[#allocation165_spill] sm:$0xff] %v12275_v44  ;;  %v12282_v11 = vpop.eup %7766  ;;  %7774 = vpow2.f32 %v4184_v13  ;;  %v15991_v13 = vpack.c.bf16 %v11943_v62, %v11917_v54  ;;  %v15992_v59 = vld [vmem:[#allocation274_spill] sm:$0xff]  ;;  %v16031_v44 = vld [vmem:[#allocation160_spill] sm:$0xff] }
 0x648   : > { %15981 = vst [vmem:[#allocation21_spill] sm:$0xff] %v12280_v46  ;;  %4978 = vmatmul.bf16.gmra.mxu2 %v15985_v29  ;;  %v3169_v42 = vpop.xlane.xlu1 %3168  ;;  %7776 = vpow2.f32 %v4186_v36 }
 0x649   : > { %15982 = vst [vmem:[#allocation179_spill] sm:$0xff] %v12282_v11  ;;  %v3557_v31 = vsub.f32 %v15987_v37, %v3169_v42  ;;  %v3558_v0 = vsub.f32 %v15988_v1, %v3169_v42  ;;  %v3559_v40 = vsub.f32 %v15989_v12, %v3169_v42  ;;  %v12299_v57 = vpop.f32.mrf.mxu0  ;;  %5182 = vmatmul.bf16.gmra.mxu3 %v15991_v13  ;;  %7778 = vpow2.f32 %v4188_v28  ;;  %v15994_v13 = vld [vmem:[#allocation122_spill] sm:$0xff] }
 0x64a   : > { %15990 = vst [vmem:[#allocation249_spill] sm:$0xff] %v12299_v57  ;;  %v3560_v32 = vsub.f32 %v15992_v59, %v3169_v42  ;;  %v3561_v20 = vsub.f32 %v15993_v3, %v3169_v42  ;;  %v3271_v36 = vsel %vm639_vm0, %v12299_v57, -inf  ;;  %v12308_v29 = vpop.eup %7768  ;;  %v4939_v12 = vpop.f32.mrf.mxu2  ;;  %7780 = vpow2.f32 %v4190_v4 }
 0x64b   : > { %v4192_v37 = vmul.f32 1.442695, %v3557_v31  ;;  %v4194_v1 = vmul.f32 1.442695, %v3558_v0  ;;  %v4196_v17 = vmul.f32 1.442695, %v3559_v40  ;;  %v12310_v15 = vpop.f32.mrf.mxu1  ;;  %v3272_v52 = vmax.f32 %v3270_v55, %v3271_v36  ;;  %v12312_v11 = vpop.eup %7770 }
 0x64c   : > { %v4198_v62 = vmul.f32 1.442695, %v3560_v32  ;;  %v4940_v54 = vadd.f32 %v4939_v12, %v11689_v14  ;;  %v12315_v28 = vpop.f32.mrf.mxu3  ;;  %5296 = vmatmul.bf16.gmra.mxu0 %v4400_v7  ;;  %v7773_v42 = vpop.eup %7772  ;;  %v3276_v59 = vmax.f32 %v3275_v47, %v15994_v13  ;;  %v4200_v31 = vmul.f32 1.442695, %v3561_v20  ;;  %v15997_v7 = vld [vmem:[#allocation189_spill] sm:$0xff]  ;;  %v15998_v47 = vld [vmem:[#allocation286_spill] sm:$0xff] }
 0x64d   : > { %7782 = vpow2.f32 %v4192_v37  ;;  %3273 = vmax.xlane.f32.xlu1 %v3272_v52  ;;  %v12318_v40 = vpop.eup %7774  ;;  %v16000_v52 = vld [vmem:[#allocation100_spill] sm:$0xff] }
 0x64e   : > { %7784 = vpow2.f32 %v4194_v1  ;;  %v12321_v55 = vadd.f32 %v12072_v33, %v4940_v54  ;;  %v12323_v0 = vpop.eup %7776  ;;  %v3277_v36 = vmax.f32 %v3276_v59, %v16000_v52 }
 0x64f   : > { %7786 = vpow2.f32 %v4196_v17  ;;  %v12325_v4 = vpop.eup %7778 }
 0x650   : > { %15995 = vst [vmem:[#allocation288_spill] sm:$0xff] %v12321_v55  ;;  %7788 = vpow2.f32 %v4198_v62  ;;  %v3176_v14 = vpop.xlane.xlu2 %3175  ;;  %v12332_v37 = vpop.eup %7780 }
 0x651   : > { %15996 = vst [vmem:[#allocation37_spill] sm:$0xff] %v12325_v4  ;;  %7790 = vpow2.f32 %v4200_v31  ;;  %v3562_v32 = vsub.f32 %v15997_v7, %v3176_v14  ;;  %v3563_v3 = vsub.f32 %v15998_v47, %v3176_v14  ;;  %v12329_v20 = vpop.f32.mrf.mxu0  ;;  %v3564_v33 = vsub.f32 %v15724_v22, %v3176_v14 }
 0x652   : > { %15999 = vst [vmem:[#allocation148_spill] sm:$0xff] %v12329_v20  ;;  %v3278_v17 = vsel %vm639_vm0, %v12329_v20, -inf  ;;  %v3565_v12 = vsub.f32 %v15735_v16, %v3176_v14  ;;  %v4941_v62 = vpop.f32.mrf.mxu2  ;;  %v3566_v47 = vsub.f32 %v11727_v48, %v3176_v14 }
 0x653   : > { %16001 = vst [vmem:[#allocation137_spill] sm:$0xff] %v12332_v37  ;;  %v7783_v1 = vpop.eup %7782  ;;  %v12338_v54 = vpop.f32.mrf.mxu1  ;;  %v3279_v31 = vmax.f32 %v3277_v36, %v3278_v17  ;;  %v4202_v57 = vmul.f32 1.442695, %v3562_v32  ;;  %v4942_v59 = vadd.f32 %v4941_v62, %v11738_v45  ;;  %v4204_v20 = vmul.f32 1.442695, %v3563_v3 }
 0x654   : > { %v12340_v7 = vpop.eup %7784  ;;  %v12344_v5 = vpop.f32.mrf.mxu3  ;;  %v4497_v22 = vpack.c.bf16 %v7783_v1, %v7773_v42  ;;  %v4206_v36 = vmul.f32 1.442695, %v3564_v33  ;;  %v4208_v42 = vmul.f32 1.442695, %v3565_v12  ;;  %v4210_v3 = vmul.f32 1.442695, %v3566_v47 }
 0x655   : > { %v12346_v52 = vpop.eup %7786  ;;  %3280 = vmax.xlane.f32.xlu2 %v3279_v31  ;;  %v12355_v14 = vadd.f32 %v12105_v8, %v4942_v59  ;;  %7792 = vpow2.f32 %v4202_v57  ;;  %v16005_v17 = vpack.c.bf16 %v11773_v49, %v11746_v23  ;;  %v4405_v1 = vpack.c.bf16 %v12312_v11, %v12308_v29  ;;  %v16006_v12 = vld [vmem:[#allocation291_spill] sm:$0xff]  ;;  %v16007_v59 = vld [vmem:[#allocation82_spill] sm:$0xff]  ;;  %v16009_v49 = vld [vmem:[#allocation109_spill] sm:$0xff] }
 0x656   : > { %v12350_v18 = vpop.eup %7788  ;;  %4829 = vmatmul.bf16.gmra.mxu1 %v4497_v22  ;;  %7794 = vpow2.f32 %v4204_v20  ;;  %v16008_v57 = vpack.c.bf16 %v12025_v58, %v11999_v38  ;;  %v16011_v29 = vld [vmem:[#allocation131_spill] sm:$0xff] }
 0x657   : > { %16002 = vst [vmem:[#allocation124_spill] sm:$0xff] %v12350_v18  ;;  %v12357_v45 = vpop.eup %7790  ;;  %7796 = vpow2.f32 %v4206_v36 }
 0x658   : > { %16003 = vst [vmem:[#allocation168_spill] sm:$0xff] %v12355_v14  ;;  %4983 = vmatmul.bf16.gmra.mxu2 %v16005_v17  ;;  %v3183_v33 = vpop.xlane.xlu0 %3182  ;;  %v16010_v17 = vld [vmem:[#allocation217_spill] sm:$0xff]  ;;  %7798 = vpow2.f32 %v4208_v42 }
 0x659   : > { %16004 = vst [vmem:[#allocation264_spill] sm:$0xff] %v12357_v45  ;;  %v3567_v62 = vsub.f32 %v15728_v2, %v3183_v33  ;;  %v3568_v31 = vsub.f32 %v16006_v12, %v3183_v33  ;;  %v3569_v22 = vsub.f32 %v16007_v59, %v3183_v33  ;;  %5187 = vmatmul.bf16.gmra.mxu3 %v16008_v57  ;;  %v5262_v23 = vpop.f32.mrf.mxu0  ;;  %7800 = vpow2.f32 %v4210_v3 }
 0x65a   : > { %v3570_v47 = vsub.f32 %v16009_v49, %v3183_v33  ;;  %v3571_v11 = vsub.f32 %v16010_v17, %v3183_v33  ;;  %v12377_v32 = vadd.f32 %v5262_v23, %v16011_v29  ;;  %v4944_v12 = vpop.f32.mrf.mxu2  ;;  %v16018_v17 = vld [vmem:[#allocation201_spill] sm:$0xff] }
 0x65b   : > { %v4212_v20 = vmul.f32 1.442695, %v3567_v62  ;;  %v4214_v2 = vmul.f32 1.442695, %v3568_v31  ;;  %v4216_v8 = vmul.f32 1.442695, %v3569_v22  ;;  %v12379_v16 = vpop.f32.mrf.mxu1  ;;  %v4945_v58 = vadd.f32 %v4944_v12, %v11771_v25  ;;  %v7793_v33 = vpop.eup %7792 }
 0x65c   : > { %16012 = vst [vmem:[#allocation104_spill] sm:$0xff] %v12377_v32  ;;  %v4218_v59 = vmul.f32 1.442695, %v3570_v47  ;;  %v12382_v38 = vpop.f32.mrf.mxu3  ;;  %5301 = vmatmul.bf16.gmra.mxu0 %v4405_v1  ;;  %v4220_v36 = vmul.f32 1.442695, %v3571_v11  ;;  %v12387_v42 = vpop.eup %7794  ;;  %v16015_v25 = vld [vmem:[#allocation58_spill] sm:$0xff] }
 0x65d   : > { %7802 = vpow2.f32 %v4212_v20  ;;  %v12385_v57 = vadd.f32 %v12154_v63, %v4945_v58  ;;  %v12389_v62 = vpop.eup %7796  ;;  %v16016_v1 = vld [vmem:[#allocation93_spill] sm:$0xff]  ;;  %v16021_v58 = vld [vmem:[#allocation118_spill] sm:$0xff] }
 0x65e   : > { %7804 = vpow2.f32 %v4214_v2  ;;  %v12391_v31 = vpop.eup %7798  ;;  %v16020_v29 = vld [vmem:[#allocation281_spill] sm:$0xff] }
 0x65f   : > { %16013 = vst [vmem:[#allocation252_spill] sm:$0xff] %v12385_v57  ;;  %7806 = vpow2.f32 %v4216_v8  ;;  %v12395_v47 = vpop.eup %7800 }
 0x660   : > { %7808 = vpow2.f32 %v4218_v59  ;;  %v3190_v3 = vpop.xlane.xlu1 %3189  ;;  %16014 = vst [vmem:[#allocation55_spill] sm:$0xff] %v12391_v31  ;;  %v16035_v31 = vld [vmem:[#allocation200_spill] sm:$0xff] }
 0x661   : > { %7810 = vpow2.f32 %v4220_v36  ;;  %v3572_v22 = vsub.f32 %v16015_v25, %v3190_v3  ;;  %v3573_v23 = vsub.f32 %v16016_v1, %v3190_v3  ;;  %v5264_v49 = vpop.f32.mrf.mxu0  ;;  %16017 = vst [vmem:[#allocation128_spill] sm:$0xff] %v12395_v47  ;;  %v3574_v63 = vsub.f32 %v15753_v30, %v3190_v3  ;;  %v16022_v1 = vld [vmem:[#allocation145_spill] sm:$0xff] }
 0x662   : > { %v12399_v11 = vadd.f32 %v5264_v49, %v16018_v17  ;;  %v3575_v20 = vsub.f32 %v16020_v29, %v3190_v3  ;;  %v4946_v2 = vpop.f32.mrf.mxu2  ;;  %v3576_v36 = vsub.f32 %v16021_v58, %v3190_v3  ;;  %v16027_v58 = vld [vmem:[#allocation222_spill] sm:$0xff]  ;;  %v16029_v17 = vld [vmem:[#allocation61_spill] sm:$0xff] }
 0x663   : > { %v7803_v8 = vpop.eup %7802  ;;  %v12402_v12 = vpop.f32.mrf.mxu1  ;;  %v4222_v25 = vmul.f32 1.442695, %v3572_v22  ;;  %v4947_v48 = vadd.f32 %v4946_v2, %v16022_v1  ;;  %v4224_v49 = vmul.f32 1.442695, %v3573_v23  ;;  %v4226_v4 = vmul.f32 1.442695, %v3574_v63 }
 0x664   : > { %16019 = vst [vmem:[#allocation150_spill] sm:$0xff] %v12399_v11  ;;  %v12404_v59 = vpop.eup %7804  ;;  %v12408_v37 = vpop.f32.mrf.mxu3  ;;  %v4502_v45 = vpack.c.bf16 %v7803_v8, %v7793_v33  ;;  %v4228_v2 = vmul.f32 1.442695, %v3575_v20  ;;  %v4230_v23 = vmul.f32 1.442695, %v3576_v36  ;;  %v16026_v8 = vld [vmem:[#allocation24_spill] sm:$0xff]  ;;  %v16032_v33 = vpack.c.bf16 %v12107_v56, %v12081_v26 }
 0x665   : > { %v12410_v30 = vpop.eup %7806  ;;  %v12419_v3 = vadd.f32 %v12187_v10, %v4947_v48  ;;  %7812 = vpow2.f32 %v4222_v25  ;;  %v16028_v1 = vpack.c.bf16 %v16026_v8, %v16027_v58  ;;  %v16030_v48 = vld [vmem:[#allocation95_spill] sm:$0xff]  ;;  %v16033_v25 = vld [vmem:[#allocation41_spill] sm:$0xff]  ;;  %v16034_v58 = vld [vmem:[#allocation52_spill] sm:$0xff] }
 0x666   : > { %v12414_v29 = vpop.eup %7808  ;;  %4834 = vmatmul.bf16.gmra.mxu1 %v4502_v45  ;;  %7814 = vpow2.f32 %v4224_v49  ;;  %v16037_v56 = vld [vmem:[#allocation147_spill] sm:$0xff] }
 0x667   : > { %16023 = vst [vmem:[#allocation171_spill] sm:$0xff] %v12414_v29  ;;  %v12421_v22 = vpop.eup %7810  ;;  %7816 = vpow2.f32 %v4226_v4  ;;  %v16038_v4 = vld [vmem:[#allocation88_spill] sm:$0xff] }
 0x668   : > { %16024 = vst [vmem:[#allocation269_spill] sm:$0xff] %v12419_v3  ;;  %4988 = vmatmul.bf16.gmra.mxu2 %v16028_v1  ;;  %v3197_v63 = vpop.xlane.xlu2 %3196  ;;  %7818 = vpow2.f32 %v4228_v2 }
 0x669   : > { %16025 = vst [vmem:[#allocation185_spill] sm:$0xff] %v12421_v22  ;;  %v3577_v10 = vsub.f32 %v16029_v17, %v3197_v63  ;;  %v3578_v18 = vsub.f32 %v16030_v48, %v3197_v63  ;;  %v3579_v20 = vsub.f32 %v16031_v44, %v3197_v63  ;;  %5192 = vmatmul.bf16.gmra.mxu3 %v16032_v33  ;;  %v5267_v36 = vpop.f32.mrf.mxu0  ;;  %7820 = vpow2.f32 %v4230_v23 }
 0x66a   : > { %v3580_v8 = vsub.f32 %v16033_v25, %v3197_v63  ;;  %v3581_v1 = vsub.f32 %v16034_v58, %v3197_v63  ;;  %v12439_v29 = vadd.f32 %v5267_v36, %v16035_v31  ;;  %v4949_v48 = vpop.f32.mrf.mxu2  ;;  %v16039_v25 = vld [vmem:[#allocation164_spill] sm:$0xff]  ;;  %v16043_v36 = vld [vmem:[#allocation63_spill] sm:$0xff] }
 0x66b   : > { %v4232_v49 = vmul.f32 1.442695, %v3577_v10  ;;  %v4234_v17 = vmul.f32 1.442695, %v3578_v18  ;;  %v4236_v45 = vmul.f32 1.442695, %v3579_v20  ;;  %v12441_v47 = vpop.f32.mrf.mxu1  ;;  %v4950_v26 = vadd.f32 %v4949_v48, %v16037_v56  ;;  %v7813_v63 = vpop.eup %7812 }
 0x66c   : > { %16036 = vst [vmem:[#allocation257_spill] sm:$0xff] %v12439_v29  ;;  %v4238_v44 = vmul.f32 1.442695, %v3580_v8  ;;  %v12444_v33 = vpop.f32.mrf.mxu3  ;;  %v16040_v22 = vpack.c.bf16 %v16038_v4, %v16039_v25  ;;  %v4240_v31 = vmul.f32 1.442695, %v3581_v1  ;;  %v12452_v2 = vpop.eup %7814  ;;  %v16047_v48 = vld [vmem:[#allocation181_spill] sm:$0xff] }
 0x66d   : > { %7822 = vpow2.f32 %v4232_v49  ;;  %v12450_v18 = vadd.f32 %v12236_v21, %v4950_v26  ;;  %v12454_v23 = vpop.eup %7816  ;;  %v16049_v26 = vld [vmem:[#allocation285_spill] sm:$0xff] }
 0x66e   : > { %5306 = vmatmul.bf16.gmra.mxu0 %v16040_v22  ;;  %7824 = vpow2.f32 %v4234_v17  ;;  %v12456_v20 = vpop.eup %7818  ;;  %v16044_v22 = vld [vmem:[#allocation30_spill] sm:$0xff]  ;;  %v16046_v17 = vld [vmem:[#allocation255_spill] sm:$0xff] }
 0x66f   : > { %16041 = vst [vmem:[#allocation178_spill] sm:$0xff] %v12450_v18  ;;  %7826 = vpow2.f32 %v4236_v45  ;;  %v12460_v49 = vpop.eup %7820 }
 0x670   : > { %7828 = vpow2.f32 %v4238_v44  ;;  %v3204_v10 = vpop.xlane.xlu0 %3203  ;;  %16042 = vst [vmem:[#allocation40_spill] sm:$0xff] %v12456_v20  ;;  %v16064_v20 = vld [vmem:[#allocation207_spill] sm:$0xff] }
 0x671   : > { %7830 = vpow2.f32 %v4240_v31  ;;  %v3582_v8 = vsub.f32 %v16043_v36, %v3204_v10  ;;  %v3583_v58 = vsub.f32 %v16044_v22, %v3204_v10  ;;  %v5269_v1 = vpop.f32.mrf.mxu0  ;;  %16045 = vst [vmem:[#allocation152_spill] sm:$0xff] %v12460_v49  ;;  %v3584_v21 = vsub.f32 %v16046_v17, %v3204_v10  ;;  %v16050_v31 = vld [vmem:[#allocation62_spill] sm:$0xff]  ;;  %v16051_v22 = vld [vmem:[#allocation192_spill] sm:$0xff] }
 0x672   : > { %v12464_v56 = vadd.f32 %v5269_v1, %v16047_v48  ;;  %v3585_v4 = vsub.f32 %v16049_v26, %v3204_v10  ;;  %v4951_v44 = vpop.f32.mrf.mxu2  ;;  %v3586_v36 = vsub.f32 %v16050_v31, %v3204_v10  ;;  %v16056_v31 = vld [vmem:[#allocation126_spill] sm:$0xff]  ;;  %v16058_v48 = vld [vmem:[#allocation36_spill] sm:$0xff] }
 0x673   : > { %v7823_v45 = vpop.eup %7822  ;;  %v12467_v25 = vpop.f32.mrf.mxu1  ;;  %v4242_v11 = vmul.f32 1.442695, %v3582_v8  ;;  %v4952_v32 = vadd.f32 %v4951_v44, %v16051_v22  ;;  %v4244_v1 = vmul.f32 1.442695, %v3583_v58 }
 0x674   : > { %16048 = vst [vmem:[#allocation132_spill] sm:$0xff] %v12464_v56  ;;  %v12469_v29 = vpop.eup %7824  ;;  %v12473_v61 = vpop.f32.mrf.mxu3  ;;  %v4507_v18 = vpack.c.bf16 %v7823_v45, %v7813_v63  ;;  %v4246_v56 = vmul.f32 1.442695, %v3584_v21  ;;  %v4248_v44 = vmul.f32 1.442695, %v3585_v4  ;;  %v16055_v45 = vld [vmem:[#allocation130_spill] sm:$0xff]  ;;  %v16061_v63 = vpack.c.bf16 %v12189_v9, %v12163_v50 }
 0x675   : > { %v12475_v17 = vpop.eup %7826  ;;  %v12484_v10 = vadd.f32 %v12269_v41, %v4952_v32  ;;  %7832 = vpow2.f32 %v4242_v11  ;;  %v4250_v58 = vmul.f32 1.442695, %v3586_v36  ;;  %v16057_v22 = vpack.c.bf16 %v16055_v45, %v16056_v31  ;;  %v16059_v32 = vld [vmem:[#allocation17_spill] sm:$0xff]  ;;  %v16063_v31 = vld [vmem:[#allocation228_spill] sm:$0xff]  ;;  %v16066_v9 = vld [vmem:[#allocation226_spill] sm:$0xff] }
 0x676   : > { %v12479_v26 = vpop.eup %7828  ;;  %4839 = vmatmul.bf16.gmra.mxu1 %v4507_v18  ;;  %7834 = vpow2.f32 %v4244_v1  ;;  %v16062_v36 = vld [vmem:[#allocation289_spill] sm:$0xff] }
 0x677   : > { %16052 = vst [vmem:[#allocation174_spill] sm:$0xff] %v12479_v26  ;;  %v12486_v8 = vpop.eup %7830  ;;  %7836 = vpow2.f32 %v4246_v56  ;;  %v16067_v56 = vld [vmem:[#allocation166_spill] sm:$0xff] }
 0x678   : > { %16053 = vst [vmem:[#allocation89_spill] sm:$0xff] %v12484_v10  ;;  %4993 = vmatmul.bf16.gmra.mxu2 %v16057_v22  ;;  %v3211_v21 = vpop.xlane.xlu1 %3210  ;;  %v16060_v10 = vld [vmem:[#allocation259_spill] sm:$0xff]  ;;  %7838 = vpow2.f32 %v4248_v44 }
 0x679   : > { %16054 = vst [vmem:[#allocation111_spill] sm:$0xff] %v12486_v8  ;;  %v3587_v41 = vsub.f32 %v16058_v48, %v3211_v21  ;;  %v3588_v3 = vsub.f32 %v16059_v32, %v3211_v21  ;;  %v3589_v4 = vsub.f32 %v16060_v10, %v3211_v21  ;;  %5197 = vmatmul.bf16.gmra.mxu3 %v16061_v63  ;;  %v5272_v11 = vpop.f32.mrf.mxu0  ;;  %7840 = vpow2.f32 %v4250_v58 }
 0x67a   : > { %v3590_v45 = vsub.f32 %v16062_v36, %v3211_v21  ;;  %v3591_v22 = vsub.f32 %v16063_v31, %v3211_v21  ;;  %v12504_v26 = vadd.f32 %v5272_v11, %v16064_v20  ;;  %v16068_v36 = vld [vmem:[#allocation14_spill] sm:$0xff] }
 0x67b   : > { %v4252_v1 = vmul.f32 1.442695, %v3587_v41  ;;  %v4254_v48 = vmul.f32 1.442695, %v3588_v3  ;;  %v4256_v18 = vmul.f32 1.442695, %v3589_v4  ;;  %v4954_v32 = vpop.f32.mrf.mxu2  ;;  %v12506_v49 = vpop.f32.mrf.mxu1  ;;  %v16069_v8 = vpack.c.bf16 %v16067_v56, %v16068_v36 }
 0x67c   : > { %16065 = vst [vmem:[#allocation261_spill] sm:$0xff] %v12504_v26  ;;  %v4258_v10 = vmul.f32 1.442695, %v3590_v45  ;;  %v4955_v50 = vadd.f32 %v4954_v32, %v16066_v9  ;;  %v12509_v63 = vpop.f32.mrf.mxu3  ;;  %v4260_v20 = vmul.f32 1.442695, %v3591_v22  ;;  %v7833_v21 = vpop.eup %7832  ;;  %v16072_v11 = vld [vmem:[#allocation66_spill] sm:$0xff] }
 0x67d   : > { %7842 = vpow2.f32 %v4252_v1  ;;  %v12517_v44 = vpop.eup %7834  ;;  %v16076_v32 = vld [vmem:[#allocation74_spill] sm:$0xff] }
 0x67e   : > { %5311 = vmatmul.bf16.gmra.mxu0 %v16069_v8  ;;  %7844 = vpow2.f32 %v4254_v48  ;;  %v12515_v3 = vadd.f32 %v12315_v28, %v4955_v50  ;;  %v12519_v58 = vpop.eup %7836  ;;  %v16073_v8 = vld [vmem:[#allocation32_spill] sm:$0xff]  ;;  %v16075_v48 = vld [vmem:[#allocation97_spill] sm:$0xff] }
 0x67f   : > { %7846 = vpow2.f32 %v4256_v18  ;;  %v12521_v4 = vpop.eup %7838  ;;  %v16078_v50 = vld [vmem:[#allocation49_spill] sm:$0xff] }
 0x680   : > { %16070 = vst [vmem:[#allocation203_spill] sm:$0xff] %v12515_v3  ;;  %7848 = vpow2.f32 %v4258_v10  ;;  %v3218_v41 = vpop.xlane.xlu2 %3217  ;;  %v12525_v1 = vpop.eup %7840 }
 0x681   : > { %16071 = vst [vmem:[#allocation90_spill] sm:$0xff] %v12521_v4  ;;  %7850 = vpow2.f32 %v4260_v20  ;;  %v3592_v45 = vsub.f32 %v16072_v11, %v3218_v41  ;;  %v3593_v31 = vsub.f32 %v16073_v8, %v3218_v41  ;;  %v5274_v22 = vpop.f32.mrf.mxu0  ;;  %v3594_v28 = vsub.f32 %v16075_v48, %v3218_v41  ;;  %v16079_v20 = vld [vmem:[#allocation134_spill] sm:$0xff]  ;;  %v16080_v8 = vld [vmem:[#allocation65_spill] sm:$0xff] }
 0x682   : > { %16074 = vst [vmem:[#allocation154_spill] sm:$0xff] %v12525_v1  ;;  %v12529_v9 = vadd.f32 %v5274_v22, %v16076_v32  ;;  %v3595_v56 = vsub.f32 %v16078_v50, %v3218_v41  ;;  %v3596_v11 = vsub.f32 %v16079_v20, %v3218_v41  ;;  %v16085_v20 = vld [vmem:[#allocation251_spill] sm:$0xff]  ;;  %v16087_v32 = vld [vmem:[#allocation69_spill] sm:$0xff]  ;;  %v16093_v4 = vld [vmem:[#allocation110_spill] sm:$0xff] }
 0x683   : > { %v7843_v18 = vpop.eup %7842  ;;  %v4956_v10 = vpop.f32.mrf.mxu2  ;;  %v4262_v3 = vmul.f32 1.442695, %v3592_v45  ;;  %v4264_v22 = vmul.f32 1.442695, %v3593_v31 }
 0x684   : > { %16077 = vst [vmem:[#allocation177_spill] sm:$0xff] %v12529_v9  ;;  %v12532_v36 = vpop.f32.mrf.mxu1  ;;  %v12534_v26 = vpop.eup %7844  ;;  %v4957_v57 = vadd.f32 %v4956_v10, %v16080_v8  ;;  %v4512_v55 = vpack.c.bf16 %v7843_v18, %v7833_v21  ;;  %v4266_v9 = vmul.f32 1.442695, %v3594_v28  ;;  %v4268_v10 = vmul.f32 1.442695, %v3595_v56  ;;  %v16084_v18 = vld [vmem:[#allocation256_spill] sm:$0xff] }
 0x685   : > { %v12538_v14 = vpop.f32.mrf.mxu3  ;;  %v12540_v48 = vpop.eup %7846  ;;  %7852 = vpow2.f32 %v4262_v3  ;;  %v4270_v31 = vmul.f32 1.442695, %v3596_v11  ;;  %v16086_v8 = vpack.c.bf16 %v16084_v18, %v16085_v20  ;;  %v16090_v21 = vpack.c.bf16 %v12271_v27, %v12245_v34  ;;  %v16091_v11 = vld [vmem:[#allocation161_spill] sm:$0xff]  ;;  %v16092_v20 = vld [vmem:[#allocation138_spill] sm:$0xff] }
 0x686   : > { %v12544_v50 = vpop.eup %7848  ;;  %4844 = vmatmul.bf16.gmra.mxu1 %v4512_v55  ;;  %v12549_v41 = vadd.f32 %v12344_v5, %v4957_v57  ;;  %7854 = vpow2.f32 %v4264_v22  ;;  %v16088_v57 = vld [vmem:[#allocation103_spill] sm:$0xff]  ;;  %v16096_v27 = vld [vmem:[#allocation237_spill] sm:$0xff] }
 0x687   : > { %16081 = vst [vmem:[#allocation275_spill] sm:$0xff] %v12544_v50  ;;  %v12551_v45 = vpop.eup %7850  ;;  %7856 = vpow2.f32 %v4266_v9  ;;  %v16097_v9 = vld [vmem:[#allocation98_spill] sm:$0xff] }
 0x688   : > { %16082 = vst [vmem:[#allocation191_spill] sm:$0xff] %v12549_v41  ;;  %4998 = vmatmul.bf16.gmra.mxu2 %v16086_v8  ;;  %v3225_v28 = vpop.xlane.xlu0 %3224  ;;  %v16089_v41 = vld [vmem:[#allocation59_spill] sm:$0xff]  ;;  %7858 = vpow2.f32 %v4268_v10 }
 0x689   : > { %16083 = vst [vmem:[#allocation266_spill] sm:$0xff] %v12551_v45  ;;  %v3597_v5 = vsub.f32 %v16087_v32, %v3225_v28  ;;  %v3598_v35 = vsub.f32 %v16088_v57, %v3225_v28  ;;  %v3599_v56 = vsub.f32 %v16089_v41, %v3225_v28  ;;  %5202 = vmatmul.bf16.gmra.mxu3 %v16090_v21  ;;  %v5277_v3 = vpop.f32.mrf.mxu0  ;;  %7860 = vpow2.f32 %v4270_v31 }
 0x68a   : > { %v3600_v18 = vsub.f32 %v16091_v11, %v3225_v28  ;;  %v3601_v8 = vsub.f32 %v16092_v20, %v3225_v28  ;;  %v12569_v50 = vadd.f32 %v5277_v3, %v16093_v4  ;;  %v16098_v11 = vld [vmem:[#allocation173_spill] sm:$0xff]  ;;  %v16103_v3 = vld [vmem:[#allocation23_spill] sm:$0xff] }
 0x68b   : > { %v4272_v22 = vmul.f32 1.442695, %v3597_v5  ;;  %v4274_v32 = vmul.f32 1.442695, %v3598_v35  ;;  %v4276_v55 = vmul.f32 1.442695, %v3599_v56  ;;  %v4959_v57 = vpop.f32.mrf.mxu2  ;;  %v16099_v45 = vpack.c.bf16 %v16097_v9, %v16098_v11  ;;  %v7853_v28 = vpop.eup %7852 }
 0x68c   : > { %16094 = vst [vmem:[#allocation204_spill] sm:$0xff] %v12569_v50  ;;  %v12571_v1 = vpop.f32.mrf.mxu1  ;;  %v4278_v41 = vmul.f32 1.442695, %v3600_v18  ;;  %v4960_v34 = vadd.f32 %v4959_v57, %v16096_v27  ;;  %v4280_v4 = vmul.f32 1.442695, %v3601_v8  ;;  %v12582_v10 = vpop.eup %7854  ;;  %v16107_v57 = vld [vmem:[#allocation187_spill] sm:$0xff] }
 0x68d   : > { %16095 = vst [vmem:[#allocation71_spill] sm:$0xff] %v12571_v1  ;;  %v12574_v21 = vpop.f32.mrf.mxu3  ;;  %7862 = vpow2.f32 %v4272_v22  ;;  %v12584_v31 = vpop.eup %7856 }
 0x68e   : > { %5316 = vmatmul.bf16.gmra.mxu0 %v16099_v45  ;;  %7864 = vpow2.f32 %v4274_v32  ;;  %v12580_v35 = vadd.f32 %v12382_v38, %v4960_v34  ;;  %16101 = vst [vmem:[#allocation180_spill] sm:$0xff] %v12582_v10  ;;  %v12586_v56 = vpop.eup %7858  ;;  %v16104_v45 = vld [vmem:[#allocation34_spill] sm:$0xff]  ;;  %v16106_v32 = vld [vmem:[#allocation267_spill] sm:$0xff] }
 0x68f   : > { %7866 = vpow2.f32 %v4276_v55  ;;  %16102 = vst [vmem:[#allocation278_spill] sm:$0xff] %v12586_v56  ;;  %v12590_v22 = vpop.eup %7860  ;;  %v16109_v34 = vld [vmem:[#allocation86_spill] sm:$0xff]  ;;  %v16124_v56 = vld [vmem:[#allocation115_spill] sm:$0xff] }
 0x690   : > { %16100 = vst [vmem:[#allocation156_spill] sm:$0xff] %v12580_v35  ;;  %7868 = vpow2.f32 %v4278_v41  ;;  %v3232_v5 = vpop.xlane.xlu1 %3231 }
 0x691   : > { %7870 = vpow2.f32 %v4280_v4  ;;  %v3602_v18 = vsub.f32 %v16103_v3, %v3232_v5  ;;  %v3603_v20 = vsub.f32 %v16104_v45, %v3232_v5  ;;  %v5279_v8 = vpop.f32.mrf.mxu0  ;;  %16105 = vst [vmem:[#allocation116_spill] sm:$0xff] %v12590_v22  ;;  %v3604_v38 = vsub.f32 %v16106_v32, %v3232_v5  ;;  %v16111_v4 = vld [vmem:[#allocation140_spill] sm:$0xff] }
 0x692   : > { %v12594_v27 = vadd.f32 %v5279_v8, %v16107_v57  ;;  %v3605_v9 = vsub.f32 %v16109_v34, %v3232_v5  ;;  %v3606_v3 = vsub.f32 %v16111_v4, %v3232_v5  ;;  %v16112_v45 = vld [vmem:[#allocation28_spill] sm:$0xff] }
 0x693   : > { %v7863_v55 = vpop.eup %7862  ;;  %v4961_v41 = vpop.f32.mrf.mxu2  ;;  %v4282_v35 = vmul.f32 1.442695, %v3602_v18  ;;  %v4284_v8 = vmul.f32 1.442695, %v3603_v20 }
 0x694   : > { %16108 = vst [vmem:[#allocation270_spill] sm:$0xff] %v12594_v27  ;;  %v12597_v11 = vpop.f32.mrf.mxu1  ;;  %v12599_v50 = vpop.eup %7864  ;;  %v4962_v13 = vadd.f32 %v4961_v41, %v16112_v45  ;;  %v4517_v46 = vpack.c.bf16 %v7863_v55, %v7853_v28  ;;  %v4286_v27 = vmul.f32 1.442695, %v3604_v38  ;;  %v4288_v41 = vmul.f32 1.442695, %v3605_v9  ;;  %v16116_v55 = vld [vmem:[#allocation153_spill] sm:$0xff] }
 0x695   : > { %16110 = vst [vmem:[#allocation112_spill] sm:$0xff] %v12597_v11  ;;  %v12603_v1 = vpop.f32.mrf.mxu3  ;;  %v12605_v32 = vpop.eup %7866  ;;  %7872 = vpow2.f32 %v4282_v35  ;;  %v4290_v20 = vmul.f32 1.442695, %v3606_v3  ;;  %v16117_v4 = vpack.c.bf16 %v12101_v60, %v16116_v55  ;;  %v16118_v45 = vld [vmem:[#allocation75_spill] sm:$0xff]  ;;  %v16120_v11 = vld [vmem:[#allocation101_spill] sm:$0xff]  ;;  %v16121_v28 = vpack.c.bf16 %v12346_v52, %v12323_v0  ;;  %v16122_v3 = vld [vmem:[#allocation92_spill] sm:$0xff] }
 0x696   : > { %v12609_v34 = vpop.eup %7868  ;;  %4849 = vmatmul.bf16.gmra.mxu1 %v4517_v46  ;;  %v12614_v5 = vadd.f32 %v12408_v37, %v4962_v13  ;;  %7874 = vpow2.f32 %v4284_v8  ;;  %v16119_v37 = vld [vmem:[#allocation107_spill] sm:$0xff]  ;;  %v16123_v55 = vld [vmem:[#allocation260_spill] sm:$0xff]  ;;  %v16127_v0 = vld [vmem:[#allocation46_spill] sm:$0xff] }
 0x697   : > { %16113 = vst [vmem:[#allocation139_spill] sm:$0xff] %v12609_v34  ;;  %v12616_v18 = vpop.eup %7870  ;;  %7876 = vpow2.f32 %v4286_v27  ;;  %v16128_v27 = vld [vmem:[#allocation50_spill] sm:$0xff] }
 0x698   : > { %16114 = vst [vmem:[#allocation158_spill] sm:$0xff] %v12614_v5  ;;  %5003 = vmatmul.bf16.gmra.mxu2 %v16117_v4  ;;  %v3239_v38 = vpop.xlane.xlu2 %3238  ;;  %7878 = vpow2.f32 %v4288_v41 }
 0x699   : > { %16115 = vst [vmem:[#allocation183_spill] sm:$0xff] %v12616_v18  ;;  %v3607_v13 = vsub.f32 %v16118_v45, %v3239_v38  ;;  %v3608_v57 = vsub.f32 %v16119_v37, %v3239_v38  ;;  %v3609_v9 = vsub.f32 %v16120_v11, %v3239_v38  ;;  %5207 = vmatmul.bf16.gmra.mxu3 %v16121_v28  ;;  %v5282_v35 = vpop.f32.mrf.mxu0  ;;  %7880 = vpow2.f32 %v4290_v20 }
 0x69a   : > { %v3610_v60 = vsub.f32 %v16122_v3, %v3239_v38  ;;  %v3611_v4 = vsub.f32 %v16123_v55, %v3239_v38  ;;  %v12634_v34 = vadd.f32 %v5282_v35, %v16124_v56  ;;  %v16129_v3 = vld [vmem:[#allocation127_spill] sm:$0xff] }
 0x69b   : > { %v4292_v8 = vmul.f32 1.442695, %v3607_v13  ;;  %v4294_v45 = vmul.f32 1.442695, %v3608_v57  ;;  %v4296_v46 = vmul.f32 1.442695, %v3609_v9  ;;  %v4964_v37 = vpop.f32.mrf.mxu2  ;;  %v16130_v18 = vpack.c.bf16 %v16128_v27, %v16129_v3  ;;  %v7873_v38 = vpop.eup %7872 }
 0x69c   : > { %16125 = vst [vmem:[#allocation280_spill] sm:$0xff] %v12634_v34  ;;  %v12636_v22 = vpop.f32.mrf.mxu1  ;;  %v4298_v11 = vmul.f32 1.442695, %v3610_v60  ;;  %v4965_v52 = vadd.f32 %v4964_v37, %v16127_v0  ;;  %v4300_v56 = vmul.f32 1.442695, %v3611_v4  ;;  %v12647_v41 = vpop.eup %7874  ;;  %v16133_v35 = vld [vmem:[#allocation15_spill] sm:$0xff] }
 0x69d   : > { %16126 = vst [vmem:[#allocation195_spill] sm:$0xff] %v12636_v22  ;;  %v12639_v28 = vpop.f32.mrf.mxu3  ;;  %7882 = vpow2.f32 %v4292_v8  ;;  %v12649_v20 = vpop.eup %7876  ;;  %v16137_v37 = vld [vmem:[#allocation169_spill] sm:$0xff] }
 0x69e   : > { %5321 = vmatmul.bf16.gmra.mxu0 %v16130_v18  ;;  %7884 = vpow2.f32 %v4294_v45  ;;  %v12645_v57 = vadd.f32 %v12444_v33, %v4965_v52  ;;  %v12651_v9 = vpop.eup %7878  ;;  %v16134_v18 = vld [vmem:[#allocation39_spill] sm:$0xff]  ;;  %v16136_v45 = vld [vmem:[#allocation26_spill] sm:$0xff] }
 0x69f   : > { %7886 = vpow2.f32 %v4296_v46  ;;  %16132 = vst [vmem:[#allocation167_spill] sm:$0xff] %v12651_v9  ;;  %v12655_v8 = vpop.eup %7880  ;;  %v16139_v52 = vld [vmem:[#allocation94_spill] sm:$0xff] }
 0x6a0   : > { %16131 = vst [vmem:[#allocation271_spill] sm:$0xff] %v12645_v57  ;;  %7888 = vpow2.f32 %v4298_v11  ;;  %v3246_v13 = vpop.xlane.xlu0 %3245 }
 0x6a1   : > { %7890 = vpow2.f32 %v4300_v56  ;;  %v3612_v60 = vsub.f32 %v16133_v35, %v3246_v13  ;;  %v3613_v55 = vsub.f32 %v16134_v18, %v3246_v13  ;;  %v5284_v4 = vpop.f32.mrf.mxu0  ;;  %16135 = vst [vmem:[#allocation56_spill] sm:$0xff] %v12655_v8  ;;  %v3614_v33 = vsub.f32 %v16136_v45, %v3246_v13  ;;  %v16141_v56 = vld [vmem:[#allocation248_spill] sm:$0xff]  ;;  %v16142_v18 = vld [vmem:[#allocation265_spill] sm:$0xff] }
 0x6a2   : > { %v12659_v0 = vadd.f32 %v5284_v4, %v16137_v37  ;;  %v3615_v27 = vsub.f32 %v16139_v52, %v3246_v13  ;;  %v3616_v35 = vsub.f32 %v16141_v56, %v3246_v13  ;;  %v16145_v56 = vld [vmem:[#allocation80_spill] sm:$0xff]  ;;  %v16147_v4 = vld [vmem:[#allocation273_spill] sm:$0xff] }
 0x6a3   : > { %v7883_v46 = vpop.eup %7882  ;;  %v4966_v11 = vpop.f32.mrf.mxu2  ;;  %v4302_v57 = vmul.f32 1.442695, %v3612_v60  ;;  %v4304_v45 = vmul.f32 1.442695, %v3613_v55  ;;  %v4306_v52 = vmul.f32 1.442695, %v3614_v33  ;;  %v16144_v33 = vpack.c.bf16 %v12183_v39, %v12156_v19 }
 0x6a4   : > { %16138 = vst [vmem:[#allocation91_spill] sm:$0xff] %v12659_v0  ;;  %v12662_v3 = vpop.f32.mrf.mxu1  ;;  %v12664_v34 = vpop.eup %7884  ;;  %v4967_v5 = vadd.f32 %v4966_v11, %v16142_v18  ;;  %v4522_v22 = vpack.c.bf16 %v7883_v46, %v7873_v38  ;;  %v4308_v38 = vmul.f32 1.442695, %v3615_v27  ;;  %v4310_v46 = vmul.f32 1.442695, %v3616_v35  ;;  %v16149_v35 = vld [vmem:[#allocation57_spill] sm:$0xff] }
 0x6a5   : > { %16140 = vst [vmem:[#allocation186_spill] sm:$0xff] %v12662_v3  ;;  %v12668_v10 = vpop.eup %7886  ;;  %v12674_v0 = vpop.f32.mrf.mxu3  ;;  %7892 = vpow2.f32 %v4302_v57  ;;  %v16148_v55 = vpack.c.bf16 %v12410_v30, %v12389_v62  ;;  %v16150_v39 = vld [vmem:[#allocation193_spill] sm:$0xff]  ;;  %v16153_v30 = vld [vmem:[#allocation64_spill] sm:$0xff] }
 0x6a6   : > { %v12672_v37 = vpop.eup %7888  ;;  %4854 = vmatmul.bf16.gmra.mxu1 %v4522_v22  ;;  %v12679_v13 = vadd.f32 %v12473_v61, %v4967_v5  ;;  %7894 = vpow2.f32 %v4304_v45  ;;  %v16146_v5 = vld [vmem:[#allocation114_spill] sm:$0xff]  ;;  %v16151_v3 = vld [vmem:[#allocation81_spill] sm:$0xff] }
 0x6a7   : > { %v12681_v60 = vpop.eup %7890  ;;  %7896 = vpow2.f32 %v4306_v52  ;;  %v16154_v52 = vld [vmem:[#allocation102_spill] sm:$0xff] }
 0x6a8   : > { %16143 = vst [vmem:[#allocation284_spill] sm:$0xff] %v12681_v60  ;;  %5008 = vmatmul.bf16.gmra.mxu2 %v16144_v33  ;;  %v3253_v11 = vpop.xlane.xlu1 %3252  ;;  %7898 = vpow2.f32 %v4308_v38 }
 0x6a9   : > { %v3617_v61 = vsub.f32 %v16145_v56, %v3253_v11  ;;  %v3618_v18 = vsub.f32 %v16146_v5, %v3253_v11  ;;  %v3619_v27 = vsub.f32 %v16147_v4, %v3253_v11  ;;  %5212 = vmatmul.bf16.gmra.mxu3 %v16148_v55  ;;  %v5287_v57 = vpop.f32.mrf.mxu0  ;;  %v3620_v19 = vsub.f32 %v16149_v35, %v3253_v11 }
 0x6aa   : > { %v3621_v33 = vsub.f32 %v16150_v39, %v3253_v11  ;;  %v12699_v9 = vadd.f32 %v5287_v57, %v16151_v3  ;;  %7900 = vpow2.f32 %v4310_v46  ;;  %v16155_v55 = vpack.c.bf16 %v16153_v30, %v16154_v52 }
 0x6ab   : > { %v4312_v45 = vmul.f32 1.442695, %v3617_v61  ;;  %v4314_v56 = vmul.f32 1.442695, %v3618_v18  ;;  %v4316_v22 = vmul.f32 1.442695, %v3619_v27  ;;  %v4969_v5 = vpop.f32.mrf.mxu2  ;;  %v7893_v35 = vpop.eup %7892 }
 0x6ac   : > { %v12701_v8 = vpop.f32.mrf.mxu1  ;;  %v4318_v4 = vmul.f32 1.442695, %v3620_v19  ;;  %v4970_v62 = vadd.f32 %v4969_v5, %v12181_v24  ;;  %v4320_v11 = vmul.f32 1.442695, %v3621_v33  ;;  %v12710_v38 = vpop.eup %7894  ;;  %v16158_v19 = vld [vmem:[#allocation292_spill] sm:$0xff] }
 0x6ad   : > { %16152 = vst [vmem:[#allocation45_spill] sm:$0xff] %v12701_v8  ;;  %7902 = vpow2.f32 %v4312_v45  ;;  %v12712_v61 = vpop.eup %7896  ;;  %v12714_v46 = vpop.f32.mrf.mxu3 }
 0x6ae   : > { %5326 = vmatmul.bf16.gmra.mxu0 %v16155_v55  ;;  %7904 = vpow2.f32 %v4314_v56  ;;  %v12708_v3 = vadd.f32 %v12509_v63, %v4970_v62  ;;  %v12716_v24 = vpop.eup %7898  ;;  %v16159_v56 = vld [vmem:[#allocation18_spill] sm:$0xff] }
 0x6af   : > { %7906 = vpow2.f32 %v4316_v22  ;;  %16156 = vst [vmem:[#allocation274_spill] sm:$0xff] %v12716_v24 }
 0x6b0   : > { %7908 = vpow2.f32 %v4318_v4  ;;  %v12718_v18 = vpop.xlane.xlu2 %3259  ;;  %v12720_v57 = vpop.eup %7900  ;;  %v16160_v4 = vld [vmem:[#allocation268_spill] sm:$0xff] }
 0x6b1   : > { %7910 = vpow2.f32 %v4320_v11  ;;  %v5289_v27 = vpop.f32.mrf.mxu0  ;;  %16157 = vst [vmem:[#allocation212_spill] sm:$0xff] %v12720_v57  ;;  %v3622_v5 = vsub.f32 %v16159_v56, %v12718_v18  ;;  %v16166_v57 = vld [vmem:[#allocation72_spill] sm:$0xff] }
 0x6b2   : > { %v12723_v39 = vadd.f32 %v5289_v27, %v16158_v19 }
 0x6b3   : > { %v7903_v63 = vpop.eup %7902  ;;  %v4971_v33 = vpop.f32.mrf.mxu2 }
 0x6b4   : > { %v12725_v45 = vpop.f32.mrf.mxu1  ;;  %v12727_v22 = vpop.eup %7904  ;;  %v4972_v62 = vadd.f32 %v4971_v33, %v16160_v4  ;;  %v4527_v30 = vpack.c.bf16 %v7903_v63, %v7893_v35  ;;  %v4322_v35 = vmul.f32 1.442695, %v3622_v5  ;;  %v16162_v63 = vpack.c.bf16 %v12265_v53, %v12238_v43  ;;  %v16165_v5 = vld [vmem:[#allocation108_spill] sm:$0xff] }
 0x6b5   : > { %v12732_v52 = vpop.eup %7906  ;;  %v12759_v27 = vpop.f32.mrf.mxu3 }
 0x6b6   : > { %v12736_v11 = vpop.eup %7908  ;;  %4859 = vmatmul.bf16.gmra.mxu1 %v4527_v30  ;;  %v12741_v19 = vadd.f32 %v12538_v14, %v4972_v62  ;;  %v16163_v30 = vld [vmem:[#allocation85_spill] sm:$0xff]  ;;  %v16164_v14 = vpack.c.bf16 %v12475_v17, %v12454_v23  ;;  %7912 = vpow2.f32 %v4322_v35 }
 0x6b7   : > { %v12743_v60 = vpop.eup %7910 }
 0x6b8   : > { %16161 = vst [vmem:[#allocation189_spill] sm:$0xff] %v12743_v60  ;;  %5013 = vmatmul.bf16.gmra.mxu2 %v16162_v63  ;;  %v12750_v56 = vpop.xlane.xlu0 %3266  ;;  %v16167_v60 = vld [vmem:[#allocation229_spill] sm:$0xff] }
 0x6b9   : > { %v3627_v55 = vsub.f32 %v16163_v30, %v12750_v56  ;;  %5217 = vmatmul.bf16.gmra.mxu3 %v16164_v14  ;;  %v5292_v62 = vpop.f32.mrf.mxu0  ;;  %v16168_v30 = vpack.c.bf16 %v16166_v57, %v16167_v60  ;;  %v16172_v60 = vld [vmem:[#allocation11_spill] sm:$0xff] }
 0x6ba   : > { %v12762_v33 = vadd.f32 %v5292_v62, %v16165_v5  ;;  %v16170_v5 = vld [vmem:[#allocation230_spill] sm:$0xff] }
 0x6bb   : > { %v4332_v53 = vmul.f32 1.442695, %v3627_v55  ;;  %v4974_v43 = vpop.f32.mrf.mxu2 }
 0x6bc   : > { %v12764_v63 = vpop.f32.mrf.mxu1  ;;  %v4975_v4 = vadd.f32 %v4974_v43, %v12263_v51  ;;  %v7913_v62 = vpop.eup %7912 }
 0x6bd   : > { %7914 = vpow2.f32 %v4332_v53  ;;  %v12780_v51 = vpop.f32.mrf.mxu3 }
 0x6be   : > { %5331 = vmatmul.bf16.gmra.mxu0 %v16168_v30  ;;  %v12771_v23 = vadd.f32 %v12574_v21, %v4975_v4  ;;  %v16173_v30 = vpack.c.bf16 %v12340_v7, %v12318_v40  ;;  %v16177_v7 = vld [vmem:[#allocation213_spill] sm:$0xff] }
 0x6c0   : > { %v12773_v17 = vpop.xlane.xlu1 %3273 }
 0x6c1   : > { %16169 = vst [vmem:[#allocation286_spill] sm:$0xff] %v12773_v17  ;;  %v5294_v14 = vpop.f32.mrf.mxu0  ;;  %v3632_v57 = vsub.f32 %v16172_v60, %v12773_v17  ;;  %v16174_v60 = vpack.c.bf16 %v12540_v48, %v12519_v58 }
 0x6c2   : > { %v12776_v55 = vadd.f32 %v5294_v14, %v16170_v5 }
 0x6c3   : > { %v7915_v8 = vpop.eup %7914  ;;  %v4976_v24 = vpop.f32.mrf.mxu2  ;;  %v4342_v43 = vmul.f32 1.442695, %v3632_v57 }
 0x6c4   : > { %v12778_v35 = vpop.f32.mrf.mxu1  ;;  %v4977_v53 = vadd.f32 %v4976_v24, %v12310_v15  ;;  %v4532_v21 = vpack.c.bf16 %v7915_v8, %v7913_v62  ;;  %v16175_v8 = vld [vmem:[#allocation231_spill] sm:$0xff] }
 0x6c5   : > { %16171 = vst [vmem:[#allocation291_spill] sm:$0xff] %v12778_v35  ;;  %7916 = vpow2.f32 %v4342_v43  ;;  %v16182_v43 = vld [vmem:[#allocation196_spill] sm:$0xff] }
 0x6c6   : > { %4864 = vmatmul.bf16.gmra.mxu1 %v4532_v21  ;;  %v12786_v4 = vadd.f32 %v12603_v1, %v4977_v53  ;;  %v16178_v53 = vld [vmem:[#allocation76_spill] sm:$0xff] }
 0x6c7   : > { %v16179_v21 = vpack.c.bf16 %v16177_v7, %v16178_v53  ;;  %v16184_v53 = vld [vmem:[#allocation234_spill] sm:$0xff] }
 0x6c8   : > { %5018 = vmatmul.bf16.gmra.mxu2 %v16173_v30  ;;  %v12791_v14 = vpop.xlane.xlu2 %3280 }
 0x6c9   : > { %v3637_v5 = vsub.f32 %v15984_v6, %v12791_v14  ;;  %5222 = vmatmul.bf16.gmra.mxu3 %v16174_v60  ;;  %v5297_v15 = vpop.f32.mrf.mxu0  ;;  %v12807_v6 = vpop.f32.mrf.mxu3  ;;  %v16180_v60 = vld [vmem:[#allocation35_spill] sm:$0xff] }
 0x6ca   : > { %v12799_v24 = vadd.f32 %v5297_v15, %v16175_v8  ;;  %v16181_v8 = vld [vmem:[#allocation238_spill] sm:$0xff] }
 0x6cb   : > { %v4352_v1 = vmul.f32 1.442695, %v3637_v5  ;;  %v4979_v62 = vpop.f32.mrf.mxu2  ;;  %v7917_v30 = vpop.eup %7916 }
 0x6cc   : > { %v12801_v57 = vpop.f32.mrf.mxu1  ;;  %v4980_v40 = vadd.f32 %v4979_v62, %v12338_v54 }
 0x6cd   : > { %16176 = vst [vmem:[#allocation82_spill] sm:$0xff] %v12801_v57  ;;  %7918 = vpow2.f32 %v4352_v1  ;;  %v3291_v57 = vsub.f32 %v16182_v43, %v16181_v8  ;;  %v16187_v43 = vpack.c.bf16 %v12605_v32, %v12584_v31 }
 0x6ce   : > { %5336 = vmatmul.bf16.gmra.mxu0 %v16179_v21  ;;  %v12810_v58 = vadd.f32 %v12639_v28, %v4980_v40  ;;  %v16185_v21 = vld [vmem:[#allocation194_spill] sm:$0xff] }
 0x6cf   : > { %v3286_v35 = vsub.f32 %v16185_v21, %v16184_v53  ;;  %v3660_v40 = vmul.f32 1.442695, %v3291_v57 }
 0x6d1   : > { %v5299_v48 = vpop.f32.mrf.mxu0  ;;  %v3650_v8 = vmul.f32 1.442695, %v3286_v35  ;;  %7920 = vpow2.f32 %v3660_v40  ;;  %v16193_v35 = vld [vmem:[#allocation142_spill] sm:$0xff] }
 0x6d2   : > { %v12813_v5 = vadd.f32 %v5299_v48, %v16180_v60  ;;  %v12825_v48 = vpop.f32.mrf.mxu3  ;;  %v16186_v60 = vpack.c.bf16 %v12404_v59, %v12387_v42 }
 0x6d3   : > { %v7919_v15 = vpop.eup %7918  ;;  %v4981_v54 = vpop.f32.mrf.mxu2  ;;  %7922 = vpow2.f32 %v3650_v8 }
 0x6d4   : > { %v12817_v62 = vpop.f32.mrf.mxu1  ;;  %v4982_v7 = vadd.f32 %v4981_v54, %v12379_v16  ;;  %v4537_v1 = vpack.c.bf16 %v7919_v15, %v7917_v30  ;;  %v16188_v30 = vld [vmem:[#allocation157_spill] sm:$0xff] }
 0x6d5   : > { %16183 = vst [vmem:[#allocation109_spill] sm:$0xff] %v12817_v62 }
 0x6d6   : > { %4869 = vmatmul.bf16.gmra.mxu1 %v4537_v1  ;;  %v12823_v28 = vadd.f32 %v12674_v0, %v4982_v7  ;;  %v16190_v7 = vld [vmem:[#allocation220_spill] sm:$0xff] }
 0x6d7   : > { %v16191_v1 = vld [vmem:[#allocation216_spill] sm:$0xff]  ;;  %v7921_v59 = vpop.eup %7920 }
 0x6d8   : > { %5023 = vmatmul.bf16.gmra.mxu2 %v16186_v60  ;;  %v16192_v53 = vpack.c.bf16 %v16190_v7, %v16191_v1  ;;  %v16194_v60 = vld [vmem:[#allocation245_spill] sm:$0xff]  ;;  %v16197_v7 = vld [vmem:[#allocation67_spill] sm:$0xff] }
 0x6d9   : > { %5227 = vmatmul.bf16.gmra.mxu3 %v16187_v43  ;;  %v5302_v16 = vpop.f32.mrf.mxu0  ;;  %v7923_v40 = vpop.eup %7922  ;;  %v16195_v43 = vld [vmem:[#allocation199_spill] sm:$0xff] }
 0x6da   : > { %v12834_v15 = vadd.f32 %v5302_v16, %v16188_v30  ;;  %v12845_v32 = vpop.f32.mrf.mxu3  ;;  %v3301_v16 = vsub.f32 %v16195_v43, %v16194_v60  ;;  %v4366_v8 = vpack.c.bf16 %v7921_v59, %v7923_v40  ;;  %v16200_v60 = vpack.c.bf16 %v12668_v10, %v12649_v20  ;;  %v16201_v59 = vld [vmem:[#allocation240_spill] sm:$0xff] }
 0x6db   : > { %v4984_v54 = vpop.f32.mrf.mxu2 }
 0x6dc   : > { %v12836_v0 = vpop.f32.mrf.mxu1  ;;  %v4985_v57 = vadd.f32 %v4984_v54, %v12402_v12 }
 0x6dd   : > { %16189 = vst [vmem:[#allocation217_spill] sm:$0xff] %v12836_v0 }
 0x6de   : > { %5341 = vmatmul.bf16.gmra.mxu0 %v16192_v53  ;;  %v12843_v42 = vadd.f32 %v12714_v46, %v4985_v57  ;;  %v16198_v46 = vld [vmem:[#allocation198_spill] sm:$0xff]  ;;  %v3680_v53 = vmul.f32 1.442695, %v3301_v16 }
 0x6df   : > { %v3296_v57 = vsub.f32 %v16198_v46, %v16197_v7  ;;  %v16206_v7 = vld [vmem:[#allocation283_spill] sm:$0xff] }
 0x6e0   : > { %7924 = vpow2.f32 %v3680_v53  ;;  %v16207_v53 = vld [vmem:[#allocation254_spill] sm:$0xff] }
 0x6e1   : > { %v5304_v31 = vpop.f32.mrf.mxu0 }
 0x6e2   : > { %v12848_v21 = vadd.f32 %v5304_v31, %v16193_v35  ;;  %v16199_v31 = vpack.c.bf16 %v12469_v29, %v12452_v2  ;;  %v3670_v35 = vmul.f32 1.442695, %v3296_v57  ;;  %v16204_v29 = vld [vmem:[#allocation68_spill] sm:$0xff] }
 0x6e3   : > { %v4986_v12 = vpop.f32.mrf.mxu2 }
 0x6e4   : > { %v12852_v30 = vpop.f32.mrf.mxu1  ;;  %v4987_v54 = vadd.f32 %v4986_v12, %v12441_v47  ;;  %7926 = vpow2.f32 %v3670_v35  ;;  %v16211_v35 = vld [vmem:[#allocation202_spill] sm:$0xff] }
 0x6e5   : > { %16196 = vst [vmem:[#allocation131_spill] sm:$0xff] %v12852_v30 }
 0x6e6   : > { %7112 = vmatmul.msk.bf16.vlgmr.msra.gmra.mxu1 %vm639_vm0, %v4366_v8  ;;  %v12859_v1 = vadd.f32 %v12759_v27, %v4987_v54  ;;  %v12872_v27 = vpop.f32.mrf.mxu3  ;;  %v16203_v54 = vld [vmem:[#allocation163_spill] sm:$0xff]  ;;  %v7925_v20 = vpop.eup %7924 }
 0x6e7   : > { %v16205_v2 = vpack.c.bf16 %v16203_v54, %v16204_v29  ;;  %v16210_v54 = vld [vmem:[#allocation73_spill] sm:$0xff] }
 0x6e8   : > { %5028 = vmatmul.bf16.gmra.mxu2 %v16199_v31  ;;  %v16208_v31 = vld [vmem:[#allocation205_spill] sm:$0xff]  ;;  %v3306_v29 = vsub.f32 %v16211_v35, %v16210_v54  ;;  %v16216_v35 = vld [vmem:[#allocation244_spill] sm:$0xff] }
 0x6e9   : > { %5232 = vmatmul.bf16.gmra.mxu3 %v16200_v60  ;;  %v3311_v60 = vsub.f32 %v16208_v31, %v16207_v53  ;;  %v16213_v53 = vld [vmem:[#allocation105_spill] sm:$0xff] }
 0x6ea   : > { %v7927_v57 = vpop.eup %7926  ;;  %v3624_v31 = vsub.f32 %v16213_v53, %v12718_v18  ;;  %v16218_v53 = vld [vmem:[#allocation208_spill] sm:$0xff] }
 0x6eb   : > { %v5307_v47 = vpop.f32.mrf.mxu0  ;;  %v4989_v43 = vpop.f32.mrf.mxu2 }
 0x6ec   : > { %v12868_v40 = vadd.f32 %v5307_v47, %v16201_v59  ;;  %v12870_v12 = vpop.f32.mrf.mxu1  ;;  %v4990_v16 = vadd.f32 %v4989_v43, %v12467_v25  ;;  %v4371_v43 = vpack.c.bf16 %v7925_v20, %v7927_v57  ;;  %v3690_v20 = vmul.f32 1.442695, %v3306_v29 }
 0x6ed   : > { %16202 = vst [vmem:[#allocation58_spill] sm:$0xff] %v12870_v12  ;;  %v16215_v57 = vpack.c.bf16 %v12732_v52, %v12712_v61  ;;  %v16237_v12 = vld [vmem:[#allocation141_spill] sm:$0xff] }
 0x6ee   : > { %5346 = vmatmul.bf16.gmra.mxu0 %v16205_v2  ;;  %v12879_v10 = vadd.f32 %v12780_v51, %v4990_v16  ;;  %v16212_v51 = vld [vmem:[#allocation277_spill] sm:$0xff]  ;;  %v12893_v2 = vpop.f32.mrf.mxu3 }
 0x6ef   : > { %v3629_v16 = vsub.f32 %v16212_v51, %v12750_v56 }
 0x6f1   : > { %v4336_v54 = vmul.f32 1.442695, %v3629_v16 }
 0x6f3   : > { %v5309_v8 = vpop.f32.mrf.mxu0  ;;  %v4991_v47 = vpop.f32.mrf.mxu2 }
 0x6f4   : > { %v12882_v46 = vadd.f32 %v5309_v8, %v16206_v7  ;;  %v12886_v59 = vpop.f32.mrf.mxu1  ;;  %v4992_v25 = vadd.f32 %v4991_v47, %v12506_v49  ;;  %v3700_v7 = vmul.f32 1.442695, %v3311_v60  ;;  %v16214_v49 = vpack.c.bf16 %v12534_v26, %v12517_v44  ;;  %v16219_v26 = vld [vmem:[#allocation250_spill] sm:$0xff] }
 0x6f5   : > { %16209 = vst [vmem:[#allocation93_spill] sm:$0xff] %v12886_v59  ;;  %v16220_v44 = vpack.c.bf16 %v16218_v53, %v16219_v26 }
 0x6f6   : > { %7113 = vmatmul.msk.bf16.gmra.mxu1 %vm639_vm0, %v4371_v43  ;;  %v12897_v8 = vadd.f32 %v12807_v6, %v4992_v25  ;;  %7928 = vpow2.f32 %v3700_v7  ;;  %v4326_v25 = vmul.f32 1.442695, %v3624_v31  ;;  %v12919_v52 = vpop.f32.mrf.mxu3  ;;  %v16222_v7 = vld [vmem:[#allocation21_spill] sm:$0xff] }
 0x6f7   : > { %7930 = vpow2.f32 %v3690_v20  ;;  %16221 = vst [vmem:[#allocation281_spill] sm:$0xff] %v12919_v52 }
 0x6f8   : > { %5033 = vmatmul.bf16.gmra.mxu2 %v16214_v49  ;;  %7932 = vpow2.f32 %v4336_v54  ;;  %v16226_v54 = vld [vmem:[#allocation71_spill] sm:$0xff] }
 0x6f9   : > { %5237 = vmatmul.bf16.gmra.mxu3 %v16215_v57  ;;  %7934 = vpow2.f32 %v4326_v25  ;;  %v16223_v57 = vld [vmem:[#allocation262_spill] sm:$0xff]  ;;  %v16228_v25 = vld [vmem:[#allocation209_spill] sm:$0xff] }
 0x6fb   : > { %v5312_v47 = vpop.f32.mrf.mxu0  ;;  %v4994_v6 = vpop.f32.mrf.mxu2 }
 0x6fc   : > { %v12908_v43 = vadd.f32 %v5312_v47, %v16216_v35  ;;  %v12910_v60 = vpop.f32.mrf.mxu1  ;;  %v4995_v51 = vadd.f32 %v4994_v6, %v12532_v36  ;;  %v7929_v29 = vpop.eup %7928  ;;  %v16224_v36 = vld [vmem:[#allocation211_spill] sm:$0xff] }
 0x6fd   : > { %16217 = vst [vmem:[#allocation201_spill] sm:$0xff] %v12910_v60  ;;  %v7931_v31 = vpop.eup %7930  ;;  %v3321_v47 = vsub.f32 %v16224_v36, %v16223_v57  ;;  %v16229_v60 = vld [vmem:[#allocation122_spill] sm:$0xff] }
 0x6fe   : > { %5351 = vmatmul.bf16.gmra.mxu0 %v16220_v44  ;;  %v12917_v61 = vadd.f32 %v12825_v48, %v4995_v51  ;;  %v7933_v20 = vpop.eup %7932  ;;  %v4376_v48 = vpack.c.bf16 %v7929_v29, %v7931_v31  ;;  %v16227_v51 = vld [vmem:[#allocation258_spill] sm:$0xff]  ;;  %v3639_v59 = vsub.f32 %v16229_v60, %v12791_v14  ;;  %v16234_v60 = vld [vmem:[#allocation288_spill] sm:$0xff] }
 0x6ff   : > { %v3316_v26 = vsub.f32 %v16228_v25, %v16227_v51  ;;  %v7935_v44 = vpop.eup %7934  ;;  %v16230_v36 = vld [vmem:[#allocation206_spill] sm:$0xff]  ;;  %v12942_v25 = vpop.f32.mrf.mxu3 }
 0x700   : > { %v4534_v57 = vpack.c.bf16 %v7933_v20, %v7935_v44  ;;  %v4356_v51 = vmul.f32 1.442695, %v3639_v59  ;;  %16233 = vst [vmem:[#allocation145_spill] sm:$0xff] %v12942_v25 }
 0x701   : > { %v3710_v31 = vmul.f32 1.442695, %v3316_v26 }
 0x703   : > { %v5314_v16 = vpop.f32.mrf.mxu0  ;;  %v4996_v35 = vpop.f32.mrf.mxu2 }
 0x704   : > { %v12922_v49 = vadd.f32 %v5314_v16, %v16222_v7  ;;  %v12926_v6 = vpop.f32.mrf.mxu1  ;;  %v4997_v53 = vadd.f32 %v4996_v35, %v16226_v54  ;;  %v3720_v7 = vmul.f32 1.442695, %v3321_v47  ;;  %v16231_v35 = vld [vmem:[#allocation180_spill] sm:$0xff] }
 0x705   : > { %16225 = vst [vmem:[#allocation118_spill] sm:$0xff] %v12926_v6  ;;  %v3634_v6 = vsub.f32 %v16230_v36, %v12773_v17  ;;  %v16232_v29 = vpack.c.bf16 %v12599_v50, %v16231_v35  ;;  %v16236_v36 = vld [vmem:[#allocation214_spill] sm:$0xff]  ;;  %v16239_v35 = vld [vmem:[#allocation168_spill] sm:$0xff] }
 0x706   : > { %7114 = vmatmul.msk.bf16.gmra.mxu1 %vm639_vm0, %v4376_v48  ;;  %v12935_v16 = vadd.f32 %v12845_v32, %v4997_v53  ;;  %7936 = vpow2.f32 %v3720_v7  ;;  %v16235_v53 = vld [vmem:[#allocation112_spill] sm:$0xff]  ;;  %v16238_v50 = vpack.c.bf16 %v16236_v36, %v16237_v12 }
 0x707   : > { %v4346_v20 = vmul.f32 1.442695, %v3634_v6  ;;  %7938 = vpow2.f32 %v3710_v31  ;;  %v16242_v6 = vld [vmem:[#allocation219_spill] sm:$0xff]  ;;  %v12963_v36 = vpop.f32.mrf.mxu3 }
 0x708   : > { %5038 = vmatmul.bf16.gmra.mxu2 %v16232_v29  ;;  %7940 = vpow2.f32 %v4356_v51  ;;  %v16243_v31 = vld [vmem:[#allocation195_spill] sm:$0xff] }
 0x709   : > { %5242 = vmatmul.bf16.gmra.mxu3 %v4534_v57  ;;  %7942 = vpow2.f32 %v4346_v20  ;;  %v16245_v20 = vld [vmem:[#allocation215_spill] sm:$0xff] }
 0x70b   : > { %v5317_v54 = vpop.f32.mrf.mxu0  ;;  %v4999_v32 = vpop.f32.mrf.mxu2 }
 0x70c   : > { %v12945_v48 = vadd.f32 %v5317_v54, %v16234_v60  ;;  %v12947_v47 = vpop.f32.mrf.mxu1  ;;  %v5000_v44 = vadd.f32 %v4999_v32, %v16235_v53  ;;  %v7937_v26 = vpop.eup %7936  ;;  %v16241_v54 = vld [vmem:[#allocation133_spill] sm:$0xff] }
 0x70d   : > { %v7939_v29 = vpop.eup %7938  ;;  %v3331_v60 = vsub.f32 %v16242_v6, %v16241_v54  ;;  %v16246_v6 = vpack.c.bf16 %v12664_v34, %v12647_v41 }
 0x70e   : > { %5356 = vmatmul.bf16.gmra.mxu0 %v16238_v50  ;;  %v12954_v59 = vadd.f32 %v12872_v27, %v5000_v44  ;;  %v7941_v12 = vpop.eup %7940  ;;  %v4381_v27 = vpack.c.bf16 %v7937_v26, %v7939_v29  ;;  %v16244_v44 = vld [vmem:[#allocation83_spill] sm:$0xff] }
 0x70f   : > { %v3326_v50 = vsub.f32 %v16245_v20, %v16244_v44  ;;  %v7943_v30 = vpop.eup %7942  ;;  %v16257_v20 = vld [vmem:[#allocation225_spill] sm:$0xff] }
 0x710   : > { %v4539_v54 = vpack.c.bf16 %v7941_v12, %v7943_v30  ;;  %v12985_v30 = vpop.f32.mrf.mxu3 }
 0x711   : > { %v3730_v0 = vmul.f32 1.442695, %v3326_v50 }
 0x713   : > { %v5319_v57 = vpop.f32.mrf.mxu0  ;;  %v5001_v32 = vpop.f32.mrf.mxu2 }
 0x714   : > { %v12957_v7 = vadd.f32 %v5319_v57, %v16239_v35  ;;  %v12961_v53 = vpop.f32.mrf.mxu1  ;;  %v5002_v51 = vadd.f32 %v5001_v32, %v16243_v31  ;;  %v3740_v35 = vmul.f32 1.442695, %v3331_v60  ;;  %v16247_v32 = vld [vmem:[#allocation252_spill] sm:$0xff]  ;;  %v16254_v60 = vld [vmem:[#allocation269_spill] sm:$0xff] }
 0x716   : > { %16240 = vst [vmem:[#allocation24_spill] sm:$0xff] %v12957_v7  ;;  %7115 = vmatmul.msk.bf16.gmra.mxu1 %vm639_vm0, %v4381_v27  ;;  %v12970_v57 = vadd.f32 %v12893_v2, %v5002_v51  ;;  %7944 = vpow2.f32 %v3740_v35  ;;  %v16251_v27 = vld [vmem:[#allocation218_spill] sm:$0xff]  ;;  %v16252_v2 = vld [vmem:[#allocation143_spill] sm:$0xff] }
 0x717   : > { %v16253_v51 = vpack.c.bf16 %v16251_v27, %v16252_v2  ;;  %7946 = vpow2.f32 %v3730_v0  ;;  %v16262_v0 = vld [vmem:[#allocation121_spill] sm:$0xff] }
 0x718   : > { %5043 = vmatmul.bf16.gmra.mxu2 %v16246_v6  ;;  %v16260_v6 = vld [vmem:[#allocation272_spill] sm:$0xff]  ;;  %v13003_v52 = vpop.f32.mrf.mxu3 }
 0x719   : > { %5247 = vmatmul.bf16.gmra.mxu3 %v4539_v54 }
 0x71b   : > { %v5322_v62 = vpop.f32.mrf.mxu0  ;;  %v12978_v29 = vpop.f32.mrf.mxu2 }
 0x71c   : > { %v12976_v26 = vadd.f32 %v5322_v62, %v16247_v32  ;;  %16249 = vst [vmem:[#allocation61_spill] sm:$0xff] %v12978_v29  ;;  %v12980_v31 = vpop.f32.mrf.mxu1  ;;  %v7945_v34 = vpop.eup %7944  ;;  %v16256_v62 = vld [vmem:[#allocation276_spill] sm:$0xff]  ;;  %v16261_v32 = vld [vmem:[#allocation223_spill] sm:$0xff]  ;;  %v16278_v29 = vld [vmem:[#allocation129_spill] sm:$0xff] }
 0x71d   : > { %16250 = vst [vmem:[#allocation95_spill] sm:$0xff] %v12980_v31  ;;  %v7947_v44 = vpop.eup %7946  ;;  %v3341_v50 = vsub.f32 %v16257_v20, %v16256_v62  ;;  %v3336_v27 = vsub.f32 %v16261_v32, %v16260_v6  ;;  %v16264_v62 = vpack.c.bf16 %v12727_v22, %v12710_v38  ;;  %v16265_v6 = vld [vmem:[#allocation178_spill] sm:$0xff] }
 0x71e   : > { %16248 = vst [vmem:[#allocation222_spill] sm:$0xff] %v12976_v26  ;;  %5361 = vmatmul.bf16.gmra.mxu0 %v16253_v51  ;;  %v4386_v2 = vpack.c.bf16 %v7945_v34, %v7947_v44  ;;  %v3628_v51 = vsub.f32 %v16262_v0, %v12750_v56 }
 0x71f   : > { %v3760_v31 = vmul.f32 1.442695, %v3341_v50  ;;  %v3750_v25 = vmul.f32 1.442695, %v3336_v27  ;;  %v16269_v27 = vld [vmem:[#allocation221_spill] sm:$0xff] }
 0x720   : > { %v4334_v20 = vmul.f32 1.442695, %v3628_v51 }
 0x721   : > { %7948 = vpow2.f32 %v3760_v31 }
 0x722   : > { %7950 = vpow2.f32 %v3750_v25 }
 0x723   : > { %v5324_v41 = vpop.f32.mrf.mxu0  ;;  %v12992_v35 = vpop.f32.mrf.mxu2  ;;  %7952 = vpow2.f32 %v4334_v20 }
 0x724   : > { %v12988_v12 = vadd.f32 %v5324_v41, %v16254_v60  ;;  %16258 = vst [vmem:[#allocation41_spill] sm:$0xff] %v12992_v35  ;;  %v12994_v54 = vpop.f32.mrf.mxu1  ;;  %v16263_v41 = vld [vmem:[#allocation117_spill] sm:$0xff] }
 0x725   : > { %16259 = vst [vmem:[#allocation52_spill] sm:$0xff] %v12994_v54  ;;  %v3623_v60 = vsub.f32 %v16263_v41, %v12718_v18  ;;  %v13018_v41 = vpop.f32.mrf.mxu3 }
 0x726   : > { %16255 = vst [vmem:[#allocation160_spill] sm:$0xff] %v12988_v12  ;;  %7116 = vmatmul.msk.bf16.gmra.mxu1 %vm639_vm0, %v4386_v2  ;;  %v16268_v2 = vld [vmem:[#allocation224_spill] sm:$0xff] }
 0x727   : > { %v4324_v44 = vmul.f32 1.442695, %v3623_v60  ;;  %v16270_v0 = vpack.c.bf16 %v16268_v2, %v16269_v27  ;;  %v7949_v38 = vpop.eup %7948  ;;  %v16273_v60 = vld [vmem:[#allocation279_spill] sm:$0xff]  ;;  %v16276_v2 = vld [vmem:[#allocation106_spill] sm:$0xff] }
 0x728   : > { %5048 = vmatmul.bf16.gmra.mxu2 %v16264_v62  ;;  %v7951_v51 = vpop.eup %7950  ;;  %v16277_v27 = vld [vmem:[#allocation227_spill] sm:$0xff] }
 0x729   : > { %7954 = vpow2.f32 %v4324_v44  ;;  %v7953_v31 = vpop.eup %7952  ;;  %v3346_v20 = vsub.f32 %v16277_v27, %v16276_v2  ;;  %v4391_v44 = vpack.c.bf16 %v7949_v38, %v7951_v51 }
 0x72b   : > { %v5327_v54 = vpop.f32.mrf.mxu0  ;;  %v13011_v32 = vpop.f32.mrf.mxu2 }
 0x72c   : > { %v13009_v34 = vadd.f32 %v5327_v54, %v16265_v6  ;;  %v13013_v50 = vpop.f32.mrf.mxu1  ;;  %v16271_v54 = vld [vmem:[#allocation89_spill] sm:$0xff]  ;;  %v16274_v6 = vld [vmem:[#allocation60_spill] sm:$0xff] }
 0x72d   : > { %16267 = vst [vmem:[#allocation147_spill] sm:$0xff] %v13013_v50  ;;  %v3351_v35 = vsub.f32 %v16274_v6, %v16273_v60  ;;  %v3770_v60 = vmul.f32 1.442695, %v3346_v20 }
 0x72e   : > { %16266 = vst [vmem:[#allocation200_spill] sm:$0xff] %v13009_v34  ;;  %5366 = vmatmul.bf16.gmra.mxu0 %v16270_v0  ;;  %v3638_v34 = vsub.f32 %v16278_v29, %v12791_v14  ;;  %v13043_v29 = vpop.f32.mrf.mxu3 }
 0x72f   : > { %v7955_v0 = vpop.eup %7954  ;;  %16283 = vst [vmem:[#allocation255_spill] sm:$0xff] %v13043_v29 }
 0x730   : > { %v4354_v6 = vmul.f32 1.442695, %v3638_v34 }
 0x733   : > { %v5329_v22 = vpop.f32.mrf.mxu0  ;;  %v13025_v50 = vpop.f32.mrf.mxu2 }
 0x734   : > { %v13021_v62 = vadd.f32 %v5329_v22, %v16271_v54  ;;  %v13027_v25 = vpop.f32.mrf.mxu1  ;;  %v4533_v22 = vpack.c.bf16 %v7953_v31, %v7955_v0  ;;  %v3780_v54 = vmul.f32 1.442695, %v3351_v35  ;;  %v16284_v35 = vld [vmem:[#allocation151_spill] sm:$0xff]  ;;  %v16285_v31 = vld [vmem:[#allocation149_spill] sm:$0xff] }
 0x735   : > { %16275 = vst [vmem:[#allocation164_spill] sm:$0xff] %v13027_v25  ;;  %v16280_v25 = vld [vmem:[#allocation203_spill] sm:$0xff]  ;;  %v16286_v27 = vpack.c.bf16 %v16284_v35, %v16285_v31  ;;  %v16292_v35 = vld [vmem:[#allocation282_spill] sm:$0xff]  ;;  %v16293_v31 = vld [vmem:[#allocation232_spill] sm:$0xff] }
 0x736   : > { %16272 = vst [vmem:[#allocation88_spill] sm:$0xff] %v13021_v62  ;;  %7117 = vmatmul.msk.bf16.gmra.mxu1 %vm639_vm0, %v4391_v44  ;;  %v16279_v62 = vld [vmem:[#allocation125_spill] sm:$0xff]  ;;  %7956 = vpow2.f32 %v3780_v54  ;;  %v16289_v44 = vld [vmem:[#allocation38_spill] sm:$0xff]  ;;  %v16290_v0 = vld [vmem:[#allocation235_spill] sm:$0xff] }
 0x737   : > { %v3633_v12 = vsub.f32 %v16279_v62, %v12773_v17  ;;  %7958 = vpow2.f32 %v3770_v60 }
 0x738   : > { %5053 = vmatmul.bf16.gmra.mxu2 %v4533_v22  ;;  %7960 = vpow2.f32 %v4354_v6  ;;  %v3361_v22 = vsub.f32 %v16290_v0, %v16289_v44  ;;  %v3356_v6 = vsub.f32 %v16293_v31, %v16292_v35  ;;  %v8288_v31 = vmov 32  }
 0x739   : > { %v4344_v38 = vmul.f32 1.442695, %v3633_v12  ;;  %7261 = vset.pattern.permute.xlu0 %v8288_v31  ;;  %7262 = vset.pattern.permute.xlu1 %v8288_v31 }
 0x73a   : > { %7263 = vset.pattern.permute.xlu2 %v8288_v31 }
 0x73b   : > { %v5332_v26 = vpop.f32.mrf.mxu0  ;;  %v13039_v51 = vpop.f32.mrf.mxu2  ;;  %7962 = vpow2.f32 %v4344_v38 }
 0x73c   : > { %v13037_v7 = vadd.f32 %v5332_v26, %v16280_v25  ;;  %v13041_v2 = vpop.f32.mrf.mxu1  ;;  %v7957_v34 = vpop.eup %7956  ;;  %v16287_v26 = vld [vmem:[#allocation191_spill] sm:$0xff] }
 0x73d   : > { %16282 = vst [vmem:[#allocation30_spill] sm:$0xff] %v13041_v2  ;;  %v7959_v20 = vpop.eup %7958  ;;  %v13059_v38 = vpop.f32.mrf.mxu3 }
 0x73e   : > { %16281 = vst [vmem:[#allocation63_spill] sm:$0xff] %v13037_v7  ;;  %5371 = vmatmul.bf16.gmra.mxu0 %v16286_v27  ;;  %v7961_v12 = vpop.eup %7960  ;;  %v4396_v2 = vpack.c.bf16 %v7957_v34, %v7959_v20  ;;  %v16295_v7 = vld [vmem:[#allocation156_spill] sm:$0xff]  ;;  %v16299_v20 = vld [vmem:[#allocation233_spill] sm:$0xff] }
 0x73f   : > { %16294 = vst [vmem:[#allocation62_spill] sm:$0xff] %v13059_v38 }
 0x741   : > { %v7963_v29 = vpop.eup %7962 }
 0x742   : > { %v4538_v27 = vpack.c.bf16 %v7961_v12, %v7963_v29 }
 0x743   : > { %v5334_v62 = vpop.f32.mrf.mxu0  ;;  %v13053_v54 = vpop.f32.mrf.mxu2 }
 0x744   : > { %v13049_v25 = vadd.f32 %v5334_v62, %v16287_v26  ;;  %v13055_v60 = vpop.f32.mrf.mxu1  ;;  %v3800_v62 = vmul.f32 1.442695, %v3361_v22  ;;  %v3790_v26 = vmul.f32 1.442695, %v3356_v6  ;;  %v16304_v6 = vld [vmem:[#allocation42_spill] sm:$0xff] }
 0x745   : > { %16291 = vst [vmem:[#allocation285_spill] sm:$0xff] %v13055_v60  ;;  %v16300_v60 = vld [vmem:[#allocation53_spill] sm:$0xff] }
 0x746   : > { %16288 = vst [vmem:[#allocation181_spill] sm:$0xff] %v13049_v25  ;;  %7118 = vmatmul.msk.bf16.gmra.mxu1 %vm639_vm0, %v4396_v2  ;;  %7964 = vpow2.f32 %v3800_v62  ;;  %v16301_v35 = vpack.c.bf16 %v16299_v20, %v16300_v60  ;;  %v13072_v2 = vpop.f32.mrf.mxu3  ;;  %v16308_v20 = vld [vmem:[#allocation287_spill] sm:$0xff] }
 0x747   : > { %7966 = vpow2.f32 %v3790_v26  ;;  %16302 = vst [vmem:[#allocation36_spill] sm:$0xff] %v13072_v2 }
 0x748   : > { %5058 = vmatmul.bf16.gmra.mxu2 %v4538_v27  ;;  %v16305_v27 = vld [vmem:[#allocation241_spill] sm:$0xff] }
 0x749   : > { %v3371_v62 = vsub.f32 %v16305_v27, %v16304_v6 }
 0x74b   : > { %v5337_v25 = vpop.f32.mrf.mxu0  ;;  %v13065_v0 = vpop.f32.mrf.mxu2  ;;  %v3820_v31 = vmul.f32 1.442695, %v3371_v62 }
 0x74c   : > { %v13063_v44 = vadd.f32 %v5337_v25, %v16295_v7  ;;  %16297 = vst [vmem:[#allocation130_spill] sm:$0xff] %v13065_v0  ;;  %v13067_v34 = vpop.f32.mrf.mxu1  ;;  %v7965_v29 = vpop.eup %7964  ;;  %v16303_v7 = vld [vmem:[#allocation158_spill] sm:$0xff] }
 0x74d   : > { %16298 = vst [vmem:[#allocation126_spill] sm:$0xff] %v13067_v34  ;;  %v7967_v22 = vpop.eup %7966  ;;  %7968 = vpow2.f32 %v3820_v31  ;;  %v16320_v31 = vld [vmem:[#allocation104_spill] sm:$0xff] }
 0x74e   : > { %16296 = vst [vmem:[#allocation192_spill] sm:$0xff] %v13063_v44  ;;  %5376 = vmatmul.bf16.gmra.mxu0 %v16301_v35  ;;  %v4401_v26 = vpack.c.bf16 %v7965_v29, %v7967_v22  ;;  %v16309_v35 = vld [vmem:[#allocation239_spill] sm:$0xff]  ;;  %v13086_v44 = vpop.f32.mrf.mxu3  ;;  %v16315_v29 = vld [vmem:[#allocation242_spill] sm:$0xff] }
 0x74f   : > { %v3366_v38 = vsub.f32 %v16309_v35, %v16308_v20  ;;  %16310 = vst [vmem:[#allocation289_spill] sm:$0xff] %v13086_v44 }
 0x751   : > { %v3810_v2 = vmul.f32 1.442695, %v3366_v38 }
 0x753   : > { %v5339_v12 = vpop.f32.mrf.mxu0  ;;  %v13079_v34 = vpop.f32.mrf.mxu2  ;;  %7970 = vpow2.f32 %v3810_v2 }
 0x754   : > { %v13075_v25 = vadd.f32 %v5339_v12, %v16303_v7  ;;  %16306 = vst [vmem:[#allocation17_spill] sm:$0xff] %v13079_v34  ;;  %v13081_v60 = vpop.f32.mrf.mxu1  ;;  %v16311_v12 = vld [vmem:[#allocation271_spill] sm:$0xff]  ;;  %v7969_v20 = vpop.eup %7968  ;;  %v16339_v34 = vld [vmem:[#allocation33_spill] sm:$0xff] }
 0x755   : > { %16307 = vst [vmem:[#allocation259_spill] sm:$0xff] %v13081_v60  ;;  %v16314_v60 = vld [vmem:[#allocation70_spill] sm:$0xff] }
 0x756   : > { %7119 = vmatmul.msk.bf16.gmra.mxu1 %vm639_vm0, %v4401_v26  ;;  %v16316_v22 = vpack.c.bf16 %v16314_v60, %v16315_v29 }
 0x759   : > { %v7971_v62 = vpop.eup %7970 }
 0x75b   : > { %v5342_v0 = vpop.f32.mrf.mxu0  ;;  %v13091_v6 = vpop.f32.mrf.mxu2 }
 0x75c   : > { %v13089_v7 = vadd.f32 %v5342_v0, %v16311_v12  ;;  %16312 = vst [vmem:[#allocation228_spill] sm:$0xff] %v13091_v6  ;;  %v13093_v27 = vpop.f32.mrf.mxu1  ;;  %v13103_v12 = vpop.f32.mrf.mxu3  ;;  %v16325_v6 = vld [vmem:[#allocation43_spill] sm:$0xff] }
 0x75d   : > { %16313 = vst [vmem:[#allocation207_spill] sm:$0xff] %v13093_v27  ;;  %v4406_v27 = vpack.c.bf16 %v7969_v20, %v7971_v62 }
 0x75e   : > { %5381 = vmatmul.bf16.gmra.mxu0 %v16316_v22  ;;  %16319 = vst [vmem:[#allocation14_spill] sm:$0xff] %v13103_v12  ;;  %v16324_v12 = vld [vmem:[#allocation31_spill] sm:$0xff] }
 0x763   : > { %v5344_v26 = vpop.f32.mrf.mxu0  ;;  %v13101_v35 = vpop.f32.mrf.mxu2 }
 0x764   : > { %v13099_v38 = vadd.f32 %v5344_v26, %v12679_v13  ;;  %16318 = vst [vmem:[#allocation166_spill] sm:$0xff] %v13101_v35  ;;  %v5451_v0 = vpop.f32.mrf.mxu1  ;;  %v16323_v26 = vld [vmem:[#allocation150_spill] sm:$0xff]  ;;  %v13121_v20 = vpop.f32.mrf.mxu3 }
 0x765   : > { %v13106_v44 = vadd.f32 %v5451_v0, %v16320_v31  ;;  %v16326_v0 = vpack.c.bf16 %v16324_v12, %v16325_v6  ;;  %16327 = vst [vmem:[#allocation97_spill] sm:$0xff] %v13121_v20  ;;  %v16331_v6 = vld [vmem:[#allocation184_spill] sm:$0xff]  ;;  %v16332_v12 = vld [vmem:[#allocation54_spill] sm:$0xff] }
 0x766   : > { %16317 = vst [vmem:[#allocation226_spill] sm:$0xff] %v13099_v38  ;;  %7120 = vmatmul.msk.bf16.gmra.mxu1 %vm639_vm0, %v4406_v27 }
 0x767   : > { %7972 = vrcp.f32 %v13106_v44 }
 0x76b   : > { %v5347_v2 = vpop.f32.mrf.mxu0  ;;  %v13113_v13 = vpop.f32.mrf.mxu2 }
 0x76c   : > { %v13111_v60 = vadd.f32 %v5347_v2, %v12708_v3  ;;  %16322 = vst [vmem:[#allocation32_spill] sm:$0xff] %v13113_v13  ;;  %v5453_v29 = vpop.f32.mrf.mxu1  ;;  %v16330_v13 = vld [vmem:[#allocation257_spill] sm:$0xff] }
 0x76d   : > { %v7973_v22 = vpop.eup %7972  ;;  %v13116_v35 = vadd.f32 %v5453_v29, %v16323_v26  ;;  %v13137_v26 = vpop.f32.mrf.mxu3 }
 0x76e   : > { %16321 = vst [vmem:[#allocation66_spill] sm:$0xff] %v13111_v60  ;;  %5386 = vmatmul.bf16.gmra.mxu0 %v16326_v0  ;;  %5705 = vperm.xlu0 %7261, %v7973_v22   ;;  %v16333_v22 = vpack.c.bf16 %v16331_v6, %v16332_v12  ;;  %v16348_v60 = vld [vmem:[#allocation37_spill] sm:$0xff] }
 0x76f   : > { %7974 = vrcp.f32 %v13116_v35  ;;  %16334 = vst [vmem:[#allocation134_spill] sm:$0xff] %v13137_v26 }
 0x773   : > { %v5349_v27 = vpop.f32.mrf.mxu0  ;;  %v13127_v62 = vpop.f32.mrf.mxu2 }
 0x774   : > { %v13125_v3 = vadd.f32 %v5349_v27, %v12741_v19  ;;  %16329 = vst [vmem:[#allocation49_spill] sm:$0xff] %v13127_v62  ;;  %v5456_v31 = vpop.f32.mrf.mxu1 }
 0x775   : > { %v7975_v2 = vpop.eup %7974  ;;  %v13130_v29 = vadd.f32 %v5456_v31, %v16330_v13  ;;  %v16337_v13 = vld [vmem:[#allocation132_spill] sm:$0xff]  ;;  %v5225_v12 = vpop.f32.mrf.mxu3 }
 0x776   : > { %16328 = vst [vmem:[#allocation74_spill] sm:$0xff] %v13125_v3  ;;  %5710 = vperm.xlu1 %7262, %v7975_v2   ;;  %7121 = vmatmul.msk.bf16.gmra.mxu1 %vm639_vm0, %v16333_v22  ;;  %v16338_v2 = vld [vmem:[#allocation165_spill] sm:$0xff] }
 0x777   : > { %7976 = vrcp.f32 %v13130_v29  ;;  %v16340_v3 = vpack.c.bf16 %v16338_v2, %v16339_v34  ;;  %v16343_v34 = vld [vmem:[#allocation119_spill] sm:$0xff] }
 0x77b   : > { %v5352_v0 = vpop.f32.mrf.mxu0  ;;  %v13142_v27 = vpop.f32.mrf.mxu2 }
 0x77c   : > { %v13140_v19 = vadd.f32 %v5352_v0, %v12771_v23  ;;  %16336 = vst [vmem:[#allocation256_spill] sm:$0xff] %v13142_v27  ;;  %v5458_v20 = vpop.f32.mrf.mxu1 }
 0x77d   : > { %v7977_v62 = vpop.eup %7976  ;;  %v13145_v31 = vadd.f32 %v5458_v20, %v16337_v13 }
 0x77e   : > { %16335 = vst [vmem:[#allocation65_spill] sm:$0xff] %v13140_v19  ;;  %5391 = vmatmul.bf16.gmra.mxu0 %v16340_v3  ;;  %5715 = vperm.xlu2 %7263, %v7977_v62   ;;  %v16342_v19 = vld [vmem:[#allocation261_spill] sm:$0xff]  ;;  %v16344_v3 = vld [vmem:[#allocation170_spill] sm:$0xff] }
 0x77f   : > { %7978 = vrcp.f32 %v13145_v31  ;;  %v16345_v62 = vpack.c.bf16 %v16343_v34, %v16344_v3  ;;  %v5228_v34 = vpop.f32.mrf.mxu3 }
 0x783   : > { %v5354_v6 = vpop.f32.mrf.mxu0  ;;  %v5036_v23 = vpop.f32.mrf.mxu2 }
 0x784   : > { %v13152_v22 = vadd.f32 %v5354_v6, %v12786_v4  ;;  %v5461_v0 = vpop.f32.mrf.mxu1  ;;  %v5037_v27 = vadd.f32 %v5036_v23, %v12947_v47  ;;  %v16346_v23 = vld [vmem:[#allocation177_spill] sm:$0xff] }
 0x785   : > { %v7979_v26 = vpop.eup %7978  ;;  %v13156_v20 = vadd.f32 %v5461_v0, %v16342_v19  ;;  %v16347_v0 = vld [vmem:[#allocation124_spill] sm:$0xff] }
 0x786   : > { %16341 = vst [vmem:[#allocation251_spill] sm:$0xff] %v13152_v22  ;;  %5720 = vperm.xlu2 %7263, %v7979_v26   ;;  %7122 = vmatmul.msk.bf16.gmra.mxu1 %vm639_vm0, %v16345_v62  ;;  %v13163_v13 = vadd.f32 %v5225_v12, %v5037_v27  ;;  %v16349_v38 = vpack.c.bf16 %v16347_v0, %v16348_v60  ;;  %v16351_v60 = vld [vmem:[#allocation48_spill] sm:$0xff] }
 0x787   : > { %7980 = vrcp.f32 %v13156_v20 }
 0x78b   : > { %v5357_v4 = vpop.f32.mrf.mxu0  ;;  %v5039_v6 = vpop.f32.mrf.mxu2 }
 0x78c   : > { %v13166_v2 = vadd.f32 %v5357_v4, %v12810_v58  ;;  %v5463_v22 = vpop.f32.mrf.mxu1  ;;  %v5040_v19 = vadd.f32 %v5039_v6, %v12961_v53  ;;  %v16350_v53 = vld [vmem:[#allocation204_spill] sm:$0xff] }
 0x78d   : > { %v7981_v47 = vpop.eup %7980  ;;  %v13170_v26 = vadd.f32 %v5463_v22, %v16346_v23  ;;  %v16354_v23 = vld [vmem:[#allocation270_spill] sm:$0xff] }
 0x78e   : > { %5396 = vmatmul.bf16.gmra.mxu0 %v16349_v38  ;;  %5725 = vperm.xlu1 %7262, %v7981_v47   ;;  %v13176_v27 = vadd.f32 %v5228_v34, %v5040_v19  ;;  %v16352_v38 = vld [vmem:[#allocation263_spill] sm:$0xff] }
 0x78f   : > { %7982 = vrcp.f32 %v13170_v26  ;;  %v16353_v22 = vpack.c.bf16 %v16351_v60, %v16352_v38  ;;  %v16355_v34 = vld [vmem:[#allocation171_spill] sm:$0xff] }
 0x793   : > { %v5359_v58 = vpop.f32.mrf.mxu0 }
 0x794   : > { %v13179_v12 = vadd.f32 %v5359_v58, %v12823_v28  ;;  %v5466_v3 = vpop.f32.mrf.mxu1  ;;  %v16356_v58 = vld [vmem:[#allocation55_spill] sm:$0xff] }
 0x795   : > { %v7983_v62 = vpop.eup %7982  ;;  %v13182_v4 = vadd.f32 %v5466_v3, %v16350_v53  ;;  %v16357_v3 = vpack.c.bf16 %v16355_v34, %v16356_v58 }
 0x796   : > { %5730 = vperm.xlu2 %7263, %v7983_v62   ;;  %7123 = vmatmul.msk.bf16.gmra.mxu1 %vm639_vm0, %v16353_v22 }
 0x797   : > { %7984 = vrcp.f32 %v13182_v4 }
 0x79b   : > { %v5362_v6 = vpop.f32.mrf.mxu0 }
 0x79c   : > { %v13190_v47 = vadd.f32 %v5362_v6, %v12843_v42  ;;  %v5468_v19 = vpop.f32.mrf.mxu1  ;;  %v16359_v42 = vld [vmem:[#allocation280_spill] sm:$0xff] }
 0x79d   : > { %v7985_v28 = vpop.eup %7984  ;;  %v13193_v0 = vadd.f32 %v5468_v19, %v16354_v23  ;;  %v16360_v6 = vld [vmem:[#allocation84_spill] sm:$0xff]  ;;  %v16361_v19 = vld [vmem:[#allocation175_spill] sm:$0xff] }
 0x79e   : > { %5401 = vmatmul.bf16.gmra.mxu0 %v16357_v3  ;;  %5735 = vperm.xlu1 %7262, %v7985_v28   ;;  %v16362_v23 = vpack.c.bf16 %v16360_v6, %v16361_v19  ;;  %v16363_v3 = vld [vmem:[#allocation91_spill] sm:$0xff] }
 0x79f   : > { %7986 = vrcp.f32 %v13193_v0 }
 0x7a3   : > { %v5364_v62 = vpop.f32.mrf.mxu0 }
 0x7a4   : > { %v13200_v53 = vadd.f32 %v5364_v62, %v12859_v1  ;;  %v5471_v60 = vpop.f32.mrf.mxu1 }
 0x7a5   : > { %v7987_v38 = vpop.eup %7986  ;;  %v13203_v22 = vadd.f32 %v5471_v60, %v16359_v42  ;;  %v16365_v60 = vld [vmem:[#allocation40_spill] sm:$0xff] }
 0x7a6   : > { %16358 = vst [vmem:[#allocation69_spill] sm:$0xff] %v13200_v53  ;;  %5740 = vperm.xlu0 %7261, %v7987_v38   ;;  %7124 = vmatmul.msk.bf16.gmra.mxu1 %vm639_vm0, %v16362_v23  ;;  %v16364_v53 = vld [vmem:[#allocation174_spill] sm:$0xff] }
 0x7a7   : > { %7988 = vrcp.f32 %v13203_v22  ;;  %v16366_v42 = vpack.c.bf16 %v16364_v53, %v16365_v60 }
 0x7ab   : > { %v5367_v28 = vpop.f32.mrf.mxu0 }
 0x7ac   : > { %v13211_v34 = vadd.f32 %v5367_v28, %v12879_v10  ;;  %v5473_v58 = vpop.f32.mrf.mxu1  ;;  %v16367_v28 = vld [vmem:[#allocation135_spill] sm:$0xff] }
 0x7ad   : > { %v7989_v1 = vpop.eup %7988  ;;  %v13214_v62 = vadd.f32 %v5473_v58, %v16363_v3  ;;  %v16368_v58 = vld [vmem:[#allocation182_spill] sm:$0xff] }
 0x7ae   : > { %5406 = vmatmul.bf16.gmra.mxu0 %v16366_v42  ;;  %5745 = vperm.xlu2 %7263, %v7989_v1   ;;  %v16369_v3 = vpack.c.bf16 %v16367_v28, %v16368_v58 }
 0x7af   : > { %7990 = vrcp.f32 %v13214_v62 }
 0x7b3   : > { %v5369_v38 = vpop.f32.mrf.mxu0 }
 0x7b4   : > { %v13221_v6 = vadd.f32 %v5369_v38, %v12897_v8  ;;  %v5476_v19 = vpop.f32.mrf.mxu1  ;;  %v16370_v38 = vld [vmem:[#allocation275_spill] sm:$0xff] }
 0x7b5   : > { %v7991_v23 = vpop.eup %7990  ;;  %v13224_v10 = vadd.f32 %v5476_v19, %v12699_v9  ;;  %v16371_v9 = vld [vmem:[#allocation90_spill] sm:$0xff] }
 0x7b6   : > { %5750 = vperm.xlu1 %7262, %v7991_v23   ;;  %7125 = vmatmul.msk.bf16.gmra.mxu1 %vm639_vm0, %v16369_v3  ;;  %v16372_v19 = vpack.c.bf16 %v16370_v38, %v16371_v9  ;;  %v6378_v23 = vld [vmem:[%s14225_s8 + $0x18] sm:$0xff] }
 0x7b7   : > { %7992 = vrcp.f32 %v13224_v10  ;;  %6422 = vmatpush.msrb.mxu2 %v6378_v23 }
 0x7bb   : > { %v5372_v53 = vpop.f32.mrf.mxu0 }
 0x7bc   : > { %v13232_v1 = vadd.f32 %v5372_v53, %v12917_v61  ;;  %v5478_v60 = vpop.f32.mrf.mxu1  ;;  %v16373_v53 = vld [vmem:[#allocation113_spill] sm:$0xff] }
 0x7bd   : > { %v7993_v8 = vpop.eup %7992  ;;  %v13235_v42 = vadd.f32 %v5478_v60, %v12723_v39  ;;  %v16374_v60 = vld [vmem:[#allocation188_spill] sm:$0xff] }
 0x7be   : > { %5411 = vmatmul.bf16.gmra.mxu0 %v16372_v19  ;;  %5755 = vperm.xlu0 %7261, %v7993_v8   ;;  %v16375_v8 = vpack.c.bf16 %v16373_v53, %v16374_v60 }
 0x7bf   : > { %7994 = vrcp.f32 %v13235_v42 }
 0x7c3   : > { %v5374_v28 = vpop.f32.mrf.mxu0 }
 0x7c4   : > { %v13245_v61 = vadd.f32 %v5374_v28, %v12935_v16  ;;  %v5481_v58 = vpop.f32.mrf.mxu1  ;;  %v16376_v28 = vld [vmem:[#allocation139_spill] sm:$0xff] }
 0x7c5   : > { %v7995_v3 = vpop.eup %7994  ;;  %v13248_v39 = vadd.f32 %v5481_v58, %v12762_v33  ;;  %v16377_v33 = vld [vmem:[#allocation278_spill] sm:$0xff] }
 0x7c6   : > { %5760 = vperm.xlu2 %7263, %v7995_v3   ;;  %7126 = vmatmul.msk.bf16.gmra.mxu1 %vm639_vm0, %v16375_v8  ;;  %v16378_v58 = vpack.c.bf16 %v16376_v28, %v16377_v33 }
 0x7c7   : > { %7996 = vrcp.f32 %v13248_v39 }
 0x7cb   : > { %v5377_v38 = vpop.f32.mrf.mxu0 }
 0x7cc   : > { %v13256_v9 = vadd.f32 %v5377_v38, %v12954_v59  ;;  %v5483_v19 = vpop.f32.mrf.mxu1  ;;  %v16380_v38 = vld [vmem:[#allocation79_spill] sm:$0xff] }
 0x7cd   : > { %v7997_v16 = vpop.eup %7996  ;;  %v13259_v23 = vadd.f32 %v5483_v19, %v12776_v55  ;;  %v16379_v55 = vld [vmem:[#allocation197_spill] sm:$0xff] }
 0x7ce   : > { %5416 = vmatmul.bf16.gmra.mxu0 %v16378_v58  ;;  %5765 = vperm.xlu1 %7262, %v7997_v16   ;;  %v16381_v19 = vpack.c.bf16 %v16379_v55, %v16380_v38  ;;  %v16382_v58 = vld [vmem:[#allocation167_spill] sm:$0xff]  ;;  %v5010_v55 = vadd.f32 %v13011_v32, %v12725_v45  ;;  %v16389_v45 = vld [vmem:[#allocation190_spill] sm:$0xff] }
 0x7cf   : > { %7998 = vrcp.f32 %v13259_v23 }
 0x7d3   : > { %v5379_v3 = vpop.f32.mrf.mxu0 }
 0x7d4   : > { %v13266_v53 = vadd.f32 %v5379_v3, %v12970_v57  ;;  %v5486_v60 = vpop.f32.mrf.mxu1  ;;  %v16383_v3 = vpack.c.bf16 %v12672_v37, %v16382_v58 }
 0x7d5   : > { %v7999_v8 = vpop.eup %7998  ;;  %v13269_v59 = vadd.f32 %v5486_v60, %v12799_v24 }
 0x7d6   : > { %5770 = vperm.xlu0 %7261, %v7999_v8   ;;  %7127 = vmatmul.msk.bf16.gmra.mxu1 %vm639_vm0, %v16381_v19  ;;  %v16386_v19 = vld [vmem:[#allocation290_spill] sm:$0xff] }
 0x7d7   : > { %8000 = vrcp.f32 %v13269_v59 }
 0x7db   : > { %v13276_v16 = vpop.f32.mrf.mxu0 }
 0x7dc   : > { %v5488_v28 = vpop.f32.mrf.mxu1 }
 0x7dd   : > { %v8001_v33 = vpop.eup %8000  ;;  %v13279_v57 = vadd.f32 %v5488_v28, %v12813_v5  ;;  %v16385_v5 = vld [vmem:[#allocation87_spill] sm:$0xff]  ;;  %v5199_v28 = vadd.f32 %v12963_v36, %v5010_v55 }
 0x7de   : > { %5421 = vmatmul.bf16.gmra.mxu0 %v16383_v3  ;;  %5775 = vperm.xlu2 %7263, %v8001_v33   ;;  %v16387_v37 = vpack.c.bf16 %v16385_v5, %v16386_v19  ;;  %v16388_v33 = vld [vmem:[#allocation99_spill] sm:$0xff]  ;;  %v16390_v19 = vld [vmem:[#allocation274_spill] sm:$0xff] }
 0x7df   : > { %8002 = vrcp.f32 %v13279_v57  ;;  %v3630_v58 = vsub.f32 %v16388_v33, %v12750_v56  ;;  %v16391_v36 = vpack.c.bf16 %v12736_v11, %v16390_v19 }
 0x7e1   : > { %v4338_v55 = vmul.f32 1.442695, %v3630_v58 }
 0x7e3   : > { %v13285_v24 = vpop.f32.mrf.mxu0 }
 0x7e4   : > { %16384 = vst [vmem:[#allocation103_spill] sm:$0xff] %v13285_v24  ;;  %v5491_v60 = vpop.f32.mrf.mxu1 }
 0x7e5   : > { %v8003_v8 = vpop.eup %8002  ;;  %v13290_v38 = vadd.f32 %v5491_v60, %v12834_v15  ;;  %v3625_v15 = vsub.f32 %v16389_v45, %v12718_v18 }
 0x7e6   : > { %5780 = vperm.xlu1 %7262, %v8003_v8   ;;  %7128 = vmatmul.msk.bf16.gmra.mxu1 %vm639_vm0, %v16387_v37  ;;  %v5012_v8 = vadd.f32 %v13025_v50, %v12764_v63  ;;  %v13312_v37 = vpop.permute.xlu2 %5715  ;;  %v16392_v50 = vld [vmem:[#allocation291_spill] sm:$0xff] }
 0x7e7   : > { %8004 = vrcp.f32 %v13290_v38  ;;  %v5015_v11 = vadd.f32 %v13039_v51, %v16392_v50 }
 0x7e8   : > { %v5201_v33 = vadd.f32 %v12985_v30, %v5012_v8 }
 0x7e9   : > { %v5204_v19 = vadd.f32 %v13003_v52, %v5015_v11 }
 0x7eb   : > { %v5387_v3 = vpop.f32.mrf.mxu0 }
 0x7ec   : > { %v13300_v24 = vadd.f32 %v5387_v3, %v5199_v28  ;;  %v5493_v32 = vpop.f32.mrf.mxu1  ;;  %v4328_v28 = vmul.f32 1.442695, %v3625_v15  ;;  %v16395_v15 = vld [vmem:[#allocation246_spill] sm:$0xff] }
 0x7ed   : > { %v8005_v60 = vpop.eup %8004  ;;  %v13307_v5 = vadd.f32 %v5493_v32, %v12848_v21  ;;  %v16394_v32 = vld [vmem:[#allocation136_spill] sm:$0xff] }
 0x7ee   : > { %5426 = vmatmul.bf16.gmra.mxu0 %v16391_v36  ;;  %5785 = vperm.xlu0 %7261, %v8005_v60   ;;  %v16396_v60 = vpack.c.bf16 %v16394_v32, %v16395_v15  ;;  %v13328_v8 = vpop.permute.xlu2 %5720  ;;  %v16400_v32 = vld [vmem:[#allocation82_spill] sm:$0xff] }
 0x7ef   : > { %8006 = vrcp.f32 %v13307_v5  ;;  %v5017_v15 = vadd.f32 %v13053_v54, %v16400_v32 }
 0x7f0   : > { %8008 = vpow2.f32 %v4338_v55  ;;  %v16397_v55 = vld [vmem:[#allocation100_spill] sm:$0xff] }
 0x7f1   : > { %8010 = vpow2.f32 %v4328_v28  ;;  %v3640_v51 = vsub.f32 %v16397_v55, %v12791_v14 }
 0x7f3   : > { %v5389_v3 = vpop.f32.mrf.mxu0  ;;  %v4358_v52 = vmul.f32 1.442695, %v3640_v51  ;;  %v16402_v51 = vld [vmem:[#allocation210_spill] sm:$0xff] }
 0x7f4   : > { %v13316_v45 = vadd.f32 %v5389_v3, %v5201_v33  ;;  %v5496_v63 = vpop.f32.mrf.mxu1  ;;  %v16399_v3 = vld [vmem:[#allocation172_spill] sm:$0xff] }
 0x7f5   : > { %v8007_v21 = vpop.eup %8006  ;;  %v13321_v58 = vadd.f32 %v5496_v63, %v12868_v40  ;;  %v3635_v63 = vsub.f32 %v16399_v3, %v12773_v17 }
 0x7f6   : > { %5790 = vperm.xlu2 %7263, %v8007_v21   ;;  %7129 = vmatmul.msk.bf16.gmra.mxu1 %vm639_vm0, %v16396_v60  ;;  %v8009_v30 = vpop.eup %8008 }
 0x7f7   : > { %16393 = vst [vmem:[#allocation59_spill] sm:$0xff] %v13321_v58  ;;  %8012 = vrcp.f32 %v13321_v58  ;;  %v8011_v36 = vpop.eup %8010  ;;  %v4348_v11 = vmul.f32 1.442695, %v3635_v63  ;;  %v5706_v58 = vpop.permute.xlu0 %5705 }
 0x7f8   : > { %v4535_v33 = vpack.c.bf16 %v8009_v30, %v8011_v36  ;;  %v5206_v30 = vadd.f32 %v13018_v41, %v5017_v15 }
 0x7fb   : > { %v5392_v28 = vpop.f32.mrf.mxu0 }
 0x7fc   : > { %v13333_v40 = vadd.f32 %v5392_v28, %v5204_v19  ;;  %v5498_v21 = vpop.f32.mrf.mxu1  ;;  %v13343_v19 = vpop.permute.xlu2 %5730 }
 0x7fd   : > { %v8013_v50 = vpop.eup %8012  ;;  %v13340_v60 = vadd.f32 %v5498_v21, %v12882_v46  ;;  %v13359_v21 = vld [vmem:[%s14220_s3] sm:$0xff] }
 0x7fe   : > { %16398 = vst [vmem:[#allocation161_spill] sm:$0xff] %v13333_v40  ;;  %5431 = vmatmul.bf16.gmra.mxu0 %v4535_v33  ;;  %5795 = vperm.xlu1 %7262, %v8013_v50   ;;  %v16403_v33 = vld [vmem:[#allocation44_spill] sm:$0xff]  ;;  %v13362_v50 = vperm.slane %v13359_v21, 0 }
 0x7ff   : > { %8014 = vrcp.f32 %v13340_v60  ;;  %v16404_v3 = vpack.c.bf16 %v16402_v51, %v16403_v33 }
 0x800   : > { %8016 = vpow2.f32 %v4358_v52 }
 0x801   : > { %8018 = vpow2.f32 %v4348_v11 }
 0x803   : > { %v5394_v36 = vpop.f32.mrf.mxu0 }
 0x804   : > { %v13346_v55 = vadd.f32 %v5394_v36, %v5206_v30  ;;  %v5501_v28 = vpop.f32.mrf.mxu1 }
 0x805   : > { %v8015_v54 = vpop.eup %8014  ;;  %v13349_v46 = vadd.f32 %v5501_v28, %v12908_v43 }
 0x806   : > { %16401 = vst [vmem:[#allocation138_spill] sm:$0xff] %v13346_v55  ;;  %5800 = vperm.xlu0 %7261, %v8015_v54   ;;  %7130 = vmatmul.msk.bf16.gmra.mxu1 %vm639_vm0, %v16404_v3  ;;  %v8017_v63 = vpop.eup %8016  ;;  %v5711_v54 = vpop.permute.xlu1 %5710  ;;  %v16413_v55 = vld [vmem:[#allocation222_spill] sm:$0xff] }
 0x807   : > { %8020 = vrcp.f32 %v13349_v46  ;;  %v8019_v32 = vpop.eup %8018 }
 0x808   : > { %v5746_v41 = vpop.permute.xlu2 %5745  ;;  %v4540_v11 = vpack.c.bf16 %v8017_v63, %v8019_v32  ;;  %v16407_v63 = vld [vmem:[#allocation47_spill] sm:$0xff] }
 0x809   : > { %v6071_v43 = vmul.f32 %v5746_v41, %v13203_v22  ;;  %v16408_v41 = vld [vmem:[#allocation77_spill] sm:$0xff] }
 0x80b   : > { %v13365_v15 = vpop.f32.mrf.mxu0  ;;  %v13368_v52 = vmul.f32 %v13362_v50, %v6071_v43  ;;  %v16409_v43 = vpack.c.bf16 %v16407_v63, %v16408_v41 }
 0x80c   : > { %16405 = vst [vmem:[#allocation110_spill] sm:$0xff] %v13365_v15  ;;  %v5503_v30 = vpop.f32.mrf.mxu1 }
 0x80d   : > { %v8021_v36 = vpop.eup %8020  ;;  %v13371_v28 = vadd.f32 %v5503_v30, %v12922_v49 }
 0x80e   : > { %5436 = vmatmul.bf16.gmra.mxu0 %v4540_v11  ;;  %5805 = vperm.xlu2 %7263, %v8021_v36   ;;  %v13384_v49 = vpop.permute.xlu1 %5725  ;;  %v6136_v11 = vrot.slane %v13359_v21, 1 }
 0x80f   : > { %8022 = vrcp.f32 %v13371_v28 }
 0x810   : > { %v13395_v63 = vperm.slane %v6136_v11, 0 }
 0x813   : > { %v13374_v51 = vpop.f32.mrf.mxu0 }
 0x814   : > { %16406 = vst [vmem:[#allocation237_spill] sm:$0xff] %v13374_v51  ;;  %v5506_v22 = vpop.f32.mrf.mxu1 }
 0x815   : > { %v8023_v33 = vpop.eup %8022  ;;  %v13377_v3 = vadd.f32 %v5506_v22, %v12945_v48  ;;  %v6065_v48 = vmul.f32 %v13312_v37, %v13130_v29  ;;  %v16411_v22 = vld [vmem:[#allocation24_spill] sm:$0xff] }
 0x816   : > { %5810 = vperm.xlu1 %7262, %v8023_v33   ;;  %7131 = vmatmul.msk.bf16.gmra.mxu1 %vm639_vm0, %v16409_v43  ;;  %v13397_v41 = vpop.permute.xlu1 %5735 }
 0x817   : > { %8024 = vrcp.f32 %v13377_v3 }
 0x81b   : > { %v13386_v32 = vpop.f32.mrf.mxu0 }
 0x81c   : > { %16410 = vst [vmem:[#allocation98_spill] sm:$0xff] %v13386_v32  ;;  %v5508_v30 = vpop.f32.mrf.mxu1  ;;  %v6161_v32 = vmul.f32 %v13362_v50, %v6065_v48  ;;  %v16415_v48 = vld [vmem:[#allocation96_spill] sm:$0xff] }
 0x81d   : > { %v8025_v36 = vpop.eup %8024  ;;  %v13392_v33 = vadd.f32 %v5508_v30, %v16411_v22  ;;  %v6063_v22 = vmul.f32 %v5706_v58, %v13106_v44 }
 0x81e   : > { %5815 = vperm.xlu0 %7261, %v8025_v36   ;;  %v6261_v36 = vsel %vm891_vm1, %v6161_v32, 0.0 }
 0x81f   : > { %8026 = vrcp.f32 %v13392_v33  ;;  %v6159_v32 = vmul.f32 %v13362_v50, %v6063_v22 }
 0x820   : > { %v5761_v43 = vpop.permute.xlu2 %5760 }
 0x821   : > { %v6074_v51 = vmul.f32 %v5761_v43, %v13235_v42  ;;  %v16416_v42 = vld [vmem:[#allocation78_spill] sm:$0xff] }
 0x822   : > { %v16417_v43 = vpack.c.bf16 %v16415_v48, %v16416_v42 }
 0x823   : > { %v13401_v15 = vpop.f32.mrf.mxu0  ;;  %v6170_v29 = vmul.f32 %v13395_v63, %v6074_v51  ;;  %v13416_v51 = vpop.permute.xlu0 %5740 }
 0x824   : > { %16412 = vst [vmem:[#allocation173_spill] sm:$0xff] %v13401_v15  ;;  %v5511_v37 = vpop.f32.mrf.mxu1 }
 0x825   : > { %v8027_v30 = vpop.eup %8026  ;;  %v6262_v11 = vsel %vm891_vm1, %v6170_v29, 0.0  ;;  %v13408_v17 = vadd.f32 %v5511_v37, %v16413_v55  ;;  %v6231_v37 = vsel %vm891_vm1, %v6159_v32, 0.0 }
 0x826   : > { %v13410_v40 = vadd.f32 %v6262_v11, %v6261_v36  ;;  %5820 = vperm.xlu0 %7261, %v8027_v30   ;;  %7132 = vmatmul.msk.bf16.gmra.mxu1 %vm639_vm0, %v16417_v43  ;;  %v6064_v30 = vmul.f32 %v5711_v54, %v13116_v35  ;;  %v16419_v11 = vld [vmem:[#allocation160_spill] sm:$0xff]  ;;  %v6068_v35 = vmul.f32 %v13343_v19, %v13170_v26 }
 0x827   : > { %16414 = vst [vmem:[#allocation23_spill] sm:$0xff] %v13408_v17 }
 0x828   : > { %v5751_v15 = vpop.permute.xlu1 %5750  ;;  %v6160_v22 = vmul.f32 %v13362_v50, %v6064_v30  ;;  %v16423_v30 = vld [vmem:[#allocation176_spill] sm:$0xff] }
 0x829   : > { %v6072_v44 = vmul.f32 %v5751_v15, %v13214_v62 }
 0x82a   : > { %v6246_v32 = vsel %vm891_vm1, %v6160_v22, 0.0 }
 0x82b   : > { %v13420_v58 = vpop.f32.mrf.mxu0  ;;  %v6168_v55 = vmul.f32 %v13395_v63, %v6072_v44 }
 0x82c   : > { %16418 = vst [vmem:[#allocation34_spill] sm:$0xff] %v13420_v58  ;;  %v5513_v29 = vpop.f32.mrf.mxu1 }
 0x82d   : > { %v6232_v36 = vsel %vm891_vm1, %v6168_v55, 0.0  ;;  %v13427_v48 = vadd.f32 %v5513_v29, %v16419_v11  ;;  %v16421_v55 = vld [vmem:[#allocation200_spill] sm:$0xff] }
 0x82e   : > { %v13429_v42 = vadd.f32 %v6232_v36, %v6231_v37  ;;  %v16424_v36 = vld [vmem:[#allocation123_spill] sm:$0xff] }
 0x82f   : > { %16420 = vst [vmem:[#allocation267_spill] sm:$0xff] %v13427_v48 }
 0x830   : > { %v5756_v43 = vpop.permute.xlu0 %5755 }
 0x831   : > { %v6073_v62 = vmul.f32 %v5756_v43, %v13224_v10  ;;  %v16425_v10 = vpack.c.bf16 %v16423_v30, %v16424_v36  ;;  %v6164_v43 = vmul.f32 %v13362_v50, %v6068_v35 }
 0x833   : > { %v13433_v15 = vpop.f32.mrf.mxu0  ;;  %v6169_v44 = vmul.f32 %v13395_v63, %v6073_v62 }
 0x834   : > { %v5516_v58 = vpop.f32.mrf.mxu1 }
 0x835   : > { %v6247_v54 = vsel %vm891_vm1, %v6169_v44, 0.0  ;;  %v13441_v29 = vadd.f32 %v5516_v58, %v16421_v55  ;;  %v6066_v58 = vmul.f32 %v13328_v8, %v13145_v31  ;;  %v6306_v44 = vsel %vm891_vm1, %v6164_v43, 0.0 }
 0x836   : > { %v13443_v37 = vadd.f32 %v6247_v54, %v6246_v32  ;;  %7133 = vmatmul.msk.bf16.gmra.mxu1 %vm639_vm0, %v16425_v10  ;;  %v16426_v54 = vld [vmem:[#allocation88_spill] sm:$0xff] }
 0x837   : > { %16422 = vst [vmem:[#allocation187_spill] sm:$0xff] %v13441_v29  ;;  %v6162_v35 = vmul.f32 %v13362_v50, %v6066_v58 }
 0x838   : > { %v5776_v11 = vpop.permute.xlu2 %5775 }
 0x839   : > { %v6077_v22 = vmul.f32 %v5776_v11, %v13269_v59 }
 0x83b   : > { %v13451_v62 = vpop.f32.mrf.mxu0  ;;  %v6173_v26 = vmul.f32 %v13395_v63, %v6077_v22  ;;  %v6276_v22 = vsel %vm891_vm1, %v6162_v35, 0.0 }
 0x83c   : > { %v5518_v19 = vpop.f32.mrf.mxu1 }
 0x83d   : > { %v6307_v32 = vsel %vm891_vm1, %v6173_v26, 0.0  ;;  %v13459_v55 = vadd.f32 %v5518_v19, %v16426_v54  ;;  %v6067_v26 = vmul.f32 %v13384_v49, %v13156_v20 }
 0x83e   : > { %v13461_v30 = vadd.f32 %v6307_v32, %v6306_v44  ;;  %v16427_v44 = vld [vmem:[#allocation63_spill] sm:$0xff] }
 0x83f   : > { %8028 = vrcp.f32 %v13459_v55  ;;  %v6163_v35 = vmul.f32 %v13362_v50, %v6067_v26 }
 0x840   : > { %v5766_v59 = vpop.permute.xlu1 %5765 }
 0x841   : > { %v6075_v36 = vmul.f32 %v5766_v59, %v13248_v39  ;;  %v16428_v39 = vld [vmem:[#allocation51_spill] sm:$0xff] }
 0x843   : > { %v5414_v10 = vpop.f32.mrf.mxu0  ;;  %v6171_v11 = vmul.f32 %v13395_v63, %v6075_v36 }
 0x844   : > { %v13468_v31 = vadd.f32 %v5414_v10, %v13163_v13  ;;  %v5521_v8 = vpop.f32.mrf.mxu1  ;;  %v16429_v13 = vld [vmem:[#allocation243_spill] sm:$0xff] }
 0x845   : > { %v8029_v43 = vpop.eup %8028  ;;  %v6277_v19 = vsel %vm891_vm1, %v6171_v11, 0.0  ;;  %v13475_v32 = vadd.f32 %v5521_v8, %v16427_v44  ;;  %v16430_v54 = vpack.c.bf16 %v16428_v39, %v16429_v13 }
 0x846   : > { %v13477_v58 = vadd.f32 %v6277_v19, %v6276_v22  ;;  %5840 = vperm.xlu0 %7261, %v8029_v43   ;;  %v6291_v43 = vsel %vm891_vm1, %v6163_v35, 0.0  ;;  %v16431_v19 = vld [vmem:[#allocation181_spill] sm:$0xff]  ;;  %v6351_v35 = vsel %vm891_vm1, %v13368_v52, 0.0 }
 0x847   : > { %8030 = vrcp.f32 %v13475_v32  ;;  %7134 = vmatmul.msk.bf16.gmra.mxu1 %vm639_vm0, %v16430_v54 }
 0x848   : > { %v5771_v59 = vpop.permute.xlu0 %5770 }
 0x849   : > { %v6076_v20 = vmul.f32 %v5771_v59, %v13259_v23  ;;  %v6377_v23 = vld [vmem:[%s14225_s8 + $0x10] sm:$0xff] }
 0x84a   : > { %6423 = vmatpush.msrb.mxu2 %v6377_v23 }
 0x84b   : > { %v5417_v49 = vpop.f32.mrf.mxu0  ;;  %v6172_v36 = vmul.f32 %v13395_v63, %v6076_v20  ;;  %v6069_v20 = vmul.f32 %v13397_v41, %v13182_v4 }
 0x84c   : > { %v13488_v10 = vadd.f32 %v5417_v49, %v13176_v27  ;;  %v5523_v11 = vpop.f32.mrf.mxu1 }
 0x84d   : > { %v8031_v8 = vpop.eup %8030  ;;  %v6292_v22 = vsel %vm891_vm1, %v6172_v36, 0.0  ;;  %v13493_v44 = vadd.f32 %v5523_v11, %v16431_v19  ;;  %v16432_v36 = vld [vmem:[#allocation192_spill] sm:$0xff]  ;;  %v6165_v52 = vmul.f32 %v13362_v50, %v6069_v20 }
 0x84e   : > { %v13495_v39 = vadd.f32 %v6292_v22, %v6291_v43  ;;  %5845 = vperm.xlu2 %7263, %v8031_v8   ;;  %v16435_v43 = vld [vmem:[#allocation155_spill] sm:$0xff] }
 0x84f   : > { %8032 = vrcp.f32 %v13493_v44 }
 0x850   : > { %v5791_v27 = vpop.permute.xlu2 %5790 }
 0x851   : > { %v6080_v26 = vmul.f32 %v5791_v27, %v13307_v5  ;;  %v16434_v5 = vld [vmem:[#allocation247_spill] sm:$0xff] }
 0x852   : > { %v16436_v22 = vpack.c.bf16 %v16434_v5, %v16435_v43  ;;  %v6137_v5 = vrot.slane %v13359_v21, 2 }
 0x853   : > { %v6176_v13 = vmul.f32 %v13395_v63, %v6080_v26  ;;  %v6321_v26 = vsel %vm891_vm1, %v6165_v52, 0.0  ;;  %v16439_v52 = vld [vmem:[#allocation159_spill] sm:$0xff] }
 0x854   : > { %v5526_v54 = vpop.f32.mrf.mxu1 }
 0x855   : > { %v8033_v59 = vpop.eup %8032  ;;  %v6352_v49 = vsel %vm891_vm1, %v6176_v13, 0.0  ;;  %v13509_v11 = vadd.f32 %v5526_v54, %v16432_v36  ;;  %v6070_v13 = vmul.f32 %v13416_v51, %v13193_v0 }
 0x856   : > { %v13511_v8 = vadd.f32 %v6352_v49, %v6351_v35  ;;  %5850 = vperm.xlu0 %7261, %v8033_v59  }
 0x857   : > { %8034 = vrcp.f32 %v13509_v11  ;;  %7135 = vmatmul.msk.bf16.gmra.mxu1 %vm639_vm0, %v16436_v22  ;;  %v6166_v20 = vmul.f32 %v13362_v50, %v6070_v13  ;;  %v16440_v50 = vld [vmem:[#allocation236_spill] sm:$0xff] }
 0x858   : > { %16433 = vst [vmem:[#allocation86_spill] sm:$0xff] %v13511_v8  ;;  %v5781_v19 = vpop.permute.xlu1 %5780 }
 0x859   : > { %v6078_v4 = vmul.f32 %v5781_v19, %v13279_v57  ;;  %v6336_v43 = vsel %vm891_vm1, %v6166_v20, 0.0  ;;  %v16443_v20 = vld [vmem:[#allocation66_spill] sm:$0xff] }
 0x85b   : > { %v6174_v41 = vmul.f32 %v13395_v63, %v6078_v4  ;;  %v16441_v4 = vpack.c.bf16 %v16439_v52, %v16440_v50  ;;  %v16447_v50 = vld [vmem:[#allocation74_spill] sm:$0xff] }
 0x85c   : > { %v5528_v23 = vpop.f32.mrf.mxu1 }
 0x85d   : > { %v8035_v27 = vpop.eup %8034  ;;  %v6322_v54 = vsel %vm891_vm1, %v6174_v41, 0.0  ;;  %v13526_v59 = vadd.f32 %v5528_v23, %v13075_v25 }
 0x85e   : > { %v13528_v35 = vadd.f32 %v6322_v54, %v6321_v26  ;;  %5855 = vperm.xlu1 %7262, %v8035_v27  }
 0x85f   : > { %8036 = vrcp.f32 %v13526_v59 }
 0x860   : > { %16437 = vst [vmem:[#allocation140_spill] sm:$0xff] %v13528_v35  ;;  %v5786_v57 = vpop.permute.xlu0 %5785 }
 0x861   : > { %v6079_v49 = vmul.f32 %v5786_v57, %v13290_v38  ;;  %v13546_v38 = vperm.slane %v6137_v5, 0  ;;  %v16445_v5 = vld [vmem:[#allocation144_spill] sm:$0xff] }
 0x863   : > { %v6175_v36 = vmul.f32 %v13395_v63, %v6079_v49 }
 0x864   : > { %v5531_v0 = vpop.f32.mrf.mxu1 }
 0x865   : > { %v8037_v51 = vpop.eup %8036  ;;  %v6337_v25 = vsel %vm891_vm1, %v6175_v36, 0.0  ;;  %v13538_v22 = vadd.f32 %v5531_v0, %v13089_v7  ;;  %v16442_v7 = vld [vmem:[#allocation226_spill] sm:$0xff] }
 0x866   : > { %v13540_v19 = vadd.f32 %v6337_v25, %v6336_v43  ;;  %5860 = vperm.xlu1 %7262, %v8037_v51   ;;  %v16444_v36 = vld [vmem:[#allocation162_spill] sm:$0xff] }
 0x867   : > { %7136 = vmatmul.msk.bf16.gmra.mxu1 %vm639_vm0, %v16441_v4  ;;  %v16446_v0 = vpack.c.bf16 %v16444_v36, %v16445_v5 }
 0x868   : > { %16438 = vst [vmem:[#allocation28_spill] sm:$0xff] %v13540_v19  ;;  %v5806_v63 = vpop.permute.xlu2 %5805 }
 0x869   : > { %v6083_v41 = vmul.f32 %v5806_v63, %v13349_v46 }
 0x86b   : > { %v6179_v23 = vmul.f32 %v13546_v38, %v6083_v41  ;;  %v16449_v41 = vld [vmem:[#allocation65_spill] sm:$0xff] }
 0x86c   : > { %v5533_v27 = vpop.f32.mrf.mxu1 }
 0x86d   : > { %v6264_v26 = vsel %vm891_vm1, %v6179_v23, 0.0  ;;  %v13552_v13 = vadd.f32 %v5533_v27, %v16442_v7  ;;  %v16450_v27 = vld [vmem:[#allocation179_spill] sm:$0xff] }
 0x86e   : > { %v13555_v54 = vadd.f32 %v6264_v26, %v13410_v40  ;;  %v16451_v26 = vld [vmem:[#allocation146_spill] sm:$0xff] }
 0x86f   : > { %v16452_v7 = vpack.c.bf16 %v16450_v27, %v16451_v26 }
 0x874   : > { %v5536_v57 = vpop.f32.mrf.mxu1 }
 0x875   : > { %v13558_v49 = vadd.f32 %v5536_v57, %v16443_v20  ;;  %v16453_v20 = vld [vmem:[#allocation251_spill] sm:$0xff] }
 0x877   : > { %7137 = vmatmul.msk.bf16.gmra.mxu1 %vm639_vm0, %v16446_v0 }
 0x878   : > { %v5801_v46 = vpop.permute.xlu0 %5800 }
 0x879   : > { %v6082_v51 = vmul.f32 %v5801_v46, %v13340_v60 }
 0x87b   : > { %v6178_v43 = vmul.f32 %v13546_v38, %v6082_v51 }
 0x87c   : > { %v5538_v25 = vpop.f32.mrf.mxu1 }
 0x87d   : > { %v6249_v52 = vsel %vm891_vm1, %v6178_v43, 0.0  ;;  %v13568_v40 = vadd.f32 %v5538_v25, %v16447_v50  ;;  %v16454_v50 = vld [vmem:[#allocation264_spill] sm:$0xff] }
 0x87e   : > { %v6250_v4 = vadd.f32 %v6249_v52, %v13443_v37 }
 0x87f   : > { %16448 = vst [vmem:[#allocation153_spill] sm:$0xff] %v13568_v40 }
 0x884   : > { %v5541_v63 = vpop.f32.mrf.mxu1 }
 0x885   : > { %v13572_v23 = vadd.f32 %v5541_v63, %v16449_v41  ;;  %v16455_v63 = vld [vmem:[#allocation137_spill] sm:$0xff] }
 0x886   : > { %v16456_v41 = vpack.c.bf16 %v16454_v50, %v16455_v63 }
 0x887   : > { %8038 = vrcp.f32 %v13572_v23  ;;  %7138 = vmatmul.msk.bf16.gmra.mxu1 %vm639_vm0, %v16452_v7 }
 0x88c   : > { %v5543_v60 = vpop.f32.mrf.mxu1 }
 0x88d   : > { %v8039_v57 = vpop.eup %8038  ;;  %v13580_v36 = vadd.f32 %v5543_v60, %v16453_v20  ;;  %v6138_v20 = vrot.slane %v13359_v21, 3 }
 0x88e   : > { %5885 = vperm.xlu2 %7263, %v8039_v57  }
 0x88f   : > { %8040 = vrcp.f32 %v13580_v36 }
 0x890   : > { %v5816_v37 = vpop.permute.xlu0 %5815 }
 0x891   : > { %v6085_v5 = vmul.f32 %v5816_v37, %v13377_v3 }
 0x893   : > { %v6181_v0 = vmul.f32 %v13546_v38, %v6085_v5 }
 0x894   : > { %v5546_v46 = vpop.f32.mrf.mxu1 }
 0x895   : > { %v8041_v51 = vpop.eup %8040  ;;  %v6294_v43 = vsel %vm891_vm1, %v6181_v0, 0.0  ;;  %v13587_v25 = vadd.f32 %v5546_v46, %v13166_v2  ;;  %v16458_v0 = vld [vmem:[#allocation185_spill] sm:$0xff]  ;;  %v16459_v46 = vld [vmem:[#allocation128_spill] sm:$0xff] }
 0x896   : > { %v13590_v52 = vadd.f32 %v6294_v43, %v13495_v39  ;;  %5890 = vperm.xlu0 %7261, %v8041_v51  }
 0x897   : > { %8042 = vrcp.f32 %v13587_v25  ;;  %7139 = vmatmul.msk.bf16.gmra.mxu1 %vm639_vm0, %v16456_v41 }
 0x898   : > { %v5821_v3 = vpop.permute.xlu0 %5820 }
 0x899   : > { %v6086_v27 = vmul.f32 %v5821_v3, %v13392_v33  ;;  %v16461_v3 = vld [vmem:[#allocation69_spill] sm:$0xff] }
 0x89b   : > { %v6182_v26 = vmul.f32 %v13546_v38, %v6086_v27 }
 0x89c   : > { %v5548_v7 = vpop.f32.mrf.mxu1 }
 0x89d   : > { %v8043_v60 = vpop.eup %8042  ;;  %v6309_v2 = vsel %vm891_vm1, %v6182_v26, 0.0  ;;  %v13601_v39 = vadd.f32 %v5548_v7, %v13179_v12  ;;  %v16460_v12 = vpack.c.bf16 %v16458_v0, %v16459_v46  ;;  %v13636_v0 = vpop.permute.xlu1 %5795 }
 0x89e   : > { %v13604_v57 = vadd.f32 %v6309_v2, %v13461_v30  ;;  %5895 = vperm.xlu1 %7262, %v8043_v60   ;;  %v13616_v30 = vperm.slane %v6138_v20, 0  ;;  %v16463_v2 = vld [vmem:[#allocation111_spill] sm:$0xff]  ;;  %v16464_v20 = vld [vmem:[#allocation152_spill] sm:$0xff] }
 0x89f   : > { %8044 = vrcp.f32 %v13601_v39 }
 0x8a0   : > { %16457 = vst [vmem:[#allocation75_spill] sm:$0xff] %v13604_v57 }
 0x8a4   : > { %v5551_v37 = vpop.f32.mrf.mxu1 }
 0x8a5   : > { %v8045_v5 = vpop.eup %8044  ;;  %v13609_v33 = vadd.f32 %v5551_v37, %v13190_v47  ;;  %v16465_v37 = vpack.c.bf16 %v16463_v2, %v16464_v20 }
 0x8a6   : > { %5900 = vperm.xlu2 %7263, %v8045_v5  }
 0x8a7   : > { %8046 = vrcp.f32 %v13609_v33  ;;  %7140 = vmatmul.msk.bf16.gmra.mxu1 %vm639_vm0, %v16460_v12  ;;  %v5811_v12 = vpop.permute.xlu1 %5810 }
 0x8a8   : > { %v5846_v51 = vpop.permute.xlu2 %5845 }
 0x8a9   : > { %v6091_v43 = vmul.f32 %v5846_v51, %v13475_v32  ;;  %v16468_v51 = vld [vmem:[#allocation266_spill] sm:$0xff] }
 0x8ab   : > { %v6187_v50 = vmul.f32 %v13616_v30, %v6091_v43  ;;  %v16469_v43 = vld [vmem:[#allocation154_spill] sm:$0xff] }
 0x8ac   : > { %v5553_v63 = vpop.f32.mrf.mxu1 }
 0x8ad   : > { %v8047_v41 = vpop.eup %8046  ;;  %v6251_v47 = vsel %vm891_vm1, %v6187_v50, 0.0  ;;  %v13622_v27 = vadd.f32 %v5553_v63, %v16461_v3  ;;  %v6084_v50 = vmul.f32 %v5811_v12, %v13371_v28  ;;  %v16472_v12 = vld [vmem:[#allocation116_spill] sm:$0xff] }
 0x8ae   : > { %v13624_v26 = vadd.f32 %v6251_v47, %v6250_v4  ;;  %5905 = vperm.xlu2 %7263, %v8047_v41  }
 0x8af   : > { %16462 = vst [vmem:[#allocation107_spill] sm:$0xff] %v13622_v27  ;;  %v6180_v41 = vmul.f32 %v13546_v38, %v6084_v50 }
 0x8b4   : > { %v5556_v7 = vpop.f32.mrf.mxu1 }
 0x8b5   : > { %v13627_v60 = vadd.f32 %v5556_v7, %v13211_v34  ;;  %v16470_v34 = vpack.c.bf16 %v16468_v51, %v16469_v43 }
 0x8b7   : > { %7141 = vmatmul.msk.bf16.gmra.mxu1 %vm639_vm0, %v16465_v37 }
 0x8bc   : > { %v5558_v32 = vpop.f32.mrf.mxu1 }
 0x8bd   : > { %v13634_v5 = vadd.f32 %v5558_v32, %v13221_v6 }
 0x8bf   : > { %16466 = vst [vmem:[#allocation101_spill] sm:$0xff] %v13634_v5 }
 0x8c4   : > { %v5561_v46 = vpop.f32.mrf.mxu1 }
 0x8c5   : > { %v13639_v4 = vadd.f32 %v5561_v46, %v13232_v1  ;;  %v6279_v1 = vsel %vm891_vm1, %v6180_v41, 0.0  ;;  %v16471_v46 = vld [vmem:[#allocation183_spill] sm:$0xff]  ;;  %v16475_v41 = vld [vmem:[#allocation61_spill] sm:$0xff] }
 0x8c6   : > { %v6280_v2 = vadd.f32 %v6279_v1, %v13477_v58  ;;  %v16473_v51 = vpack.c.bf16 %v16471_v46, %v16472_v12  ;;  %v16477_v46 = vld [vmem:[#allocation45_spill] sm:$0xff] }
 0x8c7   : > { %16467 = vst [vmem:[#allocation92_spill] sm:$0xff] %v13639_v4  ;;  %7142 = vmatmul.msk.bf16.gmra.mxu1 %vm639_vm0, %v16470_v34  ;;  %v16478_v12 = vld [vmem:[#allocation41_spill] sm:$0xff] }
 0x8cc   : > { %v5563_v63 = vpop.f32.mrf.mxu1 }
 0x8cd   : > { %v13648_v6 = vadd.f32 %v5563_v63, %v13245_v61  ;;  %v16474_v63 = vld [vmem:[#allocation186_spill] sm:$0xff] }
 0x8cf   : > { %8048 = vrcp.f32 %v13648_v6 }
 0x8d0   : > { %v5856_v47 = vpop.permute.xlu1 %5855 }
 0x8d1   : > { %v6093_v3 = vmul.f32 %v5856_v47, %v13509_v11 }
 0x8d3   : > { %v6189_v7 = vmul.f32 %v13616_v30, %v6093_v3 }
 0x8d4   : > { %v5566_v20 = vpop.f32.mrf.mxu1 }
 0x8d5   : > { %v8049_v37 = vpop.eup %8048  ;;  %v6281_v28 = vsel %vm891_vm1, %v6189_v7, 0.0  ;;  %v13657_v32 = vadd.f32 %v5566_v20, %v13256_v9  ;;  %v5005_v9 = vadd.f32 %v16475_v41, %v16474_v63  ;;  %v16476_v7 = vld [vmem:[#allocation281_spill] sm:$0xff] }
 0x8d6   : > { %v6282_v61 = vadd.f32 %v6281_v28, %v6280_v2  ;;  %5930 = vperm.xlu1 %7262, %v8049_v37  }
 0x8d7   : > { %8050 = vrcp.f32 %v13657_v32  ;;  %7143 = vmatmul.msk.bf16.gmra.mxu1 %vm639_vm0, %v16473_v51  ;;  %v5194_v2 = vadd.f32 %v16476_v7, %v5005_v9 }
 0x8d8   : > { %v5861_v11 = vpop.permute.xlu1 %5860 }
 0x8d9   : > { %v6094_v43 = vmul.f32 %v5861_v11, %v13526_v59  ;;  %v6376_v59 = vld [vmem:[%s14225_s8 + $0x8] sm:$0xff]  ;;  %v5383_v20 = vadd.f32 %v13276_v16, %v5194_v2  ;;  %v16480_v11 = vld [vmem:[#allocation56_spill] sm:$0xff] }
 0x8da   : > { %6424 = vmatpush.msrb.mxu2 %v6376_v59 }
 0x8db   : > { %v6190_v58 = vmul.f32 %v13616_v30, %v6094_v43 }
 0x8dc   : > { %v5568_v34 = vpop.f32.mrf.mxu1 }
 0x8dd   : > { %v8051_v50 = vpop.eup %8050  ;;  %v6296_v47 = vsel %vm891_vm1, %v6190_v58, 0.0  ;;  %v13670_v1 = vadd.f32 %v5568_v34, %v13266_v53  ;;  %v5007_v53 = vadd.f32 %v16478_v12, %v16477_v46  ;;  %v16482_v58 = vld [vmem:[#allocation145_spill] sm:$0xff]  ;;  %v16487_v12 = vld [vmem:[#allocation212_spill] sm:$0xff] }
 0x8de   : > { %v6297_v3 = vadd.f32 %v6296_v47, %v13590_v52  ;;  %5935 = vperm.xlu2 %7263, %v8051_v50   ;;  %v16479_v52 = vld [vmem:[#allocation284_spill] sm:$0xff]  ;;  %v16483_v50 = vld [vmem:[#allocation103_spill] sm:$0xff]  ;;  %v16486_v46 = vld [vmem:[#allocation189_spill] sm:$0xff] }
 0x8df   : > { %8052 = vrcp.f32 %v13670_v1  ;;  %v16481_v43 = vpack.c.bf16 %v16479_v52, %v16480_v11  ;;  %v5196_v34 = vadd.f32 %v16482_v58, %v5007_v53  ;;  %v16484_v47 = vld [vmem:[#allocation120_spill] sm:$0xff]  ;;  %v16488_v53 = vpack.c.bf16 %v16486_v46, %v16487_v12  ;;  %v16493_v46 = vld [vmem:[#allocation249_spill] sm:$0xff] }
 0x8e0   : > { %v3631_v59 = vsub.f32 %v16484_v47, %v12750_v56  ;;  %v6139_v58 = vrot.slane %v13359_v21, 4  ;;  %v16489_v47 = vld [vmem:[#allocation148_spill] sm:$0xff]  ;;  %v16490_v21 = vld [vmem:[#allocation161_spill] sm:$0xff] }
 0x8e1   : > { %v5385_v63 = vadd.f32 %v16483_v50, %v5196_v34 }
 0x8e2   : > { %v4340_v52 = vmul.f32 1.442695, %v3631_v59  ;;  %v3641_v59 = vsub.f32 %v16489_v47, %v12791_v14 }
 0x8e4   : > { %v5571_v37 = vpop.f32.mrf.mxu1 }
 0x8e5   : > { %v8053_v28 = vpop.eup %8052  ;;  %v13681_v51 = vadd.f32 %v5571_v37, %v5383_v20  ;;  %v16485_v37 = vld [vmem:[#allocation253_spill] sm:$0xff] }
 0x8e6   : > { %5940 = vperm.xlu0 %7261, %v8053_v28   ;;  %v3626_v28 = vsub.f32 %v16485_v37, %v12718_v18  ;;  %v13710_v18 = vperm.slane %v6139_v58, 0 }
 0x8e7   : > { %8054 = vrcp.f32 %v13681_v51  ;;  %7144 = vmatmul.msk.bf16.gmra.mxu1 %vm639_vm0, %v16481_v43 }
 0x8e8   : > { %v13704_v11 = vpop.permute.xlu2 %5885  ;;  %v4330_v43 = vmul.f32 1.442695, %v3626_v28  ;;  %v16492_v28 = vld [vmem:[#allocation286_spill] sm:$0xff] }
 0x8e9   : > { %v3636_v12 = vsub.f32 %v16493_v46, %v16492_v28  ;;  %v16502_v46 = vld [vmem:[#allocation217_spill] sm:$0xff] }
 0x8ec   : > { %v5573_v16 = vpop.f32.mrf.mxu1 }
 0x8ed   : > { %v8055_v41 = vpop.eup %8054  ;;  %v13690_v9 = vadd.f32 %v5573_v16, %v5385_v63 }
 0x8ee   : > { %5945 = vperm.xlu1 %7262, %v8055_v41  }
 0x8ef   : > { %8056 = vrcp.f32 %v13690_v9 }
 0x8f0   : > { %8058 = vpow2.f32 %v4340_v52 }
 0x8f1   : > { %8060 = vpow2.f32 %v4330_v43 }
 0x8f4   : > { %v5576_v7 = vpop.f32.mrf.mxu1 }
 0x8f5   : > { %v8057_v2 = vpop.eup %8056  ;;  %v13696_v20 = vadd.f32 %v5576_v7, %v13300_v24 }
 0x8f6   : > { %5950 = vperm.xlu1 %7262, %v8057_v2   ;;  %v8059_v63 = vpop.eup %8058 }
 0x8f7   : > { %7145 = vmatmul.msk.bf16.gmra.mxu1 %vm639_vm0, %v16488_v53  ;;  %v8061_v41 = vpop.eup %8060 }
 0x8fc   : > { %v5578_v56 = vpop.f32.mrf.mxu1 }
 0x8fd   : > { %v13708_v24 = vadd.f32 %v5578_v56, %v13316_v45  ;;  %v4536_v45 = vpack.c.bf16 %v8059_v63, %v8061_v41  ;;  %v4350_v56 = vmul.f32 1.442695, %v3636_v12  ;;  %v16497_v41 = vld [vmem:[#allocation138_spill] sm:$0xff]  ;;  %v16503_v12 = vld [vmem:[#allocation17_spill] sm:$0xff] }
 0x900   : > { %v5901_v34 = vpop.permute.xlu2 %5900 }
 0x901   : > { %v6102_v50 = vmul.f32 %v5901_v34, %v13601_v39  ;;  %v4360_v39 = vmul.f32 1.442695, %v3641_v59  ;;  %v16495_v34 = vld [vmem:[#allocation109_spill] sm:$0xff]  ;;  %v16500_v59 = vld [vmem:[#allocation255_spill] sm:$0xff] }
 0x903   : > { %v6198_v16 = vmul.f32 %v13710_v18, %v6102_v50  ;;  %8062 = vpow2.f32 %v4360_v39  ;;  %v16496_v50 = vld [vmem:[#allocation130_spill] sm:$0xff]  ;;  %v5022_v39 = vadd.f32 %v16503_v12, %v16502_v46 }
 0x904   : > { %v5581_v7 = vpop.f32.mrf.mxu1  ;;  %8064 = vpow2.f32 %v4350_v56  ;;  %v16504_v56 = vld [vmem:[#allocation62_spill] sm:$0xff] }
 0x905   : > { %v6283_v2 = vsel %vm891_vm1, %v6198_v16, 0.0  ;;  %v13718_v37 = vadd.f32 %v5581_v7, %v16490_v21  ;;  %v5020_v16 = vadd.f32 %v16496_v50, %v16495_v34  ;;  %v16510_v12 = vld [vmem:[#allocation58_spill] sm:$0xff] }
 0x906   : > { %v13722_v53 = vadd.f32 %v6283_v2, %v6282_v61 }
 0x907   : > { %16491 = vst [vmem:[#allocation260_spill] sm:$0xff] %v13718_v37  ;;  %7146 = vmatmul.msk.bf16.gmra.mxu1 %vm639_vm0, %v4536_v45  ;;  %v5209_v7 = vadd.f32 %v16500_v59, %v5020_v16  ;;  %v16506_v16 = vld [vmem:[#allocation131_spill] sm:$0xff] }
 0x908   : > { %16494 = vst [vmem:[#allocation115_spill] sm:$0xff] %v13722_v53  ;;  %v5906_v52 = vpop.permute.xlu2 %5905 }
 0x909   : > { %v6103_v43 = vmul.f32 %v5906_v52, %v13609_v33  ;;  %v8063_v2 = vpop.eup %8062  ;;  %v16501_v33 = vld [vmem:[#allocation110_spill] sm:$0xff] }
 0x90a   : > { %v5398_v21 = vadd.f32 %v16501_v33, %v5209_v7  ;;  %v8065_v45 = vpop.eup %8064  ;;  %v16508_v7 = vld [vmem:[#allocation36_spill] sm:$0xff]  ;;  %v16509_v33 = vld [vmem:[#allocation98_spill] sm:$0xff] }
 0x90b   : > { %v6199_v14 = vmul.f32 %v13710_v18, %v6103_v43  ;;  %v4541_v43 = vpack.c.bf16 %v8063_v2, %v8065_v45 }
 0x90c   : > { %v5583_v58 = vpop.f32.mrf.mxu1 }
 0x90d   : > { %v6298_v63 = vsel %vm891_vm1, %v6199_v14, 0.0  ;;  %v13731_v47 = vadd.f32 %v5583_v58, %v16497_v41  ;;  %v16505_v14 = vld [vmem:[#allocation237_spill] sm:$0xff] }
 0x90e   : > { %v13733_v61 = vadd.f32 %v6298_v63, %v6297_v3  ;;  %v5211_v3 = vadd.f32 %v16504_v56, %v5022_v39  ;;  %v16507_v63 = vld [vmem:[#allocation228_spill] sm:$0xff]  ;;  %v16511_v39 = vld [vmem:[#allocation166_spill] sm:$0xff] }
 0x90f   : > { %16498 = vst [vmem:[#allocation46_spill] sm:$0xff] %v13731_v47  ;;  %v5025_v41 = vadd.f32 %v16507_v63, %v16506_v16 }
 0x910   : > { %16499 = vst [vmem:[#allocation50_spill] sm:$0xff] %v13733_v61  ;;  %v5400_v58 = vadd.f32 %v16505_v14, %v5211_v3  ;;  %v16512_v3 = vld [vmem:[#allocation289_spill] sm:$0xff] }
 0x911   : > { %v5214_v2 = vadd.f32 %v16508_v7, %v5025_v41  ;;  %v16514_v41 = vld [vmem:[#allocation93_spill] sm:$0xff]  ;;  %v16515_v7 = vld [vmem:[#allocation32_spill] sm:$0xff] }
 0x914   : > { %v5586_v28 = vpop.f32.mrf.mxu1 }
 0x915   : > { %v13739_v52 = vadd.f32 %v5586_v28, %v5398_v21  ;;  %v5403_v21 = vadd.f32 %v16509_v33, %v5214_v2  ;;  %v5030_v2 = vadd.f32 %v16515_v7, %v16514_v41  ;;  %v5419_v41 = vpop.f32.mrf.mxu0 }
 0x917   : > { %8066 = vrcp.f32 %v13739_v52  ;;  %7147 = vmatmul.msk.bf16.gmra.mxu1 %vm639_vm0, %v4541_v43  ;;  %v5027_v43 = vadd.f32 %v16511_v39, %v16510_v12 }
 0x918   : > { %8068 = vrcp.f32 %v13408_v17  ;;  %v16524_v17 = vld [vmem:[#allocation49_spill] sm:$0xff] }
 0x919   : > { %v5216_v14 = vadd.f32 %v16512_v3, %v5027_v43 }
 0x91c   : > { %v5588_v34 = vpop.f32.mrf.mxu1 }
 0x91d   : > { %v8067_v50 = vpop.eup %8066  ;;  %v13747_v59 = vadd.f32 %v5588_v34, %v5400_v58  ;;  %v16513_v58 = vld [vmem:[#allocation173_spill] sm:$0xff] }
 0x91e   : > { %5975 = vperm.xlu0 %7261, %v8067_v50   ;;  %v8069_v45 = vpop.eup %8068  ;;  %v5405_v34 = vadd.f32 %v16513_v58, %v5216_v14 }
 0x91f   : > { %8070 = vrcp.f32 %v13747_v59 }
 0x920   : > { %8072 = vrcp.f32 %v13427_v48  ;;  %v16522_v48 = vld [vmem:[#allocation52_spill] sm:$0xff] }
 0x924   : > { %v5591_v28 = vpop.f32.mrf.mxu1 }
 0x925   : > { %v8071_v46 = vpop.eup %8070  ;;  %v13755_v56 = vadd.f32 %v5591_v28, %v5403_v21  ;;  %v16516_v21 = vld [vmem:[#allocation14_spill] sm:$0xff] }
 0x926   : > { %5980 = vperm.xlu1 %7262, %v8071_v46   ;;  %5825 = vperm.xlu0 %7261, %v8069_v45   ;;  %v8073_v50 = vpop.eup %8072  ;;  %v5219_v45 = vadd.f32 %v16516_v21, %v5030_v2  ;;  %v16517_v28 = vld [vmem:[#allocation34_spill] sm:$0xff] }
 0x927   : > { %8074 = vrcp.f32 %v13755_v56 }
 0x928   : > { %8076 = vrcp.f32 %v13441_v29  ;;  %v5408_v46 = vadd.f32 %v16517_v28, %v5219_v45  ;;  %v5422_v28 = vpop.f32.mrf.mxu0 }
 0x92c   : > { %v5593_v16 = vpop.f32.mrf.mxu1 }
 0x92d   : > { %v8075_v63 = vpop.eup %8074  ;;  %v13763_v33 = vadd.f32 %v5593_v16, %v5405_v34  ;;  %v5041_v34 = vpop.f32.mrf.mxu2 }
 0x92e   : > { %5985 = vperm.xlu2 %7263, %v8075_v63   ;;  %5830 = vperm.xlu0 %7261, %v8073_v50   ;;  %v8077_v12 = vpop.eup %8076  ;;  %v5230_v63 = vpop.f32.mrf.mxu3 }
 0x92f   : > { %8078 = vrcp.f32 %v13763_v33 }
 0x934   : > { %v5596_v39 = vpop.f32.mrf.mxu1 }
 0x935   : > { %v8079_v43 = vpop.eup %8078  ;;  %v13769_v3 = vadd.f32 %v5596_v39, %v5408_v46  ;;  %v5044_v7 = vpop.f32.mrf.mxu2 }
 0x936   : > { %5990 = vperm.xlu2 %7263, %v8079_v43   ;;  %5835 = vperm.xlu0 %7261, %v8077_v12   ;;  %v5233_v45 = vpop.f32.mrf.mxu3  ;;  %v16520_v12 = vld [vmem:[#allocation95_spill] sm:$0xff]  ;;  %v5045_v57 = vadd.f32 %v5044_v7, %v16522_v48 }
 0x937   : > { %16518 = vst [vmem:[#allocation127_spill] sm:$0xff] %v13769_v3  ;;  %8080 = vrcp.f32 %v13769_v3  ;;  %v5042_v39 = vadd.f32 %v5041_v34, %v16520_v12 }
 0x938   : > { %8082 = vrcp.f32 %v13622_v27  ;;  %v16523_v27 = vld [vmem:[#allocation201_spill] sm:$0xff] }
 0x939   : > { %v5231_v8 = vadd.f32 %v5230_v63, %v5042_v39  ;;  %v5032_v34 = vadd.f32 %v16524_v17, %v16523_v27  ;;  %v16525_v63 = vld [vmem:[#allocation147_spill] sm:$0xff] }
 0x93b   : > { %v5420_v19 = vadd.f32 %v5419_v41, %v5231_v8  ;;  %v16526_v41 = vld [vmem:[#allocation97_spill] sm:$0xff] }
 0x93c   : > { %v5598_v14 = vpop.f32.mrf.mxu1  ;;  %v5221_v3 = vadd.f32 %v16526_v41, %v5032_v34 }
 0x93d   : > { %v8081_v58 = vpop.eup %8080 }
 0x93e   : > { %5995 = vperm.xlu2 %7263, %v8081_v58   ;;  %v8083_v16 = vpop.eup %8082  ;;  %v5046_v58 = vpop.f32.mrf.mxu2 }
 0x93f   : > { %v5235_v29 = vpop.f32.mrf.mxu3  ;;  %v5047_v39 = vadd.f32 %v5046_v58, %v16525_v63  ;;  %v16527_v58 = vld [vmem:[#allocation164_spill] sm:$0xff] }
 0x944   : > { %v13773_v50 = vpop.f32.mrf.mxu1 }
 0x946   : > { %5910 = vperm.xlu2 %7263, %v8083_v16   ;;  %v5424_v16 = vpop.f32.mrf.mxu0 }
 0x947   : > { %v5238_v53 = vpop.f32.mrf.mxu3 }
 0x94c   : > { %v5603_v2 = vpop.f32.mrf.mxu1 }
 0x94d   : > { %v13776_v21 = vadd.f32 %v5603_v2, %v13468_v31  ;;  %v5049_v31 = vpop.f32.mrf.mxu2  ;;  %v5234_v2 = vadd.f32 %v5233_v45, %v5045_v57 }
 0x94e   : > { %v5427_v48 = vpop.f32.mrf.mxu0 }
 0x94f   : > { %16519 = vst [vmem:[#allocation15_spill] sm:$0xff] %v13776_v21  ;;  %v5423_v12 = vadd.f32 %v5422_v28, %v5234_v2  ;;  %v5050_v2 = vadd.f32 %v5049_v31, %v16527_v58 }
 0x954   : > { %v5606_v46 = vpop.f32.mrf.mxu1 }
 0x955   : > { %v13780_v43 = vadd.f32 %v5606_v46, %v13488_v10  ;;  %v5051_v17 = vpop.f32.mrf.mxu2 }
 0x957   : > { %16521 = vst [vmem:[#allocation39_spill] sm:$0xff] %v13780_v43 }
 0x95c   : > { %v5608_v35 = vpop.f32.mrf.mxu1 }
 0x95d   : > { %v13783_v61 = vadd.f32 %v5608_v35, %v5420_v19  ;;  %v5410_v35 = vadd.f32 %v13433_v15, %v5221_v3  ;;  %v5236_v19 = vadd.f32 %v5235_v29, %v5047_v39  ;;  %v6375_v15 = vld [vmem:[%s14225_s8] sm:$0xff]  ;;  %v5429_v29 = vpop.f32.mrf.mxu0  ;;  %v5239_v3 = vadd.f32 %v5238_v53, %v5050_v2  ;;  %v5054_v39 = vpop.f32.mrf.mxu2 }
 0x95e   : > { %6425 = vmatpush.msrb.mxu2 %v6375_v15 }
 0x95f   : > { %8084 = vrcp.f32 %v13783_v61  ;;  %v13795_v57 = vadd.f32 %v5598_v14, %v5410_v35  ;;  %v5425_v27 = vadd.f32 %v5424_v16, %v5236_v19  ;;  %v16528_v14 = vld [vmem:[#allocation118_spill] sm:$0xff]  ;;  %v16529_v16 = vld [vmem:[#allocation256_spill] sm:$0xff] }
 0x960   : > { %8086 = vrcp.f32 %v13538_v22  ;;  %v5035_v31 = vadd.f32 %v16529_v16, %v16528_v14  ;;  %v16530_v19 = vld [vmem:[#allocation30_spill] sm:$0xff] }
 0x964   : > { %v5611_v10 = vpop.f32.mrf.mxu1 }
 0x965   : > { %v8085_v46 = vpop.eup %8084  ;;  %v13789_v8 = vadd.f32 %v5611_v10, %v5423_v12  ;;  %v5240_v12 = vpop.f32.mrf.mxu3 }
 0x966   : > { %6020 = vperm.xlu1 %7262, %v8085_v46   ;;  %v8087_v7 = vpop.eup %8086  ;;  %v5428_v46 = vadd.f32 %v5427_v48, %v5239_v3  ;;  %v5432_v2 = vpop.f32.mrf.mxu0 }
 0x967   : > { %8088 = vrcp.f32 %v13789_v8 }
 0x968   : > { %8090 = vrcp.f32 %v13696_v20 }
 0x969   : > { %8092 = vrcp.f32 %v13795_v57 }
 0x96c   : > { %v5613_v45 = vpop.f32.mrf.mxu1 }
 0x96d   : > { %v8089_v28 = vpop.eup %8088  ;;  %v13799_v34 = vadd.f32 %v5613_v45, %v5425_v27  ;;  %v5052_v27 = vadd.f32 %v5051_v17, %v16530_v19  ;;  %v16531_v45 = vld [vmem:[#allocation134_spill] sm:$0xff]  ;;  %v5243_v48 = vpop.f32.mrf.mxu3 }
 0x96e   : > { %6025 = vperm.xlu2 %7263, %v8089_v28   ;;  %5865 = vperm.xlu1 %7262, %v8087_v7   ;;  %v8091_v10 = vpop.eup %8090  ;;  %v5224_v28 = vadd.f32 %v16531_v45, %v5035_v31  ;;  %v5434_v19 = vpop.f32.mrf.mxu0  ;;  %v16533_v45 = vld [vmem:[#allocation126_spill] sm:$0xff] }
 0x96f   : > { %8094 = vrcp.f32 %v13799_v34  ;;  %v8093_v63 = vpop.eup %8092  ;;  %v5241_v58 = vadd.f32 %v5240_v12, %v5052_v27 }
 0x970   : > { %8096 = vrcp.f32 %v13552_v13  ;;  %v5413_v53 = vadd.f32 %v13451_v62, %v5224_v28 }
 0x971   : > { %8098 = vrcp.f32 %v13627_v60  ;;  %v5430_v3 = vadd.f32 %v5429_v29, %v5241_v58 }
 0x972   : > { %v13817_v17 = vadd.f32 %v13773_v50, %v5413_v53 }
 0x974   : > { %v5616_v41 = vpop.f32.mrf.mxu1 }
 0x975   : > { %v8095_v35 = vpop.eup %8094  ;;  %v13810_v7 = vadd.f32 %v5616_v41, %v5428_v46  ;;  %v16532_v46 = vld [vmem:[#allocation285_spill] sm:$0xff]  ;;  %v5245_v12 = vpop.f32.mrf.mxu3 }
 0x976   : > { %6000 = vperm.xlu2 %7263, %v8093_v63   ;;  %5955 = vperm.xlu1 %7262, %v8091_v10   ;;  %v8097_v15 = vpop.eup %8096  ;;  %v5055_v41 = vadd.f32 %v5054_v39, %v16532_v46  ;;  %v5056_v63 = vpop.f32.mrf.mxu2 }
 0x977   : > { %8100 = vrcp.f32 %v13810_v7  ;;  %6030 = vperm.xlu0 %7261, %v8095_v35   ;;  %v8099_v14 = vpop.eup %8098  ;;  %v5057_v28 = vadd.f32 %v5056_v63, %v16533_v45  ;;  %v16536_v45 = vld [vmem:[#allocation207_spill] sm:$0xff] }
 0x978   : > { %8102 = vrcp.f32 %v13708_v24  ;;  %v5244_v62 = vadd.f32 %v5243_v48, %v5055_v41 }
 0x979   : > { %8104 = vrcp.f32 %v13817_v17  ;;  %v5246_v58 = vadd.f32 %v5245_v12, %v5057_v28 }
 0x97a   : > { %v5433_v29 = vadd.f32 %v5432_v2, %v5244_v62  ;;  %v5437_v62 = vpop.f32.mrf.mxu0 }
 0x97c   : > { %v5618_v16 = vpop.f32.mrf.mxu1 }
 0x97d   : > { %v8101_v31 = vpop.eup %8100  ;;  %v13821_v10 = vadd.f32 %v5618_v16, %v5430_v3  ;;  %v5248_v63 = vpop.f32.mrf.mxu3 }
 0x97e   : > { %5915 = vperm.xlu2 %7263, %v8099_v14   ;;  %5870 = vperm.xlu1 %7262, %v8097_v15   ;;  %v8103_v50 = vpop.eup %8102  ;;  %v5059_v48 = vpop.f32.mrf.mxu2  ;;  %v5435_v15 = vadd.f32 %v5434_v19, %v5246_v58 }
 0x97f   : > { %8106 = vrcp.f32 %v13821_v10  ;;  %6035 = vperm.xlu0 %7261, %v8101_v31   ;;  %v8105_v35 = vpop.eup %8104  ;;  %v16534_v31 = vld [vmem:[#allocation259_spill] sm:$0xff] }
 0x980   : > { %8108 = vrcp.f32 %v13558_v49  ;;  %v5060_v46 = vadd.f32 %v5059_v48, %v16534_v31 }
 0x981   : > { %8110 = vrcp.f32 %v13634_v5 }
 0x984   : > { %v5621_v27 = vpop.f32.mrf.mxu1 }
 0x985   : > { %v8107_v39 = vpop.eup %8106  ;;  %v13827_v53 = vadd.f32 %v5621_v27, %v5433_v29  ;;  %v5250_v58 = vpop.f32.mrf.mxu3 }
 0x986   : > { %6005 = vperm.xlu2 %7263, %v8105_v35   ;;  %5960 = vperm.xlu1 %7262, %v8103_v50   ;;  %v8109_v2 = vpop.eup %8108  ;;  %v5249_v50 = vadd.f32 %v5248_v63, %v5060_v46  ;;  %v5061_v12 = vpop.f32.mrf.mxu2 }
 0x987   : > { %8112 = vrcp.f32 %v13827_v53  ;;  %6040 = vperm.xlu0 %7261, %v8107_v39   ;;  %v8111_v3 = vpop.eup %8110  ;;  %v5062_v28 = vadd.f32 %v5061_v12, %v16536_v45 }
 0x988   : > { %8114 = vrcp.f32 %v13718_v37  ;;  %v5438_v35 = vadd.f32 %v5437_v62, %v5249_v50  ;;  %v5936_v62 = vpop.permute.xlu2 %5935  ;;  %v5841_v50 = vpop.permute.xlu0 %5840 }
 0x989   : > { %8116 = vrcp.f32 %v13776_v21 }
 0x98c   : > { %v5623_v14 = vpop.f32.mrf.mxu1 }
 0x98d   : > { %v8113_v16 = vpop.eup %8112  ;;  %v13833_v41 = vadd.f32 %v5623_v14, %v5435_v15  ;;  %v5251_v15 = vadd.f32 %v5250_v58, %v5062_v28 }
 0x98e   : > { %5920 = vperm.xlu2 %7263, %v8111_v3   ;;  %5875 = vperm.xlu1 %7262, %v8109_v2   ;;  %v8115_v29 = vpop.eup %8114  ;;  %v5439_v2 = vpop.f32.mrf.mxu0 }
 0x98f   : > { %16535 = vst [vmem:[#allocation26_spill] sm:$0xff] %v13833_v41  ;;  %8118 = vrcp.f32 %v13833_v41  ;;  %6045 = vperm.xlu0 %7261, %v8113_v16   ;;  %v8117_v19 = vpop.eup %8116  ;;  %v5440_v14 = vadd.f32 %v5439_v2, %v5251_v15 }
 0x990   : > { %8120 = vrcp.f32 %v13568_v40 }
 0x991   : > { %8122 = vrcp.f32 %v13639_v4 }
 0x994   : > { %v5626_v27 = vpop.f32.mrf.mxu1 }
 0x995   : > { %v8119_v39 = vpop.eup %8118  ;;  %v13839_v48 = vadd.f32 %v5626_v27, %v5438_v35  ;;  %v5851_v27 = vpop.permute.xlu0 %5850 }
 0x996   : > { %6010 = vperm.xlu2 %7263, %v8117_v19   ;;  %5965 = vperm.xlu1 %7262, %v8115_v29   ;;  %v8121_v3 = vpop.eup %8120  ;;  %v13848_v19 = vpop.permute.xlu2 %5985 }
 0x997   : > { %16537 = vst [vmem:[#allocation169_spill] sm:$0xff] %v13839_v48  ;;  %8124 = vrcp.f32 %v13839_v48  ;;  %6050 = vperm.xlu0 %7261, %v8119_v39   ;;  %v8123_v16 = vpop.eup %8122  ;;  %v5896_v39 = vpop.permute.xlu1 %5895 }
 0x998   : > { %8126 = vrcp.f32 %v13731_v47  ;;  %v8187_v47 = vld [vmem:[%s14220_s3] sm:$0xff] }
 0x999   : > { %v6141_v21 = vrot.slane %v8187_v47, 6 }
 0x99c   : > { %v5628_v31 = vpop.f32.mrf.mxu1 }
 0x99d   : > { %v8125_v46 = vpop.eup %8124  ;;  %v13843_v63 = vadd.f32 %v5628_v31, %v5440_v14  ;;  %v5891_v45 = vpop.permute.xlu0 %5890 }
 0x99e   : > { %5925 = vperm.xlu2 %7263, %v8123_v16   ;;  %5880 = vperm.xlu1 %7262, %v8121_v3   ;;  %v8127_v12 = vpop.eup %8126  ;;  %v13850_v28 = vpop.permute.xlu2 %5990  ;;  %v6100_v41 = vmul.f32 %v5891_v45, %v13580_v36 }
 0x99f   : > { %16538 = vst [vmem:[#allocation94_spill] sm:$0xff] %v13843_v63  ;;  %8128 = vrcp.f32 %v13843_v63  ;;  %6055 = vperm.xlu0 %7261, %v8125_v46   ;;  %v5931_v58 = vpop.permute.xlu1 %5930  ;;  %v16539_v46 = vld [vmem:[#allocation59_spill] sm:$0xff]  ;;  %v6140_v63 = vrot.slane %v8187_v47, 5 }
 0x9a0   : > { %8130 = vrcp.f32 %v13780_v43  ;;  %v6099_v43 = vmul.f32 %v13704_v11, %v13572_v23  ;;  %v6108_v40 = vmul.f32 %v5931_v58, %v13648_v6  ;;  %v6109_v58 = vmul.f32 %v5936_v62, %v13657_v32 }
 0x9a5   : > { %v8129_v29 = vpop.eup %8128  ;;  %v5941_v2 = vpop.permute.xlu0 %5940 }
 0x9a6   : > { %v8131_v35 = vpop.eup %8130  ;;  %5970 = vperm.xlu1 %7262, %v8127_v12   ;;  %6060 = vperm.xlu2 %7263, %v8129_v29   ;;  %v13854_v3 = vpop.permute.xlu2 %5995  ;;  %v6081_v12 = vmul.f32 %v13636_v0, %v16539_v46  ;;  %v6090_v29 = vmul.f32 %v5841_v50, %v13459_v55  ;;  %v6195_v50 = vmul.f32 %v13710_v18, %v6099_v43 }
 0x9a7   : > { %6015 = vperm.xlu0 %7261, %v8131_v35   ;;  %v13852_v15 = vpop.permute.xlu1 %5945 }
 0x9a8   : > { %v6177_v35 = vmul.f32 %v13546_v38, %v6081_v12  ;;  %v6186_v48 = vmul.f32 %v13616_v30, %v6090_v29  ;;  %v13875_v12 = vperm.slane %v6140_v63, 0  ;;  %v13881_v29 = vperm.slane %v6141_v21, 0 }
 0x9a9   : > { %v6142_v63 = vrot.slane %v8187_v47, 7 }
 0x9aa   : > { %v6234_v55 = vsel %vm891_vm1, %v6177_v35, 0.0  ;;  %v6236_v11 = vsel %vm891_vm1, %v6186_v48, 0.0  ;;  %v6204_v37 = vmul.f32 %v13875_v12, %v6108_v40  ;;  %v6238_v35 = vsel %vm891_vm1, %v6195_v50, 0.0 }
 0x9ab   : > { %v6235_v6 = vadd.f32 %v6234_v55, %v13429_v42  ;;  %v6205_v21 = vmul.f32 %v13875_v12, %v6109_v58  ;;  %v13894_v62 = vperm.slane %v6142_v63, 0  ;;  %v6110_v63 = vmul.f32 %v5941_v2, %v13670_v1 }
 0x9ac   : > { %v6240_v48 = vsel %vm891_vm1, %v6204_v37, 0.0 }
 0x9ad   : > { %v5976_v14 = vpop.permute.xlu0 %5975  ;;  %v6237_v5 = vadd.f32 %v6236_v11, %v6235_v6 }
 0x9ae   : > { %v13858_v31 = vpop.permute.xlu2 %5910  ;;  %v6117_v23 = vmul.f32 %v5976_v14, %v13739_v52  ;;  %v6196_v52 = vmul.f32 %v13710_v18, %v6100_v41 }
 0x9af   : > { %v13856_v16 = vpop.permute.xlu1 %5950  ;;  %v6239_v40 = vadd.f32 %v6238_v35, %v6237_v5 }
 0x9b0   : > { %v6213_v43 = vmul.f32 %v13881_v29, %v6117_v23  ;;  %v6253_v37 = vsel %vm891_vm1, %v6196_v52, 0.0  ;;  %v6255_v23 = vsel %vm891_vm1, %v6205_v21, 0.0  ;;  %v6206_v21 = vmul.f32 %v13875_v12, %v6110_v63 }
 0x9b1   : > { %v6241_v55 = vadd.f32 %v6240_v48, %v6239_v40 }
 0x9b2   : > { %v6242_v32 = vsel %vm891_vm1, %v6213_v43, 0.0 }
 0x9b3   : > { %v6243_v50 = vadd.f32 %v6242_v32, %v6241_v55  ;;  %v16541_v55 = vld [vmem:[#allocation25_spill] sm:$0xff] }
 0x9b5   : > { %v13869_v4 = vpop.permute.xlu0 %5825 }
 0x9b7   : > { %v5981_v0 = vpop.permute.xlu1 %5980 }
 0x9b8   : > { %v6118_v36 = vmul.f32 %v5981_v0, %v13747_v59  ;;  %v6092_v0 = vmul.f32 %v5851_v27, %v13493_v44  ;;  %v16540_v44 = vld [vmem:[#allocation27_spill] sm:$0xff] }
 0x9ba   : > { %v6214_v59 = vmul.f32 %v13881_v29, %v6118_v36  ;;  %v6188_v35 = vmul.f32 %v13616_v30, %v6092_v0 }
 0x9bc   : > { %v6257_v58 = vsel %vm891_vm1, %v6214_v59, 0.0 }
 0x9bd   : > { %v13890_v45 = vpop.permute.xlu0 %5830 }
 0x9c5   : > { %v13913_v48 = vpop.permute.xlu0 %5835 }
 0x9c8   : > { %v6026_v46 = vpop.permute.xlu2 %6025 }
 0x9c9   : > { %v6127_v14 = vmul.f32 %v6026_v46, %v13789_v8  ;;  %v6101_v46 = vmul.f32 %v5896_v39, %v13587_v25  ;;  %v6119_v25 = vmul.f32 %v13848_v19, %v13755_v56  ;;  %v6266_v39 = vsel %vm891_vm1, %v6188_v35, 0.0 }
 0x9ca   : > { %v6111_v56 = vmul.f32 %v13852_v15, %v13681_v51 }
 0x9cb   : > { %v6223_v11 = vmul.f32 %v13894_v62, %v6127_v14  ;;  %v6197_v40 = vmul.f32 %v13710_v18, %v6101_v46  ;;  %v6215_v32 = vmul.f32 %v13881_v29, %v6119_v25  ;;  %v6267_v14 = vadd.f32 %v6266_v39, %v13555_v54  ;;  %v16544_v25 = vld [vmem:[#allocation115_spill] sm:$0xff] }
 0x9cd   : > { %v6259_v36 = vsel %vm891_vm1, %v6223_v11, 0.0  ;;  %v6272_v0 = vsel %vm891_vm1, %v6215_v32, 0.0  ;;  %v6207_v11 = vmul.f32 %v13875_v12, %v6111_v56 }
 0x9d0   : > { %v13898_v41 = vpop.permute.xlu2 %6000 }
 0x9d8   : > { %v6021_v42 = vpop.permute.xlu1 %6020  ;;  %v13922_v2 = vpop.permute.xlu2 %5915 }
 0x9d9   : > { %v6126_v47 = vmul.f32 %v6021_v42, %v13783_v61  ;;  %v6254_v61 = vadd.f32 %v6253_v37, %v13624_v26  ;;  %v6268_v42 = vsel %vm891_vm1, %v6197_v40, 0.0 }
 0x9da   : > { %v6269_v59 = vadd.f32 %v6268_v42, %v6267_v14 }
 0x9db   : > { %v6222_v5 = vmul.f32 %v13894_v62, %v6126_v47  ;;  %v6256_v43 = vadd.f32 %v6255_v23, %v6254_v61  ;;  %v6270_v47 = vsel %vm891_vm1, %v6206_v21, 0.0 }
 0x9dc   : > { %v6271_v54 = vadd.f32 %v6270_v47, %v6269_v59 }
 0x9dd   : > { %v6244_v8 = vsel %vm891_vm1, %v6222_v5, 0.0  ;;  %v6258_v26 = vadd.f32 %v6257_v58, %v6256_v43  ;;  %v6285_v58 = vsel %vm891_vm1, %v6207_v11, 0.0  ;;  %v16542_v43 = vld [vmem:[#allocation19_spill] sm:$0xff] }
 0x9de   : > { %v6245_v6 = vadd.f32 %v6244_v8, %v6243_v50  ;;  %v6120_v50 = vmul.f32 %v13850_v28, %v13763_v33  ;;  %v6273_v51 = vadd.f32 %v6272_v0, %v6271_v54  ;;  %v6112_v33 = vmul.f32 %v13856_v16, %v13690_v9  ;;  %v16547_v0 = vld [vmem:[#allocation22_spill] sm:$0xff] }
 0x9df   : > { %v6260_v1 = vadd.f32 %v6259_v36, %v6258_v26  ;;  %v6286_v26 = vadd.f32 %v6285_v58, %v16544_v25  ;;  %v16548_v54 = vld [vmem:[#allocation50_spill] sm:$0xff] }
 0x9e0   : > { %v6366_v27 = vadd.f32 %v6245_v6, %v16540_v44  ;;  %v5866_v52 = vpop.permute.xlu1 %5865  ;;  %v6216_v15 = vmul.f32 %v13881_v29, %v6120_v50  ;;  %v13939_v61 = vpop.permute.xlu2 %6005  ;;  %v6208_v39 = vmul.f32 %v13875_v12, %v6112_v33 }
 0x9e1   : > { %v6367_v37 = vadd.f32 %v6260_v1, %v16541_v55  ;;  %v16546_v1 = vld [vmem:[#allocation107_spill] sm:$0xff] }
 0x9e2   : > { %7148 = vmatmul.msk.f32.vlgmr.msrb.gmra.mxu2 %vm891_vm1, %v6366_v27  ;;  %v6287_v44 = vsel %vm891_vm1, %v6216_v15, 0.0  ;;  %v16543_v27 = vld [vmem:[#allocation127_spill] sm:$0xff]  ;;  %v6104_v42 = vmul.f32 %v13858_v31, %v16546_v1  ;;  %v6300_v47 = vsel %vm891_vm1, %v6208_v39, 0.0  ;;  %v16552_v39 = vld [vmem:[#allocation20_spill] sm:$0xff] }
 0x9e3   : > { %v6121_v36 = vmul.f32 %v13854_v3, %v16543_v27  ;;  %v6288_v16 = vadd.f32 %v6287_v44, %v6286_v26  ;;  %v6301_v11 = vadd.f32 %v6300_v47, %v16548_v54  ;;  %v16551_v44 = vld [vmem:[#allocation140_spill] sm:$0xff]  ;;  %v16553_v47 = vld [vmem:[#allocation101_spill] sm:$0xff] }
 0x9e4   : > { %v16556_v54 = vld [vmem:[#allocation13_spill] sm:$0xff] }
 0x9e5   : > { %v6217_v3 = vmul.f32 %v13881_v29, %v6121_v36 }
 0x9e8   : > { %v5956_v19 = vpop.permute.xlu1 %5955  ;;  %v5921_v55 = vpop.permute.xlu2 %5920 }
 0x9e9   : > { %v6031_v5 = vpop.permute.xlu0 %6030 }
 0x9ea   : > { %v6128_v23 = vmul.f32 %v6031_v5, %v13799_v34  ;;  %7149 = vmatmul.msk.f32.gmra.mxu2 %vm891_vm1, %v6367_v37  ;;  %v6095_v34 = vmul.f32 %v5866_v52, %v13538_v22  ;;  %v16545_v52 = vld [vmem:[#allocation23_spill] sm:$0xff]  ;;  %v6200_v5 = vmul.f32 %v13710_v18, %v6104_v42  ;;  %v6123_v42 = vmul.f32 %v13939_v61, %v13817_v17 }
 0x9eb   : > { %v6087_v21 = vmul.f32 %v13869_v4, %v16545_v52 }
 0x9ec   : > { %v6224_v8 = vmul.f32 %v13894_v62, %v6128_v23  ;;  %v6191_v9 = vmul.f32 %v13616_v30, %v6095_v34  ;;  %v6313_v33 = vsel %vm891_vm1, %v6200_v5, 0.0  ;;  %v16550_v34 = vld [vmem:[#allocation267_spill] sm:$0xff]  ;;  %v6219_v5 = vmul.f32 %v13881_v29, %v6123_v42 }
 0x9ed   : > { %v6183_v4 = vmul.f32 %v13546_v38, %v6087_v21 }
 0x9ee   : > { %v6274_v46 = vsel %vm891_vm1, %v6224_v8, 0.0  ;;  %v6311_v56 = vsel %vm891_vm1, %v6191_v9, 0.0  ;;  %v16549_v8 = vld [vmem:[#allocation75_spill] sm:$0xff] }
 0x9ef   : > { %v6275_v6 = vadd.f32 %v6274_v46, %v6273_v51  ;;  %v6312_v51 = vadd.f32 %v6311_v56, %v16549_v8  ;;  %v6324_v58 = vsel %vm891_vm1, %v6183_v4, 0.0  ;;  %v6106_v56 = vmul.f32 %v5921_v55, %v16553_v47  ;;  %v16557_v8 = vld [vmem:[#allocation26_spill] sm:$0xff] }
 0x9f0   : > { %v5871_v28 = vpop.permute.xlu1 %5870  ;;  %v6325_v27 = vadd.f32 %v6324_v58, %v16551_v44  ;;  %v6332_v58 = vsel %vm891_vm1, %v6219_v5, 0.0 }
 0x9f1   : > { %v6036_v35 = vpop.permute.xlu0 %6035  ;;  %v6368_v63 = vadd.f32 %v6275_v6, %v16542_v43  ;;  %v6096_v37 = vmul.f32 %v5871_v28, %v13552_v13  ;;  %v6122_v13 = vmul.f32 %v13898_v41, %v13795_v57  ;;  %v6105_v28 = vmul.f32 %v13922_v2, %v13627_v60 }
 0x9f2   : > { %v6129_v40 = vmul.f32 %v6036_v35, %v13810_v7  ;;  %v6113_v7 = vmul.f32 %v5956_v19, %v13696_v20  ;;  %v6302_v20 = vsel %vm891_vm1, %v6217_v3, 0.0  ;;  %v6314_v41 = vadd.f32 %v6313_v33, %v6312_v51  ;;  %v16559_v33 = vld [vmem:[#allocation15_spill] sm:$0xff] }
 0x9f3   : > { %7150 = vmatmul.msk.f32.gmra.mxu2 %vm891_vm1, %v6368_v63  ;;  %v6192_v15 = vmul.f32 %v13616_v30, %v6096_v37  ;;  %v6303_v6 = vadd.f32 %v6302_v20, %v6301_v11  ;;  %v6218_v36 = vmul.f32 %v13881_v29, %v6122_v13  ;;  %v16555_v20 = vld [vmem:[#allocation260_spill] sm:$0xff]  ;;  %v6202_v55 = vmul.f32 %v13710_v18, %v6106_v56  ;;  %v16558_v13 = vld [vmem:[#allocation187_spill] sm:$0xff] }
 0x9f4   : > { %v6225_v22 = vmul.f32 %v13894_v62, %v6129_v40  ;;  %v6209_v19 = vmul.f32 %v13875_v12, %v6113_v7 }
 0x9f5   : > { %v6326_v40 = vsel %vm891_vm1, %v6192_v15, 0.0  ;;  %v6317_v1 = vsel %vm891_vm1, %v6218_v36, 0.0  ;;  %v6089_v15 = vmul.f32 %v13913_v48, %v16558_v13 }
 0x9f6   : > { %v6289_v32 = vsel %vm891_vm1, %v6225_v22, 0.0  ;;  %v6315_v35 = vsel %vm891_vm1, %v6209_v19, 0.0  ;;  %v6011_v22 = vpop.permute.xlu2 %6010  ;;  %v6327_v21 = vadd.f32 %v6326_v40, %v6325_v27 }
 0x9f7   : > { %v6290_v14 = vadd.f32 %v6289_v32, %v6288_v16  ;;  %v6316_v26 = vadd.f32 %v6315_v35, %v6314_v41  ;;  %v6185_v48 = vmul.f32 %v13546_v38, %v6089_v15  ;;  %v16569_v15 = vld [vmem:[#allocation29_spill] sm:$0xff] }
 0x9f8   : > { %v5961_v59 = vpop.permute.xlu1 %5960 }
 0x9f9   : > { %v6041_v31 = vpop.permute.xlu0 %6040  ;;  %v6369_v50 = vadd.f32 %v6290_v14, %v16547_v0  ;;  %v6114_v43 = vmul.f32 %v5961_v59, %v13708_v24  ;;  %v6201_v24 = vmul.f32 %v13710_v18, %v6105_v28  ;;  %v6318_v32 = vadd.f32 %v6317_v1, %v6316_v26 }
 0x9fa   : > { %v6130_v23 = vmul.f32 %v6041_v31, %v13821_v10  ;;  %v6088_v10 = vmul.f32 %v13890_v45, %v16550_v34  ;;  %v16554_v31 = vld [vmem:[#allocation28_spill] sm:$0xff]  ;;  %v6124_v34 = vmul.f32 %v6011_v22, %v16559_v33 }
 0x9fb   : > { %7151 = vmatmul.msk.f32.gmra.mxu2 %vm891_vm1, %v6369_v50  ;;  %v6210_v16 = vmul.f32 %v13875_v12, %v6114_v43  ;;  %v6328_v14 = vsel %vm891_vm1, %v6201_v24, 0.0  ;;  %v6343_v43 = vsel %vm891_vm1, %v6202_v55, 0.0  ;;  %v6354_v24 = vsel %vm891_vm1, %v6185_v48, 0.0  ;;  %v16563_v22 = vld [vmem:[#allocation92_spill] sm:$0xff] }
 0x9fc   : > { %v6226_v46 = vmul.f32 %v13894_v62, %v6130_v23  ;;  %v6184_v45 = vmul.f32 %v13546_v38, %v6088_v10  ;;  %v6329_v59 = vadd.f32 %v6328_v14, %v6327_v21  ;;  %v6220_v27 = vmul.f32 %v13881_v29, %v6124_v34 }
 0x9fe   : > { %v6304_v57 = vsel %vm891_vm1, %v6226_v46, 0.0  ;;  %v6339_v7 = vsel %vm891_vm1, %v6184_v45, 0.0  ;;  %v5926_v10 = vpop.permute.xlu2 %5925  ;;  %v6347_v38 = vsel %vm891_vm1, %v6220_v27, 0.0 }
 0x9ff   : > { %v6305_v63 = vadd.f32 %v6304_v57, %v6303_v6  ;;  %v6340_v0 = vadd.f32 %v6339_v7, %v16554_v31  ;;  %v16568_v31 = vld [vmem:[#allocation39_spill] sm:$0xff] }
 0xa00   : > { %v5876_v25 = vpop.permute.xlu1 %5875 }
 0xa01   : > { %v6097_v60 = vmul.f32 %v5876_v25, %v13558_v49  ;;  %v6046_v2 = vpop.permute.xlu0 %6045  ;;  %v6370_v9 = vadd.f32 %v6305_v63, %v16552_v39  ;;  %v16560_v25 = vld [vmem:[#allocation153_spill] sm:$0xff] }
 0xa02   : > { %v6131_v52 = vmul.f32 %v6046_v2, %v13827_v53  ;;  %v6330_v53 = vsel %vm891_vm1, %v6210_v16, 0.0  ;;  %v16562_v39 = vld [vmem:[#allocation169_spill] sm:$0xff]  ;;  %v6107_v16 = vmul.f32 %v5926_v10, %v16563_v22 }
 0xa03   : > { %7152 = vmatmul.msk.f32.gmra.mxu2 %vm891_vm1, %v6370_v9  ;;  %v6193_v49 = vmul.f32 %v13616_v30, %v6097_v60  ;;  %v6331_v50 = vadd.f32 %v6330_v53, %v6329_v59  ;;  %v16561_v60 = vld [vmem:[#allocation12_spill] sm:$0xff]  ;;  %v16566_v59 = vld [vmem:[#allocation46_spill] sm:$0xff] }
 0xa04   : > { %v6227_v3 = vmul.f32 %v13894_v62, %v6131_v52  ;;  %v6203_v14 = vmul.f32 %v13710_v18, %v6107_v16  ;;  %v8289_v16 = vmov 32.0  }
 0xa05   : > { %v6341_v17 = vsel %vm891_vm1, %v6193_v49, 0.0  ;;  %v6333_v35 = vadd.f32 %v6332_v58, %v6331_v50  ;;  %v16564_v49 = vld [vmem:[#allocation86_spill] sm:$0xff]  ;;  %8132 = vrcp.f32 %v8289_v16 }
 0xa06   : > { %v6319_v37 = vsel %vm891_vm1, %v6227_v3, 0.0  ;;  %v6342_v46 = vadd.f32 %v6341_v17, %v6340_v0  ;;  %v6355_v3 = vadd.f32 %v6354_v24, %v16564_v49  ;;  %v6061_v7 = vpop.permute.xlu2 %6060  ;;  %v16567_v17 = vld [vmem:[#allocation16_spill] sm:$0xff]  ;;  %v6358_v50 = vsel %vm891_vm1, %v6203_v14, 0.0 }
 0xa07   : > { %v6320_v4 = vadd.f32 %v6319_v37, %v6318_v32 }
 0xa08   : > { %v5966_v61 = vpop.permute.xlu1 %5965  ;;  %v6344_v63 = vadd.f32 %v6343_v43, %v6342_v46 }
 0xa09   : > { %v6115_v19 = vmul.f32 %v5966_v61, %v16555_v20  ;;  %v6051_v23 = vpop.permute.xlu0 %6050  ;;  %v6371_v11 = vadd.f32 %v6320_v4, %v16556_v54 }
 0xa0a   : > { %v6132_v51 = vmul.f32 %v6051_v23, %v16557_v8 }
 0xa0b   : > { %v6211_v6 = vmul.f32 %v13875_v12, %v6115_v19  ;;  %7153 = vmatmul.msk.f32.gmra.mxu2 %vm891_vm1, %v6371_v11 }
 0xa0c   : > { %v6228_v28 = vmul.f32 %v13894_v62, %v6132_v51 }
 0xa0d   : > { %v6345_v57 = vsel %vm891_vm1, %v6211_v6, 0.0 }
 0xa0e   : > { %v6334_v41 = vsel %vm891_vm1, %v6228_v28, 0.0  ;;  %v6346_v40 = vadd.f32 %v6345_v57, %v6344_v63 }
 0xa0f   : > { %v6335_v44 = vadd.f32 %v6334_v41, %v6333_v35 }
 0xa10   : > { %v5881_v36 = vpop.permute.xlu1 %5880  ;;  %v6348_v42 = vadd.f32 %v6347_v38, %v6346_v40 }
 0xa11   : > { %v6098_v45 = vmul.f32 %v5881_v36, %v16560_v25  ;;  %v6056_v26 = vpop.permute.xlu0 %6055  ;;  %v6372_v2 = vadd.f32 %v6335_v44, %v16561_v60 }
 0xa12   : > { %v6133_v9 = vmul.f32 %v6056_v26, %v16562_v39 }
 0xa13   : > { %v6194_v52 = vmul.f32 %v13616_v30, %v6098_v45  ;;  %7154 = vmatmul.msk.f32.gmra.mxu2 %vm891_vm1, %v6372_v2  ;;  %v16565_v30 = vld [vmem:[#allocation94_spill] sm:$0xff] }
 0xa14   : > { %v6229_v21 = vmul.f32 %v13894_v62, %v6133_v9  ;;  %v6134_v37 = vmul.f32 %v6061_v7, %v16565_v30 }
 0xa15   : > { %v6356_v1 = vsel %vm891_vm1, %v6194_v52, 0.0  ;;  %v8133_v52 = vpop.eup %8132 }
 0xa16   : > { %v6349_v32 = vsel %vm891_vm1, %v6229_v21, 0.0  ;;  %v6357_v56 = vadd.f32 %v6356_v1, %v6355_v3  ;;  %v6230_v23 = vmul.f32 %v13894_v62, %v6134_v37  ;;  %v6482_v38 = vmul.f32 32.0, %v8133_v52 }
 0xa17   : > { %v6350_v47 = vadd.f32 %v6349_v32, %v6348_v42  ;;  %vm6486_vm2 = vweird.f32 %v8133_v52 }
 0xa18   : > { %v5971_v53 = vpop.permute.xlu1 %5970  ;;  %v6359_v19 = vadd.f32 %v6358_v50, %v6357_v56  ;;  %v6364_v51 = vsel %vm891_vm1, %v6230_v23, 0.0  ;;  %v6483_v21 = vsub.f32 1.0, %v6482_v38 }
 0xa19   : > { %v6116_v4 = vmul.f32 %v5971_v53, %v16566_v59  ;;  %v6016_v5 = vpop.permute.xlu0 %6015  ;;  %v6373_v61 = vadd.f32 %v6350_v47, %v16567_v17 }
 0xa1a   : > { %v6125_v0 = vmul.f32 %v6016_v5, %v16568_v31  ;;  %v6484_v1 = vmul.f32 %v8133_v52, %v6483_v21 }
 0xa1b   : > { %v6212_v20 = vmul.f32 %v13875_v12, %v6116_v4  ;;  %7155 = vmatmul.msk.f32.gmra.mxu2 %vm891_vm1, %v6373_v61  ;;  %v7265_v12 = vld [vmem:[%s14226_s9] ss:$0 sm:$0xff] }
 0xa1c   : > { %v6221_v18 = vmul.f32 %v13881_v29, %v6125_v0  ;;  %v6485_v42 = vadd.f32 %v8133_v52, %v6484_v1 }
 0xa1d   : > { %v6360_v54 = vsel %vm891_vm1, %v6212_v20, 0.0 }
 0xa1e   : > { %v6361_v11 = vadd.f32 %v6360_v54, %v6359_v19  ;;  %v6362_v55 = vsel %vm891_vm1, %v6221_v18, 0.0  ;;  %v14066_v49 = vsel %vm6486_vm2, %v8133_v52, %v6485_v42  ;;  %v14130_v42 = vld [vmem:[%s14227_s10] ss:$0 sm:$0xff] }
 0xa20   : > { %v6363_v8 = vadd.f32 %v6362_v55, %v6361_v11 }
 0xa22   : > { %v6365_v13 = vadd.f32 %v6364_v51, %v6363_v8 }
 0xa24   : > { %v6374_v46 = vadd.f32 %v6365_v13, %v16569_v15 }
 0xa26   : > { %7156 = vmatmul.msk.f32.gmra.mxu2 %vm891_vm1, %v6374_v46 }
 0xa65   : > { %v6427_v29 = vpop.f32.mrf.mxu2 }
 0xa66   : > { %v6428_v6 = vadd.f32 %v7265_v12, %v6427_v29 }
 0xa68   : > { %v6454_v62 = vsel %vm891_vm1, %v6428_v6, 0.0 }
 0xa69   : > { %6455 = vadd.xlane.f32.xlu1 %v6454_v62 }
 0xa6d   : > { %v6430_v58 = vpop.f32.mrf.mxu2 }
 0xa6e   : > { %v6431_v33 = vadd.f32 %v7265_v12, %v6430_v58 }
 0xa70   : > { %v6457_v34 = vsel %vm891_vm1, %v6431_v33, 0.0 }
 0xa71   : > { %6458 = vadd.xlane.f32.xlu0 %v6457_v34 }
 0xa76   : > { %v6433_v10 = vpop.f32.mrf.mxu2 }
 0xa77   : > { %v6434_v28 = vadd.f32 %v7265_v12, %v6433_v10 }
 0xa79   : > { %v6460_v35 = vsel %vm891_vm1, %v6434_v28, 0.0 }
 0xa7a   : > { %6461 = vadd.xlane.f32.xlu2 %v6460_v35 }
 0xa7e   : > { %v6436_v43 = vpop.f32.mrf.mxu2 }
 0xa7f   : > { %v6437_v57 = vadd.f32 %v7265_v12, %v6436_v43 }
 0xa81   : > { %v6463_v41 = vsel %vm891_vm1, %v6437_v57, 0.0 }
 0xa82   : > { %6464 = vadd.xlane.f32.xlu1 %v6463_v41 }
 0xa86   : > { %v6439_v48 = vpop.f32.mrf.mxu2 }
 0xa87   : > { %v6440_v63 = vadd.f32 %v7265_v12, %v6439_v48 }
 0xa89   : > { %v6466_v44 = vsel %vm891_vm1, %v6440_v63, 0.0 }
 0xa8a   : > { %6467 = vadd.xlane.f32.xlu2 %v6466_v44 }
 0xa8e   : > { %v6442_v27 = vpop.f32.mrf.mxu2 }
 0xa8f   : > { %v6443_v36 = vadd.f32 %v7265_v12, %v6442_v27 }
 0xa91   : > { %v6469_v40 = vsel %vm891_vm1, %v6443_v36, 0.0 }
 0xa92   : > { %6470 = vadd.xlane.f32.xlu0 %v6469_v40 }
 0xa96   : > { %v6445_v25 = vpop.f32.mrf.mxu2 }
 0xa97   : > { %v6446_v45 = vadd.f32 %v7265_v12, %v6445_v25 }
 0xa99   : > { %v6472_v26 = vsel %vm891_vm1, %v6446_v45, 0.0 }
 0xa9a   : > { %6473 = vadd.xlane.f32.xlu1 %v6472_v26 }
 0xa9e   : > { %v6448_v60 = vpop.f32.mrf.mxu2 }
 0xa9f   : > { %v6449_v2 = vadd.f32 %v7265_v12, %v6448_v60 }
 0xaa1   : > { %v6475_v39 = vsel %vm891_vm1, %v6449_v2, 0.0 }
 0xaa2   : > { %6476 = vadd.xlane.f32.xlu2 %v6475_v39 }
 0xaa9   : > { %v6451_v9 = vpop.f32.mrf.mxu2 }
 0xaaa   : > { %v6452_v24 = vadd.f32 %v7265_v12, %v6451_v9 }
 0xaac   : > { %v6478_v22 = vsel %vm891_vm1, %v6452_v24, 0.0 }
 0xaad   : > { %6479 = vadd.xlane.f32.xlu0 %v6478_v22 }
 0xadc   : > { %v6456_v3 = vpop.xlane.xlu1 %6455 }
 0xadd   : > { %v6488_v7 = vmul.f32 %v14066_v49, %v6456_v3 }
 0xadf   : > { %v14069_v32 = vsub.f32 %v6428_v6, %v6488_v7 }
 0xae1   : > { %v6506_v14 = vmul.f32 %v14069_v32, %v14069_v32 }
 0xae3   : > { %v6515_v47 = vsel %vm891_vm1, %v6506_v14, 0.0  ;;  %v14135_v14 = vld [vmem:[%s14228_s11] ss:$0 sm:$0xff] }
 0xae4   : > { %6516 = vadd.xlane.f32.xlu1 %v6515_v47  ;;  %v6459_v56 = vpop.xlane.xlu0 %6458 }
 0xae5   : > { %v6489_v53 = vmul.f32 %v14066_v49, %v6459_v56 }
 0xae7   : > { %v14075_v30 = vsub.f32 %v6431_v33, %v6489_v53 }
 0xae9   : > { %v6507_v37 = vmul.f32 %v14075_v30, %v14075_v30 }
 0xaeb   : > { %v6518_v59 = vsel %vm891_vm1, %v6507_v37, 0.0 }
 0xaec   : > { %6519 = vadd.xlane.f32.xlu2 %v6518_v59 }
 0xaed   : > { %v6462_v4 = vpop.xlane.xlu2 %6461 }
 0xaee   : > { %v6490_v5 = vmul.f32 %v14066_v49, %v6462_v4 }
 0xaf0   : > { %v14081_v17 = vsub.f32 %v6434_v28, %v6490_v5 }
 0xaf2   : > { %v6508_v61 = vmul.f32 %v14081_v17, %v14081_v17 }
 0xaf4   : > { %v6521_v31 = vsel %vm891_vm1, %v6508_v61, 0.0 }
 0xaf5   : > { %v6465_v0 = vpop.xlane.xlu1 %6464  ;;  %6522 = vadd.xlane.f32.xlu0 %v6521_v31 }
 0xaf6   : > { %v6491_v50 = vmul.f32 %v14066_v49, %v6465_v0 }
 0xaf8   : > { %v14087_v20 = vsub.f32 %v6437_v57, %v6491_v50 }
 0xafa   : > { %v6509_v19 = vmul.f32 %v14087_v20, %v14087_v20 }
 0xafc   : > { %v6524_v18 = vsel %vm891_vm1, %v6509_v19, 0.0 }
 0xafd   : > { %6525 = vadd.xlane.f32.xlu1 %v6524_v18  ;;  %v6468_v23 = vpop.xlane.xlu2 %6467 }
 0xafe   : > { %v6492_v54 = vmul.f32 %v14066_v49, %v6468_v23 }
 0xb00   : > { %v14093_v11 = vsub.f32 %v6440_v63, %v6492_v54 }
 0xb02   : > { %v6510_v55 = vmul.f32 %v14093_v11, %v14093_v11 }
 0xb04   : > { %v6527_v8 = vsel %vm891_vm1, %v6510_v55, 0.0 }
 0xb05   : > { %v6471_v51 = vpop.xlane.xlu0 %6470  ;;  %6528 = vadd.xlane.f32.xlu2 %v6527_v8 }
 0xb06   : > { %v6493_v13 = vmul.f32 %v14066_v49, %v6471_v51 }
 0xb08   : > { %v14099_v15 = vsub.f32 %v6443_v36, %v6493_v13 }
 0xb0a   : > { %v6511_v46 = vmul.f32 %v14099_v15, %v14099_v15 }
 0xb0c   : > { %v6530_v12 = vsel %vm891_vm1, %v6511_v46, 0.0 }
 0xb0d   : > { %v6474_v29 = vpop.xlane.xlu1 %6473  ;;  %6531 = vadd.xlane.f32.xlu0 %v6530_v12 }
 0xb0e   : > { %v6494_v6 = vmul.f32 %v14066_v49, %v6474_v29 }
 0xb10   : > { %v14105_v62 = vsub.f32 %v6446_v45, %v6494_v6 }
 0xb12   : > { %v6512_v58 = vmul.f32 %v14105_v62, %v14105_v62 }
 0xb14   : > { %v6533_v33 = vsel %vm891_vm1, %v6512_v58, 0.0 }
 0xb15   : > { %6534 = vadd.xlane.f32.xlu1 %v6533_v33  ;;  %v6477_v34 = vpop.xlane.xlu2 %6476 }
 0xb16   : > { %v6495_v10 = vmul.f32 %v14066_v49, %v6477_v34 }
 0xb18   : > { %v14111_v28 = vsub.f32 %v6449_v2, %v6495_v10 }
 0xb1a   : > { %v6513_v35 = vmul.f32 %v14111_v28, %v14111_v28 }
 0xb1c   : > { %v6536_v43 = vsel %vm891_vm1, %v6513_v35, 0.0 }
 0xb1d   : > { %6537 = vadd.xlane.f32.xlu2 %v6536_v43 }
 0xb20   : > { %v6480_v57 = vpop.xlane.xlu0 %6479 }
 0xb21   : > { %v6496_v41 = vmul.f32 %v14066_v49, %v6480_v57 }
 0xb23   : > { %v14117_v48 = vsub.f32 %v6452_v24, %v6496_v41 }
 0xb25   : > { %v6514_v63 = vmul.f32 %v14117_v48, %v14117_v48 }
 0xb27   : > { %v6539_v44 = vsel %vm891_vm1, %v6514_v63, 0.0 }
 0xb28   : > { %6540 = vadd.xlane.f32.xlu0 %v6539_v44 }
 0xb57   : > { %v6517_v27 = vpop.xlane.xlu1 %6516 }
 0xb58   : > { %v6542_v36 = vmul.f32 %v6517_v27, %v14066_v49 }
 0xb5a   : > { %v6551_v40 = vadd.f32 1e-06, %v6542_v36 }
 0xb5c   : > { %8134 = vrsqrt.f32 %v6551_v40  ;;  %vm6566_vm4 = vweird.f32 %v6551_v40 }
 0xb5f   : > { %v6520_v25 = vpop.xlane.xlu2 %6519 }
 0xb60   : > { %v6543_v45 = vmul.f32 %v6520_v25, %v14066_v49 }
 0xb62   : > { %v8135_v26 = vpop.eup %8134  ;;  %v6552_v60 = vadd.f32 1e-06, %v6543_v45 }
 0xb63   : > { %v6561_v2 = vmul.f32 %v8135_v26, %v6551_v40  ;;  %vm6567_vm3 = vweird.f32 %v8135_v26 }
 0xb64   : > { %8136 = vrsqrt.f32 %v6552_v60  ;;  %vm6568_vm5 = vmor %vm6566_vm4, %vm6567_vm3  ;;  %vm6576_vm7 = vweird.f32 %v6552_v60 }
 0xb65   : > { %v6562_v39 = vmul.f32 %v8135_v26, %v6561_v2 }
 0xb67   : > { %v6563_v9 = vmul.f32 0.5, %v6562_v39 }
 0xb68   : > { %v6523_v24 = vpop.xlane.xlu0 %6522 }
 0xb69   : > { %v6564_v22 = vsub.f32 1.5, %v6563_v9  ;;  %v6544_v16 = vmul.f32 %v6523_v24, %v14066_v49 }
 0xb6a   : > { %v8137_v52 = vpop.eup %8136 }
 0xb6b   : > { %v6565_v38 = vmul.f32 %v8135_v26, %v6564_v22  ;;  %v6571_v21 = vmul.f32 %v8137_v52, %v6552_v60  ;;  %v6553_v1 = vadd.f32 1e-06, %v6544_v16  ;;  %vm6577_vm6 = vweird.f32 %v8137_v52 }
 0xb6c   : > { %vm6578_vm8 = vmor %vm6576_vm7, %vm6577_vm6 }
 0xb6d   : > { %v6569_v3 = vsel %vm6568_vm5, %v8135_v26, %v6565_v38  ;;  %v6572_v7 = vmul.f32 %v8137_v52, %v6571_v21  ;;  %8138 = vrsqrt.f32 %v6553_v1  ;;  %vm6586_vm10 = vweird.f32 %v6553_v1 }
 0xb6e   : > { %v6650_v47 = vmul.f32 %v6569_v3, %v14069_v32 }
 0xb6f   : > { %v6573_v56 = vmul.f32 0.5, %v6572_v7 }
 0xb70   : > { %v6663_v53 = vmul.f32 %v14130_v42, %v6650_v47  ;;  %v6526_v37 = vpop.xlane.xlu1 %6525 }
 0xb71   : > { %v6574_v59 = vsub.f32 1.5, %v6573_v56  ;;  %v6545_v4 = vmul.f32 %v6526_v37, %v14066_v49 }
 0xb72   : > { %v6676_v5 = vadd.f32 %v14135_v14, %v6663_v53 }
 0xb73   : > { %v8139_v61 = vpop.eup %8138  ;;  %v6575_v31 = vmul.f32 %v8137_v52, %v6574_v59  ;;  %v6554_v32 = vadd.f32 1e-06, %v6545_v4 }
 0xb74   : > { %6685 = vst.msk [vmem:[%s14142_s17] sm:$0xff] %vm891_vm1, %v6676_v5  ;;  %v6581_v0 = vmul.f32 %v8139_v61, %v6553_v1  ;;  %vm6587_vm9 = vweird.f32 %v8139_v61 }
 0xb75   : > { %v6579_v50 = vsel %vm6578_vm8, %v8137_v52, %v6575_v31  ;;  %8140 = vrsqrt.f32 %v6554_v32  ;;  %vm6588_vm11 = vmor %vm6586_vm10, %vm6587_vm9  ;;  %vm6596_vm13 = vweird.f32 %v6554_v32 }
 0xb76   : > { %v6651_v19 = vmul.f32 %v6579_v50, %v14075_v30  ;;  %v6582_v18 = vmul.f32 %v8139_v61, %v6581_v0 }
 0xb78   : > { %v6664_v23 = vmul.f32 %v14130_v42, %v6651_v19  ;;  %v6583_v54 = vmul.f32 0.5, %v6582_v18  ;;  %v6529_v55 = vpop.xlane.xlu2 %6528 }
 0xb79   : > { %v6546_v8 = vmul.f32 %v6529_v55, %v14066_v49 }
 0xb7a   : > { %v6677_v51 = vadd.f32 %v14135_v14, %v6664_v23  ;;  %v6584_v13 = vsub.f32 1.5, %v6583_v54 }
 0xb7b   : > { %v8141_v46 = vpop.eup %8140  ;;  %v6555_v12 = vadd.f32 1e-06, %v6546_v8 }
 0xb7c   : > { %6686 = vst.msk [vmem:[%s14142_s17 + $0x8] sm:$0xff] %vm891_vm1, %v6677_v51  ;;  %v6585_v29 = vmul.f32 %v8139_v61, %v6584_v13  ;;  %v6591_v6 = vmul.f32 %v8141_v46, %v6554_v32  ;;  %vm6597_vm12 = vweird.f32 %v8141_v46 }
 0xb7d   : > { %8142 = vrsqrt.f32 %v6555_v12  ;;  %vm6598_vm14 = vmor %vm6596_vm13, %vm6597_vm12  ;;  %vm6606_vm0 = vweird.f32 %v6555_v12 }
 0xb7e   : > { %v6589_v30 = vsel %vm6588_vm11, %v8139_v61, %v6585_v29  ;;  %v6592_v58 = vmul.f32 %v8141_v46, %v6591_v6 }
 0xb7f   : > { %v6652_v33 = vmul.f32 %v6589_v30, %v14081_v17 }
 0xb80   : > { %v6593_v34 = vmul.f32 0.5, %v6592_v58  ;;  %v6532_v10 = vpop.xlane.xlu0 %6531 }
 0xb81   : > { %v6665_v35 = vmul.f32 %v14130_v42, %v6652_v33  ;;  %v6547_v43 = vmul.f32 %v6532_v10, %v14066_v49 }
 0xb82   : > { %v6594_v57 = vsub.f32 1.5, %v6593_v34 }
 0xb83   : > { %v8143_v41 = vpop.eup %8142  ;;  %v6678_v63 = vadd.f32 %v14135_v14, %v6665_v35  ;;  %v6556_v44 = vadd.f32 1e-06, %v6547_v43 }
 0xb84   : > { %v6595_v27 = vmul.f32 %v8141_v46, %v6594_v57  ;;  %v6601_v36 = vmul.f32 %v8143_v41, %v6555_v12  ;;  %vm6607_vm15 = vweird.f32 %v8143_v41 }
 0xb85   : > { %6687 = vst.msk [vmem:[%s14142_s17 + $0x10] sm:$0xff] %vm891_vm1, %v6678_v63  ;;  %8144 = vrsqrt.f32 %v6556_v44  ;;  %vm6608_vm2 = vmor %vm6606_vm0, %vm6607_vm15  ;;  %vm6616_vm4 = vweird.f32 %v6556_v44 }
 0xb86   : > { %v6599_v17 = vsel %vm6598_vm14, %v8141_v46, %v6595_v27  ;;  %v6602_v40 = vmul.f32 %v8143_v41, %v6601_v36 }
 0xb87   : > { %v6653_v25 = vmul.f32 %v6599_v17, %v14087_v20 }
 0xb88   : > { %v6603_v45 = vmul.f32 0.5, %v6602_v40  ;;  %v6535_v26 = vpop.xlane.xlu1 %6534 }
 0xb89   : > { %v6666_v60 = vmul.f32 %v14130_v42, %v6653_v25  ;;  %v6548_v2 = vmul.f32 %v6535_v26, %v14066_v49 }
 0xb8a   : > { %v6604_v39 = vsub.f32 1.5, %v6603_v45 }
 0xb8b   : > { %v8145_v9 = vpop.eup %8144  ;;  %v6679_v24 = vadd.f32 %v14135_v14, %v6666_v60  ;;  %v6557_v22 = vadd.f32 1e-06, %v6548_v2 }
 0xb8c   : > { %v6605_v16 = vmul.f32 %v8143_v41, %v6604_v39  ;;  %v6611_v52 = vmul.f32 %v8145_v9, %v6556_v44  ;;  %vm6617_vm3 = vweird.f32 %v8145_v9 }
 0xb8d   : > { %6688 = vst.msk [vmem:[%s14142_s17 + $0x18] sm:$0xff] %vm891_vm1, %v6679_v24  ;;  %8146 = vrsqrt.f32 %v6557_v22  ;;  %vm6618_vm5 = vmor %vm6616_vm4, %vm6617_vm3  ;;  %vm6626_vm7 = vweird.f32 %v6557_v22 }
 0xb8e   : > { %v6609_v20 = vsel %vm6608_vm2, %v8143_v41, %v6605_v16  ;;  %v6612_v38 = vmul.f32 %v8145_v9, %v6611_v52 }
 0xb8f   : > { %v6654_v21 = vmul.f32 %v6609_v20, %v14093_v11 }
 0xb90   : > { %v6613_v1 = vmul.f32 0.5, %v6612_v38  ;;  %v6538_v3 = vpop.xlane.xlu2 %6537 }
 0xb91   : > { %v6667_v7 = vmul.f32 %v14130_v42, %v6654_v21  ;;  %v6549_v47 = vmul.f32 %v6538_v3, %v14066_v49 }
 0xb92   : > { %v6614_v56 = vsub.f32 1.5, %v6613_v1 }
 0xb93   : > { %v8147_v53 = vpop.eup %8146  ;;  %v6680_v37 = vadd.f32 %v14135_v14, %v6667_v7  ;;  %v6558_v59 = vadd.f32 1e-06, %v6549_v47 }
 0xb94   : > { %v6615_v4 = vmul.f32 %v8145_v9, %v6614_v56  ;;  %v6621_v5 = vmul.f32 %v8147_v53, %v6557_v22  ;;  %vm6627_vm6 = vweird.f32 %v8147_v53 }
 0xb95   : > { %6689 = vst.msk [vmem:[%s14142_s17 + $0x20] sm:$0xff] %vm891_vm1, %v6680_v37  ;;  %8148 = vrsqrt.f32 %v6558_v59  ;;  %vm6628_vm8 = vmor %vm6626_vm7, %vm6627_vm6  ;;  %vm6636_vm10 = vweird.f32 %v6558_v59 }
 0xb96   : > { %v6619_v11 = vsel %vm6618_vm5, %v8145_v9, %v6615_v4  ;;  %v6622_v61 = vmul.f32 %v8147_v53, %v6621_v5 }
 0xb97   : > { %v6655_v31 = vmul.f32 %v6619_v11, %v14099_v15 }
 0xb98   : > { %v6623_v32 = vmul.f32 0.5, %v6622_v61 }
 0xb99   : > { %v6668_v0 = vmul.f32 %v14130_v42, %v6655_v31 }
 0xb9a   : > { %v6624_v50 = vsub.f32 1.5, %v6623_v32 }
 0xb9b   : > { %v8149_v19 = vpop.eup %8148  ;;  %v6681_v18 = vadd.f32 %v14135_v14, %v6668_v0  ;;  %v6541_v23 = vpop.xlane.xlu0 %6540 }
 0xb9c   : > { %v6625_v54 = vmul.f32 %v8147_v53, %v6624_v50  ;;  %v6631_v55 = vmul.f32 %v8149_v19, %v6558_v59  ;;  %v6550_v8 = vmul.f32 %v6541_v23, %v14066_v49  ;;  %vm6637_vm9 = vweird.f32 %v8149_v19 }
 0xb9d   : > { %6690 = vst.msk [vmem:[%s14142_s17 + $0x28] sm:$0xff] %vm891_vm1, %v6681_v18  ;;  %vm6638_vm11 = vmor %vm6636_vm10, %vm6637_vm9 }
 0xb9e   : > { %v6629_v51 = vsel %vm6628_vm8, %v8147_v53, %v6625_v54  ;;  %v6632_v15 = vmul.f32 %v8149_v19, %v6631_v55  ;;  %v6559_v13 = vadd.f32 1e-06, %v6550_v8 }
 0xb9f   : > { %v6656_v46 = vmul.f32 %v6629_v51, %v14105_v62 }
 0xba0   : > { %v6633_v12 = vmul.f32 0.5, %v6632_v15  ;;  %8150 = vrsqrt.f32 %v6559_v13  ;;  %vm6646_vm13 = vweird.f32 %v6559_v13 }
 0xba1   : > { %v6669_v29 = vmul.f32 %v14130_v42, %v6656_v46 }
 0xba2   : > { %v6634_v6 = vsub.f32 1.5, %v6633_v12 }
 0xba3   : > { %v6682_v30 = vadd.f32 %v14135_v14, %v6669_v29 }
 0xba4   : > { %v6635_v58 = vmul.f32 %v8149_v19, %v6634_v6 }
 0xba5   : > { %6691 = vst.msk [vmem:[%s14142_s17 + $0x30] sm:$0xff] %vm891_vm1, %v6682_v30 }
 0xba6   : > { %v8151_v49 = vpop.eup %8150  ;;  %v6639_v33 = vsel %vm6638_vm11, %v8149_v19, %v6635_v58 }
 0xba7   : > { %v6657_v34 = vmul.f32 %v6639_v33, %v14111_v28  ;;  %v6641_v62 = vmul.f32 %v8151_v49, %v6559_v13  ;;  %vm6647_vm12 = vweird.f32 %v8151_v49 }
 0xba8   : > { %vm6648_vm14 = vmor %vm6646_vm13, %vm6647_vm12 }
 0xba9   : > { %v6670_v10 = vmul.f32 %v14130_v42, %v6657_v34  ;;  %v6642_v35 = vmul.f32 %v8151_v49, %v6641_v62 }
 0xbab   : > { %v6683_v43 = vadd.f32 %v14135_v14, %v6670_v10  ;;  %v6643_v57 = vmul.f32 0.5, %v6642_v35 }
 0xbad   : > { %6692 = vst.msk [vmem:[%s14142_s17 + $0x38] sm:$0xff] %vm891_vm1, %v6683_v43  ;;  %v6644_v41 = vsub.f32 1.5, %v6643_v57 }
 0xbaf   : > { %v6645_v63 = vmul.f32 %v8151_v49, %v6644_v41 }
 0xbb1   : > { %v6649_v44 = vsel %vm6648_vm14, %v8151_v49, %v6645_v63 }
 0xbb2   : > { %v6658_v27 = vmul.f32 %v6649_v44, %v14117_v48 }
 0xbb4   : > { %v6671_v28 = vmul.f32 %v14130_v42, %v6658_v27 }
 0xbb6   : > { %v6684_v36 = vadd.f32 %v14135_v14, %v6671_v28 }
 0xbb8   : > { %6693 = vst.msk [vmem:[%s14142_s17 + $0x40] sm:$0xff] %vm891_vm1, %v6684_v36 }
 0xbb9 PF: > { %s25_s28 = sadd.s32 1, %s8284_s28   ;;  %s16571_s20 = sld [smem:[#allocation5_spill]] }
 0xbba   : > { %p22_p2 = scmp.ge.s32.totalorder %s25_s28, 6   ;;  %s16572_s23 = sld [smem:[#allocation10_spill]] }
 0xbbb   : > { %s16573_s24 = sld [smem:[#allocation6_spill]]  ;;  %s16577_s21 = smov %s8260_s22 }
 0xbbc   : > { %s16574_s25 = sld [smem:[#allocation7_spill]]  ;;  %24 = sbr.rel (!%p22_p2) target bundleno = 7 (0x7), region = 114 }
 0xbbd   : > { %s16575_s26 = sld [smem:[#allocation8_spill]] }
 0xbbe   : > { %s16576_s27 = sld [smem:[#allocation9_spill]] }
 0xbbf   : > { %s16578_s22 = smov %s16571_s20 }
 0xbc1   :  { %6724 = vsyncpa [#allocation3], 1 }
 0xbc2   :  { %6726 = vsyncpa [#allocation3 + $0x1], 1 }

</bundles_post_ra>
